<compile_context>
chip_gen: v6e
topology: v6e:2x2x1
jax: 0.10.0
libtpu: 0.0.40
codegen_flags: <defaults>
</compile_context>

<pallas_src>
import jax
import jax.numpy as jnp
from jax.experimental import pallas as pl
from jax.experimental.pallas import tpu as pltpu

NORMAL_SIZE = 224
CUBIC_A = -0.75          # cv2.INTER_CUBIC cubic coefficient


# --------------------------------------------------------------------------- #
# Hardware-aware sizing helpers
# --------------------------------------------------------------------------- #
def _vmem_budget_bytes():
    """~75% of physical per-core VMEM (v5e/v6e: 128 MiB -> 96 MiB,
    v7x: 64 MiB -> 48 MiB); leaves headroom for compiler scratch/semaphores."""
    cap = 128 * 1024 * 1024
    try:
        cap = int(pltpu.get_tpu_info().vmem_capacity_bytes)
    except Exception:      # non-TPU backend / older jax: keep the default
        pass
    return max(32 * 1024 * 1024, (cap * 3) // 4)


def _const_spec(block_shape, index_map):
    """BlockSpec for blocks whose index is constant (or rarely changing) over
    the grid: request single buffering so their VMEM footprint is halved
    (perf-review item: untiled weights must fit v7x's 64 MiB VMEM).  Falls
    back to the default double-buffered spec if `pipeline_mode` is missing."""
    try:
        return pl.BlockSpec(block_shape, index_map,
                            pipeline_mode=pl.Buffered(1))
    except (TypeError, AttributeError):
        return pl.BlockSpec(block_shape, index_map)


# --------------------------------------------------------------------------- #
# 1-D bicubic interpolation matrices (cv2.INTER_CUBIC convention)
# --------------------------------------------------------------------------- #
def _cubic_weight(t):
    a = CUBIC_A
    t = jnp.abs(t)
    w_near = ((a + 2.0) * t - (a + 3.0)) * t * t + 1.0            # |t| <= 1
    w_far = ((a * t - 5.0 * a) * t + 8.0 * a) * t - 4.0 * a        # 1 < |t| < 2
    return jnp.where(t <= 1.0, w_near, jnp.where(t < 2.0, w_far, 0.0))


def bicubic_matrix(n_out, n_in):
    """Dense (n_out, n_in) 1-D bicubic interpolation matrix (half-pixel
    centers, border replication via index clamping), float32."""
    scale = n_in / n_out
    dst = jnp.arange(n_out, dtype=jnp.float32)
    src = (dst + 0.5) * scale - 0.5
    i0 = jnp.floor(src)
    offsets = jnp.array([-1.0, 0.0, 1.0, 2.0], dtype=jnp.float32)
    taps = i0[:, None] + offsets[None, :]                          # (n_out, 4)
    w = _cubic_weight(taps - src[:, None])                         # (n_out, 4)
    idx = jnp.clip(taps, 0.0, float(n_in - 1)).astype(jnp.int32)   # (n_out, 4)
    mat = jnp.zeros((n_out, n_in), jnp.float32)
    mat = mat.at[jnp.arange(n_out)[:, None], idx].add(w)
    return mat


# --------------------------------------------------------------------------- #
# Path A: fully fused small-image kernel.  HWC in, HWC out, no transposes.
#   tmp(f32, VMEM)   = ah_tile           @ img.reshape(H_in, W_in*C)
#   out_tile(HWC-ish) = tmp              @ kron(awt, I_C)
# All-f32 operands (weights keep exact tap sums), f32 accumulation.
# --------------------------------------------------------------------------- #
def _small_fused_kernel(ah_ref, x_ref, w_ref, o_ref, tmp_ref):
    tmp_ref[...] = jnp.dot(ah_ref[...], x_ref[...],
                           preferred_element_type=jnp.float32)
    o_ref[...] = jnp.dot(tmp_ref[...], w_ref[...],
                         preferred_element_type=jnp.float32).astype(o_ref.dtype)


def _tune_small_fused(img_hwc, ah, awt, H_out, W_out, tile_m, vmem_limit):
    H_in, W_in, C = img_hwc.shape
    x2 = img_hwc.astype(jnp.float32).reshape(H_in, W_in * C)      # pure view
    w_exp = jnp.kron(awt, jnp.eye(C, dtype=jnp.float32))          # (W_in*C, W_out*C)
    grid_m = H_out // tile_m
    flops = 2 * H_out * H_in * W_in * C + 2 * H_out * (W_in * C) * (W_out * C)
    bytes_acc = 4 * (ah.size + x2.size + w_exp.size + H_out * W_out * C)
    out = pl.pallas_call(
        _small_fused_kernel,
        out_shape=jax.ShapeDtypeStruct((H_out, W_out * C), jnp.float32),
        grid_spec=pltpu.PrefetchScalarGridSpec(
            num_scalar_prefetch=0,
            grid=(grid_m,),
            in_specs=[
                pl.BlockSpec((tile_m, H_in), lambda i: (i, 0)),
                # constant block indices -> DMA'd only once across the grid
                pl.BlockSpec((H_in, W_in * C), lambda i: (0, 0)),
                pl.BlockSpec((W_in * C, W_out * C), lambda i: (0, 0)),
            ],
            out_specs=pl.BlockSpec((tile_m, W_out * C), lambda i: (i, 0)),
            scratch_shapes=[pltpu.VMEM((tile_m, W_in * C), jnp.float32)],
        ),
        compiler_params=pltpu.CompilerParams(
            dimension_semantics=("parallel",),
            vmem_limit_bytes=vmem_limit),
        cost_estimate=pl.CostEstimate(flops=int(flops), transcendentals=0,
                                      bytes_accessed=int(bytes_acc)),
    )(ah, x2, w_exp)
    # (H_out, W_out*C) -> (H_out, W_out, C): free reshape, already HWC order.
    return out.reshape(H_out, W_out, C)


# --------------------------------------------------------------------------- #
# Path B: fused per-channel kernel (review's primary recommendation).
# grid = (C, H_out row tiles); intermediate stays f32 in VMEM.
# bf16 operands, f32 accumulation (weight quantization ~ cv2's own 5.11
# fixed-point level; flip to f32 weights for exact tap sums at lower MXU rate).
# --------------------------------------------------------------------------- #
def _fused_chw_kernel(ah_ref, x_ref, w_ref, o_ref, tmp_ref):
    tmp_ref[...] = jnp.dot(ah_ref[...], x_ref[0],
                           preferred_element_type=jnp.float32)
    o_ref[0] = jnp.dot(tmp_ref[...].astype(w_ref.dtype), w_ref[...],
                       preferred_element_type=jnp.float32).astype(o_ref.dtype)


def _tune_fused_chw(img_hwc, ah, awt, H_out, W_out, tile_m, vmem_limit):
    H_in, W_in, C = img_hwc.shape
    # TODO(synk): fold these layout changes into kernel DMAs (pl.ANY) to drop
    #             the two extra HBM passes on this path.
    x_chw = jnp.transpose(img_hwc, (2, 0, 1)).astype(jnp.bfloat16)
    ah_b = ah.astype(jnp.bfloat16)
    awt_b = awt.astype(jnp.bfloat16)
    grid_m = H_out // tile_m
    flops = 2 * C * H_out * H_in * W_in + 2 * C * H_out * W_in * W_out
    bytes_acc = 2 * (ah_b.size + x_chw.size + awt_b.size) + 4 * C * H_out * W_out
    out = pl.pallas_call(
        _fused_chw_kernel,
        out_shape=jax.ShapeDtypeStruct((C, H_out, W_out), jnp.float32),
        grid_spec=pltpu.PrefetchScalarGridSpec(
            num_scalar_prefetch=0,
            grid=(C, grid_m),
            in_specs=[
                pl.BlockSpec((tile_m, H_in), lambda c, i: (i, 0)),
                pl.BlockSpec((1, H_in, W_in), lambda c, i: (c, 0, 0)),
                pl.BlockSpec((W_in, W_out), lambda c, i: (0, 0)),
            ],
            out_specs=pl.BlockSpec((1, tile_m, W_out), lambda c, i: (c, i, 0)),
            scratch_shapes=[pltpu.VMEM((tile_m, W_in), jnp.float32)],
        ),
        compiler_params=pltpu.CompilerParams(
            dimension_semantics=("parallel", "parallel"),
            vmem_limit_bytes=vmem_limit),
        cost_estimate=pl.CostEstimate(flops=int(flops), transcendentals=0,
                                      bytes_accessed=int(bytes_acc)),
    )(ah_b, x_chw, awt_b)
    return jnp.transpose(out, (1, 2, 0))


# --------------------------------------------------------------------------- #
# Path C: two-pass fallback for very large images (HBM-resident intermediate).
# --------------------------------------------------------------------------- #
def _rows_matmul_kernel(x_ref, w_ref, o_ref):
    o_ref[...] = jnp.dot(x_ref[...], w_ref[...],
                         preferred_element_type=jnp.float32).astype(o_ref.dtype)


def _resize_lane_axis(x_rows, w, out_dtype, tile_m, vmem_limit):
    M, K = x_rows.shape
    N = w.shape[1]
    tile_m = min(tile_m, M)
    grid_m = pl.cdiv(M, tile_m)
    flops = 2 * M * K * N
    bytes_acc = (x_rows.size * x_rows.dtype.itemsize
                 + w.size * w.dtype.itemsize
                 + M * N * jnp.dtype(out_dtype).itemsize)
    return pl.pallas_call(
        _rows_matmul_kernel,
        out_shape=jax.ShapeDtypeStruct((M, N), out_dtype),
        grid_spec=pltpu.PrefetchScalarGridSpec(
            num_scalar_prefetch=0,
            grid=(grid_m,),
            in_specs=[
                pl.BlockSpec((tile_m, K), lambda i: (i, 0)),
                _const_spec((K, N), lambda i: (0, 0)),        # single-buffered
            ],
            out_specs=pl.BlockSpec((tile_m, N), lambda i: (i, 0)),
        ),
        compiler_params=pltpu.CompilerParams(
            dimension_semantics=("parallel",),
            vmem_limit_bytes=vmem_limit),
        cost_estimate=pl.CostEstimate(flops=int(flops), transcendentals=0,
                                      bytes_accessed=int(bytes_acc)),
    )(x_rows, w)


def _left_matmul_kernel(a_ref, x_ref, o_ref):
    o_ref[0] = jnp.dot(a_ref[...], x_ref[0],
                       preferred_element_type=jnp.float32).astype(o_ref.dtype)


def _resize_sublane_axis(a, x_chw, out_dtype, tile_m, vmem_limit):
    M_out, K = a.shape
    C, _, W = x_chw.shape
    tile_m = min(tile_m, M_out)
    grid_m = pl.cdiv(M_out, tile_m)
    flops = 2 * C * M_out * K * W
    bytes_acc = (a.size * a.dtype.itemsize
                 + x_chw.size * x_chw.dtype.itemsize
                 + C * M_out * W * jnp.dtype(out_dtype).itemsize)
    return pl.pallas_call(
        _left_matmul_kernel,
        out_shape=jax.ShapeDtypeStruct((C, M_out, W), out_dtype),
        grid_spec=pltpu.PrefetchScalarGridSpec(
            num_scalar_prefetch=0,
            grid=(C, grid_m),
            in_specs=[
                pl.BlockSpec((tile_m, K), lambda c, i: (i, 0)),
                _const_spec((1, K, W), lambda c, i: (c, 0, 0)),  # per-channel slab
            ],
            out_specs=pl.BlockSpec((1, tile_m, W), lambda c, i: (c, i, 0)),
        ),
        compiler_params=pltpu.CompilerParams(
            dimension_semantics=("parallel", "parallel"),
            vmem_limit_bytes=vmem_limit),
        cost_estimate=pl.CostEstimate(flops=int(flops), transcendentals=0,
                                      bytes_accessed=int(bytes_acc)),
    )(a, x_chw)


def _tune_two_pass(img_hwc, ah, awt, H_out, W_out, vmem_limit):
    H_in, W_in, C = img_hwc.shape
    # TODO(synk): band-tile (4-tap sparsity) the interpolation matrices with
    #             scalar-prefetched K offsets; dense weights waste ~K/4 of MXU.
    # Bigger lane-pass row tiles on 128-MiB-VMEM chips (v5e/v6e), 256 on v7x.
    lane_tile = 512 if vmem_limit >= 96 * 1024 * 1024 else 256
    ah_b = ah.astype(jnp.bfloat16)
    awt_b = awt.astype(jnp.bfloat16)
    x_chw = jnp.transpose(img_hwc, (2, 0, 1)).astype(jnp.bfloat16)

    cost_h_first = W_out * H_in * (W_in + H_out)
    cost_v_first = H_out * W_in * (H_in + W_out)
    if cost_h_first <= cost_v_first:
        y = _resize_lane_axis(x_chw.reshape(C * H_in, W_in), awt_b,
                              jnp.bfloat16, lane_tile, vmem_limit)
        y = y.reshape(C, H_in, W_out)
        out_chw = _resize_sublane_axis(ah_b, y, jnp.float32,
                                       NORMAL_SIZE, vmem_limit)
    else:
        y = _resize_sublane_axis(ah_b, x_chw, jnp.bfloat16,
                                 NORMAL_SIZE, vmem_limit)
        out_chw = _resize_lane_axis(y.reshape(C * H_out, W_in), awt_b,
                                    jnp.float32, lane_tile, vmem_limit)
        out_chw = out_chw.reshape(C, H_out, W_out)
    return jnp.transpose(out_chw, (1, 2, 0))


# --------------------------------------------------------------------------- #
# Dispatcher: crnet.tune
# --------------------------------------------------------------------------- #
def tune_pallas(img_hwc):
    """Pallas implementation of crnet.tune: bicubic resize to multiples of 224.

    img_hwc: float array (H, W, C), H >= 224 and W >= 224.
    Returns float32 array (m*224, n*224, C), m = H//224, n = W//224.
    """
    H_in, W_in, C = img_hwc.shape
    m, n = H_in // NORMAL_SIZE, W_in // NORMAL_SIZE
    assert m >= 1 and n >= 1, "crnet.tune requires H >= 224 and W >= 224"
    H_out, W_out = m * NORMAL_SIZE, n * NORMAL_SIZE

    ah = bicubic_matrix(H_out, H_in)          # (H_out, H_in)  f32
    awt = bicubic_matrix(W_out, W_in).T       # (W_in,  W_out) f32

    budget = _vmem_budget_bytes()
    tile_r = NORMAL_SIZE                      # 224 always divides H_out exactly
    f32, bf16 = 4, 2

    # Path A VMEM estimate (conservative: everything double-buffered, all f32).
    est_a = f32 * (2 * tile_r * H_in
                   + 2 * H_in * W_in * C
                   + 2 * (W_in * C) * (W_out * C)
                   + 2 * tile_r * W_out * C
                   + tile_r * W_in * C)
    if est_a <= budget:
        return _tune_small_fused(img_hwc, ah, awt, H_out, W_out, tile_r, budget)

    # Path B VMEM estimate (bf16 operands, f32 scratch/out).
    est_b = (2 * bf16 * tile_r * H_in
             + 2 * bf16 * H_in * W_in
             + 2 * bf16 * W_in * W_out
             + 2 * f32 * tile_r * W_out
             + f32 * tile_r * W_in)
    if est_b <= budget:
        return _tune_fused_chw(img_hwc, ah, awt, H_out, W_out, tile_r, budget)

    return _tune_two_pass(img_hwc, ah, awt, H_out, W_out, budget)


def crnet_forward(img_hwc):
    """Forward pass of crnet. Only the well-defined `region`/`tune` stage is
    executable; the rest of the reference forward() uses undefined attributes."""
    x = tune_pallas(img_hwc)
    # TODO(synk): self.backbone_piece / self.decoder_piece / self.r.joint_piece
    #             have no definition in the reference module.
    return x


if __name__ == "__main__":
    key = jax.random.PRNGKey(0)
    H_in, W_in, C = 250, 300, 3          # m = n = 1 -> output 224 x 224 x 3
    img = jax.random.uniform(key, (H_in, W_in, C), dtype=jnp.float32)

    out = crnet_forward(img)             # exercises Path A (fused, no transposes)
    out = jax.block_until_ready(out)
    assert out.shape == (224, 224, 3), out.shape

    # Pure-JAX f32 reference of the same separable bicubic math.
    ah_f32 = bicubic_matrix(224, H_in)
    aw_f32 = bicubic_matrix(224, W_in)
    ref = jnp.einsum("oh,hwc,pw->opc", ah_f32, img, aw_f32)
    err_a = float(jnp.max(jnp.abs(out - ref)))
    assert jnp.allclose(out, ref, atol=1e-2, rtol=1e-2), err_a

    # Also exercise the fused per-channel path (Path B) on the same input.
    out_b = _tune_fused_chw(img, ah_f32, aw_f32.T, 224, 224, NORMAL_SIZE,
                            _vmem_budget_bytes())
    out_b = jax.block_until_ready(out_b)
    assert out_b.shape == (224, 224, 3), out_b.shape
    err_b = float(jnp.max(jnp.abs(out_b - ref)))
    assert jnp.allclose(out_b, ref, atol=3e-2, rtol=3e-2), err_b

    print("KERNEL_OK")
</pallas_src>

<mosaic_0001>
module attributes {stable_mosaic.version = 11 : i64} {
  func.func @_small_fused_kernel(%arg0: i32, %arg1: memref<224x250xf32, #tpu.memory_space<vmem>>, %arg2: memref<250x900xf32, #tpu.memory_space<vmem>>, %arg3: memref<900x672xf32, #tpu.memory_space<vmem>>, %arg4: memref<224x672xf32, #tpu.memory_space<vmem>>, %arg5: memref<224x900xf32, #tpu.memory_space<vmem>>) attributes {dimension_semantics = [#tpu.dimension_semantics<parallel>], iteration_bounds = array<i64: 1>, scalar_prefetch = 0 : i64, scratch_operands = 1 : i64, tpu.core_type = #tpu.core_type<tc>, window_params = [{transform_indices = @transform_0, window_bounds = array<i64: 224, 250>}, {pipeline_mode = #tpu.pipeline_mode<synchronous>, transform_indices = @transform_1, window_bounds = array<i64: 250, 900>}, {pipeline_mode = #tpu.pipeline_mode<synchronous>, transform_indices = @transform_2, window_bounds = array<i64: 900, 672>}, {transform_indices = @transform_3, window_bounds = array<i64: 224, 672>}]} {
    %c0 = arith.constant 0 : index
    %c0_0 = arith.constant 0 : index
    %0 = vector.load %arg1[%c0, %c0_0] : memref<224x250xf32, #tpu.memory_space<vmem>>, vector<224x250xf32>
    %c0_1 = arith.constant 0 : index
    %c0_2 = arith.constant 0 : index
    %1 = vector.load %arg2[%c0_1, %c0_2] : memref<250x900xf32, #tpu.memory_space<vmem>>, vector<250x900xf32>
    %cst = arith.constant dense<0.000000e+00> : vector<224x900xf32>
    %2 = tpu.matmul %0, %1, %cst {dimension_numbers = #tpu.dot_dimension_numbers<[1], [0], [0], [1], [0, 0, 1, 1], [], []>} : vector<224x250xf32>, vector<250x900xf32>, vector<224x900xf32> -> vector<224x900xf32>
    %c0_3 = arith.constant 0 : index
    %c0_4 = arith.constant 0 : index
    %3 = vector.load %arg5[%c0_3, %c0_4] : memref<224x900xf32, #tpu.memory_space<vmem>>, vector<224x900xf32>
    tpu.vector_store %arg5[%c0_3, %c0_4], %2 {strides = array<i32>} : memref<224x900xf32, #tpu.memory_space<vmem>>, vector<224x900xf32>,
    %c0_5 = arith.constant 0 : index
    %c0_6 = arith.constant 0 : index
    %4 = vector.load %arg5[%c0_5, %c0_6] : memref<224x900xf32, #tpu.memory_space<vmem>>, vector<224x900xf32>
    %c0_7 = arith.constant 0 : index
    %c0_8 = arith.constant 0 : index
    %5 = vector.load %arg3[%c0_7, %c0_8] : memref<900x672xf32, #tpu.memory_space<vmem>>, vector<900x672xf32>
    %cst_9 = arith.constant dense<0.000000e+00> : vector<224x672xf32>
    %6 = tpu.matmul %4, %5, %cst_9 {dimension_numbers = #tpu.dot_dimension_numbers<[1], [0], [0], [1], [0, 0, 1, 1], [], []>} : vector<224x900xf32>, vector<900x672xf32>, vector<224x672xf32> -> vector<224x672xf32>
    %c0_10 = arith.constant 0 : index
    %c0_11 = arith.constant 0 : index
    %7 = vector.load %arg4[%c0_10, %c0_11] : memref<224x672xf32, #tpu.memory_space<vmem>>, vector<224x672xf32>
    tpu.vector_store %arg4[%c0_10, %c0_11], %6 {strides = array<i32>} : memref<224x672xf32, #tpu.memory_space<vmem>>, vector<224x672xf32>,
    return
  }
  func.func @transform_0(%arg0: i32) -> (i32, i32) {
    %c0_i32 = arith.constant 0 : i32
    %c0_i32_0 = arith.constant 0 : i32
    return %arg0, %c0_i32 : i32, i32
  }
  func.func @transform_1(%arg0: i32) -> (i32, i32) {
    %c0_i32 = arith.constant 0 : i32
    %c0_i32_0 = arith.constant 0 : i32
    %c0_i32_1 = arith.constant 0 : i32
    return %c0_i32, %c0_i32_0 : i32, i32
  }
  func.func @transform_2(%arg0: i32) -> (i32, i32) {
    %c0_i32 = arith.constant 0 : i32
    %c0_i32_0 = arith.constant 0 : i32
    %c0_i32_1 = arith.constant 0 : i32
    return %c0_i32, %c0_i32_0 : i32, i32
  }
  func.func @transform_3(%arg0: i32) -> (i32, i32) {
    %c0_i32 = arith.constant 0 : i32
    %c0_i32_0 = arith.constant 0 : i32
    return %arg0, %c0_i32 : i32, i32
  }
}

</mosaic_0001>

<bundles_post_ra>
// kernel: tpu_custom_call.1
= control target key start
LH: loop header
LB: loop body
LE: loop exit
PB: predicated region body
PF: predicated region fallthrough
CT: control target
= control target key end

     0   :  { %vm412_vm0 = vcmask 1041408   ;;  %vm327_vm1 = vcmask 998400   ;;  %s11149_s0 = inlined_call_operand.vmem [shape: f32[224,250], index: 0, kind: input, shape index: {}]   ;;  %s11150_s1 = inlined_call_operand.vmem [shape: f32[250,900], index: 1, kind: input, shape index: {}]   ;;  %s11151_s2 = inlined_call_operand.vmem [shape: f32[900,672], index: 2, kind: input, shape index: {}]   ;;  %s11152_s3 = inlined_call_operand.hbm [shape: f32[224,672], index: 3, kind: output, shape index: {}]  }
   0x1   :  { %v192_v0 = vld [vmem:[%s11150_s1 + $0x3c8] sm:$0xff]  ;;  %v194_v1 = vld [vmem:[%s11150_s1 + $0x3d8] sm:$0xff]  ;;  %v191_v2 = vld [vmem:[%s11150_s1 + $0x3c0] sm:$0xff] }
   0x2   :  { %437 = vmatprep.subr.mxu0 %v192_v0  ;;  %670 = vmatprep.subr.mxu1 %v194_v1  ;;  %v193_v3 = vld [vmem:[%s11150_s1 + $0x3d0] sm:$0xff]  ;;  %v184_v4 = vld [vmem:[%s11150_s1 + $0x388] sm:$0xff]  ;;  %v186_v5 = vld [vmem:[%s11150_s1 + $0x398] sm:$0xff] }
   0x3   :  { %438 = vmatpush1.msra.mxu0 %v191_v2  ;;  %671 = vmatpush1.msra.mxu1 %v193_v3  ;;  %v183_v6 = vld [vmem:[%s11150_s1 + $0x380] sm:$0xff]  ;;  %v185_v7 = vld [vmem:[%s11150_s1 + $0x390] sm:$0xff]  ;;  %v176_v8 = vld [vmem:[%s11150_s1 + $0x348] sm:$0xff] }
   0x4   :  { %439 = vmatprep.subr.mxu0 %v184_v4  ;;  %672 = vmatprep.subr.mxu1 %v186_v5  ;;  %v178_v9 = vld [vmem:[%s11150_s1 + $0x358] sm:$0xff]  ;;  %v175_v10 = vld [vmem:[%s11150_s1 + $0x340] sm:$0xff]  ;;  %v177_v11 = vld [vmem:[%s11150_s1 + $0x350] sm:$0xff] }
   0x5   :  { %440 = vmatpush1.msra.mxu0 %v183_v6  ;;  %673 = vmatpush1.msra.mxu1 %v185_v7  ;;  %v168_v12 = vld [vmem:[%s11150_s1 + $0x308] sm:$0xff]  ;;  %v170_v13 = vld [vmem:[%s11150_s1 + $0x318] sm:$0xff]  ;;  %v167_v14 = vld [vmem:[%s11150_s1 + $0x300] sm:$0xff] }
   0x6   :  { %441 = vmatprep.subr.mxu0 %v176_v8  ;;  %674 = vmatprep.subr.mxu1 %v178_v9  ;;  %v169_v15 = vld [vmem:[%s11150_s1 + $0x310] sm:$0xff]  ;;  %v160_v16 = vld [vmem:[%s11150_s1 + $0x2c8] sm:$0xff]  ;;  %v162_v17 = vld [vmem:[%s11150_s1 + $0x2d8] sm:$0xff] }
   0x7   :  { %442 = vmatpush1.msra.mxu0 %v175_v10  ;;  %675 = vmatpush1.msra.mxu1 %v177_v11  ;;  %v159_v18 = vld [vmem:[%s11150_s1 + $0x2c0] sm:$0xff]  ;;  %v161_v19 = vld [vmem:[%s11150_s1 + $0x2d0] sm:$0xff]  ;;  %v152_v20 = vld [vmem:[%s11150_s1 + $0x288] sm:$0xff] }
   0x8   :  { %443 = vmatprep.subr.mxu0 %v168_v12  ;;  %676 = vmatprep.subr.mxu1 %v170_v13  ;;  %v154_v21 = vld [vmem:[%s11150_s1 + $0x298] sm:$0xff]  ;;  %v151_v22 = vld [vmem:[%s11150_s1 + $0x280] sm:$0xff]  ;;  %v153_v23 = vld [vmem:[%s11150_s1 + $0x290] sm:$0xff] }
   0x9   :  { %444 = vmatpush1.msra.mxu0 %v167_v14  ;;  %677 = vmatpush1.msra.mxu1 %v169_v15  ;;  %v144_v24 = vld [vmem:[%s11150_s1 + $0x248] sm:$0xff]  ;;  %v146_v25 = vld [vmem:[%s11150_s1 + $0x258] sm:$0xff]  ;;  %v143_v26 = vld [vmem:[%s11150_s1 + $0x240] sm:$0xff] }
   0xa   :  { %445 = vmatprep.subr.mxu0 %v160_v16  ;;  %678 = vmatprep.subr.mxu1 %v162_v17  ;;  %v145_v27 = vld [vmem:[%s11150_s1 + $0x250] sm:$0xff]  ;;  %v136_v28 = vld [vmem:[%s11150_s1 + $0x208] sm:$0xff]  ;;  %v138_v29 = vld [vmem:[%s11150_s1 + $0x218] sm:$0xff] }
   0xb   :  { %446 = vmatpush1.msra.mxu0 %v159_v18  ;;  %679 = vmatpush1.msra.mxu1 %v161_v19  ;;  %v135_v30 = vld [vmem:[%s11150_s1 + $0x200] sm:$0xff]  ;;  %v137_v31 = vld [vmem:[%s11150_s1 + $0x210] sm:$0xff]  ;;  %v128_v32 = vld [vmem:[%s11150_s1 + $0x1c8] sm:$0xff] }
   0xc   :  { %447 = vmatprep.subr.mxu0 %v152_v20  ;;  %680 = vmatprep.subr.mxu1 %v154_v21  ;;  %v130_v33 = vld [vmem:[%s11150_s1 + $0x1d8] sm:$0xff]  ;;  %v127_v34 = vld [vmem:[%s11150_s1 + $0x1c0] sm:$0xff]  ;;  %v129_v35 = vld [vmem:[%s11150_s1 + $0x1d0] sm:$0xff] }
   0xd   :  { %448 = vmatpush1.msra.mxu0 %v151_v22  ;;  %681 = vmatpush1.msra.mxu1 %v153_v23  ;;  %v120_v36 = vld [vmem:[%s11150_s1 + $0x188] sm:$0xff]  ;;  %v122_v37 = vld [vmem:[%s11150_s1 + $0x198] sm:$0xff]  ;;  %v119_v38 = vld [vmem:[%s11150_s1 + $0x180] sm:$0xff] }
   0xe   :  { %449 = vmatprep.subr.mxu0 %v144_v24  ;;  %682 = vmatprep.subr.mxu1 %v146_v25  ;;  %v121_v39 = vld [vmem:[%s11150_s1 + $0x190] sm:$0xff]  ;;  %v112_v40 = vld [vmem:[%s11150_s1 + $0x148] sm:$0xff]  ;;  %v114_v41 = vld [vmem:[%s11150_s1 + $0x158] sm:$0xff] }
   0xf   :  { %450 = vmatpush1.msra.mxu0 %v143_v26  ;;  %683 = vmatpush1.msra.mxu1 %v145_v27  ;;  %v111_v42 = vld [vmem:[%s11150_s1 + $0x140] sm:$0xff]  ;;  %v113_v43 = vld [vmem:[%s11150_s1 + $0x150] sm:$0xff]  ;;  %v104_v44 = vld [vmem:[%s11150_s1 + $0x108] sm:$0xff] }
  0x10   :  { %451 = vmatprep.subr.mxu0 %v136_v28  ;;  %684 = vmatprep.subr.mxu1 %v138_v29  ;;  %v106_v45 = vld [vmem:[%s11150_s1 + $0x118] sm:$0xff]  ;;  %v103_v46 = vld [vmem:[%s11150_s1 + $0x100] sm:$0xff]  ;;  %v105_v47 = vld [vmem:[%s11150_s1 + $0x110] sm:$0xff] }
  0x11   :  { %452 = vmatpush1.msra.mxu0 %v135_v30  ;;  %685 = vmatpush1.msra.mxu1 %v137_v31  ;;  %v96_v48 = vld [vmem:[%s11150_s1 + $0xc8] sm:$0xff]  ;;  %v98_v49 = vld [vmem:[%s11150_s1 + $0xd8] sm:$0xff]  ;;  %v95_v50 = vld [vmem:[%s11150_s1 + $0xc0] sm:$0xff] }
  0x12   :  { %453 = vmatprep.subr.mxu0 %v128_v32  ;;  %686 = vmatprep.subr.mxu1 %v130_v33  ;;  %v97_v51 = vld [vmem:[%s11150_s1 + $0xd0] sm:$0xff]  ;;  %v88_v52 = vld [vmem:[%s11150_s1 + $0x88] sm:$0xff]  ;;  %v90_v53 = vld [vmem:[%s11150_s1 + $0x98] sm:$0xff] }
  0x13   :  { %454 = vmatpush1.msra.mxu0 %v127_v34  ;;  %687 = vmatpush1.msra.mxu1 %v129_v35  ;;  %v87_v54 = vld [vmem:[%s11150_s1 + $0x80] sm:$0xff]  ;;  %v89_v55 = vld [vmem:[%s11150_s1 + $0x90] sm:$0xff]  ;;  %v80_v56 = vld [vmem:[%s11150_s1 + $0x48] sm:$0xff] }
  0x14   :  { %455 = vmatprep.subr.mxu0 %v120_v36  ;;  %688 = vmatprep.subr.mxu1 %v122_v37  ;;  %v82_v57 = vld [vmem:[%s11150_s1 + $0x58] sm:$0xff]  ;;  %v79_v58 = vld [vmem:[%s11150_s1 + $0x40] sm:$0xff]  ;;  %v81_v59 = vld [vmem:[%s11150_s1 + $0x50] sm:$0xff] }
  0x15   :  { %456 = vmatpush1.msra.mxu0 %v119_v38  ;;  %689 = vmatpush1.msra.mxu1 %v121_v39  ;;  %v72_v60 = vld [vmem:[%s11150_s1 + $0x8] sm:$0xff]  ;;  %v74_v61 = vld [vmem:[%s11150_s1 + $0x18] sm:$0xff]  ;;  %v71_v62 = vld [vmem:[%s11150_s1] sm:$0xff] }
  0x16   :  { %457 = vmatprep.subr.mxu0 %v112_v40  ;;  %690 = vmatprep.subr.mxu1 %v114_v41  ;;  %v73_v63 = vld [vmem:[%s11150_s1 + $0x10] sm:$0xff]  ;;  %v320_v0 = vld [vmem:[%s11150_s1 + $0x7c8] sm:$0x3]  ;;  %v322_v1 = vld [vmem:[%s11150_s1 + $0x7d8] sm:$0x3] }
  0x17   :  { %458 = vmatpush1.msra.mxu0 %v111_v42  ;;  %691 = vmatpush1.msra.mxu1 %v113_v43  ;;  %v319_v2 = vld [vmem:[%s11150_s1 + $0x7c0] sm:$0x3]  ;;  %v321_v3 = vld [vmem:[%s11150_s1 + $0x7d0] sm:$0x3]  ;;  %v312_v4 = vld [vmem:[%s11150_s1 + $0x788] sm:$0xff] }
  0x18   :  { %459 = vmatprep.subr.mxu0 %v104_v44  ;;  %692 = vmatprep.subr.mxu1 %v106_v45  ;;  %v314_v5 = vld [vmem:[%s11150_s1 + $0x798] sm:$0xff]  ;;  %v311_v6 = vld [vmem:[%s11150_s1 + $0x780] sm:$0xff]  ;;  %v313_v7 = vld [vmem:[%s11150_s1 + $0x790] sm:$0xff] }
  0x19   :  { %460 = vmatpush1.msra.mxu0 %v103_v46  ;;  %693 = vmatpush1.msra.mxu1 %v105_v47  ;;  %v304_v8 = vld [vmem:[%s11150_s1 + $0x748] sm:$0xff]  ;;  %v306_v9 = vld [vmem:[%s11150_s1 + $0x758] sm:$0xff]  ;;  %v303_v10 = vld [vmem:[%s11150_s1 + $0x740] sm:$0xff] }
  0x1a   :  { %461 = vmatprep.subr.mxu0 %v96_v48  ;;  %694 = vmatprep.subr.mxu1 %v98_v49  ;;  %v305_v11 = vld [vmem:[%s11150_s1 + $0x750] sm:$0xff]  ;;  %v296_v12 = vld [vmem:[%s11150_s1 + $0x708] sm:$0xff]  ;;  %v298_v13 = vld [vmem:[%s11150_s1 + $0x718] sm:$0xff] }
  0x1b   :  { %462 = vmatpush1.msra.mxu0 %v95_v50  ;;  %695 = vmatpush1.msra.mxu1 %v97_v51  ;;  %v295_v14 = vld [vmem:[%s11150_s1 + $0x700] sm:$0xff]  ;;  %v297_v15 = vld [vmem:[%s11150_s1 + $0x710] sm:$0xff]  ;;  %v288_v16 = vld [vmem:[%s11150_s1 + $0x6c8] sm:$0xff] }
  0x1c   :  { %463 = vmatprep.subr.mxu0 %v88_v52  ;;  %696 = vmatprep.subr.mxu1 %v90_v53  ;;  %v290_v17 = vld [vmem:[%s11150_s1 + $0x6d8] sm:$0xff]  ;;  %v287_v18 = vld [vmem:[%s11150_s1 + $0x6c0] sm:$0xff]  ;;  %v289_v19 = vld [vmem:[%s11150_s1 + $0x6d0] sm:$0xff] }
  0x1d   :  { %464 = vmatpush1.msra.mxu0 %v87_v54  ;;  %697 = vmatpush1.msra.mxu1 %v89_v55  ;;  %v280_v20 = vld [vmem:[%s11150_s1 + $0x688] sm:$0xff]  ;;  %v282_v21 = vld [vmem:[%s11150_s1 + $0x698] sm:$0xff]  ;;  %v279_v22 = vld [vmem:[%s11150_s1 + $0x680] sm:$0xff] }
  0x1e   :  { %465 = vmatprep.subr.mxu0 %v80_v56  ;;  %698 = vmatprep.subr.mxu1 %v82_v57  ;;  %v281_v23 = vld [vmem:[%s11150_s1 + $0x690] sm:$0xff]  ;;  %v272_v24 = vld [vmem:[%s11150_s1 + $0x648] sm:$0xff]  ;;  %v274_v25 = vld [vmem:[%s11150_s1 + $0x658] sm:$0xff] }
  0x1f   :  { %466 = vmatpush1.msra.mxu0 %v79_v58  ;;  %699 = vmatpush1.msra.mxu1 %v81_v59  ;;  %v271_v26 = vld [vmem:[%s11150_s1 + $0x640] sm:$0xff]  ;;  %v273_v27 = vld [vmem:[%s11150_s1 + $0x650] sm:$0xff]  ;;  %v264_v28 = vld [vmem:[%s11150_s1 + $0x608] sm:$0xff] }
  0x20   :  { %467 = vmatprep.subr.mxu0 %v72_v60  ;;  %700 = vmatprep.subr.mxu1 %v74_v61  ;;  %v266_v29 = vld [vmem:[%s11150_s1 + $0x618] sm:$0xff]  ;;  %v263_v30 = vld [vmem:[%s11150_s1 + $0x600] sm:$0xff]  ;;  %v265_v31 = vld [vmem:[%s11150_s1 + $0x610] sm:$0xff] }
  0x21   :  { %468 = vmatpush1.msra.mxu0 %v71_v62  ;;  %701 = vmatpush1.msra.mxu1 %v73_v63  ;;  %v256_v32 = vld [vmem:[%s11150_s1 + $0x5c8] sm:$0xff]  ;;  %v258_v33 = vld [vmem:[%s11150_s1 + $0x5d8] sm:$0xff]  ;;  %v255_v34 = vld [vmem:[%s11150_s1 + $0x5c0] sm:$0xff] }
  0x22   :  { %5580 = vmatprep.subr.msk.mxu0 %vm412_vm0, %v320_v0  ;;  %5610 = vmatprep.subr.msk.mxu1 %vm412_vm0, %v322_v1  ;;  %v257_v35 = vld [vmem:[%s11150_s1 + $0x5d0] sm:$0xff]  ;;  %v248_v36 = vld [vmem:[%s11150_s1 + $0x588] sm:$0xff]  ;;  %v250_v37 = vld [vmem:[%s11150_s1 + $0x598] sm:$0xff] }
  0x23   :  { %5581 = vmatpush2.msk.msra.mxu0 %vm412_vm0, %v319_v2  ;;  %5611 = vmatpush2.msk.msra.mxu1 %vm412_vm0, %v321_v3  ;;  %v247_v38 = vld [vmem:[%s11150_s1 + $0x580] sm:$0xff]  ;;  %v249_v39 = vld [vmem:[%s11150_s1 + $0x590] sm:$0xff]  ;;  %v240_v40 = vld [vmem:[%s11150_s1 + $0x548] sm:$0xff] }
  0x24   :  { %471 = vmatprep.subr.mxu0 %v312_v4  ;;  %704 = vmatprep.subr.mxu1 %v314_v5  ;;  %v242_v41 = vld [vmem:[%s11150_s1 + $0x558] sm:$0xff]  ;;  %v239_v42 = vld [vmem:[%s11150_s1 + $0x540] sm:$0xff]  ;;  %v241_v43 = vld [vmem:[%s11150_s1 + $0x550] sm:$0xff] }
  0x25   :  { %472 = vmatpush2.msra.mxu0 %v311_v6  ;;  %705 = vmatpush2.msra.mxu1 %v313_v7  ;;  %v232_v44 = vld [vmem:[%s11150_s1 + $0x508] sm:$0xff]  ;;  %v234_v45 = vld [vmem:[%s11150_s1 + $0x518] sm:$0xff]  ;;  %v231_v46 = vld [vmem:[%s11150_s1 + $0x500] sm:$0xff] }
  0x26   :  { %473 = vmatprep.subr.mxu0 %v304_v8  ;;  %706 = vmatprep.subr.mxu1 %v306_v9  ;;  %v233_v47 = vld [vmem:[%s11150_s1 + $0x510] sm:$0xff]  ;;  %v224_v48 = vld [vmem:[%s11150_s1 + $0x4c8] sm:$0xff]  ;;  %v226_v49 = vld [vmem:[%s11150_s1 + $0x4d8] sm:$0xff] }
  0x27   :  { %474 = vmatpush2.msra.mxu0 %v303_v10  ;;  %707 = vmatpush2.msra.mxu1 %v305_v11  ;;  %v223_v50 = vld [vmem:[%s11150_s1 + $0x4c0] sm:$0xff]  ;;  %v225_v51 = vld [vmem:[%s11150_s1 + $0x4d0] sm:$0xff]  ;;  %v216_v52 = vld [vmem:[%s11150_s1 + $0x488] sm:$0xff] }
  0x28   :  { %475 = vmatprep.subr.mxu0 %v296_v12  ;;  %708 = vmatprep.subr.mxu1 %v298_v13  ;;  %v218_v53 = vld [vmem:[%s11150_s1 + $0x498] sm:$0xff]  ;;  %v215_v54 = vld [vmem:[%s11150_s1 + $0x480] sm:$0xff]  ;;  %v217_v55 = vld [vmem:[%s11150_s1 + $0x490] sm:$0xff] }
  0x29   :  { %476 = vmatpush2.msra.mxu0 %v295_v14  ;;  %709 = vmatpush2.msra.mxu1 %v297_v15  ;;  %v208_v56 = vld [vmem:[%s11150_s1 + $0x448] sm:$0xff]  ;;  %v210_v57 = vld [vmem:[%s11150_s1 + $0x458] sm:$0xff]  ;;  %v207_v58 = vld [vmem:[%s11150_s1 + $0x440] sm:$0xff] }
  0x2a   :  { %477 = vmatprep.subr.mxu0 %v288_v16  ;;  %710 = vmatprep.subr.mxu1 %v290_v17  ;;  %v209_v59 = vld [vmem:[%s11150_s1 + $0x450] sm:$0xff]  ;;  %v200_v60 = vld [vmem:[%s11150_s1 + $0x408] sm:$0xff]  ;;  %v202_v61 = vld [vmem:[%s11150_s1 + $0x418] sm:$0xff] }
  0x2b   :  { %478 = vmatpush2.msra.mxu0 %v287_v18  ;;  %711 = vmatpush2.msra.mxu1 %v289_v19  ;;  %v199_v62 = vld [vmem:[%s11150_s1 + $0x400] sm:$0xff]  ;;  %v6674_v63 = vld [vmem:[%s11149_s0 + $0x8] sm:$0xff]  ;;  %v201_v0 = vld [vmem:[%s11150_s1 + $0x410] sm:$0xff] }
  0x2c   :  { %479 = vmatprep.subr.mxu0 %v280_v20  ;;  %712 = vmatprep.subr.mxu1 %v282_v21  ;;  %v6682_v1 = vld [vmem:[%s11149_s0] sm:$0xff]  ;;  %v196_v2 = vld [vmem:[%s11150_s1 + $0x3e8] sm:$0xff]  ;;  %v198_v3 = vld [vmem:[%s11150_s1 + $0x3f8] sm:$0xff] }
  0x2d   :  { %480 = vmatpush2.msra.mxu0 %v279_v22  ;;  %713 = vmatpush2.msra.mxu1 %v281_v23  ;;  %v195_v4 = vld [vmem:[%s11150_s1 + $0x3e0] sm:$0xff]  ;;  %v6700_v5 = vld [vmem:[%s11149_s0 + $0x18] sm:$0xff]  ;;  %v197_v6 = vld [vmem:[%s11150_s1 + $0x3f0] sm:$0xff] }
  0x2e   :  { %481 = vmatprep.subr.mxu0 %v272_v24  ;;  %714 = vmatprep.subr.mxu1 %v274_v25  ;;  %v6710_v7 = vld [vmem:[%s11149_s0 + $0x10] sm:$0xff]  ;;  %v188_v8 = vld [vmem:[%s11150_s1 + $0x3a8] sm:$0xff]  ;;  %v190_v9 = vld [vmem:[%s11150_s1 + $0x3b8] sm:$0xff] }
  0x2f   :  { %482 = vmatpush2.msra.mxu0 %v271_v26  ;;  %715 = vmatpush2.msra.mxu1 %v273_v27  ;;  %v187_v10 = vld [vmem:[%s11150_s1 + $0x3a0] sm:$0xff]  ;;  %v6728_v11 = vld [vmem:[%s11149_s0 + $0x28] sm:$0xff]  ;;  %v189_v13 = vld [vmem:[%s11150_s1 + $0x3b0] sm:$0xff] }
  0x30   :  { %483 = vmatprep.subr.mxu0 %v264_v28  ;;  %716 = vmatprep.subr.mxu1 %v266_v29  ;;  %v180_v12 = vld [vmem:[%s11150_s1 + $0x368] sm:$0xff]  ;;  %v6741_v14 = vld [vmem:[%s11149_s0 + $0x20] sm:$0xff]  ;;  %v182_v16 = vld [vmem:[%s11150_s1 + $0x378] sm:$0xff] }
  0x31   :  { %484 = vmatpush2.msra.mxu0 %v263_v30  ;;  %717 = vmatpush2.msra.mxu1 %v265_v31  ;;  %v179_v15 = vld [vmem:[%s11150_s1 + $0x360] sm:$0xff]  ;;  %v6756_v17 = vld [vmem:[%s11149_s0 + $0x38] sm:$0xff]  ;;  %v181_v18 = vld [vmem:[%s11150_s1 + $0x370] sm:$0xff] }
  0x32   :  { %485 = vmatprep.subr.mxu0 %v256_v32  ;;  %718 = vmatprep.subr.mxu1 %v258_v33  ;;  %v172_v19 = vld [vmem:[%s11150_s1 + $0x328] sm:$0xff]  ;;  %v6769_v20 = vld [vmem:[%s11149_s0 + $0x30] sm:$0xff]  ;;  %v171_v21 = vld [vmem:[%s11150_s1 + $0x320] sm:$0xff] }
  0x33   :  { %486 = vmatpush2.msra.mxu0 %v255_v34  ;;  %719 = vmatpush2.msra.mxu1 %v257_v35  ;;  %v174_v22 = vld [vmem:[%s11150_s1 + $0x338] sm:$0xff]  ;;  %v164_v23 = vld [vmem:[%s11150_s1 + $0x2e8] sm:$0xff]  ;;  %v173_v24 = vld [vmem:[%s11150_s1 + $0x330] sm:$0xff] }
  0x34   :  { %487 = vmatprep.subr.mxu0 %v248_v36  ;;  %720 = vmatprep.subr.mxu1 %v250_v37  ;;  %v6791_v25 = vld [vmem:[%s11149_s0 + $0x48] sm:$0xff]  ;;  %v163_v26 = vld [vmem:[%s11150_s1 + $0x2e0] sm:$0xff]  ;;  %v166_v28 = vld [vmem:[%s11150_s1 + $0x2f8] sm:$0xff] }
  0x35   :  { %488 = vmatpush2.msra.mxu0 %v247_v38  ;;  %721 = vmatpush2.msra.mxu1 %v249_v39  ;;  %v6800_v27 = vld [vmem:[%s11149_s0 + $0x40] sm:$0xff]  ;;  %v156_v29 = vld [vmem:[%s11150_s1 + $0x2a8] sm:$0xff]  ;;  %v165_v30 = vld [vmem:[%s11150_s1 + $0x2f0] sm:$0xff] }
  0x36   :  { %489 = vmatprep.subr.mxu0 %v240_v40  ;;  %722 = vmatprep.subr.mxu1 %v242_v41  ;;  %v6818_v31 = vld [vmem:[%s11149_s0 + $0x58] sm:$0xff]  ;;  %v155_v32 = vld [vmem:[%s11150_s1 + $0x2a0] sm:$0xff]  ;;  %v6828_v33 = vld [vmem:[%s11149_s0 + $0x50] sm:$0xff] }
  0x37   :  { %490 = vmatpush2.msra.mxu0 %v239_v42  ;;  %723 = vmatpush2.msra.mxu1 %v241_v43  ;;  %v158_v34 = vld [vmem:[%s11150_s1 + $0x2b8] sm:$0xff]  ;;  %v148_v35 = vld [vmem:[%s11150_s1 + $0x268] sm:$0xff]  ;;  %v157_v36 = vld [vmem:[%s11150_s1 + $0x2b0] sm:$0xff] }
  0x38   :  { %491 = vmatprep.subr.mxu0 %v232_v44  ;;  %724 = vmatprep.subr.mxu1 %v234_v45  ;;  %v147_v37 = vld [vmem:[%s11150_s1 + $0x260] sm:$0xff]  ;;  %v6851_v38 = vld [vmem:[%s11149_s0 + $0x68] sm:$0xff]  ;;  %v150_v39 = vld [vmem:[%s11150_s1 + $0x278] sm:$0xff] }
  0x39   :  { %492 = vmatpush2.msra.mxu0 %v231_v46  ;;  %725 = vmatpush2.msra.mxu1 %v233_v47  ;;  %v6859_v40 = vld [vmem:[%s11149_s0 + $0x60] sm:$0xff]  ;;  %v140_v41 = vld [vmem:[%s11150_s1 + $0x228] sm:$0xff]  ;;  %v149_v42 = vld [vmem:[%s11150_s1 + $0x270] sm:$0xff] }
  0x3a   :  { %493 = vmatprep.subr.mxu0 %v224_v48  ;;  %726 = vmatprep.subr.mxu1 %v226_v49  ;;  %v139_v43 = vld [vmem:[%s11150_s1 + $0x220] sm:$0xff]  ;;  %v6878_v44 = vld [vmem:[%s11149_s0 + $0x78] sm:$0xff]  ;;  %v6887_v46 = vld [vmem:[%s11149_s0 + $0x70] sm:$0xff] }
  0x3b   :  { %494 = vmatpush2.msra.mxu0 %v223_v50  ;;  %727 = vmatpush2.msra.mxu1 %v225_v51  ;;  %v142_v45 = vld [vmem:[%s11150_s1 + $0x238] sm:$0xff]  ;;  %v132_v47 = vld [vmem:[%s11150_s1 + $0x1e8] sm:$0xff]  ;;  %v141_v48 = vld [vmem:[%s11150_s1 + $0x230] sm:$0xff] }
  0x3c   :  { %495 = vmatprep.subr.mxu0 %v216_v52  ;;  %728 = vmatprep.subr.mxu1 %v218_v53  ;;  %v131_v49 = vld [vmem:[%s11150_s1 + $0x1e0] sm:$0xff]  ;;  %v134_v50 = vld [vmem:[%s11150_s1 + $0x1f8] sm:$0xff]  ;;  %v6909_v51 = vld [vmem:[%s11149_s0 + $0x88] sm:$0xff] }
  0x3d   :  { %496 = vmatpush2.msra.mxu0 %v215_v54  ;;  %729 = vmatpush2.msra.mxu1 %v217_v55  ;;  %v133_v52 = vld [vmem:[%s11150_s1 + $0x1f0] sm:$0xff]  ;;  %v6918_v53 = vld [vmem:[%s11149_s0 + $0x80] sm:$0xff]  ;;  %v124_v54 = vld [vmem:[%s11150_s1 + $0x1a8] sm:$0xff] }
  0x3e   :  { %497 = vmatprep.subr.mxu0 %v208_v56  ;;  %730 = vmatprep.subr.mxu1 %v210_v57  ;;  %v126_v55 = vld [vmem:[%s11150_s1 + $0x1b8] sm:$0xff]  ;;  %v123_v56 = vld [vmem:[%s11150_s1 + $0x1a0] sm:$0xff] }
  0x3f   :  { %498 = vmatpush2.msra.mxu0 %v207_v58  ;;  %731 = vmatpush2.msra.mxu1 %v209_v59  ;;  %v6936_v57 = vld [vmem:[%s11149_s0 + $0x98] sm:$0xff]  ;;  %v116_v58 = vld [vmem:[%s11150_s1 + $0x168] sm:$0xff]  ;;  %v125_v59 = vld [vmem:[%s11150_s1 + $0x1b0] sm:$0xff] }
  0x40   :  { %499 = vmatprep.subr.mxu0 %v200_v60  ;;  %732 = vmatprep.subr.mxu1 %v202_v61  ;;  %v6949_v60 = vld [vmem:[%s11149_s0 + $0x90] sm:$0xff]  ;;  %v115_v61 = vld [vmem:[%s11150_s1 + $0x160] sm:$0xff] }
  0x41   :  { %500 = vmatpush2.msra.mxu0 %v199_v62  ;;  %5582 = vmatprep.mubr.msk.f32.mxu0 %vm327_vm1, %v6674_v63  ;;  %v118_v62 = vld [vmem:[%s11150_s1 + $0x178] sm:$0xff] }
  0x42   :  { %733 = vmatpush2.msra.mxu1 %v201_v0  ;;  %5612 = vmatprep.mubr.msk.f32.mxu1 %vm327_vm1, %v6674_v63  ;;  %v6964_v0 = vld [vmem:[%s11149_s0 + $0xa8] sm:$0xff] }
  0x43   :  { %502 = vmatmul.mubr.f32.vlgmr.msra.gmra.mxu0 %v6682_v1  ;;  %735 = vmatmul.mubr.f32.vlgmr.msra.gmra.mxu1 %v6682_v1 }
  0x44   :  { %903 = vmatprep.subr.mxu0 %v196_v2  ;;  %1136 = vmatprep.subr.mxu1 %v198_v3  ;;  %v117_v2 = vld [vmem:[%s11150_s1 + $0x170] sm:$0xff]  ;;  %v108_v3 = vld [vmem:[%s11150_s1 + $0x128] sm:$0xff] }
  0x45   :  { %904 = vmatpush1.msra.mxu0 %v195_v4  ;;  %5583 = vmatprep.mubr.msk.f32.mxu0 %vm327_vm1, %v6700_v5  ;;  %v6977_v4 = vld [vmem:[%s11149_s0 + $0xa0] sm:$0xff] }
  0x46   :  { %5613 = vmatprep.mubr.msk.f32.mxu1 %vm327_vm1, %v6700_v5  ;;  %1137 = vmatpush1.msra.mxu1 %v197_v6  ;;  %v107_v6 = vld [vmem:[%s11150_s1 + $0x120] sm:$0xff] }
  0x47   :  { %508 = vmatmul.mubr.f32.gmra.mxu0 %v6710_v7  ;;  %741 = vmatmul.mubr.f32.gmra.mxu1 %v6710_v7 }
  0x48   :  { %905 = vmatprep.subr.mxu0 %v188_v8  ;;  %1138 = vmatprep.subr.mxu1 %v190_v9  ;;  %v110_v8 = vld [vmem:[%s11150_s1 + $0x138] sm:$0xff]  ;;  %v100_v9 = vld [vmem:[%s11150_s1 + $0xe8] sm:$0xff] }
  0x49   :  { %906 = vmatpush1.msra.mxu0 %v187_v10  ;;  %5584 = vmatprep.mubr.msk.f32.mxu0 %vm327_vm1, %v6728_v11  ;;  %v109_v10 = vld [vmem:[%s11150_s1 + $0x130] sm:$0xff] }
  0x4a   :  { %5614 = vmatprep.mubr.msk.f32.mxu1 %vm327_vm1, %v6728_v11  ;;  %907 = vmatprep.subr.mxu0 %v180_v12  ;;  %v6999_v12 = vld [vmem:[%s11149_s0 + $0xb8] sm:$0xff] }
  0x4b   :  { %1139 = vmatpush1.msra.mxu1 %v189_v13  ;;  %514 = vmatmul.mubr.f32.gmra.mxu0 %v6741_v14  ;;  %v99_v13 = vld [vmem:[%s11150_s1 + $0xe0] sm:$0xff] }
  0x4c   :  { %747 = vmatmul.mubr.f32.gmra.mxu1 %v6741_v14  ;;  %908 = vmatpush1.msra.mxu0 %v179_v15  ;;  %v7008_v15 = vld [vmem:[%s11149_s0 + $0xb0] sm:$0xff] }
  0x4d   :  { %1140 = vmatprep.subr.mxu1 %v182_v16  ;;  %5585 = vmatprep.mubr.msk.f32.mxu0 %vm327_vm1, %v6756_v17  ;;  %v102_v16 = vld [vmem:[%s11150_s1 + $0xf8] sm:$0xff] }
  0x4e   :  { %1141 = vmatpush1.msra.mxu1 %v181_v18  ;;  %5615 = vmatprep.mubr.msk.f32.mxu1 %vm327_vm1, %v6756_v17  ;;  %v92_v18 = vld [vmem:[%s11150_s1 + $0xa8] sm:$0xff] }
  0x4f   :  { %909 = vmatprep.subr.mxu0 %v172_v19  ;;  %520 = vmatmul.mubr.f32.gmra.mxu0 %v6769_v20  ;;  %v101_v19 = vld [vmem:[%s11150_s1 + $0xf0] sm:$0xff] }
  0x50   :  { %753 = vmatmul.mubr.f32.gmra.mxu1 %v6769_v20  ;;  %910 = vmatpush1.msra.mxu0 %v171_v21  ;;  %v7026_v21 = vld [vmem:[%s11149_s0 + $0xc8] sm:$0xff] }
  0x51   :  { %1142 = vmatprep.subr.mxu1 %v174_v22  ;;  %911 = vmatprep.subr.mxu0 %v164_v23  ;;  %v91_v22 = vld [vmem:[%s11150_s1 + $0xa0] sm:$0xff] }
  0x52   :  { %1143 = vmatpush1.msra.mxu1 %v173_v24  ;;  %5586 = vmatprep.mubr.msk.f32.mxu0 %vm327_vm1, %v6791_v25  ;;  %v7036_v23 = vld [vmem:[%s11149_s0 + $0xc0] sm:$0xff]  ;;  %v94_v24 = vld [vmem:[%s11150_s1 + $0xb8] sm:$0xff] }
  0x53   :  { %5616 = vmatprep.mubr.msk.f32.mxu1 %vm327_vm1, %v6791_v25  ;;  %912 = vmatpush1.msra.mxu0 %v163_v26  ;;  %v84_v26 = vld [vmem:[%s11150_s1 + $0x68] sm:$0xff] }
  0x54   :  { %526 = vmatmul.mubr.f32.gmra.mxu0 %v6800_v27  ;;  %759 = vmatmul.mubr.f32.gmra.mxu1 %v6800_v27 }
  0x55   :  { %1144 = vmatprep.subr.mxu1 %v166_v28  ;;  %913 = vmatprep.subr.mxu0 %v156_v29  ;;  %v93_v28 = vld [vmem:[%s11150_s1 + $0xb0] sm:$0xff]  ;;  %v83_v29 = vld [vmem:[%s11150_s1 + $0x60] sm:$0xff] }
  0x56   :  { %1145 = vmatpush1.msra.mxu1 %v165_v30  ;;  %5587 = vmatprep.mubr.msk.f32.mxu0 %vm327_vm1, %v6818_v31  ;;  %v7059_v30 = vld [vmem:[%s11149_s0 + $0xd8] sm:$0xff] }
  0x57   :  { %5617 = vmatprep.mubr.msk.f32.mxu1 %vm327_vm1, %v6818_v31  ;;  %914 = vmatpush1.msra.mxu0 %v155_v32  ;;  %v86_v32 = vld [vmem:[%s11150_s1 + $0x78] sm:$0xff] }
  0x58   :  { %532 = vmatmul.mubr.f32.gmra.mxu0 %v6828_v33  ;;  %765 = vmatmul.mubr.f32.gmra.mxu1 %v6828_v33 }
  0x59   :  { %1146 = vmatprep.subr.mxu1 %v158_v34  ;;  %915 = vmatprep.subr.mxu0 %v148_v35  ;;  %v7067_v34 = vld [vmem:[%s11149_s0 + $0xd0] sm:$0xff]  ;;  %v76_v35 = vld [vmem:[%s11150_s1 + $0x28] sm:$0xff] }
  0x5a   :  { %1147 = vmatpush1.msra.mxu1 %v157_v36  ;;  %916 = vmatpush1.msra.mxu0 %v147_v37  ;;  %v85_v36 = vld [vmem:[%s11150_s1 + $0x70] sm:$0xff]  ;;  %v75_v37 = vld [vmem:[%s11150_s1 + $0x20] sm:$0xff] }
  0x5b   :  { %5588 = vmatprep.mubr.msk.f32.mxu0 %vm327_vm1, %v6851_v38  ;;  %5618 = vmatprep.mubr.msk.f32.mxu1 %vm327_vm1, %v6851_v38 }
  0x5c   :  { %1148 = vmatprep.subr.mxu1 %v150_v39  ;;  %538 = vmatmul.mubr.f32.gmra.mxu0 %v6859_v40  ;;  %v7086_v39 = vld [vmem:[%s11149_s0 + $0xe8] sm:$0xff] }
  0x5d   :  { %771 = vmatmul.mubr.f32.gmra.mxu1 %v6859_v40  ;;  %917 = vmatprep.subr.mxu0 %v140_v41  ;;  %v78_v41 = vld [vmem:[%s11150_s1 + $0x38] sm:$0xff] }
  0x5e   :  { %1149 = vmatpush1.msra.mxu1 %v149_v42  ;;  %918 = vmatpush1.msra.mxu0 %v139_v43  ;;  %v7095_v42 = vld [vmem:[%s11149_s0 + $0xe0] sm:$0xff]  ;;  %v324_v43 = vld [vmem:[%s11150_s1 + $0x7e8] sm:$0x3] }
  0x5f   :  { %5589 = vmatprep.mubr.msk.f32.mxu0 %vm327_vm1, %v6878_v44  ;;  %5619 = vmatprep.mubr.msk.f32.mxu1 %vm327_vm1, %v6878_v44 }
  0x60   :  { %1150 = vmatprep.subr.mxu1 %v142_v45  ;;  %544 = vmatmul.mubr.f32.gmra.mxu0 %v6887_v46  ;;  %v77_v45 = vld [vmem:[%s11150_s1 + $0x30] sm:$0xff] }
  0x61   :  { %777 = vmatmul.mubr.f32.gmra.mxu1 %v6887_v46  ;;  %919 = vmatprep.subr.mxu0 %v132_v47  ;;  %v323_v47 = vld [vmem:[%s11150_s1 + $0x7e0] sm:$0x3] }
  0x62   :  { %1151 = vmatpush1.msra.mxu1 %v141_v48  ;;  %920 = vmatpush1.msra.mxu0 %v131_v49  ;;  %v326_v48 = vld [vmem:[%s11150_s1 + $0x7f8] sm:$0x3] }
  0x63   :  { %1152 = vmatprep.subr.mxu1 %v134_v50  ;;  %5590 = vmatprep.mubr.msk.f32.mxu0 %vm327_vm1, %v6909_v51  ;;  %v7117_v49 = vld [vmem:[%s11149_s0 + $0xf8] sm:$0xff]  ;;  %v325_v50 = vld [vmem:[%s11150_s1 + $0x7f0] sm:$0x3] }
  0x64   :  { %5620 = vmatprep.mubr.msk.f32.mxu1 %vm327_vm1, %v6909_v51  ;;  %1153 = vmatpush1.msra.mxu1 %v133_v52  ;;  %v7128_v52 = vld [vmem:[%s11149_s0 + $0xf0] sm:$0xff] }
  0x65   :  { %550 = vmatmul.mubr.f32.gmra.mxu0 %v6918_v53  ;;  %783 = vmatmul.mubr.f32.gmra.mxu1 %v6918_v53 }
  0x66   :  { %921 = vmatprep.subr.mxu0 %v124_v54  ;;  %1154 = vmatprep.subr.mxu1 %v126_v55  ;;  %v316_v54 = vld [vmem:[%s11150_s1 + $0x7a8] sm:$0xff]  ;;  %v318_v55 = vld [vmem:[%s11150_s1 + $0x7b8] sm:$0xff] }
  0x67   :  { %922 = vmatpush1.msra.mxu0 %v123_v56  ;;  %5591 = vmatprep.mubr.msk.f32.mxu0 %vm327_vm1, %v6936_v57  ;;  %v315_v56 = vld [vmem:[%s11150_s1 + $0x7a0] sm:$0xff] }
  0x68   :  { %5621 = vmatprep.mubr.msk.f32.mxu1 %vm327_vm1, %v6936_v57  ;;  %923 = vmatprep.subr.mxu0 %v116_v58  ;;  %v7148_v58 = vld [vmem:[%s11149_s0 + $0x108] sm:$0xff] }
  0x69   :  { %1155 = vmatpush1.msra.mxu1 %v125_v59  ;;  %556 = vmatmul.mubr.f32.gmra.mxu0 %v6949_v60 }
  0x6a   :  { %789 = vmatmul.mubr.f32.gmra.mxu1 %v6949_v60  ;;  %924 = vmatpush1.msra.mxu0 %v115_v61 }
  0x6b   :  { %1156 = vmatprep.subr.mxu1 %v118_v62  ;;  %5592 = vmatprep.mubr.msk.f32.mxu0 %vm327_vm1, %v6964_v0 }
  0x6c   :  { %1157 = vmatpush1.msra.mxu1 %v117_v2  ;;  %5622 = vmatprep.mubr.msk.f32.mxu1 %vm327_vm1, %v6964_v0 }
  0x6d   :  { %925 = vmatprep.subr.mxu0 %v108_v3  ;;  %562 = vmatmul.mubr.f32.gmra.mxu0 %v6977_v4 }
  0x6e   :  { %795 = vmatmul.mubr.f32.gmra.mxu1 %v6977_v4  ;;  %926 = vmatpush1.msra.mxu0 %v107_v6 }
  0x6f   :  { %1158 = vmatprep.subr.mxu1 %v110_v8  ;;  %927 = vmatprep.subr.mxu0 %v100_v9 }
  0x70   :  { %1159 = vmatpush1.msra.mxu1 %v109_v10  ;;  %5593 = vmatprep.mubr.msk.f32.mxu0 %vm327_vm1, %v6999_v12 }
  0x71   :  { %5623 = vmatprep.mubr.msk.f32.mxu1 %vm327_vm1, %v6999_v12  ;;  %928 = vmatpush1.msra.mxu0 %v99_v13 }
  0x72   :  { %568 = vmatmul.mubr.f32.gmra.mxu0 %v7008_v15  ;;  %801 = vmatmul.mubr.f32.gmra.mxu1 %v7008_v15 }
  0x73   :  { %1160 = vmatprep.subr.mxu1 %v102_v16  ;;  %929 = vmatprep.subr.mxu0 %v92_v18 }
  0x74   :  { %1161 = vmatpush1.msra.mxu1 %v101_v19  ;;  %5594 = vmatprep.mubr.msk.f32.mxu0 %vm327_vm1, %v7026_v21 }
  0x75   :  { %5624 = vmatprep.mubr.msk.f32.mxu1 %vm327_vm1, %v7026_v21  ;;  %930 = vmatpush1.msra.mxu0 %v91_v22 }
  0x76   :  { %574 = vmatmul.mubr.f32.gmra.mxu0 %v7036_v23  ;;  %807 = vmatmul.mubr.f32.gmra.mxu1 %v7036_v23 }
  0x77   :  { %1162 = vmatprep.subr.mxu1 %v94_v24  ;;  %931 = vmatprep.subr.mxu0 %v84_v26 }
  0x78   :  { %1163 = vmatpush1.msra.mxu1 %v93_v28  ;;  %932 = vmatpush1.msra.mxu0 %v83_v29 }
  0x79   :  { %5595 = vmatprep.mubr.msk.f32.mxu0 %vm327_vm1, %v7059_v30  ;;  %5625 = vmatprep.mubr.msk.f32.mxu1 %vm327_vm1, %v7059_v30 }
  0x7a   :  { %1164 = vmatprep.subr.mxu1 %v86_v32  ;;  %580 = vmatmul.mubr.f32.gmra.mxu0 %v7067_v34 }
  0x7b   :  { %813 = vmatmul.mubr.f32.gmra.mxu1 %v7067_v34  ;;  %933 = vmatprep.subr.mxu0 %v76_v35 }
  0x7c   :  { %1165 = vmatpush1.msra.mxu1 %v85_v36  ;;  %934 = vmatpush1.msra.mxu0 %v75_v37 }
  0x7d   :  { %5596 = vmatprep.mubr.msk.f32.mxu0 %vm327_vm1, %v7086_v39  ;;  %5626 = vmatprep.mubr.msk.f32.mxu1 %vm327_vm1, %v7086_v39 }
  0x7e   :  { %1166 = vmatprep.subr.mxu1 %v78_v41  ;;  %586 = vmatmul.mubr.f32.gmra.mxu0 %v7095_v42 }
  0x7f   :  { %819 = vmatmul.mubr.f32.gmra.mxu1 %v7095_v42  ;;  %5640 = vmatprep.subr.msk.mxu0 %vm412_vm0, %v324_v43 }
  0x80   :  { %1167 = vmatpush1.msra.mxu1 %v77_v45  ;;  %5641 = vmatpush2.msk.msra.mxu0 %vm412_vm0, %v323_v47 }
  0x81   :  { %5670 = vmatprep.subr.msk.mxu1 %vm412_vm0, %v326_v48  ;;  %5597 = vmatprep.mubr.msk.f32.mxu0 %vm327_vm1, %v7117_v49 }
  0x82   :  { %5627 = vmatprep.mubr.msk.f32.mxu1 %vm327_vm1, %v7117_v49  ;;  %5671 = vmatpush2.msk.msra.mxu1 %vm412_vm0, %v325_v50 }
  0x83   :  { %8 = vsyncpa [#allocation4], 0  ;;  %592 = vmatmul.mubr.f32.gmra.mxu0 %v7128_v52  ;;  %825 = vmatmul.mubr.f32.gmra.mxu1 %v7128_v52  ;;  %v308_v59 = vld [vmem:[%s11150_s1 + $0x768] sm:$0xff]  ;;  %v317_v61 = vld [vmem:[%s11150_s1 + $0x7b0] sm:$0xff]  ;;  %vm1376_vm2 = vcmask 31744   ;;  %vm2580_vm3 = vcmask 1043456  }
  0x84   :  { %937 = vmatprep.subr.mxu0 %v316_v54  ;;  %1170 = vmatprep.subr.mxu1 %v318_v55  ;;  %v7161_v62 = vld [vmem:[%s11149_s0 + $0x100] sm:$0xff]  ;;  %v310_v3 = vld [vmem:[%s11150_s1 + $0x778] sm:$0xff]  ;;  %v309_v8 = vld [vmem:[%s11150_s1 + $0x770] sm:$0xff]  ;;  %vm5400_vm4 = vcmask 261120  }
  0x85   :  { %938 = vmatpush2.msra.mxu0 %v315_v56  ;;  %5598 = vmatprep.mubr.msk.f32.mxu0 %vm327_vm1, %v7148_v58  ;;  %v307_v2 = vld [vmem:[%s11150_s1 + $0x760] sm:$0xff]  ;;  %v7176_v6 = vld [vmem:[%s11149_s0 + $0x118] sm:$0xff]  ;;  %v300_v9 = vld [vmem:[%s11150_s1 + $0x728] sm:$0xff] }
  0x86   :  { %5628 = vmatprep.mubr.msk.f32.mxu1 %vm327_vm1, %v7148_v58  ;;  %939 = vmatprep.subr.mxu0 %v308_v59  ;;  %v7189_v10 = vld [vmem:[%s11149_s0 + $0x110] sm:$0xff]  ;;  %v299_v13 = vld [vmem:[%s11150_s1 + $0x720] sm:$0xff]  ;;  %v302_v16 = vld [vmem:[%s11150_s1 + $0x738] sm:$0xff] }
  0x87   :  { %1171 = vmatpush2.msra.mxu1 %v317_v61  ;;  %598 = vmatmul.mubr.f32.gmra.mxu0 %v7161_v62  ;;  %v292_v18 = vld [vmem:[%s11150_s1 + $0x6e8] sm:$0xff]  ;;  %v301_v19 = vld [vmem:[%s11150_s1 + $0x730] sm:$0xff]  ;;  %v291_v24 = vld [vmem:[%s11150_s1 + $0x6e0] sm:$0xff] }
  0x88   :  { %831 = vmatmul.mubr.f32.gmra.mxu1 %v7161_v62  ;;  %940 = vmatpush2.msra.mxu0 %v307_v2  ;;  %v7211_v22 = vld [vmem:[%s11149_s0 + $0x128] sm:$0xff]  ;;  %v7220_v26 = vld [vmem:[%s11149_s0 + $0x120] sm:$0xff]  ;;  %v294_v28 = vld [vmem:[%s11150_s1 + $0x6f8] sm:$0xff] }
  0x89   :  { %1172 = vmatprep.subr.mxu1 %v310_v3  ;;  %5599 = vmatprep.mubr.msk.f32.mxu0 %vm327_vm1, %v7176_v6  ;;  %v284_v29 = vld [vmem:[%s11150_s1 + $0x6a8] sm:$0xff]  ;;  %v293_v32 = vld [vmem:[%s11150_s1 + $0x6f0] sm:$0xff]  ;;  %v7238_v35 = vld [vmem:[%s11149_s0 + $0x138] sm:$0xff] }
  0x8a   :  { %1173 = vmatpush2.msra.mxu1 %v309_v8  ;;  %5629 = vmatprep.mubr.msk.f32.mxu1 %vm327_vm1, %v7176_v6  ;;  %v283_v36 = vld [vmem:[%s11150_s1 + $0x6a0] sm:$0xff]  ;;  %v7248_v37 = vld [vmem:[%s11149_s0 + $0x130] sm:$0xff]  ;;  %v286_v41 = vld [vmem:[%s11150_s1 + $0x6b8] sm:$0xff] }
  0x8b   :  { %941 = vmatprep.subr.mxu0 %v300_v9  ;;  %604 = vmatmul.mubr.f32.gmra.mxu0 %v7189_v10  ;;  %v276_v43 = vld [vmem:[%s11150_s1 + $0x668] sm:$0xff]  ;;  %v285_v45 = vld [vmem:[%s11150_s1 + $0x6b0] sm:$0xff]  ;;  %v275_v47 = vld [vmem:[%s11150_s1 + $0x660] sm:$0xff] }
  0x8c   :  { %837 = vmatmul.mubr.f32.gmra.mxu1 %v7189_v10  ;;  %942 = vmatpush2.msra.mxu0 %v299_v13  ;;  %v7271_v48 = vld [vmem:[%s11149_s0 + $0x148] sm:$0xff]  ;;  %v278_v50 = vld [vmem:[%s11150_s1 + $0x678] sm:$0xff]  ;;  %v7279_v54 = vld [vmem:[%s11149_s0 + $0x140] sm:$0xff] }
  0x8d   :  { %1174 = vmatprep.subr.mxu1 %v302_v16  ;;  %943 = vmatprep.subr.mxu0 %v292_v18  ;;  %v268_v55 = vld [vmem:[%s11150_s1 + $0x628] sm:$0xff]  ;;  %v277_v56 = vld [vmem:[%s11150_s1 + $0x670] sm:$0xff]  ;;  %v267_v59 = vld [vmem:[%s11150_s1 + $0x620] sm:$0xff] }
  0x8e   :  { %1175 = vmatpush2.msra.mxu1 %v301_v19  ;;  %5600 = vmatprep.mubr.msk.f32.mxu0 %vm327_vm1, %v7211_v22  ;;  %v7298_v61 = vld [vmem:[%s11149_s0 + $0x158] sm:$0xff]  ;;  %v7307_v3 = vld [vmem:[%s11149_s0 + $0x150] sm:$0xff]  ;;  %v260_v8 = vld [vmem:[%s11150_s1 + $0x5e8] sm:$0xff] }
  0x8f   :  { %5630 = vmatprep.mubr.msk.f32.mxu1 %vm327_vm1, %v7211_v22  ;;  %944 = vmatpush2.msra.mxu0 %v291_v24  ;;  %v270_v2 = vld [vmem:[%s11150_s1 + $0x638] sm:$0xff]  ;;  %v269_v9 = vld [vmem:[%s11150_s1 + $0x630] sm:$0xff]  ;;  %v259_v13 = vld [vmem:[%s11150_s1 + $0x5e0] sm:$0xff] }
  0x90   :  { %610 = vmatmul.mubr.f32.gmra.mxu0 %v7220_v26  ;;  %843 = vmatmul.mubr.f32.gmra.mxu1 %v7220_v26  ;;  %v262_v16 = vld [vmem:[%s11150_s1 + $0x5f8] sm:$0xff]  ;;  %v7329_v18 = vld [vmem:[%s11149_s0 + $0x168] sm:$0xff]  ;;  %v261_v19 = vld [vmem:[%s11150_s1 + $0x5f0] sm:$0xff] }
  0x91   :  { %1176 = vmatprep.subr.mxu1 %v294_v28  ;;  %945 = vmatprep.subr.mxu0 %v284_v29  ;;  %v7338_v24 = vld [vmem:[%s11149_s0 + $0x160] sm:$0xff]  ;;  %v252_v28 = vld [vmem:[%s11150_s1 + $0x5a8] sm:$0xff]  ;;  %v254_v29 = vld [vmem:[%s11150_s1 + $0x5b8] sm:$0xff] }
  0x92   :  { %1177 = vmatpush2.msra.mxu1 %v293_v32  ;;  %5601 = vmatprep.mubr.msk.f32.mxu0 %vm327_vm1, %v7238_v35  ;;  %v251_v32 = vld [vmem:[%s11150_s1 + $0x5a0] sm:$0xff] }
  0x93   :  { %5631 = vmatprep.mubr.msk.f32.mxu1 %vm327_vm1, %v7238_v35  ;;  %946 = vmatpush2.msra.mxu0 %v283_v36  ;;  %v7356_v36 = vld [vmem:[%s11149_s0 + $0x178] sm:$0xff] }
  0x94   :  { %616 = vmatmul.mubr.f32.gmra.mxu0 %v7248_v37  ;;  %849 = vmatmul.mubr.f32.gmra.mxu1 %v7248_v37 }
  0x95   :  { %1178 = vmatprep.subr.mxu1 %v286_v41  ;;  %947 = vmatprep.subr.mxu0 %v276_v43  ;;  %v244_v41 = vld [vmem:[%s11150_s1 + $0x568] sm:$0xff]  ;;  %v253_v43 = vld [vmem:[%s11150_s1 + $0x5b0] sm:$0xff] }
  0x96   :  { %1179 = vmatpush2.msra.mxu1 %v285_v45  ;;  %948 = vmatpush2.msra.mxu0 %v275_v47  ;;  %v7369_v45 = vld [vmem:[%s11149_s0 + $0x170] sm:$0xff]  ;;  %v243_v47 = vld [vmem:[%s11150_s1 + $0x560] sm:$0xff] }
  0x97   :  { %5602 = vmatprep.mubr.msk.f32.mxu0 %vm327_vm1, %v7271_v48  ;;  %5632 = vmatprep.mubr.msk.f32.mxu1 %vm327_vm1, %v7271_v48 }
  0x98   :  { %1180 = vmatprep.subr.mxu1 %v278_v50  ;;  %622 = vmatmul.mubr.f32.gmra.mxu0 %v7279_v54  ;;  %v246_v50 = vld [vmem:[%s11150_s1 + $0x578] sm:$0xff] }
  0x99   :  { %855 = vmatmul.mubr.f32.gmra.mxu1 %v7279_v54  ;;  %949 = vmatprep.subr.mxu0 %v268_v55  ;;  %v7384_v55 = vld [vmem:[%s11149_s0 + $0x188] sm:$0xff] }
  0x9a   :  { %1181 = vmatpush2.msra.mxu1 %v277_v56  ;;  %950 = vmatpush2.msra.mxu0 %v267_v59  ;;  %v245_v56 = vld [vmem:[%s11150_s1 + $0x570] sm:$0xff]  ;;  %v236_v59 = vld [vmem:[%s11150_s1 + $0x528] sm:$0xff] }
  0x9b   :  { %5603 = vmatprep.mubr.msk.f32.mxu0 %vm327_vm1, %v7298_v61  ;;  %5633 = vmatprep.mubr.msk.f32.mxu1 %vm327_vm1, %v7298_v61 }
  0x9c   :  { %1182 = vmatprep.subr.mxu1 %v270_v2  ;;  %628 = vmatmul.mubr.f32.gmra.mxu0 %v7307_v3  ;;  %v7397_v2 = vld [vmem:[%s11149_s0 + $0x180] sm:$0xff] }
  0x9d   :  { %861 = vmatmul.mubr.f32.gmra.mxu1 %v7307_v3  ;;  %951 = vmatprep.subr.mxu0 %v260_v8  ;;  %v235_v8 = vld [vmem:[%s11150_s1 + $0x520] sm:$0xff] }
  0x9e   :  { %1183 = vmatpush2.msra.mxu1 %v269_v9  ;;  %952 = vmatpush2.msra.mxu0 %v259_v13  ;;  %v238_v9 = vld [vmem:[%s11150_s1 + $0x538] sm:$0xff]  ;;  %v228_v13 = vld [vmem:[%s11150_s1 + $0x4e8] sm:$0xff] }
  0x9f   :  { %1184 = vmatprep.subr.mxu1 %v262_v16  ;;  %5604 = vmatprep.mubr.msk.f32.mxu0 %vm327_vm1, %v7329_v18  ;;  %v237_v16 = vld [vmem:[%s11150_s1 + $0x530] sm:$0xff] }
  0xa0   :  { %5634 = vmatprep.mubr.msk.f32.mxu1 %vm327_vm1, %v7329_v18  ;;  %1185 = vmatpush2.msra.mxu1 %v261_v19  ;;  %v7419_v19 = vld [vmem:[%s11149_s0 + $0x198] sm:$0xff] }
  0xa1   :  { %634 = vmatmul.mubr.f32.gmra.mxu0 %v7338_v24  ;;  %867 = vmatmul.mubr.f32.gmra.mxu1 %v7338_v24 }
  0xa2   :  { %953 = vmatprep.subr.mxu0 %v252_v28  ;;  %1186 = vmatprep.subr.mxu1 %v254_v29  ;;  %v227_v28 = vld [vmem:[%s11150_s1 + $0x4e0] sm:$0xff]  ;;  %v7428_v29 = vld [vmem:[%s11149_s0 + $0x190] sm:$0xff] }
  0xa3   :  { %954 = vmatpush2.msra.mxu0 %v251_v32  ;;  %5605 = vmatprep.mubr.msk.f32.mxu0 %vm327_vm1, %v7356_v36  ;;  %v230_v32 = vld [vmem:[%s11150_s1 + $0x4f8] sm:$0xff] }
  0xa4   :  { %5635 = vmatprep.mubr.msk.f32.mxu1 %vm327_vm1, %v7356_v36  ;;  %955 = vmatprep.subr.mxu0 %v244_v41  ;;  %v220_v41 = vld [vmem:[%s11150_s1 + $0x4a8] sm:$0xff] }
  0xa5   :  { %1187 = vmatpush2.msra.mxu1 %v253_v43  ;;  %640 = vmatmul.mubr.f32.gmra.mxu0 %v7369_v45  ;;  %v229_v43 = vld [vmem:[%s11150_s1 + $0x4f0] sm:$0xff] }
  0xa6   :  { %873 = vmatmul.mubr.f32.gmra.mxu1 %v7369_v45  ;;  %956 = vmatpush2.msra.mxu0 %v243_v47  ;;  %v7446_v47 = vld [vmem:[%s11149_s0 + $0x1a8] sm:$0xff] }
  0xa7   :  { %1188 = vmatprep.subr.mxu1 %v246_v50  ;;  %5606 = vmatprep.mubr.msk.f32.mxu0 %vm327_vm1, %v7384_v55  ;;  %v219_v50 = vld [vmem:[%s11150_s1 + $0x4a0] sm:$0xff] }
  0xa8   :  { %1189 = vmatpush2.msra.mxu1 %v245_v56  ;;  %5636 = vmatprep.mubr.msk.f32.mxu1 %vm327_vm1, %v7384_v55  ;;  %v7456_v56 = vld [vmem:[%s11149_s0 + $0x1a0] sm:$0xff] }
  0xa9   :  { %957 = vmatprep.subr.mxu0 %v236_v59  ;;  %646 = vmatmul.mubr.f32.gmra.mxu0 %v7397_v2  ;;  %v222_v59 = vld [vmem:[%s11150_s1 + $0x4b8] sm:$0xff] }
  0xaa   :  { %879 = vmatmul.mubr.f32.gmra.mxu1 %v7397_v2  ;;  %958 = vmatpush2.msra.mxu0 %v235_v8  ;;  %v212_v8 = vld [vmem:[%s11150_s1 + $0x468] sm:$0xff] }
  0xab   :  { %1190 = vmatprep.subr.mxu1 %v238_v9  ;;  %959 = vmatprep.subr.mxu0 %v228_v13  ;;  %v221_v9 = vld [vmem:[%s11150_s1 + $0x4b0] sm:$0xff]  ;;  %v211_v13 = vld [vmem:[%s11150_s1 + $0x460] sm:$0xff] }
  0xac   :  { %1191 = vmatpush2.msra.mxu1 %v237_v16  ;;  %5607 = vmatprep.mubr.msk.f32.mxu0 %vm327_vm1, %v7419_v19  ;;  %v7479_v16 = vld [vmem:[%s11149_s0 + $0x1b8] sm:$0xff] }
  0xad   :  { %5637 = vmatprep.mubr.msk.f32.mxu1 %vm327_vm1, %v7419_v19  ;;  %960 = vmatpush2.msra.mxu0 %v227_v28  ;;  %v214_v28 = vld [vmem:[%s11150_s1 + $0x478] sm:$0xff] }
  0xae   :  { %652 = vmatmul.mubr.f32.gmra.mxu0 %v7428_v29  ;;  %885 = vmatmul.mubr.f32.gmra.mxu1 %v7428_v29 }
  0xaf   :  { %1192 = vmatprep.subr.mxu1 %v230_v32  ;;  %961 = vmatprep.subr.mxu0 %v220_v41  ;;  %v7487_v32 = vld [vmem:[%s11149_s0 + $0x1b0] sm:$0xff]  ;;  %v204_v41 = vld [vmem:[%s11150_s1 + $0x428] sm:$0xff] }
  0xb0   :  { %1193 = vmatpush2.msra.mxu1 %v229_v43  ;;  %5608 = vmatprep.mubr.msk.f32.mxu0 %vm327_vm1, %v7446_v47  ;;  %v213_v43 = vld [vmem:[%s11150_s1 + $0x470] sm:$0xff] }
  0xb1   :  { %5638 = vmatprep.mubr.msk.f32.mxu1 %vm327_vm1, %v7446_v47  ;;  %962 = vmatpush2.msra.mxu0 %v219_v50  ;;  %v203_v50 = vld [vmem:[%s11150_s1 + $0x420] sm:$0xff] }
  0xb2   :  { %658 = vmatmul.mubr.f32.gmra.mxu0 %v7456_v56  ;;  %891 = vmatmul.mubr.f32.gmra.mxu1 %v7456_v56 }
  0xb3   :  { %1194 = vmatprep.subr.mxu1 %v222_v59  ;;  %963 = vmatprep.subr.mxu0 %v212_v8  ;;  %v206_v59 = vld [vmem:[%s11150_s1 + $0x438] sm:$0xff]  ;;  %v205_v8 = vld [vmem:[%s11150_s1 + $0x430] sm:$0xff] }
  0xb4   :  { %1195 = vmatpush2.msra.mxu1 %v221_v9  ;;  %964 = vmatpush2.msra.mxu0 %v211_v13  ;;  %v1909_v9 = vld [vmem:[%s11151_s2 + $0x2d8] sm:$0xff] }
  0xb5   :  { %5609 = vmatprep.mubr.msk.f32.mxu0 %vm327_vm1, %v7479_v16  ;;  %5639 = vmatprep.mubr.msk.f32.mxu1 %vm327_vm1, %v7479_v16  ;;  %v2101_v13 = vld [vmem:[%s11151_s2 + $0x8d8] sm:$0xff] }
  0xb6   :  { %1196 = vmatprep.subr.mxu1 %v214_v28  ;;  %664 = vmatmul.mubr.f32.gmra.mxu0 %v7487_v32  ;;  %v1908_v28 = vld [vmem:[%s11151_s2 + $0x2d0] sm:$0xff] }
  0xb7   :  { %897 = vmatmul.mubr.f32.gmra.mxu1 %v7487_v32  ;;  %965 = vmatprep.subr.mxu0 %v204_v41  ;;  %v2100_v41 = vld [vmem:[%s11151_s2 + $0x8d0] sm:$0xff] }
  0xb8   :  { %1197 = vmatpush2.msra.mxu1 %v213_v43  ;;  %966 = vmatpush2.msra.mxu0 %v203_v50  ;;  %v2095_v43 = vld [vmem:[%s11151_s2 + $0x8a8] sm:$0xff]  ;;  %v1897_v50 = vld [vmem:[%s11151_s2 + $0x278] sm:$0xff] }
  0xb9   :  { %1198 = vmatprep.subr.mxu1 %v206_v59  ;;  %5642 = vmatprep.mubr.msk.f32.mxu0 %vm327_vm1, %v6674_v63  ;;  %v2094_v59 = vld [vmem:[%s11151_s2 + $0x8a0] sm:$0xff] }
  0xba   :  { %1199 = vmatpush2.msra.mxu1 %v205_v8  ;;  %5672 = vmatprep.mubr.msk.f32.mxu1 %vm327_vm1, %v6674_v63  ;;  %v1903_v63 = vld [vmem:[%s11151_s2 + $0x2a8] sm:$0xff]  ;;  %v2088_v8 = vld [vmem:[%s11151_s2 + $0x870] sm:$0xff] }
  0xbb   :  { %968 = vmatmul.mubr.f32.vlgmr.msra.gmra.mxu0 %v6682_v1  ;;  %1201 = vmatmul.mubr.f32.vlgmr.msra.gmra.mxu1 %v6682_v1  ;;  %v1902_v1 = vld [vmem:[%s11151_s2 + $0x2a0] sm:$0xff] }
  0xbc   :  { %2599 = vmatprep.subr.mxu0 %v1909_v9  ;;  %2832 = vmatprep.subr.mxu1 %v2101_v13  ;;  %v1891_v9 = vld [vmem:[%s11151_s2 + $0x248] sm:$0xff]  ;;  %v1885_v13 = vld [vmem:[%s11151_s2 + $0x218] sm:$0xff] }
  0xbd   :  { %2600 = vmatpush1.msra.mxu0 %v1908_v28  ;;  %5643 = vmatprep.mubr.msk.f32.mxu0 %vm327_vm1, %v6700_v5  ;;  %v2082_v28 = vld [vmem:[%s11151_s2 + $0x840] sm:$0xff] }
  0xbe   :  { %5673 = vmatprep.mubr.msk.f32.mxu1 %vm327_vm1, %v6700_v5  ;;  %2833 = vmatpush1.msra.mxu1 %v2100_v41  ;;  %v1896_v5 = vld [vmem:[%s11151_s2 + $0x270] sm:$0xff]  ;;  %v2077_v41 = vld [vmem:[%s11151_s2 + $0x818] sm:$0xff] }
  0xbf   :  { %974 = vmatmul.mubr.f32.gmra.mxu0 %v6710_v7  ;;  %1207 = vmatmul.mubr.f32.gmra.mxu1 %v6710_v7  ;;  %v2089_v7 = vld [vmem:[%s11151_s2 + $0x878] sm:$0xff] }
  0xc0   :  { %2601 = vmatprep.subr.mxu0 %v1903_v63  ;;  %2834 = vmatprep.subr.mxu1 %v2095_v43  ;;  %v1879_v63 = vld [vmem:[%s11151_s2 + $0x1e8] sm:$0xff]  ;;  %v1878_v43 = vld [vmem:[%s11151_s2 + $0x1e0] sm:$0xff] }
  0xc1   :  { %2602 = vmatpush1.msra.mxu0 %v1902_v1  ;;  %5644 = vmatprep.mubr.msk.f32.mxu0 %vm327_vm1, %v6728_v11  ;;  %v1873_v1 = vld [vmem:[%s11151_s2 + $0x1b8] sm:$0xff] }
  0xc2   :  { %5674 = vmatprep.mubr.msk.f32.mxu1 %vm327_vm1, %v6728_v11  ;;  %2603 = vmatprep.subr.mxu0 %v1897_v50  ;;  %v1890_v11 = vld [vmem:[%s11151_s2 + $0x240] sm:$0xff]  ;;  %v1872_v50 = vld [vmem:[%s11151_s2 + $0x1b0] sm:$0xff] }
  0xc3   :  { %2835 = vmatpush1.msra.mxu1 %v2094_v59  ;;  %980 = vmatmul.mubr.f32.gmra.mxu0 %v6741_v14  ;;  %v2065_v59 = vld [vmem:[%s11151_s2 + $0x7b8] sm:$0xff] }
  0xc4   :  { %1213 = vmatmul.mubr.f32.gmra.mxu1 %v6741_v14  ;;  %2604 = vmatpush1.msra.mxu0 %v1896_v5  ;;  %v2083_v14 = vld [vmem:[%s11151_s2 + $0x848] sm:$0xff]  ;;  %v1866_v5 = vld [vmem:[%s11151_s2 + $0x180] sm:$0xff] }
  0xc5   :  { %2836 = vmatprep.subr.mxu1 %v2089_v7  ;;  %5645 = vmatprep.mubr.msk.f32.mxu0 %vm327_vm1, %v6756_v17  ;;  %v2059_v7 = vld [vmem:[%s11151_s2 + $0x788] sm:$0xff] }
  0xc6   :  { %2837 = vmatpush1.msra.mxu1 %v2088_v8  ;;  %5675 = vmatprep.mubr.msk.f32.mxu1 %vm327_vm1, %v6756_v17  ;;  %v1884_v17 = vld [vmem:[%s11151_s2 + $0x210] sm:$0xff] }
  0xc7   :  { %2605 = vmatprep.subr.mxu0 %v1891_v9  ;;  %986 = vmatmul.mubr.f32.gmra.mxu0 %v6769_v20  ;;  %v1860_v8 = vld [vmem:[%s11151_s2 + $0x150] sm:$0xff]  ;;  %v2053_v9 = vld [vmem:[%s11151_s2 + $0x758] sm:$0xff] }
  0xc8   :  { %1219 = vmatmul.mubr.f32.gmra.mxu1 %v6769_v20  ;;  %2606 = vmatpush1.msra.mxu0 %v1890_v11  ;;  %v2076_v20 = vld [vmem:[%s11151_s2 + $0x810] sm:$0xff]  ;;  %v1855_v11 = vld [vmem:[%s11151_s2 + $0x128] sm:$0xff] }
  0xc9   :  { %2838 = vmatprep.subr.mxu1 %v2083_v14  ;;  %2607 = vmatprep.subr.mxu0 %v1885_v13  ;;  %v2047_v14 = vld [vmem:[%s11151_s2 + $0x728] sm:$0xff]  ;;  %v1849_v13 = vld [vmem:[%s11151_s2 + $0xf8] sm:$0xff] }
  0xca   :  { %2839 = vmatpush1.msra.mxu1 %v2082_v28  ;;  %5646 = vmatprep.mubr.msk.f32.mxu0 %vm327_vm1, %v6791_v25  ;;  %v2046_v28 = vld [vmem:[%s11151_s2 + $0x720] sm:$0xff] }
  0xcb   :  { %5676 = vmatprep.mubr.msk.f32.mxu1 %vm327_vm1, %v6791_v25  ;;  %2608 = vmatpush1.msra.mxu0 %v1884_v17  ;;  %v2071_v25 = vld [vmem:[%s11151_s2 + $0x7e8] sm:$0xff]  ;;  %v2040_v17 = vld [vmem:[%s11151_s2 + $0x6f0] sm:$0xff] }
  0xcc   :  { %992 = vmatmul.mubr.f32.gmra.mxu0 %v6800_v27  ;;  %1225 = vmatmul.mubr.f32.gmra.mxu1 %v6800_v27  ;;  %v2070_v27 = vld [vmem:[%s11151_s2 + $0x7e0] sm:$0xff] }
  0xcd   :  { %2840 = vmatprep.subr.mxu1 %v2077_v41  ;;  %2609 = vmatprep.subr.mxu0 %v1879_v63  ;;  %v1843_v41 = vld [vmem:[%s11151_s2 + $0xc8] sm:$0xff]  ;;  %v1837_v63 = vld [vmem:[%s11151_s2 + $0x98] sm:$0xff] }
  0xce   :  { %2841 = vmatpush1.msra.mxu1 %v2076_v20  ;;  %5647 = vmatprep.mubr.msk.f32.mxu0 %vm327_vm1, %v6818_v31  ;;  %v2034_v20 = vld [vmem:[%s11151_s2 + $0x6c0] sm:$0xff] }
  0xcf   :  { %5677 = vmatprep.mubr.msk.f32.mxu1 %vm327_vm1, %v6818_v31  ;;  %2610 = vmatpush1.msra.mxu0 %v1878_v43  ;;  %v1867_v31 = vld [vmem:[%s11151_s2 + $0x188] sm:$0xff]  ;;  %v2029_v43 = vld [vmem:[%s11151_s2 + $0x698] sm:$0xff] }
  0xd0   :  { %998 = vmatmul.mubr.f32.gmra.mxu0 %v6828_v33  ;;  %1231 = vmatmul.mubr.f32.gmra.mxu1 %v6828_v33  ;;  %v2064_v33 = vld [vmem:[%s11151_s2 + $0x7b0] sm:$0xff] }
  0xd1   :  { %2842 = vmatprep.subr.mxu1 %v2071_v25  ;;  %2611 = vmatprep.subr.mxu0 %v1873_v1  ;;  %v1831_v25 = vld [vmem:[%s11151_s2 + $0x68] sm:$0xff]  ;;  %v1830_v1 = vld [vmem:[%s11151_s2 + $0x60] sm:$0xff] }
  0xd2   :  { %2843 = vmatpush1.msra.mxu1 %v2070_v27  ;;  %2612 = vmatpush1.msra.mxu0 %v1872_v50  ;;  %v1825_v27 = vld [vmem:[%s11151_s2 + $0x38] sm:$0xff]  ;;  %v1824_v50 = vld [vmem:[%s11151_s2 + $0x30] sm:$0xff] }
  0xd3   :  { %5648 = vmatprep.mubr.msk.f32.mxu0 %vm327_vm1, %v6851_v38  ;;  %5678 = vmatprep.mubr.msk.f32.mxu1 %vm327_vm1, %v6851_v38  ;;  %v1861_v38 = vld [vmem:[%s11151_s2 + $0x158] sm:$0xff] }
  0xd4   :  { %2844 = vmatprep.subr.mxu1 %v2065_v59  ;;  %1004 = vmatmul.mubr.f32.gmra.mxu0 %v6859_v40  ;;  %v2017_v59 = vld [vmem:[%s11151_s2 + $0x638] sm:$0xff] }
  0xd5   :  { %1237 = vmatmul.mubr.f32.gmra.mxu1 %v6859_v40  ;;  %2613 = vmatprep.subr.mxu0 %v1867_v31  ;;  %v2058_v40 = vld [vmem:[%s11151_s2 + $0x780] sm:$0xff] }
  0xd6   :  { %2845 = vmatpush1.msra.mxu1 %v2064_v33  ;;  %2614 = vmatpush1.msra.mxu0 %v1866_v5  ;;  %v1818_v31 = vld [vmem:[%s11151_s2] sm:$0xff]  ;;  %v2011_v33 = vld [vmem:[%s11151_s2 + $0x608] sm:$0xff]  ;;  %v2004_v5 = vld [vmem:[%s11151_s2 + $0x5d0] sm:$0xff] }
  0xd7   :  { %5649 = vmatprep.mubr.msk.f32.mxu0 %vm327_vm1, %v6878_v44  ;;  %5679 = vmatprep.mubr.msk.f32.mxu1 %vm327_vm1, %v6878_v44  ;;  %v2052_v44 = vld [vmem:[%s11151_s2 + $0x750] sm:$0xff] }
  0xd8   :  { %2846 = vmatprep.subr.mxu1 %v2059_v7  ;;  %1010 = vmatmul.mubr.f32.gmra.mxu0 %v6887_v46  ;;  %v2197_v7 = vld [vmem:[%s11151_s2 + $0xbd8] sm:$0xff] }
  0xd9   :  { %1243 = vmatmul.mubr.f32.gmra.mxu1 %v6887_v46  ;;  %2615 = vmatprep.subr.mxu0 %v1861_v38  ;;  %v1854_v46 = vld [vmem:[%s11151_s2 + $0x120] sm:$0xff]  ;;  %v1999_v38 = vld [vmem:[%s11151_s2 + $0x5a8] sm:$0xff] }
  0xda   :  { %2847 = vmatpush1.msra.mxu1 %v2058_v40  ;;  %2616 = vmatpush1.msra.mxu0 %v1860_v8  ;;  %v2191_v40 = vld [vmem:[%s11151_s2 + $0xba8] sm:$0xff]  ;;  %v1993_v8 = vld [vmem:[%s11151_s2 + $0x578] sm:$0xff] }
  0xdb   :  { %2848 = vmatprep.subr.mxu1 %v2053_v9  ;;  %5650 = vmatprep.mubr.msk.f32.mxu0 %vm327_vm1, %v6909_v51  ;;  %v2190_v9 = vld [vmem:[%s11151_s2 + $0xba0] sm:$0xff] }
  0xdc   :  { %5680 = vmatprep.mubr.msk.f32.mxu1 %vm327_vm1, %v6909_v51  ;;  %2849 = vmatpush1.msra.mxu1 %v2052_v44  ;;  %v1848_v51 = vld [vmem:[%s11151_s2 + $0xf0] sm:$0xff] }
  0xdd   :  { %1016 = vmatmul.mubr.f32.gmra.mxu0 %v6918_v53  ;;  %1249 = vmatmul.mubr.f32.gmra.mxu1 %v6918_v53  ;;  %v2041_v53 = vld [vmem:[%s11151_s2 + $0x6f8] sm:$0xff]  ;;  %v2184_v44 = vld [vmem:[%s11151_s2 + $0xb70] sm:$0xff] }
  0xde   :  { %2617 = vmatprep.subr.mxu0 %v1855_v11  ;;  %2850 = vmatprep.subr.mxu1 %v2047_v14  ;;  %v1987_v11 = vld [vmem:[%s11151_s2 + $0x548] sm:$0xff]  ;;  %v1981_v14 = vld [vmem:[%s11151_s2 + $0x518] sm:$0xff] }
  0xdf   :  { %2618 = vmatpush1.msra.mxu0 %v1854_v46  ;;  %5651 = vmatprep.mubr.msk.f32.mxu0 %vm327_vm1, %v6936_v57  ;;  %v2178_v46 = vld [vmem:[%s11151_s2 + $0xb40] sm:$0xff] }
  0xe0   :  { %5681 = vmatprep.mubr.msk.f32.mxu1 %vm327_vm1, %v6936_v57  ;;  %2619 = vmatprep.subr.mxu0 %v1849_v13  ;;  %v1842_v57 = vld [vmem:[%s11151_s2 + $0xc0] sm:$0xff] }
  0xe1   :  { %2851 = vmatpush1.msra.mxu1 %v2046_v28  ;;  %1022 = vmatmul.mubr.f32.gmra.mxu0 %v6949_v60 }
  0xe2   :  { %1255 = vmatmul.mubr.f32.gmra.mxu1 %v6949_v60  ;;  %2620 = vmatpush1.msra.mxu0 %v1848_v51  ;;  %v2035_v60 = vld [vmem:[%s11151_s2 + $0x6c8] sm:$0xff] }
  0xe3   :  { %2852 = vmatprep.subr.mxu1 %v2041_v53  ;;  %5652 = vmatprep.mubr.msk.f32.mxu0 %vm327_vm1, %v6964_v0 }
  0xe4   :  { %2853 = vmatpush1.msra.mxu1 %v2040_v17  ;;  %5682 = vmatprep.mubr.msk.f32.mxu1 %vm327_vm1, %v6964_v0  ;;  %v1836_v0 = vld [vmem:[%s11151_s2 + $0x90] sm:$0xff]  ;;  %v1975_v17 = vld [vmem:[%s11151_s2 + $0x4e8] sm:$0xff] }
  0xe5   :  { %2621 = vmatprep.subr.mxu0 %v1843_v41  ;;  %1028 = vmatmul.mubr.f32.gmra.mxu0 %v6977_v4  ;;  %v2172_v41 = vld [vmem:[%s11151_s2 + $0xb10] sm:$0xff] }
  0xe6   :  { %1261 = vmatmul.mubr.f32.gmra.mxu1 %v6977_v4  ;;  %2622 = vmatpush1.msra.mxu0 %v1842_v57  ;;  %v2028_v4 = vld [vmem:[%s11151_s2 + $0x690] sm:$0xff] }
  0xe7   :  { %2854 = vmatprep.subr.mxu1 %v2035_v60  ;;  %2623 = vmatprep.subr.mxu0 %v1837_v63  ;;  %v1974_v63 = vld [vmem:[%s11151_s2 + $0x4e0] sm:$0xff] }
  0xe8   :  { %2855 = vmatpush1.msra.mxu1 %v2034_v20  ;;  %5653 = vmatprep.mubr.msk.f32.mxu0 %vm327_vm1, %v6999_v12 }
  0xe9   :  { %5683 = vmatprep.mubr.msk.f32.mxu1 %vm327_vm1, %v6999_v12  ;;  %2624 = vmatpush1.msra.mxu0 %v1836_v0  ;;  %v2023_v12 = vld [vmem:[%s11151_s2 + $0x668] sm:$0xff]  ;;  %v1969_v0 = vld [vmem:[%s11151_s2 + $0x4b8] sm:$0xff] }
  0xea   :  { %1034 = vmatmul.mubr.f32.gmra.mxu0 %v7008_v15  ;;  %1267 = vmatmul.mubr.f32.gmra.mxu1 %v7008_v15  ;;  %v2022_v15 = vld [vmem:[%s11151_s2 + $0x660] sm:$0xff] }
  0xeb   :  { %2856 = vmatprep.subr.mxu1 %v2029_v43  ;;  %2625 = vmatprep.subr.mxu0 %v1831_v25  ;;  %v2166_v43 = vld [vmem:[%s11151_s2 + $0xae0] sm:$0xff]  ;;  %v1968_v25 = vld [vmem:[%s11151_s2 + $0x4b0] sm:$0xff] }
  0xec   :  { %2857 = vmatpush1.msra.mxu1 %v2028_v4  ;;  %5654 = vmatprep.mubr.msk.f32.mxu0 %vm327_vm1, %v7026_v21 }
  0xed   :  { %5684 = vmatprep.mubr.msk.f32.mxu1 %vm327_vm1, %v7026_v21  ;;  %2626 = vmatpush1.msra.mxu0 %v1830_v1  ;;  %v1819_v21 = vld [vmem:[%s11151_s2 + $0x8] sm:$0xff] }
  0xee   :  { %1040 = vmatmul.mubr.f32.gmra.mxu0 %v7036_v23  ;;  %1273 = vmatmul.mubr.f32.gmra.mxu1 %v7036_v23  ;;  %v2016_v23 = vld [vmem:[%s11151_s2 + $0x630] sm:$0xff] }
  0xef   :  { %2858 = vmatprep.subr.mxu1 %v2023_v12  ;;  %2627 = vmatprep.subr.mxu0 %v1825_v27 }
  0xf0   :  { %2859 = vmatpush1.msra.mxu1 %v2022_v15  ;;  %2628 = vmatpush1.msra.mxu0 %v1824_v50  ;;  %v2160_v15 = vld [vmem:[%s11151_s2 + $0xab0] sm:$0xff]  ;;  %v1962_v50 = vld [vmem:[%s11151_s2 + $0x480] sm:$0xff] }
  0xf1   :  { %5655 = vmatprep.mubr.msk.f32.mxu0 %vm327_vm1, %v7059_v30  ;;  %5685 = vmatprep.mubr.msk.f32.mxu1 %vm327_vm1, %v7059_v30  ;;  %v2005_v30 = vld [vmem:[%s11151_s2 + $0x5d8] sm:$0xff] }
  0xf2   :  { %2860 = vmatprep.subr.mxu1 %v2017_v59  ;;  %1046 = vmatmul.mubr.f32.gmra.mxu0 %v7067_v34 }
  0xf3   :  { %1279 = vmatmul.mubr.f32.gmra.mxu1 %v7067_v34  ;;  %2629 = vmatprep.subr.mxu0 %v1819_v21  ;;  %v2010_v34 = vld [vmem:[%s11151_s2 + $0x600] sm:$0xff] }
  0xf4   :  { %2861 = vmatpush1.msra.mxu1 %v2016_v23  ;;  %2630 = vmatpush1.msra.mxu0 %v1818_v31  ;;  %v1957_v31 = vld [vmem:[%s11151_s2 + $0x458] sm:$0xff] }
  0xf5   :  { %5656 = vmatprep.mubr.msk.f32.mxu0 %vm327_vm1, %v7086_v39  ;;  %5686 = vmatprep.mubr.msk.f32.mxu1 %vm327_vm1, %v7086_v39  ;;  %v2196_v39 = vld [vmem:[%s11151_s2 + $0xbd0] sm:$0xff] }
  0xf6   :  { %2862 = vmatprep.subr.mxu1 %v2011_v33  ;;  %1052 = vmatmul.mubr.f32.gmra.mxu0 %v7095_v42 }
  0xf7   :  { %1285 = vmatmul.mubr.f32.gmra.mxu1 %v7095_v42  ;;  %2631 = vmatprep.subr.mxu0 %v2005_v30  ;;  %v1998_v42 = vld [vmem:[%s11151_s2 + $0x5a0] sm:$0xff]  ;;  %v1956_v30 = vld [vmem:[%s11151_s2 + $0x450] sm:$0xff] }
  0xf8   :  { %2863 = vmatpush1.msra.mxu1 %v2010_v34  ;;  %2632 = vmatpush2.msra.mxu0 %v2004_v5  ;;  %v2149_v34 = vld [vmem:[%s11151_s2 + $0xa58] sm:$0xff] }
  0xf9   :  { %2864 = vmatprep.subr.mxu1 %v2197_v7  ;;  %5657 = vmatprep.mubr.msk.f32.mxu0 %vm327_vm1, %v7117_v49  ;;  %v2148_v7 = vld [vmem:[%s11151_s2 + $0xa50] sm:$0xff] }
  0xfa   :  { %5687 = vmatprep.mubr.msk.f32.mxu1 %vm327_vm1, %v7117_v49  ;;  %2865 = vmatpush2.msra.mxu1 %v2196_v39  ;;  %v1992_v49 = vld [vmem:[%s11151_s2 + $0x570] sm:$0xff] }
  0xfb   :  { %1058 = vmatmul.mubr.f32.gmra.mxu0 %v7128_v52  ;;  %1291 = vmatmul.mubr.f32.gmra.mxu1 %v7128_v52  ;;  %v2185_v52 = vld [vmem:[%s11151_s2 + $0xb78] sm:$0xff] }
  0xfc   :  { %2633 = vmatprep.subr.mxu0 %v1999_v38  ;;  %2866 = vmatprep.subr.mxu1 %v2191_v40  ;;  %v2143_v40 = vld [vmem:[%s11151_s2 + $0xa28] sm:$0xff] }
  0xfd   :  { %2634 = vmatpush2.msra.mxu0 %v1998_v42  ;;  %5658 = vmatprep.mubr.msk.f32.mxu0 %vm327_vm1, %v7148_v58  ;;  %v1950_v42 = vld [vmem:[%s11151_s2 + $0x420] sm:$0xff] }
  0xfe   :  { %5688 = vmatprep.mubr.msk.f32.mxu1 %vm327_vm1, %v7148_v58  ;;  %2635 = vmatprep.subr.mxu0 %v1993_v8  ;;  %v1986_v58 = vld [vmem:[%s11151_s2 + $0x540] sm:$0xff] }
  0xff   :  { %2867 = vmatpush2.msra.mxu1 %v2190_v9  ;;  %1064 = vmatmul.mubr.f32.gmra.mxu0 %v7161_v62 }
 0x100   :  { %1297 = vmatmul.mubr.f32.gmra.mxu1 %v7161_v62  ;;  %2636 = vmatpush2.msra.mxu0 %v1992_v49  ;;  %v2179_v62 = vld [vmem:[%s11151_s2 + $0xb48] sm:$0xff]  ;;  %v1945_v49 = vld [vmem:[%s11151_s2 + $0x3f8] sm:$0xff] }
 0x101   :  { %2868 = vmatprep.subr.mxu1 %v2185_v52  ;;  %5659 = vmatprep.mubr.msk.f32.mxu0 %vm327_vm1, %v7176_v6 }
 0x102   :  { %2869 = vmatpush2.msra.mxu1 %v2184_v44  ;;  %5689 = vmatprep.mubr.msk.f32.mxu1 %vm327_vm1, %v7176_v6  ;;  %v1980_v6 = vld [vmem:[%s11151_s2 + $0x510] sm:$0xff] }
 0x103   :  { %2637 = vmatprep.subr.mxu0 %v1987_v11  ;;  %1070 = vmatmul.mubr.f32.gmra.mxu0 %v7189_v10  ;;  %v7860_v13 = vpop.f32.mrf.mxu0  ;;  %v7862_v28 = vpop.f32.mrf.mxu1  ;;  %v2137_v11 = vld [vmem:[%s11151_s2 + $0x9f8] sm:$0xff] }
 0x104   :  { %1303 = vmatmul.mubr.f32.gmra.mxu1 %v7189_v10  ;;  %2638 = vmatpush2.msra.mxu0 %v1986_v58  ;;  %1369 = vst [vmem:[#allocation2] sm:$0xff] %v7860_v13  ;;  %1371 = vst [vmem:[#allocation2 + $0x10] sm:$0xff] %v7862_v28  ;;  %v2173_v10 = vld [vmem:[%s11151_s2 + $0xb18] sm:$0xff] }
 0x105   :  { %2870 = vmatprep.subr.mxu1 %v2179_v62  ;;  %2639 = vmatprep.subr.mxu0 %v1981_v14  ;;  %v7870_v51 = vpop.f32.mrf.mxu0  ;;  %v7872_v53 = vpop.f32.mrf.mxu1  ;;  %v2136_v62 = vld [vmem:[%s11151_s2 + $0x9f0] sm:$0xff] }
 0x106   :  { %2871 = vmatpush2.msra.mxu1 %v2178_v46  ;;  %5660 = vmatprep.mubr.msk.f32.mxu0 %vm327_vm1, %v7211_v22  ;;  %1370 = vst [vmem:[#allocation2 + $0x8] sm:$0xff] %v7870_v51  ;;  %1372 = vst [vmem:[#allocation2 + $0x18] sm:$0xff] %v7872_v53 }
 0x107   :  { %5690 = vmatprep.mubr.msk.f32.mxu1 %vm327_vm1, %v7211_v22  ;;  %2640 = vmatpush2.msra.mxu0 %v1980_v6  ;;  %v7889_v57 = vpop.f32.mrf.mxu0  ;;  %v7891_v60 = vpop.f32.mrf.mxu1  ;;  %v1938_v6 = vld [vmem:[%s11151_s2 + $0x3c0] sm:$0xff] }
 0x108   :  { %1076 = vmatmul.mubr.f32.gmra.mxu0 %v7220_v26  ;;  %1309 = vmatmul.mubr.f32.gmra.mxu1 %v7220_v26  ;;  %1378 = vst [vmem:[#allocation2 + $0x40] sm:$0xff] %v7889_v57  ;;  %1380 = vst [vmem:[#allocation2 + $0x50] sm:$0xff] %v7891_v60  ;;  %v2167_v26 = vld [vmem:[%s11151_s2 + $0xae8] sm:$0xff] }
 0x109   :  { %2872 = vmatprep.subr.mxu1 %v2173_v10  ;;  %2641 = vmatprep.subr.mxu0 %v1975_v17  ;;  %v7900_v22 = vpop.f32.mrf.mxu0  ;;  %v7902_v20 = vpop.f32.mrf.mxu1  ;;  %v2131_v10 = vld [vmem:[%s11151_s2 + $0x9c8] sm:$0xff]  ;;  %v1933_v17 = vld [vmem:[%s11151_s2 + $0x398] sm:$0xff] }
 0x10a   :  { %2873 = vmatpush2.msra.mxu1 %v2172_v41  ;;  %5661 = vmatprep.mubr.msk.f32.mxu0 %vm327_vm1, %v7238_v35  ;;  %1379 = vst [vmem:[#allocation2 + $0x48] sm:$0xff] %v7900_v22  ;;  %1381 = vst [vmem:[#allocation2 + $0x58] sm:$0xff] %v7902_v20 }
 0x10b   :  { %5691 = vmatprep.mubr.msk.f32.mxu1 %vm327_vm1, %v7238_v35  ;;  %2642 = vmatpush2.msra.mxu0 %v1974_v63  ;;  %v7922_v4 = vpop.f32.mrf.mxu0  ;;  %v2161_v35 = vld [vmem:[%s11151_s2 + $0xab8] sm:$0xff]  ;;  %v2130_v63 = vld [vmem:[%s11151_s2 + $0x9c0] sm:$0xff] }
 0x10c   :  { %1082 = vmatmul.mubr.f32.gmra.mxu0 %v7248_v37  ;;  %1315 = vmatmul.mubr.f32.gmra.mxu1 %v7248_v37  ;;  %1386 = vst [vmem:[#allocation2 + $0x80] sm:$0xff] %v7922_v4  ;;  %v7927_v1 = vpop.f32.mrf.mxu1  ;;  %v1963_v37 = vld [vmem:[%s11151_s2 + $0x488] sm:$0xff] }
 0x10d   :  { %2874 = vmatprep.subr.mxu1 %v2167_v26  ;;  %2643 = vmatprep.subr.mxu0 %v1969_v0  ;;  %1388 = vst [vmem:[#allocation2 + $0x90] sm:$0xff] %v7927_v1  ;;  %v7933_v12 = vpop.f32.mrf.mxu0  ;;  %v1932_v26 = vld [vmem:[%s11151_s2 + $0x390] sm:$0xff] }
 0x10e   :  { %2875 = vmatpush2.msra.mxu1 %v2166_v43  ;;  %2644 = vmatpush2.msra.mxu0 %v1968_v25  ;;  %1387 = vst [vmem:[#allocation2 + $0x88] sm:$0xff] %v7933_v12  ;;  %v7939_v27 = vpop.f32.mrf.mxu1  ;;  %v1927_v25 = vld [vmem:[%s11151_s2 + $0x368] sm:$0xff] }
 0x10f   :  { %5662 = vmatprep.mubr.msk.f32.mxu0 %vm327_vm1, %v7271_v48  ;;  %5692 = vmatprep.mubr.msk.f32.mxu1 %vm327_vm1, %v7271_v48  ;;  %1389 = vst [vmem:[#allocation2 + $0x98] sm:$0xff] %v7939_v27  ;;  %v7952_v59 = vpop.f32.mrf.mxu0  ;;  %v2155_v48 = vld [vmem:[%s11151_s2 + $0xa88] sm:$0xff] }
 0x110   :  { %2876 = vmatprep.subr.mxu1 %v2161_v35  ;;  %1088 = vmatmul.mubr.f32.gmra.mxu0 %v7279_v54  ;;  %1394 = vst [vmem:[#allocation2 + $0xc0] sm:$0xff] %v7952_v59  ;;  %v7956_v21 = vpop.f32.mrf.mxu1  ;;  %v2124_v35 = vld [vmem:[%s11151_s2 + $0x990] sm:$0xff] }
 0x111   :  { %1321 = vmatmul.mubr.f32.gmra.mxu1 %v7279_v54  ;;  %2645 = vmatprep.subr.mxu0 %v1963_v37  ;;  %1396 = vst [vmem:[#allocation2 + $0xd0] sm:$0xff] %v7956_v21  ;;  %v7963_v23 = vpop.f32.mrf.mxu0  ;;  %v2154_v54 = vld [vmem:[%s11151_s2 + $0xa80] sm:$0xff] }
 0x112   :  { %2877 = vmatpush2.msra.mxu1 %v2160_v15  ;;  %2646 = vmatpush2.msra.mxu0 %v1962_v50  ;;  %1395 = vst [vmem:[#allocation2 + $0xc8] sm:$0xff] %v7963_v23  ;;  %v7969_v33 = vpop.f32.mrf.mxu1  ;;  %v1926_v50 = vld [vmem:[%s11151_s2 + $0x360] sm:$0xff] }
 0x113   :  { %5663 = vmatprep.mubr.msk.f32.mxu0 %vm327_vm1, %v7298_v61  ;;  %5693 = vmatprep.mubr.msk.f32.mxu1 %vm327_vm1, %v7298_v61  ;;  %1397 = vst [vmem:[#allocation2 + $0xd8] sm:$0xff] %v7969_v33 }
 0x114   :  { %2878 = vmatprep.subr.mxu1 %v2155_v48  ;;  %1094 = vmatmul.mubr.f32.gmra.mxu0 %v7307_v3  ;;  %v7986_v5 = vpop.f32.mrf.mxu0  ;;  %v7988_v61 = vpop.f32.mrf.mxu1 }
 0x115   :  { %1327 = vmatmul.mubr.f32.gmra.mxu1 %v7307_v3  ;;  %2647 = vmatprep.subr.mxu0 %v1957_v31  ;;  %1402 = vst [vmem:[#allocation2 + $0x100] sm:$0xff] %v7986_v5  ;;  %1404 = vst [vmem:[#allocation2 + $0x110] sm:$0xff] %v7988_v61  ;;  %v1951_v3 = vld [vmem:[%s11151_s2 + $0x428] sm:$0xff]  ;;  %v1921_v31 = vld [vmem:[%s11151_s2 + $0x338] sm:$0xff] }
 0x116   :  { %2879 = vmatpush2.msra.mxu1 %v2154_v54  ;;  %2648 = vmatpush2.msra.mxu0 %v1956_v30  ;;  %v7996_v39 = vpop.f32.mrf.mxu0  ;;  %v7998_v38 = vpop.f32.mrf.mxu1  ;;  %v2118_v54 = vld [vmem:[%s11151_s2 + $0x960] sm:$0xff]  ;;  %v1920_v30 = vld [vmem:[%s11151_s2 + $0x330] sm:$0xff] }
 0x117   :  { %2880 = vmatprep.subr.mxu1 %v2149_v34  ;;  %5664 = vmatprep.mubr.msk.f32.mxu0 %vm327_vm1, %v7329_v18  ;;  %1403 = vst [vmem:[#allocation2 + $0x108] sm:$0xff] %v7996_v39  ;;  %1405 = vst [vmem:[#allocation2 + $0x118] sm:$0xff] %v7998_v38 }
 0x118   :  { %5694 = vmatprep.mubr.msk.f32.mxu1 %vm327_vm1, %v7329_v18  ;;  %2881 = vmatpush2.msra.mxu1 %v2148_v7  ;;  %v8015_v8 = vpop.f32.mrf.mxu0  ;;  %v8017_v9 = vpop.f32.mrf.mxu1  ;;  %v2142_v18 = vld [vmem:[%s11151_s2 + $0xa20] sm:$0xff] }
 0x119   :  { %1100 = vmatmul.mubr.f32.gmra.mxu0 %v7338_v24  ;;  %1333 = vmatmul.mubr.f32.gmra.mxu1 %v7338_v24  ;;  %1410 = vst [vmem:[#allocation2 + $0x140] sm:$0xff] %v8015_v8  ;;  %1412 = vst [vmem:[#allocation2 + $0x150] sm:$0xff] %v8017_v9  ;;  %v1944_v24 = vld [vmem:[%s11151_s2 + $0x3f0] sm:$0xff] }
 0x11a   :  { %2649 = vmatprep.subr.mxu0 %v1951_v3  ;;  %2882 = vmatprep.subr.mxu1 %v2143_v40  ;;  %v8029_v52 = vpop.f32.mrf.mxu0  ;;  %v8031_v44 = vpop.f32.mrf.mxu1 }
 0x11b   :  { %2650 = vmatpush2.msra.mxu0 %v1950_v42  ;;  %5665 = vmatprep.mubr.msk.f32.mxu0 %vm327_vm1, %v7356_v36  ;;  %1411 = vst [vmem:[#allocation2 + $0x148] sm:$0xff] %v8029_v52  ;;  %1413 = vst [vmem:[#allocation2 + $0x158] sm:$0xff] %v8031_v44  ;;  %v2112_v42 = vld [vmem:[%s11151_s2 + $0x930] sm:$0xff] }
 0x11c   :  { %5695 = vmatprep.mubr.msk.f32.mxu1 %vm327_vm1, %v7356_v36  ;;  %2651 = vmatprep.subr.mxu0 %v1945_v49  ;;  %v8045_v58 = vpop.f32.mrf.mxu0  ;;  %v1939_v36 = vld [vmem:[%s11151_s2 + $0x3c8] sm:$0xff] }
 0x11d   :  { %2883 = vmatpush2.msra.mxu1 %v2142_v18  ;;  %1106 = vmatmul.mubr.f32.gmra.mxu0 %v7369_v45  ;;  %1418 = vst [vmem:[#allocation2 + $0x180] sm:$0xff] %v8045_v58  ;;  %v8052_v14 = vpop.f32.mrf.mxu1  ;;  %v1914_v18 = vld [vmem:[%s11151_s2 + $0x300] sm:$0xff] }
 0x11e   :  { %1339 = vmatmul.mubr.f32.gmra.mxu1 %v7369_v45  ;;  %2652 = vmatpush2.msra.mxu0 %v1944_v24  ;;  %1420 = vst [vmem:[#allocation2 + $0x190] sm:$0xff] %v8052_v14  ;;  %v8059_v46 = vpop.f32.mrf.mxu0 }
 0x11f   :  { %2884 = vmatprep.subr.mxu1 %v2137_v11  ;;  %5666 = vmatprep.mubr.msk.f32.mxu0 %vm327_vm1, %v7384_v55  ;;  %1419 = vst [vmem:[#allocation2 + $0x188] sm:$0xff] %v8059_v46  ;;  %v8067_v45 = vpop.f32.mrf.mxu1 }
 0x120   :  { %2885 = vmatpush2.msra.mxu1 %v2136_v62  ;;  %5696 = vmatprep.mubr.msk.f32.mxu1 %vm327_vm1, %v7384_v55  ;;  %1421 = vst [vmem:[#allocation2 + $0x198] sm:$0xff] %v8067_v45  ;;  %v8078_v41 = vpop.f32.mrf.mxu0  ;;  %v2106_v62 = vld [vmem:[%s11151_s2 + $0x900] sm:$0xff] }
 0x121   :  { %2653 = vmatprep.subr.mxu0 %v1939_v36  ;;  %1112 = vmatmul.mubr.f32.gmra.mxu0 %v7397_v2  ;;  %1426 = vst [vmem:[#allocation2 + $0x1c0] sm:$0xff] %v8078_v41  ;;  %v8085_v55 = vpop.f32.mrf.mxu1 }
 0x122   :  { %1345 = vmatmul.mubr.f32.gmra.mxu1 %v7397_v2  ;;  %2654 = vmatpush2.msra.mxu0 %v1938_v6  ;;  %1428 = vst [vmem:[#allocation2 + $0x1d0] sm:$0xff] %v8085_v55  ;;  %v8092_v0 = vpop.f32.mrf.mxu0  ;;  %v2125_v2 = vld [vmem:[%s11151_s2 + $0x998] sm:$0xff] }
 0x123   :  { %2886 = vmatprep.subr.mxu1 %v2131_v10  ;;  %2655 = vmatprep.subr.mxu0 %v1933_v17  ;;  %1427 = vst [vmem:[#allocation2 + $0x1c8] sm:$0xff] %v8092_v0  ;;  %v8095_v43 = vpop.f32.mrf.mxu1  ;;  %v2287_v17 = vld [vmem:[%s11151_s2 + $0xea8] sm:$0xff] }
 0x124   :  { %2887 = vmatpush2.msra.mxu1 %v2130_v63  ;;  %5667 = vmatprep.mubr.msk.f32.mxu0 %vm327_vm1, %v7419_v19  ;;  %1429 = vst [vmem:[#allocation2 + $0x1d8] sm:$0xff] %v8095_v43 }
 0x125   :  { %5697 = vmatprep.mubr.msk.f32.mxu1 %vm327_vm1, %v7419_v19  ;;  %2656 = vmatpush2.msra.mxu0 %v1932_v26  ;;  %v8111_v37 = vpop.f32.mrf.mxu0  ;;  %v8113_v15 = vpop.f32.mrf.mxu1 }
 0x126   :  { %1118 = vmatmul.mubr.f32.gmra.mxu0 %v7428_v29  ;;  %1351 = vmatmul.mubr.f32.gmra.mxu1 %v7428_v29  ;;  %1434 = vst [vmem:[#allocation2 + $0x200] sm:$0xff] %v8111_v37  ;;  %1436 = vst [vmem:[#allocation2 + $0x210] sm:$0xff] %v8113_v15  ;;  %v2119_v29 = vld [vmem:[%s11151_s2 + $0x968] sm:$0xff] }
 0x127   :  { %2888 = vmatprep.subr.mxu1 %v2125_v2  ;;  %2657 = vmatprep.subr.mxu0 %v1927_v25  ;;  %v8122_v19 = vpop.f32.mrf.mxu0  ;;  %v8124_v48 = vpop.f32.mrf.mxu1 }
 0x128   :  { %2889 = vmatpush2.msra.mxu1 %v2124_v35  ;;  %5668 = vmatprep.mubr.msk.f32.mxu0 %vm327_vm1, %v7446_v47  ;;  %1435 = vst [vmem:[#allocation2 + $0x208] sm:$0xff] %v8122_v19  ;;  %1437 = vst [vmem:[#allocation2 + $0x218] sm:$0xff] %v8124_v48 }
 0x129   :  { %5698 = vmatprep.mubr.msk.f32.mxu1 %vm327_vm1, %v7446_v47  ;;  %2658 = vmatpush2.msra.mxu0 %v1926_v50  ;;  %v8144_v34 = vpop.f32.mrf.mxu0  ;;  %v2113_v47 = vld [vmem:[%s11151_s2 + $0x938] sm:$0xff]  ;;  %v2479_v50 = vld [vmem:[%s11151_s2 + $0x14a8] sm:$0xff] }
 0x12a   :  { %1124 = vmatmul.mubr.f32.gmra.mxu0 %v7456_v56  ;;  %1357 = vmatmul.mubr.f32.gmra.mxu1 %v7456_v56  ;;  %1442 = vst [vmem:[#allocation2 + $0x240] sm:$0xff] %v8144_v34  ;;  %v8149_v7 = vpop.f32.mrf.mxu1  ;;  %v1915_v56 = vld [vmem:[%s11151_s2 + $0x308] sm:$0xff] }
 0x12b   :  { %2890 = vmatprep.subr.mxu1 %v2119_v29  ;;  %2659 = vmatprep.subr.mxu0 %v1921_v31  ;;  %1444 = vst [vmem:[#allocation2 + $0x250] sm:$0xff] %v8149_v7  ;;  %v8155_v3 = vpop.f32.mrf.mxu0 }
 0x12c   :  { %2891 = vmatpush2.msra.mxu1 %v2118_v54  ;;  %2660 = vmatpush2.msra.mxu0 %v1920_v30  ;;  %1443 = vst [vmem:[#allocation2 + $0x248] sm:$0xff] %v8155_v3  ;;  %v8161_v40 = vpop.f32.mrf.mxu1 }
 0x12d   :  { %5669 = vmatprep.mubr.msk.f32.mxu0 %vm327_vm1, %v7479_v16  ;;  %5699 = vmatprep.mubr.msk.f32.mxu1 %vm327_vm1, %v7479_v16  ;;  %1445 = vst [vmem:[#allocation2 + $0x258] sm:$0xff] %v8161_v40  ;;  %v8171_v49 = vpop.f32.mrf.mxu0  ;;  %v2107_v16 = vld [vmem:[%s11151_s2 + $0x908] sm:$0xff] }
 0x12e   :  { %2892 = vmatprep.subr.mxu1 %v2113_v47  ;;  %1130 = vmatmul.mubr.f32.gmra.mxu0 %v7487_v32  ;;  %1450 = vst [vmem:[#allocation2 + $0x280] sm:$0xff] %v8171_v49  ;;  %v8178_v24 = vpop.f32.mrf.mxu1 }
 0x12f   :  { %1363 = vmatmul.mubr.f32.gmra.mxu1 %v7487_v32  ;;  %2661 = vmatprep.subr.mxu0 %v1915_v56  ;;  %1452 = vst [vmem:[#allocation2 + $0x290] sm:$0xff] %v8178_v24  ;;  %v8185_v11 = vpop.f32.mrf.mxu0  ;;  %v2293_v32 = vld [vmem:[%s11151_s2 + $0xed8] sm:$0xff] }
 0x130   :  { %2893 = vmatpush2.msra.mxu1 %v2112_v42  ;;  %2663 = vmatprep.mubr.f32.mxu0 %v7870_v51  ;;  %1451 = vst [vmem:[#allocation2 + $0x288] sm:$0xff] %v8185_v11  ;;  %v8195_v36 = vpop.f32.mrf.mxu1  ;;  %v2292_v51 = vld [vmem:[%s11151_s2 + $0xed0] sm:$0xff] }
 0x131   :  { %2896 = vmatprep.mubr.f32.mxu1 %v7872_v53  ;;  %2662 = vmatpush2.msra.mxu0 %v1914_v18  ;;  %1453 = vst [vmem:[#allocation2 + $0x298] sm:$0xff] %v8195_v36  ;;  %v2485_v53 = vld [vmem:[%s11151_s2 + $0x14d8] sm:$0xff] }
 0x132   :  { %2894 = vmatprep.subr.mxu1 %v2107_v16  ;;  %2664 = vmatmul.mubr.f32.vlgmr.msra.gmra.mxu0 %v7860_v13  ;;  %v8203_v6 = vpop.f32.mrf.mxu0  ;;  %v8205_v10 = vpop.f32.mrf.mxu1  ;;  %v2484_v13 = vld [vmem:[%s11151_s2 + $0x14d0] sm:$0xff] }
 0x133   :  { %2895 = vmatpush2.msra.mxu1 %v2106_v62  ;;  %3065 = vmatprep.subr.mxu0 %v2293_v32  ;;  %1458 = vst [vmem:[#allocation2 + $0x2c0] sm:$0xff] %v8203_v6  ;;  %1460 = vst [vmem:[#allocation2 + $0x2d0] sm:$0xff] %v8205_v10 }
 0x134   :  { %2897 = vmatmul.mubr.f32.vlgmr.msra.gmra.mxu1 %v7862_v28  ;;  %2669 = vmatprep.mubr.f32.mxu0 %v7900_v22  ;;  %v8220_v63 = vpop.f32.mrf.mxu0  ;;  %v8222_v26 = vpop.f32.mrf.mxu1  ;;  %v2286_v28 = vld [vmem:[%s11151_s2 + $0xea0] sm:$0xff] }
 0x135   :  { %2902 = vmatprep.mubr.f32.mxu1 %v7902_v20  ;;  %3066 = vmatpush1.msra.mxu0 %v2292_v51  ;;  %1459 = vst [vmem:[#allocation2 + $0x2c8] sm:$0xff] %v8220_v63  ;;  %1461 = vst [vmem:[#allocation2 + $0x2d8] sm:$0xff] %v8222_v26  ;;  %v2281_v20 = vld [vmem:[%s11151_s2 + $0xe78] sm:$0xff] }
 0x136   :  { %3298 = vmatprep.subr.mxu1 %v2485_v53  ;;  %2670 = vmatmul.mubr.f32.gmra.mxu0 %v7889_v57  ;;  %v8231_v22 = vpop.f32.mrf.mxu0  ;;  %v8233_v2 = vpop.f32.mrf.mxu1  ;;  %v2280_v57 = vld [vmem:[%s11151_s2 + $0xe70] sm:$0xff] }
 0x137   :  { %3299 = vmatpush1.msra.mxu1 %v2484_v13  ;;  %3067 = vmatprep.subr.mxu0 %v2287_v17  ;;  %1466 = vst [vmem:[#allocation2 + $0x300] sm:$0xff] %v8231_v22  ;;  %1468 = vst [vmem:[#allocation2 + $0x310] sm:$0xff] %v8233_v2 }
 0x138   :  { %2903 = vmatmul.mubr.f32.gmra.mxu1 %v7891_v60  ;;  %2675 = vmatprep.mubr.f32.mxu0 %v7933_v12  ;;  %v8245_v25 = vpop.f32.mrf.mxu0  ;;  %v8247_v35 = vpop.f32.mrf.mxu1  ;;  %v2478_v60 = vld [vmem:[%s11151_s2 + $0x14a0] sm:$0xff] }
 0x139   :  { %2908 = vmatprep.mubr.f32.mxu1 %v7939_v27  ;;  %3068 = vmatpush1.msra.mxu0 %v2286_v28  ;;  %1467 = vst [vmem:[#allocation2 + $0x308] sm:$0xff] %v8245_v25  ;;  %1469 = vst [vmem:[#allocation2 + $0x318] sm:$0xff] %v8247_v35  ;;  %v2275_v27 = vld [vmem:[%s11151_s2 + $0xe48] sm:$0xff] }
 0x13a   :  { %3069 = vmatprep.subr.mxu0 %v2281_v20  ;;  %2676 = vmatmul.mubr.f32.gmra.mxu0 %v7922_v4  ;;  %v8259_v12 = vpop.f32.mrf.mxu0  ;;  %v2274_v4 = vld [vmem:[%s11151_s2 + $0xe40] sm:$0xff] }
 0x13b   :  { %3070 = vmatpush1.msra.mxu0 %v2280_v57  ;;  %2681 = vmatprep.mubr.f32.mxu0 %v7963_v23  ;;  %1474 = vst [vmem:[#allocation2 + $0x340] sm:$0xff] %v8259_v12  ;;  %v8266_v29 = vpop.f32.mrf.mxu1  ;;  %v2269_v23 = vld [vmem:[%s11151_s2 + $0xe18] sm:$0xff] }
 0x13c   :  { %2909 = vmatmul.mubr.f32.gmra.mxu1 %v7927_v1  ;;  %3300 = vmatprep.subr.mxu1 %v2479_v50  ;;  %1476 = vst [vmem:[#allocation2 + $0x350] sm:$0xff] %v8266_v29  ;;  %v8273_v31 = vpop.f32.mrf.mxu0  ;;  %v2268_v1 = vld [vmem:[%s11151_s2 + $0xe10] sm:$0xff] }
 0x13d   :  { %2914 = vmatprep.mubr.f32.mxu1 %v7969_v33  ;;  %3301 = vmatpush1.msra.mxu1 %v2478_v60  ;;  %1475 = vst [vmem:[#allocation2 + $0x348] sm:$0xff] %v8273_v31  ;;  %v8280_v54 = vpop.f32.mrf.mxu1  ;;  %v2473_v33 = vld [vmem:[%s11151_s2 + $0x1478] sm:$0xff] }
 0x13e   :  { %3071 = vmatprep.subr.mxu0 %v2275_v27  ;;  %2682 = vmatmul.mubr.f32.gmra.mxu0 %v7952_v59  ;;  %1477 = vst [vmem:[#allocation2 + $0x358] sm:$0xff] %v8280_v54  ;;  %v8287_v30 = vpop.f32.mrf.mxu0  ;;  %v2472_v59 = vld [vmem:[%s11151_s2 + $0x1470] sm:$0xff] }
 0x13f   :  { %3072 = vmatpush1.msra.mxu0 %v2274_v4  ;;  %2687 = vmatprep.mubr.f32.mxu0 %v7996_v39  ;;  %1482 = vst [vmem:[#allocation2 + $0x380] sm:$0xff] %v8287_v30  ;;  %v8294_v47 = vpop.f32.mrf.mxu1  ;;  %v2263_v39 = vld [vmem:[%s11151_s2 + $0xde8] sm:$0xff] }
 0x140   :  { %2915 = vmatmul.mubr.f32.gmra.mxu1 %v7956_v21  ;;  %3073 = vmatprep.subr.mxu0 %v2269_v23  ;;  %1484 = vst [vmem:[#allocation2 + $0x390] sm:$0xff] %v8294_v47  ;;  %v8301_v56 = vpop.f32.mrf.mxu0  ;;  %v2262_v21 = vld [vmem:[%s11151_s2 + $0xde0] sm:$0xff] }
 0x141   :  { %2920 = vmatprep.mubr.f32.mxu1 %v7998_v38  ;;  %3074 = vmatpush1.msra.mxu0 %v2268_v1  ;;  %1483 = vst [vmem:[#allocation2 + $0x388] sm:$0xff] %v8301_v56  ;;  %v8308_v42 = vpop.f32.mrf.mxu1  ;;  %v2257_v38 = vld [vmem:[%s11151_s2 + $0xdb8] sm:$0xff] }
 0x142   :  { %2688 = vmatmul.mubr.f32.gmra.mxu0 %v7986_v5  ;;  %3302 = vmatprep.subr.mxu1 %v2473_v33  ;;  %1485 = vst [vmem:[#allocation2 + $0x398] sm:$0xff] %v8308_v42  ;;  %v2256_v5 = vld [vmem:[%s11151_s2 + $0xdb0] sm:$0xff] }
 0x143   :  { %2693 = vmatprep.mubr.f32.mxu0 %v8029_v52  ;;  %3303 = vmatpush1.msra.mxu1 %v2472_v59  ;;  %v8319_v18 = vpop.f32.mrf.mxu0  ;;  %v8321_v16 = vpop.f32.mrf.mxu1  ;;  %v2467_v52 = vld [vmem:[%s11151_s2 + $0x1448] sm:$0xff] }
 0x144   :  { %2921 = vmatmul.mubr.f32.gmra.mxu1 %v7988_v61  ;;  %3075 = vmatprep.subr.mxu0 %v2263_v39  ;;  %1490 = vst [vmem:[#allocation2 + $0x3c0] sm:$0xff] %v8319_v18  ;;  %1492 = vst [vmem:[#allocation2 + $0x3d0] sm:$0xff] %v8321_v16  ;;  %v2466_v61 = vld [vmem:[%s11151_s2 + $0x1440] sm:$0xff] }
 0x145   :  { %2926 = vmatprep.mubr.f32.mxu1 %v8031_v44  ;;  %3076 = vmatpush1.msra.mxu0 %v2262_v21  ;;  %v8333_v62 = vpop.f32.mrf.mxu0  ;;  %v8335_v32 = vpop.f32.mrf.mxu1  ;;  %v2251_v44 = vld [vmem:[%s11151_s2 + $0xd88] sm:$0xff] }
 0x146   :  { %2694 = vmatmul.mubr.f32.gmra.mxu0 %v8015_v8  ;;  %3077 = vmatprep.subr.mxu0 %v2257_v38  ;;  %1491 = vst [vmem:[#allocation2 + $0x3c8] sm:$0xff] %v8333_v62  ;;  %1493 = vst [vmem:[#allocation2 + $0x3d8] sm:$0xff] %v8335_v32  ;;  %v2250_v8 = vld [vmem:[%s11151_s2 + $0xd80] sm:$0xff] }
 0x147   :  { %2699 = vmatprep.mubr.f32.mxu0 %v8059_v46  ;;  %3078 = vmatpush1.msra.mxu0 %v2256_v5  ;;  %v8347_v51 = vpop.f32.mrf.mxu0  ;;  %v2245_v46 = vld [vmem:[%s11151_s2 + $0xd58] sm:$0xff] }
 0x148   :  { %2927 = vmatmul.mubr.f32.gmra.mxu1 %v8017_v9  ;;  %3304 = vmatprep.subr.mxu1 %v2467_v52  ;;  %1498 = vst [vmem:[#allocation2 + $0x400] sm:$0xff] %v8347_v51  ;;  %v8354_v53 = vpop.f32.mrf.mxu1  ;;  %v2244_v9 = vld [vmem:[%s11151_s2 + $0xd50] sm:$0xff] }
 0x149   :  { %2932 = vmatprep.mubr.f32.mxu1 %v8067_v45  ;;  %3305 = vmatpush1.msra.mxu1 %v2466_v61  ;;  %1500 = vst [vmem:[#allocation2 + $0x410] sm:$0xff] %v8354_v53  ;;  %v8361_v13 = vpop.f32.mrf.mxu0  ;;  %v2461_v45 = vld [vmem:[%s11151_s2 + $0x1418] sm:$0xff] }
 0x14a   :  { %2700 = vmatmul.mubr.f32.gmra.mxu0 %v8045_v58  ;;  %3079 = vmatprep.subr.mxu0 %v2251_v44  ;;  %1499 = vst [vmem:[#allocation2 + $0x408] sm:$0xff] %v8361_v13  ;;  %v8368_v17 = vpop.f32.mrf.mxu1  ;;  %v2460_v58 = vld [vmem:[%s11151_s2 + $0x1410] sm:$0xff] }
 0x14b   :  { %2705 = vmatprep.mubr.f32.mxu0 %v8092_v0  ;;  %3080 = vmatpush1.msra.mxu0 %v2250_v8  ;;  %1501 = vst [vmem:[#allocation2 + $0x418] sm:$0xff] %v8368_v17  ;;  %v8375_v28 = vpop.f32.mrf.mxu0  ;;  %v2239_v0 = vld [vmem:[%s11151_s2 + $0xd28] sm:$0xff] }
 0x14c   :  { %2933 = vmatmul.mubr.f32.gmra.mxu1 %v8052_v14  ;;  %3081 = vmatprep.subr.mxu0 %v2245_v46  ;;  %1506 = vst [vmem:[#allocation2 + $0x440] sm:$0xff] %v8375_v28  ;;  %v8382_v20 = vpop.f32.mrf.mxu1  ;;  %v2238_v14 = vld [vmem:[%s11151_s2 + $0xd20] sm:$0xff] }
 0x14d   :  { %2938 = vmatprep.mubr.f32.mxu1 %v8095_v43  ;;  %3082 = vmatpush1.msra.mxu0 %v2244_v9  ;;  %1508 = vst [vmem:[#allocation2 + $0x450] sm:$0xff] %v8382_v20  ;;  %v8389_v57 = vpop.f32.mrf.mxu0  ;;  %v2233_v43 = vld [vmem:[%s11151_s2 + $0xcf8] sm:$0xff] }
 0x14e   :  { %2706 = vmatmul.mubr.f32.gmra.mxu0 %v8078_v41  ;;  %3306 = vmatprep.subr.mxu1 %v2461_v45  ;;  %1507 = vst [vmem:[#allocation2 + $0x448] sm:$0xff] %v8389_v57  ;;  %v8396_v50 = vpop.f32.mrf.mxu1  ;;  %v2455_v41 = vld [vmem:[%s11151_s2 + $0x13e8] sm:$0xff] }
 0x14f   :  { %2711 = vmatprep.mubr.f32.mxu0 %v8122_v19  ;;  %3307 = vmatpush1.msra.mxu1 %v2460_v58  ;;  %1509 = vst [vmem:[#allocation2 + $0x458] sm:$0xff] %v8396_v50  ;;  %v2232_v19 = vld [vmem:[%s11151_s2 + $0xcf0] sm:$0xff] }
 0x150   :  { %2939 = vmatmul.mubr.f32.gmra.mxu1 %v8085_v55  ;;  %3083 = vmatprep.subr.mxu0 %v2239_v0  ;;  %v8407_v60 = vpop.f32.mrf.mxu0  ;;  %v8409_v27 = vpop.f32.mrf.mxu1  ;;  %v2454_v55 = vld [vmem:[%s11151_s2 + $0x13e0] sm:$0xff] }
 0x151   :  { %2944 = vmatprep.mubr.f32.mxu1 %v8124_v48  ;;  %3084 = vmatpush1.msra.mxu0 %v2238_v14  ;;  %1514 = vst [vmem:[#allocation2 + $0x480] sm:$0xff] %v8407_v60  ;;  %1516 = vst [vmem:[#allocation2 + $0x490] sm:$0xff] %v8409_v27  ;;  %v2227_v48 = vld [vmem:[%s11151_s2 + $0xcc8] sm:$0xff] }
 0x152   :  { %2712 = vmatmul.mubr.f32.gmra.mxu0 %v8111_v37  ;;  %3085 = vmatprep.subr.mxu0 %v2233_v43  ;;  %v8421_v4 = vpop.f32.mrf.mxu0  ;;  %v8423_v23 = vpop.f32.mrf.mxu1  ;;  %v2226_v37 = vld [vmem:[%s11151_s2 + $0xcc0] sm:$0xff]  ;;  %v2383_v14 = vld [vmem:[%s11151_s2 + $0x11a8] sm:$0xff] }
 0x153   :  { %2717 = vmatprep.mubr.f32.mxu0 %v8155_v3  ;;  %3308 = vmatprep.subr.mxu1 %v2455_v41  ;;  %1515 = vst [vmem:[#allocation2 + $0x488] sm:$0xff] %v8421_v4  ;;  %1517 = vst [vmem:[#allocation2 + $0x498] sm:$0xff] %v8423_v23  ;;  %v2221_v3 = vld [vmem:[%s11151_s2 + $0xc98] sm:$0xff]  ;;  %v2382_v43 = vld [vmem:[%s11151_s2 + $0x11a0] sm:$0xff] }
 0x154   :  { %2945 = vmatmul.mubr.f32.gmra.mxu1 %v8113_v15  ;;  %3086 = vmatpush1.msra.mxu0 %v2232_v19  ;;  %v8435_v1 = vpop.f32.mrf.mxu0  ;;  %v8437_v33 = vpop.f32.mrf.mxu1  ;;  %v2449_v15 = vld [vmem:[%s11151_s2 + $0x13b8] sm:$0xff] }
 0x155   :  { %2950 = vmatprep.mubr.f32.mxu1 %v8161_v40  ;;  %3309 = vmatpush1.msra.mxu1 %v2454_v55  ;;  %1522 = vst [vmem:[#allocation2 + $0x4c0] sm:$0xff] %v8435_v1  ;;  %1524 = vst [vmem:[#allocation2 + $0x4d0] sm:$0xff] %v8437_v33  ;;  %v2448_v40 = vld [vmem:[%s11151_s2 + $0x13b0] sm:$0xff]  ;;  %v2430_v55 = vld [vmem:[%s11151_s2 + $0x1320] sm:$0xff] }
 0x156   :  { %2718 = vmatmul.mubr.f32.gmra.mxu0 %v8144_v34  ;;  %3087 = vmatprep.subr.mxu0 %v2227_v48  ;;  %v8449_v59 = vpop.f32.mrf.mxu0  ;;  %v8451_v39 = vpop.f32.mrf.mxu1  ;;  %v2220_v34 = vld [vmem:[%s11151_s2 + $0xc90] sm:$0xff] }
 0x157   :  { %2723 = vmatprep.mubr.f32.mxu0 %v8185_v11  ;;  %3088 = vmatpush1.msra.mxu0 %v2226_v37  ;;  %1523 = vst [vmem:[#allocation2 + $0x4c8] sm:$0xff] %v8449_v59  ;;  %1525 = vst [vmem:[#allocation2 + $0x4d8] sm:$0xff] %v8451_v39  ;;  %v2215_v11 = vld [vmem:[%s11151_s2 + $0xc68] sm:$0xff] }
 0x158   :  { %2951 = vmatmul.mubr.f32.gmra.mxu1 %v8149_v7  ;;  %3089 = vmatprep.subr.mxu0 %v2221_v3  ;;  %v8463_v21 = vpop.f32.mrf.mxu0  ;;  %v2214_v7 = vld [vmem:[%s11151_s2 + $0xc60] sm:$0xff]  ;;  %v2425_v3 = vld [vmem:[%s11151_s2 + $0x12f8] sm:$0xff] }
 0x159   :  { %2956 = vmatprep.mubr.f32.mxu1 %v8195_v36  ;;  %3310 = vmatprep.subr.mxu1 %v2449_v15  ;;  %1530 = vst [vmem:[#allocation2 + $0x500] sm:$0xff] %v8463_v21  ;;  %v8470_v38 = vpop.f32.mrf.mxu1  ;;  %v2209_v36 = vld [vmem:[%s11151_s2 + $0xc38] sm:$0xff] }
 0x15a   :  { %2724 = vmatmul.mubr.f32.gmra.mxu0 %v8171_v49  ;;  %3311 = vmatpush1.msra.mxu1 %v2448_v40  ;;  %1532 = vst [vmem:[#allocation2 + $0x510] sm:$0xff] %v8470_v38  ;;  %v8477_v5 = vpop.f32.mrf.mxu0  ;;  %v2443_v49 = vld [vmem:[%s11151_s2 + $0x1388] sm:$0xff]  ;;  %v2424_v40 = vld [vmem:[%s11151_s2 + $0x12f0] sm:$0xff] }
 0x15b   :  { %2729 = vmatprep.mubr.f32.mxu0 %v8220_v63  ;;  %3090 = vmatpush1.msra.mxu0 %v2220_v34  ;;  %1531 = vst [vmem:[#allocation2 + $0x508] sm:$0xff] %v8477_v5  ;;  %v8484_v52 = vpop.f32.mrf.mxu1  ;;  %v2208_v63 = vld [vmem:[%s11151_s2 + $0xc30] sm:$0xff] }
 0x15c   :  { %2957 = vmatmul.mubr.f32.gmra.mxu1 %v8178_v24  ;;  %3091 = vmatprep.subr.mxu0 %v2215_v11  ;;  %1533 = vst [vmem:[#allocation2 + $0x518] sm:$0xff] %v8484_v52  ;;  %v8491_v61 = vpop.f32.mrf.mxu0  ;;  %v2442_v24 = vld [vmem:[%s11151_s2 + $0x1380] sm:$0xff] }
 0x15d   :  { %2962 = vmatprep.mubr.f32.mxu1 %v8222_v26  ;;  %3092 = vmatpush1.msra.mxu0 %v2214_v7  ;;  %1538 = vst [vmem:[#allocation2 + $0x540] sm:$0xff] %v8491_v61  ;;  %v8498_v44 = vpop.f32.mrf.mxu1  ;;  %v2203_v26 = vld [vmem:[%s11151_s2 + $0xc08] sm:$0xff] }
 0x15e   :  { %2730 = vmatmul.mubr.f32.gmra.mxu0 %v8203_v6  ;;  %3093 = vmatprep.subr.mxu0 %v2209_v36  ;;  %1540 = vst [vmem:[#allocation2 + $0x550] sm:$0xff] %v8498_v44  ;;  %v8505_v8 = vpop.f32.mrf.mxu0  ;;  %v2202_v6 = vld [vmem:[%s11151_s2 + $0xc00] sm:$0xff] }
 0x15f   :  { %2735 = vmatprep.mubr.f32.mxu0 %v8245_v25  ;;  %3312 = vmatprep.subr.mxu1 %v2443_v49  ;;  %1539 = vst [vmem:[#allocation2 + $0x548] sm:$0xff] %v8505_v8  ;;  %v8512_v46 = vpop.f32.mrf.mxu1  ;;  %v2437_v25 = vld [vmem:[%s11151_s2 + $0x1358] sm:$0xff] }
 0x160   :  { %2963 = vmatmul.mubr.f32.gmra.mxu1 %v8205_v10  ;;  %3094 = vmatpush1.msra.mxu0 %v2208_v63  ;;  %1541 = vst [vmem:[#allocation2 + $0x558] sm:$0xff] %v8512_v46  ;;  %v2389_v10 = vld [vmem:[%s11151_s2 + $0x11d8] sm:$0xff] }
 0x161   :  { %2968 = vmatprep.mubr.f32.mxu1 %v8247_v35  ;;  %3313 = vmatpush1.msra.mxu1 %v2442_v24  ;;  %v8523_v9 = vpop.f32.mrf.mxu0  ;;  %v8525_v45 = vpop.f32.mrf.mxu1  ;;  %v2436_v35 = vld [vmem:[%s11151_s2 + $0x1350] sm:$0xff] }
 0x162   :  { %2736 = vmatmul.mubr.f32.gmra.mxu0 %v8231_v22  ;;  %3095 = vmatprep.subr.mxu0 %v2203_v26  ;;  %1546 = vst [vmem:[#allocation2 + $0x580] sm:$0xff] %v8523_v9  ;;  %1548 = vst [vmem:[#allocation2 + $0x590] sm:$0xff] %v8525_v45  ;;  %v2388_v22 = vld [vmem:[%s11151_s2 + $0x11d0] sm:$0xff]  ;;  %v2347_v26 = vld [vmem:[%s11151_s2 + $0x1088] sm:$0xff] }
 0x163   :  { %2741 = vmatprep.mubr.f32.mxu0 %v8273_v31  ;;  %3096 = vmatpush1.msra.mxu0 %v2202_v6  ;;  %v8537_v58 = vpop.f32.mrf.mxu0  ;;  %v8539_v0 = vpop.f32.mrf.mxu1  ;;  %v2352_v24 = vld [vmem:[%s11151_s2 + $0x10b0] sm:$0xff] }
 0x164   :  { %2969 = vmatmul.mubr.f32.gmra.mxu1 %v8233_v2  ;;  %3314 = vmatprep.subr.mxu1 %v2437_v25  ;;  %1547 = vst [vmem:[#allocation2 + $0x588] sm:$0xff] %v8537_v58  ;;  %1549 = vst [vmem:[#allocation2 + $0x598] sm:$0xff] %v8539_v0  ;;  %v2412_v25 = vld [vmem:[%s11151_s2 + $0x1290] sm:$0xff] }
 0x165   :  { %2974 = vmatprep.mubr.f32.mxu1 %v8280_v54  ;;  %3097 = vmatprep.subr.mxu0 %v2389_v10  ;;  %v8548_v31 = vpop.f32.mrf.mxu0 }
 0x166   :  { %2742 = vmatmul.mubr.f32.gmra.mxu0 %v8259_v12  ;;  %3315 = vmatpush1.msra.mxu1 %v2436_v35  ;;  %1554 = vst [vmem:[#allocation2 + $0x5c0] sm:$0xff] %v8548_v31  ;;  %v8555_v2 = vpop.f32.mrf.mxu1  ;;  %v2431_v12 = vld [vmem:[%s11151_s2 + $0x1328] sm:$0xff]  ;;  %v2341_v35 = vld [vmem:[%s11151_s2 + $0x1058] sm:$0xff] }
 0x167   :  { %2747 = vmatprep.mubr.f32.mxu0 %v8301_v56  ;;  %3098 = vmatpush2.msra.mxu0 %v2388_v22  ;;  %1556 = vst [vmem:[#allocation2 + $0x5d0] sm:$0xff] %v8555_v2  ;;  %v8562_v54 = vpop.f32.mrf.mxu0  ;;  %v2377_v56 = vld [vmem:[%s11151_s2 + $0x1178] sm:$0xff] }
 0x168   :  { %2975 = vmatmul.mubr.f32.gmra.mxu1 %v8266_v29  ;;  %3099 = vmatprep.subr.mxu0 %v2383_v14  ;;  %1555 = vst [vmem:[#allocation2 + $0x5c8] sm:$0xff] %v8562_v54  ;;  %v8569_v41 = vpop.f32.mrf.mxu1  ;;  %v2376_v29 = vld [vmem:[%s11151_s2 + $0x1170] sm:$0xff]  ;;  %v2335_v14 = vld [vmem:[%s11151_s2 + $0x1028] sm:$0xff] }
 0x169   :  { %2980 = vmatprep.mubr.f32.mxu1 %v8308_v42  ;;  %3100 = vmatpush2.msra.mxu0 %v2382_v43  ;;  %1557 = vst [vmem:[#allocation2 + $0x5d8] sm:$0xff] %v8569_v41  ;;  %v8576_v19 = vpop.f32.mrf.mxu0 }
 0x16a   :  { %2748 = vmatmul.mubr.f32.gmra.mxu0 %v8287_v30  ;;  %3316 = vmatprep.subr.mxu1 %v2431_v12  ;;  %1562 = vst [vmem:[#allocation2 + $0x600] sm:$0xff] %v8576_v19  ;;  %v8586_v48 = vpop.f32.mrf.mxu1  ;;  %v2371_v30 = vld [vmem:[%s11151_s2 + $0x1148] sm:$0xff] }
 0x16b   :  { %2753 = vmatprep.mubr.f32.mxu0 %v8333_v62  ;;  %3101 = vmatprep.subr.mxu0 %v2377_v56  ;;  %1564 = vst [vmem:[#allocation2 + $0x610] sm:$0xff] %v8586_v48  ;;  %v8590_v42 = vpop.f32.mrf.mxu0  ;;  %v2370_v62 = vld [vmem:[%s11151_s2 + $0x1140] sm:$0xff] }
 0x16c   :  { %2981 = vmatmul.mubr.f32.gmra.mxu1 %v8294_v47  ;;  %3102 = vmatpush2.msra.mxu0 %v2376_v29  ;;  %1563 = vst [vmem:[#allocation2 + $0x608] sm:$0xff] %v8590_v42  ;;  %v8597_v37 = vpop.f32.mrf.mxu1  ;;  %v2329_v29 = vld [vmem:[%s11151_s2 + $0xff8] sm:$0xff] }
 0x16d   :  { %2986 = vmatprep.mubr.f32.mxu1 %v8335_v32  ;;  %3317 = vmatpush1.msra.mxu1 %v2430_v55  ;;  %1565 = vst [vmem:[#allocation2 + $0x618] sm:$0xff] %v8597_v37  ;;  %v2323_v55 = vld [vmem:[%s11151_s2 + $0xfc8] sm:$0xff] }
 0x16e   :  { %2754 = vmatmul.mubr.f32.gmra.mxu0 %v8319_v18  ;;  %3103 = vmatprep.subr.mxu0 %v2371_v30  ;;  %v8608_v47 = vpop.f32.mrf.mxu0  ;;  %v8610_v15 = vpop.f32.mrf.mxu1  ;;  %v2365_v18 = vld [vmem:[%s11151_s2 + $0x1118] sm:$0xff] }
 0x16f   :  { %2759 = vmatprep.mubr.f32.mxu0 %v8361_v13  ;;  %1570 = vst [vmem:[#allocation2 + $0x640] sm:$0xff] %v8608_v47  ;;  %1572 = vst [vmem:[#allocation2 + $0x650] sm:$0xff] %v8610_v15  ;;  %3104 = vmatpush2.msra.mxu0 %v2370_v62  ;;  %v2364_v13 = vld [vmem:[%s11151_s2 + $0x1110] sm:$0xff]  ;;  %v2401_v30 = vld [vmem:[%s11151_s2 + $0x1238] sm:$0xff] }
 0x170   :  { %2987 = vmatmul.mubr.f32.gmra.mxu1 %v8321_v16  ;;  %3318 = vmatprep.subr.mxu1 %v2425_v3  ;;  %v8622_v32 = vpop.f32.mrf.mxu0  ;;  %v8624_v34 = vpop.f32.mrf.mxu1  ;;  %v2359_v16 = vld [vmem:[%s11151_s2 + $0x10e8] sm:$0xff]  ;;  %v2400_v3 = vld [vmem:[%s11151_s2 + $0x1230] sm:$0xff] }
 0x171   :  { %2992 = vmatprep.mubr.f32.mxu1 %v8368_v17  ;;  %3319 = vmatpush1.msra.mxu1 %v2424_v40  ;;  %1571 = vst [vmem:[#allocation2 + $0x648] sm:$0xff] %v8622_v32  ;;  %1573 = vst [vmem:[#allocation2 + $0x658] sm:$0xff] %v8624_v34  ;;  %v2358_v17 = vld [vmem:[%s11151_s2 + $0x10e0] sm:$0xff]  ;;  %v2317_v40 = vld [vmem:[%s11151_s2 + $0xf98] sm:$0xff] }
 0x172   :  { %2760 = vmatmul.mubr.f32.gmra.mxu0 %v8347_v51  ;;  %3105 = vmatprep.subr.mxu0 %v2365_v18  ;;  %v8636_v11 = vpop.f32.mrf.mxu0  ;;  %v8638_v7 = vpop.f32.mrf.mxu1  ;;  %v2419_v51 = vld [vmem:[%s11151_s2 + $0x12c8] sm:$0xff] }
 0x173   :  { %2765 = vmatprep.mubr.f32.mxu0 %v8389_v57  ;;  %3106 = vmatpush2.msra.mxu0 %v2364_v13  ;;  %1578 = vst [vmem:[#allocation2 + $0x680] sm:$0xff] %v8636_v11  ;;  %1580 = vst [vmem:[#allocation2 + $0x690] sm:$0xff] %v8638_v7  ;;  %v2418_v57 = vld [vmem:[%s11151_s2 + $0x12c0] sm:$0xff] }
 0x174   :  { %2993 = vmatmul.mubr.f32.gmra.mxu1 %v8354_v53  ;;  %v8650_v36 = vpop.f32.mrf.mxu0  ;;  %v8652_v49 = vpop.f32.mrf.mxu1  ;;  %3107 = vmatprep.subr.mxu0 %v2359_v16  ;;  %v2353_v53 = vld [vmem:[%s11151_s2 + $0x10b8] sm:$0xff]  ;;  %v2311_v16 = vld [vmem:[%s11151_s2 + $0xf68] sm:$0xff] }
 0x175   :  { %2998 = vmatprep.mubr.f32.mxu1 %v8396_v50  ;;  %1579 = vst [vmem:[#allocation2 + $0x688] sm:$0xff] %v8650_v36  ;;  %1581 = vst [vmem:[#allocation2 + $0x698] sm:$0xff] %v8652_v49  ;;  %3108 = vmatpush2.msra.mxu0 %v2358_v17 }
 0x176   :  { %2766 = vmatmul.mubr.f32.gmra.mxu0 %v8375_v28  ;;  %3320 = vmatprep.subr.mxu1 %v2419_v51  ;;  %v8664_v63 = vpop.f32.mrf.mxu0  ;;  %v2310_v51 = vld [vmem:[%s11151_s2 + $0xf60] sm:$0xff] }
 0x177   :  { %2771 = vmatprep.mubr.f32.mxu0 %v8421_v4  ;;  %1586 = vst [vmem:[#allocation2 + $0x6c0] sm:$0xff] %v8664_v63  ;;  %v8671_v50 = vpop.f32.mrf.mxu1  ;;  %3321 = vmatpush1.msra.mxu1 %v2418_v57  ;;  %v2346_v4 = vld [vmem:[%s11151_s2 + $0x1080] sm:$0xff] }
 0x178   :  { %2999 = vmatmul.mubr.f32.gmra.mxu1 %v8382_v20  ;;  %1588 = vst [vmem:[#allocation2 + $0x6d0] sm:$0xff] %v8671_v50  ;;  %3109 = vmatprep.subr.mxu0 %v2353_v53  ;;  %v8678_v28 = vpop.f32.mrf.mxu0  ;;  %v2413_v20 = vld [vmem:[%s11151_s2 + $0x1298] sm:$0xff]  ;;  %v2304_v53 = vld [vmem:[%s11151_s2 + $0xf30] sm:$0xff] }
 0x179   :  { %3004 = vmatprep.mubr.f32.mxu1 %v8423_v23  ;;  %1587 = vst [vmem:[#allocation2 + $0x6c8] sm:$0xff] %v8678_v28  ;;  %v8685_v6 = vpop.f32.mrf.mxu1  ;;  %3110 = vmatpush2.msra.mxu0 %v2352_v24 }
 0x17a   :  { %2772 = vmatmul.mubr.f32.gmra.mxu0 %v8407_v60  ;;  %1589 = vst [vmem:[#allocation2 + $0x6d8] sm:$0xff] %v8685_v6  ;;  %3111 = vmatprep.subr.mxu0 %v2347_v26  ;;  %v2340_v60 = vld [vmem:[%s11151_s2 + $0x1050] sm:$0xff] }
 0x17b   :  { %2777 = vmatprep.mubr.f32.mxu0 %v8449_v59  ;;  %v8696_v23 = vpop.f32.mrf.mxu0  ;;  %v8698_v10 = vpop.f32.mrf.mxu1  ;;  %3112 = vmatpush2.msra.mxu0 %v2346_v4 }
 0x17c   :  { %3005 = vmatmul.mubr.f32.gmra.mxu1 %v8409_v27  ;;  %1373 = vst [vmem:[#allocation2 + $0x20] sm:$0xff] %v8696_v23  ;;  %1375 = vst [vmem:[#allocation2 + $0x30] sm:$0xff] %v8698_v10  ;;  %3322 = vmatprep.subr.mxu1 %v2413_v20  ;;  %v2407_v27 = vld [vmem:[%s11151_s2 + $0x1268] sm:$0xff] }
 0x17d   :  { %3010 = vmatprep.mubr.f32.mxu1 %v8451_v39  ;;  %v8710_v59 = vpop.f32.mrf.mxu0  ;;  %v1204_v22 = vpop.f32.mrf.mxu1  ;;  %3323 = vmatpush1.msra.mxu1 %v2412_v25  ;;  %v2103_v25 = vld [vmem:[%s11151_s2 + $0x8e8] sm:$0xff] }
 0x17e   :  { %2778 = vmatmul.mubr.f32.gmra.mxu0 %v8435_v1  ;;  %1374 = vst [vmem:[#allocation2 + $0x28] sm:$0xff] %v8710_v59  ;;  %1377 = vst.msk [vmem:[#allocation2 + $0x38] sm:$0xff] %vm1376_vm2, %v1204_v22  ;;  %3113 = vmatprep.subr.mxu0 %v2341_v35  ;;  %v2406_v1 = vld [vmem:[%s11151_s2 + $0x1260] sm:$0xff] }
 0x17f   :  { %2783 = vmatprep.mubr.f32.mxu0 %v8477_v5  ;;  %v8722_v39 = vpop.f32.mrf.mxu0  ;;  %v8724_v43 = vpop.f32.mrf.mxu1  ;;  %3114 = vmatpush2.msra.mxu0 %v2340_v60  ;;  %v2334_v5 = vld [vmem:[%s11151_s2 + $0x1020] sm:$0xff] }
 0x180   :  { %3011 = vmatmul.mubr.f32.gmra.mxu1 %v8437_v33  ;;  %1382 = vst [vmem:[#allocation2 + $0x60] sm:$0xff] %v8722_v39  ;;  %1384 = vst [vmem:[#allocation2 + $0x70] sm:$0xff] %v8724_v43  ;;  %3115 = vmatprep.subr.mxu0 %v2335_v14  ;;  %v2328_v33 = vld [vmem:[%s11151_s2 + $0xff0] sm:$0xff] }
 0x181   :  { %3016 = vmatprep.mubr.f32.mxu1 %v8484_v52  ;;  %v8736_v12 = vpop.f32.mrf.mxu0  ;;  %v1210_v56 = vpop.f32.mrf.mxu1  ;;  %3324 = vmatprep.subr.mxu1 %v2407_v27  ;;  %v2097_v27 = vld [vmem:[%s11151_s2 + $0x8b8] sm:$0xff] }
 0x182   :  { %2784 = vmatmul.mubr.f32.gmra.mxu0 %v8463_v21  ;;  %1383 = vst [vmem:[#allocation2 + $0x68] sm:$0xff] %v8736_v12  ;;  %1385 = vst.msk [vmem:[#allocation2 + $0x78] sm:$0xff] %vm1376_vm2, %v1210_v56  ;;  %3325 = vmatpush1.msra.mxu1 %v2406_v1  ;;  %v1904_v1 = vld [vmem:[%s11151_s2 + $0x2b0] sm:$0xff] }
 0x183   :  { %2789 = vmatprep.mubr.f32.mxu0 %v8505_v8  ;;  %v8748_v52 = vpop.f32.mrf.mxu0  ;;  %3116 = vmatpush2.msra.mxu0 %v2334_v5 }
 0x184   :  { %3017 = vmatmul.mubr.f32.gmra.mxu1 %v8470_v38  ;;  %1390 = vst [vmem:[#allocation2 + $0xa0] sm:$0xff] %v8748_v52  ;;  %v8755_v21 = vpop.f32.mrf.mxu1  ;;  %3117 = vmatprep.subr.mxu0 %v2329_v29  ;;  %v2322_v38 = vld [vmem:[%s11151_s2 + $0xfc0] sm:$0xff] }
 0x185   :  { %3022 = vmatprep.mubr.f32.mxu1 %v8512_v46  ;;  %1392 = vst [vmem:[#allocation2 + $0xb0] sm:$0xff] %v8755_v21  ;;  %v8762_v8 = vpop.f32.mrf.mxu0  ;;  %3118 = vmatpush2.msra.mxu0 %v2328_v33  ;;  %v2091_v33 = vld [vmem:[%s11151_s2 + $0x888] sm:$0xff] }
 0x186   :  { %2790 = vmatmul.mubr.f32.gmra.mxu0 %v8491_v61  ;;  %1391 = vst [vmem:[#allocation2 + $0xa8] sm:$0xff] %v8762_v8  ;;  %v1216_v62 = vpop.f32.mrf.mxu1  ;;  %3119 = vmatprep.subr.mxu0 %v2323_v55 }
 0x187   :  { %2795 = vmatprep.mubr.f32.mxu0 %v8537_v58  ;;  %1393 = vst.msk [vmem:[#allocation2 + $0xb8] sm:$0xff] %vm1376_vm2, %v1216_v62  ;;  %v8774_v46 = vpop.f32.mrf.mxu0  ;;  %3326 = vmatprep.subr.mxu1 %v2401_v30  ;;  %v2316_v58 = vld [vmem:[%s11151_s2 + $0xf90] sm:$0xff]  ;;  %v1898_v30 = vld [vmem:[%s11151_s2 + $0x280] sm:$0xff] }
 0x188   :  { %3023 = vmatmul.mubr.f32.gmra.mxu1 %v8498_v44  ;;  %1398 = vst [vmem:[#allocation2 + $0xe0] sm:$0xff] %v8774_v46  ;;  %v8781_v61 = vpop.f32.mrf.mxu1  ;;  %3120 = vmatpush2.msra.mxu0 %v2322_v38  ;;  %v2395_v44 = vld [vmem:[%s11151_s2 + $0x1208] sm:$0xff]  ;;  %v1893_v38 = vld [vmem:[%s11151_s2 + $0x258] sm:$0xff] }
 0x189   :  { %3028 = vmatprep.mubr.f32.mxu1 %v8539_v0  ;;  %1400 = vst [vmem:[#allocation2 + $0xf0] sm:$0xff] %v8781_v61  ;;  %v8788_v18 = vpop.f32.mrf.mxu0  ;;  %3327 = vmatpush1.msra.mxu1 %v2400_v3  ;;  %v2394_v0 = vld [vmem:[%s11151_s2 + $0x1200] sm:$0xff] }
 0x18a   :  { %2796 = vmatmul.mubr.f32.gmra.mxu0 %v8523_v9  ;;  %1399 = vst [vmem:[#allocation2 + $0xe8] sm:$0xff] %v8788_v18  ;;  %v1222_v13 = vpop.f32.mrf.mxu1  ;;  %3121 = vmatprep.subr.mxu0 %v2317_v40 }
 0x18b   :  { %2801 = vmatprep.mubr.f32.mxu0 %v8562_v54  ;;  %1401 = vst.msk [vmem:[#allocation2 + $0xf8] sm:$0xff] %vm1376_vm2, %v1222_v13  ;;  %3122 = vmatpush2.msra.mxu0 %v2316_v58  ;;  %v1892_v58 = vld [vmem:[%s11151_s2 + $0x250] sm:$0xff] }
 0x18c   :  { %3029 = vmatmul.mubr.f32.gmra.mxu1 %v8525_v45  ;;  %v8804_v9 = vpop.f32.mrf.mxu0  ;;  %v8806_v17 = vpop.f32.mrf.mxu1  ;;  %3328 = vmatprep.subr.mxu1 %v2395_v44  ;;  %v2305_v45 = vld [vmem:[%s11151_s2 + $0xf38] sm:$0xff] }
 0x18d   :  { %3034 = vmatprep.mubr.f32.mxu1 %v8569_v41  ;;  %1406 = vst [vmem:[#allocation2 + $0x120] sm:$0xff] %v8804_v9  ;;  %1408 = vst [vmem:[#allocation2 + $0x130] sm:$0xff] %v8806_v17  ;;  %3123 = vmatprep.subr.mxu0 %v2311_v16  ;;  %v2491_v41 = vld [vmem:[%s11151_s2 + $0x1508] sm:$0xf] }
 0x18e   :  { %2802 = vmatmul.mubr.f32.gmra.mxu0 %v8548_v31  ;;  %v8818_v54 = vpop.f32.mrf.mxu0  ;;  %v1228_v57 = vpop.f32.mrf.mxu1  ;;  %3329 = vmatpush1.msra.mxu1 %v2394_v0 }
 0x18f   :  { %2807 = vmatprep.mubr.f32.mxu0 %v8590_v42  ;;  %1407 = vst [vmem:[#allocation2 + $0x128] sm:$0xff] %v8818_v54  ;;  %1409 = vst.msk [vmem:[#allocation2 + $0x138] sm:$0xff] %vm1376_vm2, %v1228_v57  ;;  %3124 = vmatpush2.msra.mxu0 %v2310_v51  ;;  %v2299_v42 = vld [vmem:[%s11151_s2 + $0xf08] sm:$0xff]  ;;  %v1886_v51 = vld [vmem:[%s11151_s2 + $0x220] sm:$0xff] }
 0x190   :  { %3035 = vmatmul.mubr.f32.gmra.mxu1 %v8555_v2  ;;  %v8830_v31 = vpop.f32.mrf.mxu0  ;;  %v8832_v24 = vpop.f32.mrf.mxu1  ;;  %3125 = vmatprep.subr.mxu0 %v2305_v45  ;;  %v2298_v2 = vld [vmem:[%s11151_s2 + $0xf00] sm:$0xff] }
 0x191   :  { %3040 = vmatprep.mubr.f32.mxu1 %v8597_v37  ;;  %1414 = vst [vmem:[#allocation2 + $0x160] sm:$0xff] %v8830_v31  ;;  %1416 = vst [vmem:[#allocation2 + $0x170] sm:$0xff] %v8832_v24  ;;  %3126 = vmatpush2.msra.mxu0 %v2304_v53  ;;  %v2490_v37 = vld [vmem:[%s11151_s2 + $0x1500] sm:$0xf] }
 0x192   :  { %2808 = vmatmul.mubr.f32.gmra.mxu0 %v8576_v19  ;;  %v8844_v26 = vpop.f32.mrf.mxu0  ;;  %v1234_v4 = vpop.f32.mrf.mxu1  ;;  %5700 = vmatprep.subr.msk.mxu1 %vm2580_vm3, %v2491_v41  ;;  %v1911_v19 = vld [vmem:[%s11151_s2 + $0x2e8] sm:$0xff]  ;;  %v1625_v40 = vld [vmem:[#allocation2 + $0xf8] sm:$0xff] }
 0x193   :  { %2813 = vmatprep.mubr.f32.mxu0 %v8622_v32  ;;  %1415 = vst [vmem:[#allocation2 + $0x168] sm:$0xff] %v8844_v26  ;;  %1417 = vst.msk [vmem:[#allocation2 + $0x178] sm:$0xff] %vm1376_vm2, %v1234_v4  ;;  %3127 = vmatprep.subr.mxu0 %v2299_v42  ;;  %v1880_v42 = vld [vmem:[%s11151_s2 + $0x1f0] sm:$0xff]  ;;  %v2073_v4 = vld [vmem:[%s11151_s2 + $0x7f8] sm:$0xff] }
 0x194   :  { %3041 = vmatmul.mubr.f32.gmra.mxu1 %v8586_v48  ;;  %v8857_v20 = vpop.f32.mrf.mxu0  ;;  %3128 = vmatpush2.msra.mxu0 %v2298_v2 }
 0x195   :  { %3046 = vmatprep.mubr.f32.mxu1 %v8624_v34  ;;  %1422 = vst [vmem:[#allocation2 + $0x1a0] sm:$0xff] %v8857_v20  ;;  %v8864_v32 = vpop.f32.mrf.mxu1  ;;  %5701 = vmatpush2.msk.msra.mxu1 %vm2580_vm3, %v2490_v37 }
 0x196   :  { %2814 = vmatmul.mubr.f32.gmra.mxu0 %v8608_v47  ;;  %1424 = vst [vmem:[#allocation2 + $0x1b0] sm:$0xff] %v8864_v32  ;;  %v8869_v48 = vpop.f32.mrf.mxu0  ;;  %3531 = vmatprep.subr.mxu0 %v1911_v19  ;;  %v1633_v45 = vld [vmem:[#allocation2 + $0x138] sm:$0xff] }
 0x197   :  { %2819 = vmatprep.mubr.f32.mxu0 %v8650_v36  ;;  %1423 = vst [vmem:[#allocation2 + $0x1a8] sm:$0xff] %v8869_v48  ;;  %v1240_v35 = vpop.f32.mrf.mxu1  ;;  %3764 = vmatprep.subr.mxu1 %v2103_v25 }
 0x198   :  { %3047 = vmatmul.mubr.f32.gmra.mxu1 %v8610_v15  ;;  %1425 = vst.msk [vmem:[#allocation2 + $0x1b8] sm:$0xff] %vm1376_vm2, %v1240_v35  ;;  %v8875_v34 = vpop.f32.mrf.mxu0  ;;  %v1874_v35 = vld [vmem:[%s11151_s2 + $0x1c0] sm:$0xff] }
 0x199   :  { %3052 = vmatprep.mubr.f32.mxu1 %v8652_v49  ;;  %1430 = vst [vmem:[#allocation2 + $0x1e0] sm:$0xff] %v8875_v34  ;;  %v8879_v47 = vpop.f32.mrf.mxu1 }
 0x19a   :  { %2820 = vmatmul.mubr.f32.gmra.mxu0 %v8636_v11  ;;  %1432 = vst [vmem:[#allocation2 + $0x1f0] sm:$0xff] %v8879_v47  ;;  %v8883_v36 = vpop.f32.mrf.mxu0  ;;  %v1641_v37 = vld [vmem:[#allocation2 + $0x178] sm:$0xff] }
 0x19b   :  { %2825 = vmatprep.mubr.f32.mxu0 %v8678_v28  ;;  %1431 = vst [vmem:[#allocation2 + $0x1e8] sm:$0xff] %v8883_v36  ;;  %v1246_v15 = vpop.f32.mrf.mxu1 }
 0x19c   :  { %3053 = vmatmul.mubr.f32.gmra.mxu1 %v8638_v7  ;;  %1433 = vst.msk [vmem:[#allocation2 + $0x1f8] sm:$0xff] %vm1376_vm2, %v1246_v15  ;;  %v1601_v7 = vld [vmem:[#allocation2 + $0x38] sm:$0xff]  ;;  %v2067_v15 = vld [vmem:[%s11151_s2 + $0x7c8] sm:$0xff] }
 0x19d   :  { %3058 = vmatprep.mubr.f32.mxu1 %v8685_v6  ;;  %v8890_v49 = vpop.f32.mrf.mxu0  ;;  %v8892_v60 = vpop.f32.mrf.mxu1  ;;  %v1910_v6 = vld [vmem:[%s11151_s2 + $0x2e0] sm:$0xff] }
 0x19e   :  { %2826 = vmatmul.mubr.f32.gmra.mxu0 %v8664_v63  ;;  %1438 = vst [vmem:[#allocation2 + $0x220] sm:$0xff] %v8890_v49  ;;  %1440 = vst [vmem:[#allocation2 + $0x230] sm:$0xff] %v8892_v60 }
 0x19f   :  { %3129 = vmatprep.mubr.f32.mxu0 %v8710_v59  ;;  %v8898_v11 = vpop.f32.mrf.mxu0  ;;  %v1252_v28 = vpop.f32.mrf.mxu1  ;;  %v1905_v59 = vld [vmem:[%s11151_s2 + $0x2b8] sm:$0xff] }
 0x1a0   :  { %3059 = vmatmul.mubr.f32.gmra.mxu1 %v8671_v50  ;;  %1439 = vst [vmem:[#allocation2 + $0x228] sm:$0xff] %v8898_v11  ;;  %1441 = vst.msk [vmem:[#allocation2 + $0x238] sm:$0xff] %vm1376_vm2, %v1252_v28  ;;  %v2102_v50 = vld [vmem:[%s11151_s2 + $0x8e0] sm:$0xff] }
 0x1a1   :  { %5702 = vmatprep.mubr.msk.f32.mxu1 %vm1376_vm2, %v1601_v7  ;;  %v8907_v63 = vpop.f32.mrf.mxu0  ;;  %v1649_v7 = vld [vmem:[#allocation2 + $0x1b8] sm:$0xff] }
 0x1a2   :  { %3130 = vmatmul.mubr.f32.vlgmr.msra.gmra.mxu0 %v8696_v23  ;;  %1446 = vst [vmem:[#allocation2 + $0x260] sm:$0xff] %v8907_v63  ;;  %v8917_v22 = vpop.f32.mrf.mxu1  ;;  %v1609_v23 = vld [vmem:[#allocation2 + $0x78] sm:$0xff] }
 0x1a3   :  { %3135 = vmatprep.mubr.f32.mxu0 %v8736_v12  ;;  %3532 = vmatpush1.msra.mxu0 %v1910_v6  ;;  %1448 = vst [vmem:[#allocation2 + $0x270] sm:$0xff] %v8917_v22  ;;  %v8921_v14 = vpop.f32.mrf.mxu0  ;;  %v1899_v12 = vld [vmem:[%s11151_s2 + $0x288] sm:$0xff] }
 0x1a4   :  { %3363 = vmatmul.mubr.f32.vlgmr.msra.gmra.mxu1 %v8698_v10  ;;  %3533 = vmatprep.subr.mxu0 %v1905_v59  ;;  %1447 = vst [vmem:[#allocation2 + $0x268] sm:$0xff] %v8921_v14  ;;  %v1258_v5 = vpop.f32.mrf.mxu1  ;;  %v2096_v10 = vld [vmem:[%s11151_s2 + $0x8b0] sm:$0xff] }
 0x1a5   :  { %5703 = vmatprep.mubr.msk.f32.mxu1 %vm1376_vm2, %v1609_v23  ;;  %3765 = vmatpush1.msra.mxu1 %v2102_v50  ;;  %1449 = vst.msk [vmem:[#allocation2 + $0x278] sm:$0xff] %vm1376_vm2, %v1258_v5  ;;  %v8936_v56 = vpop.f32.mrf.mxu0  ;;  %v2061_v50 = vld [vmem:[%s11151_s2 + $0x798] sm:$0xff] }
 0x1a6   :  { %3136 = vmatmul.mubr.f32.gmra.mxu0 %v8722_v39  ;;  %3766 = vmatprep.subr.mxu1 %v2097_v27  ;;  %1454 = vst [vmem:[#allocation2 + $0x2a0] sm:$0xff] %v8936_v56  ;;  %v8943_v29 = vpop.f32.mrf.mxu1  ;;  %v1617_v39 = vld [vmem:[#allocation2 + $0xb8] sm:$0xff] }
 0x1a7   :  { %3141 = vmatprep.mubr.f32.mxu0 %v8762_v8  ;;  %3534 = vmatpush1.msra.mxu0 %v1904_v1  ;;  %1456 = vst [vmem:[#allocation2 + $0x2b0] sm:$0xff] %v8943_v29  ;;  %v8950_v55 = vpop.f32.mrf.mxu0  ;;  %v1657_v1 = vld [vmem:[#allocation2 + $0x1f8] sm:$0xff] }
 0x1a8   :  { %3369 = vmatmul.mubr.f32.gmra.mxu1 %v8724_v43  ;;  %3535 = vmatprep.subr.mxu0 %v1899_v12  ;;  %1455 = vst [vmem:[#allocation2 + $0x2a8] sm:$0xff] %v8950_v55  ;;  %v1264_v8 = vpop.f32.mrf.mxu1  ;;  %v2090_v43 = vld [vmem:[%s11151_s2 + $0x880] sm:$0xff] }
 0x1a9   :  { %5704 = vmatprep.mubr.msk.f32.mxu1 %vm1376_vm2, %v1617_v39  ;;  %3767 = vmatpush1.msra.mxu1 %v2096_v10  ;;  %1457 = vst.msk [vmem:[#allocation2 + $0x2b8] sm:$0xff] %vm1376_vm2, %v1264_v8  ;;  %v2055_v10 = vld [vmem:[%s11151_s2 + $0x768] sm:$0xff]  ;;  %v1665_v39 = vld [vmem:[#allocation2 + $0x238] sm:$0xff] }
 0x1aa   :  { %3142 = vmatmul.mubr.f32.gmra.mxu0 %v8748_v52  ;;  %3768 = vmatprep.subr.mxu1 %v2091_v33  ;;  %v8966_v62 = vpop.f32.mrf.mxu0  ;;  %v8968_v3 = vpop.f32.mrf.mxu1  ;;  %v2085_v52 = vld [vmem:[%s11151_s2 + $0x858] sm:$0xff] }
 0x1ab   :  { %3536 = vmatpush1.msra.mxu0 %v1898_v30  ;;  %3147 = vmatprep.mubr.f32.mxu0 %v8788_v18  ;;  %1462 = vst [vmem:[#allocation2 + $0x2e0] sm:$0xff] %v8966_v62  ;;  %1464 = vst [vmem:[#allocation2 + $0x2f0] sm:$0xff] %v8968_v3  ;;  %v2084_v18 = vld [vmem:[%s11151_s2 + $0x850] sm:$0xff] }
 0x1ac   :  { %3375 = vmatmul.mubr.f32.gmra.mxu1 %v8755_v21  ;;  %3537 = vmatprep.subr.mxu0 %v1893_v38  ;;  %v8980_v44 = vpop.f32.mrf.mxu0  ;;  %v1270_v13 = vpop.f32.mrf.mxu1  ;;  %v1887_v21 = vld [vmem:[%s11151_s2 + $0x228] sm:$0xff]  ;;  %v1856_v38 = vld [vmem:[%s11151_s2 + $0x130] sm:$0xff] }
 0x1ad   :  { %5705 = vmatprep.mubr.msk.f32.mxu1 %vm1376_vm2, %v1625_v40  ;;  %3769 = vmatpush1.msra.mxu1 %v2090_v43  ;;  %1463 = vst [vmem:[#allocation2 + $0x2e8] sm:$0xff] %v8980_v44  ;;  %1465 = vst.msk [vmem:[#allocation2 + $0x2f8] sm:$0xff] %vm1376_vm2, %v1270_v13  ;;  %v2049_v43 = vld [vmem:[%s11151_s2 + $0x738] sm:$0xff] }
 0x1ae   :  { %3148 = vmatmul.mubr.f32.gmra.mxu0 %v8774_v46  ;;  %3770 = vmatprep.subr.mxu1 %v2085_v52  ;;  %v8992_v16 = vpop.f32.mrf.mxu0  ;;  %v8994_v0 = vpop.f32.mrf.mxu1  ;;  %v2079_v46 = vld [vmem:[%s11151_s2 + $0x828] sm:$0xff]  ;;  %v1673_v40 = vld [vmem:[#allocation2 + $0x278] sm:$0xff] }
 0x1af   :  { %3538 = vmatpush1.msra.mxu0 %v1892_v58  ;;  %3153 = vmatprep.mubr.f32.mxu0 %v8818_v54  ;;  %1470 = vst [vmem:[#allocation2 + $0x320] sm:$0xff] %v8992_v16  ;;  %1472 = vst [vmem:[#allocation2 + $0x330] sm:$0xff] %v8994_v0  ;;  %v2078_v54 = vld [vmem:[%s11151_s2 + $0x820] sm:$0xff]  ;;  %v2048_v58 = vld [vmem:[%s11151_s2 + $0x730] sm:$0xff] }
 0x1b0   :  { %3381 = vmatmul.mubr.f32.gmra.mxu1 %v8781_v61  ;;  %3539 = vmatprep.subr.mxu0 %v1887_v21  ;;  %v9009_v57 = vpop.f32.mrf.mxu0  ;;  %v1276_v53 = vpop.f32.mrf.mxu1  ;;  %v1881_v61 = vld [vmem:[%s11151_s2 + $0x1f8] sm:$0xff]  ;;  %v1850_v21 = vld [vmem:[%s11151_s2 + $0x100] sm:$0xff] }
 0x1b1   :  { %5706 = vmatprep.mubr.msk.f32.mxu1 %vm1376_vm2, %v1633_v45  ;;  %3771 = vmatpush1.msra.mxu1 %v2084_v18  ;;  %1471 = vst [vmem:[#allocation2 + $0x328] sm:$0xff] %v9009_v57  ;;  %1473 = vst.msk [vmem:[#allocation2 + $0x338] sm:$0xff] %vm1376_vm2, %v1276_v53  ;;  %v1681_v53 = vld [vmem:[#allocation2 + $0x2b8] sm:$0xff] }
 0x1b2   :  { %3540 = vmatpush1.msra.mxu0 %v1886_v51  ;;  %3772 = vmatprep.subr.mxu1 %v2079_v46  ;;  %v9017_v41 = vpop.f32.mrf.mxu0  ;;  %v2042_v51 = vld [vmem:[%s11151_s2 + $0x700] sm:$0xff]  ;;  %v1845_v46 = vld [vmem:[%s11151_s2 + $0xd8] sm:$0xff] }
 0x1b3   :  { %3154 = vmatmul.mubr.f32.gmra.mxu0 %v8804_v9  ;;  %3773 = vmatpush1.msra.mxu1 %v2078_v54  ;;  %1478 = vst [vmem:[#allocation2 + $0x360] sm:$0xff] %v9017_v41  ;;  %v9024_v2 = vpop.f32.mrf.mxu1  ;;  %v1875_v9 = vld [vmem:[%s11151_s2 + $0x1c8] sm:$0xff] }
 0x1b4   :  { %3387 = vmatmul.mubr.f32.gmra.mxu1 %v8806_v17  ;;  %3159 = vmatprep.mubr.f32.mxu0 %v8844_v26  ;;  %1480 = vst [vmem:[#allocation2 + $0x370] sm:$0xff] %v9024_v2  ;;  %v9035_v19 = vpop.f32.mrf.mxu0  ;;  %v2072_v17 = vld [vmem:[%s11151_s2 + $0x7f0] sm:$0xff] }
 0x1b5   :  { %5707 = vmatprep.mubr.msk.f32.mxu1 %vm1376_vm2, %v1641_v37  ;;  %3541 = vmatprep.subr.mxu0 %v1881_v61  ;;  %1479 = vst [vmem:[#allocation2 + $0x368] sm:$0xff] %v9035_v19  ;;  %v1282_v25 = vpop.f32.mrf.mxu1 }
 0x1b6   :  { %3542 = vmatpush1.msra.mxu0 %v1880_v42  ;;  %3774 = vmatprep.subr.mxu1 %v2073_v4  ;;  %1481 = vst.msk [vmem:[#allocation2 + $0x378] sm:$0xff] %vm1376_vm2, %v1282_v25  ;;  %v9043_v26 = vpop.f32.mrf.mxu0  ;;  %v1839_v42 = vld [vmem:[%s11151_s2 + $0xa8] sm:$0xff]  ;;  %v2036_v4 = vld [vmem:[%s11151_s2 + $0x6d0] sm:$0xff]  ;;  %v1689_v25 = vld [vmem:[#allocation2 + $0x2f8] sm:$0xff] }
 0x1b7   :  { %3160 = vmatmul.mubr.f32.gmra.mxu0 %v8830_v31  ;;  %3543 = vmatprep.subr.mxu0 %v1875_v9  ;;  %1486 = vst [vmem:[#allocation2 + $0x3a0] sm:$0xff] %v9043_v26  ;;  %v9053_v28 = vpop.f32.mrf.mxu1  ;;  %v2066_v31 = vld [vmem:[%s11151_s2 + $0x7c0] sm:$0xff] }
 0x1b8   :  { %3393 = vmatmul.mubr.f32.gmra.mxu1 %v8832_v24  ;;  %3165 = vmatprep.mubr.f32.mxu0 %v8869_v48  ;;  %1488 = vst [vmem:[#allocation2 + $0x3b0] sm:$0xff] %v9053_v28  ;;  %v9061_v6 = vpop.f32.mrf.mxu0  ;;  %v1869_v24 = vld [vmem:[%s11151_s2 + $0x198] sm:$0xff]  ;;  %v1868_v48 = vld [vmem:[%s11151_s2 + $0x190] sm:$0xff] }
 0x1b9   :  { %5708 = vmatprep.mubr.msk.f32.mxu1 %vm1376_vm2, %v1649_v7  ;;  %3775 = vmatpush1.msra.mxu1 %v2072_v17  ;;  %1487 = vst [vmem:[#allocation2 + $0x3a8] sm:$0xff] %v9061_v6  ;;  %v1288_v59 = vpop.f32.mrf.mxu1 }
 0x1ba   :  { %3544 = vmatpush1.msra.mxu0 %v1874_v35  ;;  %3776 = vmatprep.subr.mxu1 %v2067_v15  ;;  %1489 = vst.msk [vmem:[#allocation2 + $0x3b8] sm:$0xff] %vm1376_vm2, %v1288_v59  ;;  %v1833_v15 = vld [vmem:[%s11151_s2 + $0x78] sm:$0xff]  ;;  %v1832_v59 = vld [vmem:[%s11151_s2 + $0x70] sm:$0xff] }
 0x1bb   :  { %3166 = vmatmul.mubr.f32.gmra.mxu0 %v8857_v20  ;;  %3777 = vmatpush1.msra.mxu1 %v2066_v31  ;;  %v9076_v27 = vpop.f32.mrf.mxu0  ;;  %v9078_v23 = vpop.f32.mrf.mxu1  ;;  %v1863_v20 = vld [vmem:[%s11151_s2 + $0x168] sm:$0xff]  ;;  %v1697_v31 = vld [vmem:[#allocation2 + $0x338] sm:$0xff] }
 0x1bc   :  { %3399 = vmatmul.mubr.f32.gmra.mxu1 %v8864_v32  ;;  %3171 = vmatprep.mubr.f32.mxu0 %v8883_v36  ;;  %1494 = vst [vmem:[#allocation2 + $0x3e0] sm:$0xff] %v9076_v27  ;;  %1496 = vst [vmem:[#allocation2 + $0x3f0] sm:$0xff] %v9078_v23  ;;  %v2060_v32 = vld [vmem:[%s11151_s2 + $0x790] sm:$0xff]  ;;  %v1862_v36 = vld [vmem:[%s11151_s2 + $0x160] sm:$0xff] }
 0x1bd   :  { %5709 = vmatprep.mubr.msk.f32.mxu1 %vm1376_vm2, %v1657_v1  ;;  %3545 = vmatprep.subr.mxu0 %v1869_v24  ;;  %v9088_v5 = vpop.f32.mrf.mxu0  ;;  %v1294_v12 = vpop.f32.mrf.mxu1 }
 0x1be   :  { %3546 = vmatpush1.msra.mxu0 %v1868_v48  ;;  %3778 = vmatprep.subr.mxu1 %v2061_v50  ;;  %1495 = vst [vmem:[#allocation2 + $0x3e8] sm:$0xff] %v9088_v5  ;;  %1497 = vst.msk [vmem:[#allocation2 + $0x3f8] sm:$0xff] %vm1376_vm2, %v1294_v12  ;;  %v2024_v50 = vld [vmem:[%s11151_s2 + $0x670] sm:$0xff]  ;;  %v2019_v12 = vld [vmem:[%s11151_s2 + $0x648] sm:$0xff] }
 0x1bf   :  { %3172 = vmatmul.mubr.f32.gmra.mxu0 %v8875_v34  ;;  %3547 = vmatprep.subr.mxu0 %v1863_v20  ;;  %v9102_v33 = vpop.f32.mrf.mxu0  ;;  %v2054_v34 = vld [vmem:[%s11151_s2 + $0x760] sm:$0xff]  ;;  %v1705_v20 = vld [vmem:[#allocation2 + $0x378] sm:$0xff] }
 0x1c0   :  { %3405 = vmatmul.mubr.f32.gmra.mxu1 %v8879_v47  ;;  %3177 = vmatprep.mubr.f32.mxu0 %v8898_v11  ;;  %1502 = vst [vmem:[#allocation2 + $0x420] sm:$0xff] %v9102_v33  ;;  %v9110_v30 = vpop.f32.mrf.mxu1  ;;  %v1857_v47 = vld [vmem:[%s11151_s2 + $0x138] sm:$0xff] }
 0x1c1   :  { %3779 = vmatpush1.msra.mxu1 %v2060_v32  ;;  %5710 = vmatprep.mubr.msk.f32.mxu1 %vm1376_vm2, %v1665_v39  ;;  %1504 = vst [vmem:[#allocation2 + $0x430] sm:$0xff] %v9110_v30  ;;  %v9117_v8 = vpop.f32.mrf.mxu0  ;;  %v1820_v39 = vld [vmem:[%s11151_s2 + $0x10] sm:$0xff] }
 0x1c2   :  { %3548 = vmatpush1.msra.mxu0 %v1862_v36  ;;  %3780 = vmatprep.subr.mxu1 %v2055_v10  ;;  %1503 = vst [vmem:[#allocation2 + $0x428] sm:$0xff] %v9117_v8  ;;  %v1300_v11 = vpop.f32.mrf.mxu1  ;;  %v2018_v36 = vld [vmem:[%s11151_s2 + $0x640] sm:$0xff] }
 0x1c3   :  { %3781 = vmatpush1.msra.mxu1 %v2054_v34  ;;  %3178 = vmatmul.mubr.f32.gmra.mxu0 %v8890_v49  ;;  %1505 = vst.msk [vmem:[#allocation2 + $0x438] sm:$0xff] %vm1376_vm2, %v1300_v11  ;;  %v9128_v52 = vpop.f32.mrf.mxu0  ;;  %v1851_v49 = vld [vmem:[%s11151_s2 + $0x108] sm:$0xff]  ;;  %v2013_v34 = vld [vmem:[%s11151_s2 + $0x618] sm:$0xff] }
 0x1c4   :  { %3411 = vmatmul.mubr.f32.gmra.mxu1 %v8892_v60  ;;  %3549 = vmatprep.subr.mxu0 %v1857_v47  ;;  %1510 = vst [vmem:[#allocation2 + $0x460] sm:$0xff] %v9128_v52  ;;  %v9138_v13 = vpop.f32.mrf.mxu1 }
 0x1c5   :  { %3183 = vmatprep.mubr.f32.mxu0 %v8921_v14  ;;  %5711 = vmatprep.mubr.msk.f32.mxu1 %vm1376_vm2, %v1673_v40  ;;  %1512 = vst [vmem:[#allocation2 + $0x470] sm:$0xff] %v9138_v13  ;;  %v9143_v60 = vpop.f32.mrf.mxu0  ;;  %v2043_v14 = vld [vmem:[%s11151_s2 + $0x708] sm:$0xff] }
 0x1c6   :  { %3550 = vmatpush1.msra.mxu0 %v1856_v38  ;;  %3782 = vmatprep.subr.mxu1 %v2049_v43  ;;  %1511 = vst [vmem:[#allocation2 + $0x468] sm:$0xff] %v9143_v60  ;;  %v1306_v18 = vpop.f32.mrf.mxu1  ;;  %v1713_v38 = vld [vmem:[#allocation2 + $0x3b8] sm:$0xff] }
 0x1c7   :  { %3551 = vmatprep.subr.mxu0 %v1851_v49  ;;  %3783 = vmatpush1.msra.mxu1 %v2048_v58  ;;  %1513 = vst.msk [vmem:[#allocation2 + $0x478] sm:$0xff] %vm1376_vm2, %v1306_v18  ;;  %v2199_v49 = vld [vmem:[%s11151_s2 + $0xbe8] sm:$0xff]  ;;  %v2198_v18 = vld [vmem:[%s11151_s2 + $0xbe0] sm:$0xff] }
 0x1c8   :  { %3184 = vmatmul.mubr.f32.gmra.mxu0 %v8907_v63  ;;  %3417 = vmatmul.mubr.f32.gmra.mxu1 %v8917_v22  ;;  %v9161_v45 = vpop.f32.mrf.mxu0  ;;  %v9163_v54 = vpop.f32.mrf.mxu1  ;;  %v1844_v63 = vld [vmem:[%s11151_s2 + $0xd0] sm:$0xff] }
 0x1c9   :  { %3552 = vmatpush1.msra.mxu0 %v1850_v21  ;;  %3189 = vmatprep.mubr.f32.mxu0 %v8950_v55  ;;  %1518 = vst [vmem:[#allocation2 + $0x4a0] sm:$0xff] %v9161_v45  ;;  %1520 = vst [vmem:[#allocation2 + $0x4b0] sm:$0xff] %v9163_v54  ;;  %v2037_v55 = vld [vmem:[%s11151_s2 + $0x6d8] sm:$0xff] }
 0x1ca   :  { %5712 = vmatprep.mubr.msk.f32.mxu1 %vm1376_vm2, %v1681_v53  ;;  %3784 = vmatprep.subr.mxu1 %v2043_v14  ;;  %v9172_v22 = vpop.f32.mrf.mxu0  ;;  %v1312_v61 = vpop.f32.mrf.mxu1  ;;  %v1721_v21 = vld [vmem:[#allocation2 + $0x3f8] sm:$0xff] }
 0x1cb   :  { %3785 = vmatpush1.msra.mxu1 %v2042_v51  ;;  %3553 = vmatprep.subr.mxu0 %v1845_v46  ;;  %1519 = vst [vmem:[#allocation2 + $0x4a8] sm:$0xff] %v9172_v22  ;;  %1521 = vst.msk [vmem:[#allocation2 + $0x4b8] sm:$0xff] %vm1376_vm2, %v1312_v61  ;;  %v2193_v46 = vld [vmem:[%s11151_s2 + $0xbb8] sm:$0xff]  ;;  %v2192_v61 = vld [vmem:[%s11151_s2 + $0xbb0] sm:$0xff] }
 0x1cc   :  { %3190 = vmatmul.mubr.f32.gmra.mxu0 %v8936_v56  ;;  %3423 = vmatmul.mubr.f32.gmra.mxu1 %v8943_v29  ;;  %v9187_v37 = vpop.f32.mrf.mxu0  ;;  %v9189_v9 = vpop.f32.mrf.mxu1  ;;  %v1838_v56 = vld [vmem:[%s11151_s2 + $0xa0] sm:$0xff]  ;;  %v2031_v29 = vld [vmem:[%s11151_s2 + $0x6a8] sm:$0xff] }
 0x1cd   :  { %3554 = vmatpush1.msra.mxu0 %v1844_v63  ;;  %3195 = vmatprep.mubr.f32.mxu0 %v8980_v44  ;;  %1526 = vst [vmem:[#allocation2 + $0x4e0] sm:$0xff] %v9187_v37  ;;  %1528 = vst [vmem:[#allocation2 + $0x4f0] sm:$0xff] %v9189_v9  ;;  %v2030_v44 = vld [vmem:[%s11151_s2 + $0x6a0] sm:$0xff]  ;;  %v1729_v63 = vld [vmem:[#allocation2 + $0x438] sm:$0xff] }
 0x1ce   :  { %5713 = vmatprep.mubr.msk.f32.mxu1 %vm1376_vm2, %v1689_v25  ;;  %3786 = vmatprep.subr.mxu1 %v2037_v55  ;;  %v9201_v17 = vpop.f32.mrf.mxu0  ;;  %v1318_v35 = vpop.f32.mrf.mxu1  ;;  %v2186_v25 = vld [vmem:[%s11151_s2 + $0xb80] sm:$0xff] }
 0x1cf   :  { %3555 = vmatprep.subr.mxu0 %v1839_v42  ;;  %3787 = vmatpush1.msra.mxu1 %v2036_v4  ;;  %1527 = vst [vmem:[#allocation2 + $0x4e8] sm:$0xff] %v9201_v17  ;;  %1529 = vst.msk [vmem:[#allocation2 + $0x4f8] sm:$0xff] %vm1376_vm2, %v1318_v35  ;;  %v1994_v42 = vld [vmem:[%s11151_s2 + $0x580] sm:$0xff] }
 0x1d0   :  { %3556 = vmatpush1.msra.mxu0 %v1838_v56  ;;  %3429 = vmatmul.mubr.f32.gmra.mxu1 %v8968_v3  ;;  %v9212_v7 = vpop.f32.mrf.mxu0  ;;  %v1989_v56 = vld [vmem:[%s11151_s2 + $0x558] sm:$0xff] }
 0x1d1   :  { %3196 = vmatmul.mubr.f32.gmra.mxu0 %v8966_v62  ;;  %3788 = vmatprep.subr.mxu1 %v2031_v29  ;;  %1534 = vst [vmem:[#allocation2 + $0x520] sm:$0xff] %v9212_v7  ;;  %v9219_v3 = vpop.f32.mrf.mxu1  ;;  %v2025_v62 = vld [vmem:[%s11151_s2 + $0x678] sm:$0xff] }
 0x1d2   :  { %3201 = vmatprep.mubr.f32.mxu0 %v9009_v57  ;;  %5714 = vmatprep.mubr.msk.f32.mxu1 %vm1376_vm2, %v1697_v31  ;;  %1536 = vst [vmem:[#allocation2 + $0x530] sm:$0xff] %v9219_v3  ;;  %v9227_v24 = vpop.f32.mrf.mxu0  ;;  %v1827_v57 = vld [vmem:[%s11151_s2 + $0x48] sm:$0xff] }
 0x1d3   :  { %3789 = vmatpush1.msra.mxu1 %v2030_v44  ;;  %3557 = vmatprep.subr.mxu0 %v1833_v15  ;;  %1535 = vst [vmem:[#allocation2 + $0x528] sm:$0xff] %v9227_v24  ;;  %v1324_v48 = vpop.f32.mrf.mxu1  ;;  %v1737_v44 = vld [vmem:[#allocation2 + $0x478] sm:$0xff]  ;;  %v1983_v31 = vld [vmem:[%s11151_s2 + $0x528] sm:$0xff] }
 0x1d4   :  { %3558 = vmatpush1.msra.mxu0 %v1832_v59  ;;  %3435 = vmatmul.mubr.f32.gmra.mxu1 %v8994_v0  ;;  %1537 = vst.msk [vmem:[#allocation2 + $0x538] sm:$0xff] %vm1376_vm2, %v1324_v48  ;;  %v9238_v1 = vpop.f32.mrf.mxu0  ;;  %v1826_v0 = vld [vmem:[%s11151_s2 + $0x40] sm:$0xff]  ;;  %v2180_v59 = vld [vmem:[%s11151_s2 + $0xb50] sm:$0xff] }
 0x1d5   :  { %3202 = vmatmul.mubr.f32.gmra.mxu0 %v8992_v16  ;;  %3790 = vmatprep.subr.mxu1 %v2025_v62  ;;  %1542 = vst [vmem:[#allocation2 + $0x560] sm:$0xff] %v9238_v1  ;;  %v9248_v32 = vpop.f32.mrf.mxu1 }
 0x1d6   :  { %3207 = vmatprep.mubr.f32.mxu0 %v9035_v19  ;;  %5715 = vmatprep.mubr.msk.f32.mxu1 %vm1376_vm2, %v1705_v20  ;;  %1544 = vst [vmem:[#allocation2 + $0x570] sm:$0xff] %v9248_v32  ;;  %v9253_v16 = vpop.f32.mrf.mxu0  ;;  %v1821_v19 = vld [vmem:[%s11151_s2 + $0x18] sm:$0xff] }
 0x1d7   :  { %3559 = vmatprep.subr.mxu0 %v1827_v57  ;;  %3791 = vmatpush1.msra.mxu1 %v2024_v50  ;;  %1543 = vst [vmem:[#allocation2 + $0x568] sm:$0xff] %v9253_v16  ;;  %v1330_v10 = vpop.f32.mrf.mxu1  ;;  %v1745_v57 = vld [vmem:[#allocation2 + $0x4b8] sm:$0xff] }
 0x1d8   :  { %3560 = vmatpush1.msra.mxu0 %v1826_v0  ;;  %3792 = vmatprep.subr.mxu1 %v2019_v12  ;;  %1545 = vst.msk [vmem:[#allocation2 + $0x578] sm:$0xff] %vm1376_vm2, %v1330_v10  ;;  %v1977_v0 = vld [vmem:[%s11151_s2 + $0x4f8] sm:$0xff]  ;;  %v1976_v10 = vld [vmem:[%s11151_s2 + $0x4f0] sm:$0xff] }
 0x1d9   :  { %3208 = vmatmul.mubr.f32.gmra.mxu0 %v9017_v41  ;;  %3441 = vmatmul.mubr.f32.gmra.mxu1 %v9024_v2  ;;  %v9271_v47 = vpop.f32.mrf.mxu0  ;;  %v9273_v11 = vpop.f32.mrf.mxu1  ;;  %v2007_v41 = vld [vmem:[%s11151_s2 + $0x5e8] sm:$0xff]  ;;  %v2012_v2 = vld [vmem:[%s11151_s2 + $0x610] sm:$0xff] }
 0x1da   :  { %3793 = vmatpush1.msra.mxu1 %v2018_v36  ;;  %3213 = vmatprep.mubr.f32.mxu0 %v9061_v6  ;;  %1550 = vst [vmem:[#allocation2 + $0x5a0] sm:$0xff] %v9271_v47  ;;  %1552 = vst [vmem:[#allocation2 + $0x5b0] sm:$0xff] %v9273_v11  ;;  %v2006_v6 = vld [vmem:[%s11151_s2 + $0x5e0] sm:$0xff]  ;;  %v1753_v36 = vld [vmem:[#allocation2 + $0x4f8] sm:$0xff] }
 0x1db   :  { %5716 = vmatprep.mubr.msk.f32.mxu1 %vm1376_vm2, %v1713_v38  ;;  %3561 = vmatprep.subr.mxu0 %v1821_v19  ;;  %v9285_v43 = vpop.f32.mrf.mxu0  ;;  %v1336_v40 = vpop.f32.mrf.mxu1 }
 0x1dc   :  { %3562 = vmatpush1.msra.mxu0 %v1820_v39  ;;  %3794 = vmatprep.subr.mxu1 %v2013_v34  ;;  %1551 = vst [vmem:[#allocation2 + $0x5a8] sm:$0xff] %v9285_v43  ;;  %1553 = vst.msk [vmem:[#allocation2 + $0x5b8] sm:$0xff] %vm1376_vm2, %v1336_v40  ;;  %v2168_v34 = vld [vmem:[%s11151_s2 + $0xaf0] sm:$0xff] }
 0x1dd   :  { %3214 = vmatmul.mubr.f32.gmra.mxu0 %v9043_v26  ;;  %3447 = vmatmul.mubr.f32.gmra.mxu1 %v9053_v28  ;;  %v9297_v58 = vpop.f32.mrf.mxu0  ;;  %v2001_v28 = vld [vmem:[%s11151_s2 + $0x5b8] sm:$0xff] }
 0x1de   :  { %3563 = vmatprep.subr.mxu0 %v2007_v41  ;;  %3795 = vmatpush1.msra.mxu1 %v2012_v2  ;;  %1558 = vst [vmem:[#allocation2 + $0x5e0] sm:$0xff] %v9297_v58  ;;  %v9303_v26 = vpop.f32.mrf.mxu1  ;;  %v1761_v41 = vld [vmem:[#allocation2 + $0x538] sm:$0xff]  ;;  %v1970_v2 = vld [vmem:[%s11151_s2 + $0x4c0] sm:$0xff] }
 0x1df   :  { %3219 = vmatprep.mubr.f32.mxu0 %v9088_v5  ;;  %5717 = vmatprep.mubr.msk.f32.mxu1 %vm1376_vm2, %v1721_v21  ;;  %1560 = vst [vmem:[#allocation2 + $0x5f0] sm:$0xff] %v9303_v26  ;;  %v9311_v14 = vpop.f32.mrf.mxu0  ;;  %v2000_v5 = vld [vmem:[%s11151_s2 + $0x5b0] sm:$0xff]  ;;  %v1965_v21 = vld [vmem:[%s11151_s2 + $0x498] sm:$0xff] }
 0x1e0   :  { %3564 = vmatpush2.msra.mxu0 %v2006_v6  ;;  %3796 = vmatprep.subr.mxu1 %v2199_v49  ;;  %1559 = vst [vmem:[#allocation2 + $0x5e8] sm:$0xff] %v9311_v14  ;;  %v1342_v51 = vpop.f32.mrf.mxu1 }
 0x1e1   :  { %3797 = vmatpush2.msra.mxu1 %v2198_v18  ;;  %3220 = vmatmul.mubr.f32.gmra.mxu0 %v9076_v27  ;;  %1561 = vst.msk [vmem:[#allocation2 + $0x5f8] sm:$0xff] %vm1376_vm2, %v1342_v51  ;;  %v9322_v53 = vpop.f32.mrf.mxu0  ;;  %v1995_v27 = vld [vmem:[%s11151_s2 + $0x588] sm:$0xff]  ;;  %v1964_v51 = vld [vmem:[%s11151_s2 + $0x490] sm:$0xff] }
 0x1e2   :  { %3453 = vmatmul.mubr.f32.gmra.mxu1 %v9078_v23  ;;  %3565 = vmatprep.subr.mxu0 %v2001_v28  ;;  %1566 = vst [vmem:[#allocation2 + $0x620] sm:$0xff] %v9322_v53  ;;  %v9332_v55 = vpop.f32.mrf.mxu1 }
 0x1e3   :  { %3225 = vmatprep.mubr.f32.mxu0 %v9117_v8  ;;  %5718 = vmatprep.mubr.msk.f32.mxu1 %vm1376_vm2, %v1729_v63  ;;  %1568 = vst [vmem:[#allocation2 + $0x630] sm:$0xff] %v9332_v55  ;;  %v9337_v23 = vpop.f32.mrf.mxu0  ;;  %v2187_v8 = vld [vmem:[%s11151_s2 + $0xb88] sm:$0xff] }
 0x1e4   :  { %3566 = vmatpush2.msra.mxu0 %v2000_v5  ;;  %3798 = vmatprep.subr.mxu1 %v2193_v46  ;;  %1567 = vst [vmem:[#allocation2 + $0x628] sm:$0xff] %v9337_v23  ;;  %v1348_v4 = vpop.f32.mrf.mxu1  ;;  %v2157_v5 = vld [vmem:[%s11151_s2 + $0xa98] sm:$0xff] }
 0x1e5   :  { %3567 = vmatprep.subr.mxu0 %v1995_v27  ;;  %3799 = vmatpush2.msra.mxu1 %v2192_v61  ;;  %1569 = vst.msk [vmem:[#allocation2 + $0x638] sm:$0xff] %vm1376_vm2, %v1348_v4  ;;  %v1769_v46 = vld [vmem:[#allocation2 + $0x578] sm:$0xff]  ;;  %v2156_v61 = vld [vmem:[%s11151_s2 + $0xa90] sm:$0xff]  ;;  %v1958_v4 = vld [vmem:[%s11151_s2 + $0x460] sm:$0xff] }
 0x1e6   :  { %3226 = vmatmul.mubr.f32.gmra.mxu0 %v9102_v33  ;;  %3459 = vmatmul.mubr.f32.gmra.mxu1 %v9110_v30  ;;  %v9355_v29 = vpop.f32.mrf.mxu0  ;;  %v9357_v35 = vpop.f32.mrf.mxu1  ;;  %v1988_v33 = vld [vmem:[%s11151_s2 + $0x550] sm:$0xff] }
 0x1e7   :  { %3568 = vmatpush2.msra.mxu0 %v1994_v42  ;;  %3231 = vmatprep.mubr.f32.mxu0 %v9143_v60  ;;  %1574 = vst [vmem:[#allocation2 + $0x660] sm:$0xff] %v9355_v29  ;;  %1576 = vst [vmem:[#allocation2 + $0x670] sm:$0xff] %v9357_v35  ;;  %v2181_v60 = vld [vmem:[%s11151_s2 + $0xb58] sm:$0xff] }
 0x1e8   :  { %5719 = vmatprep.mubr.msk.f32.mxu1 %vm1376_vm2, %v1737_v44  ;;  %3800 = vmatprep.subr.mxu1 %v2187_v8  ;;  %v9366_v30 = vpop.f32.mrf.mxu0  ;;  %v1354_v15 = vpop.f32.mrf.mxu1  ;;  %v2150_v44 = vld [vmem:[%s11151_s2 + $0xa60] sm:$0xff] }
 0x1e9   :  { %3801 = vmatpush2.msra.mxu1 %v2186_v25  ;;  %3569 = vmatprep.subr.mxu0 %v1989_v56  ;;  %1575 = vst [vmem:[#allocation2 + $0x668] sm:$0xff] %v9366_v30  ;;  %1577 = vst.msk [vmem:[#allocation2 + $0x678] sm:$0xff] %vm1376_vm2, %v1354_v15  ;;  %v2151_v25 = vld [vmem:[%s11151_s2 + $0xa68] sm:$0xff]  ;;  %v1777_v56 = vld [vmem:[#allocation2 + $0x5b8] sm:$0xff] }
 0x1ea   :  { %3232 = vmatmul.mubr.f32.gmra.mxu0 %v9128_v52  ;;  %3465 = vmatmul.mubr.f32.gmra.mxu1 %v9138_v13  ;;  %v9381_v62 = vpop.f32.mrf.mxu0  ;;  %v9383_v48 = vpop.f32.mrf.mxu1  ;;  %v1982_v52 = vld [vmem:[%s11151_s2 + $0x520] sm:$0xff]  ;;  %v2175_v13 = vld [vmem:[%s11151_s2 + $0xb28] sm:$0xff]  ;;  %v1953_v15 = vld [vmem:[%s11151_s2 + $0x438] sm:$0xff] }
 0x1eb   :  { %3570 = vmatpush2.msra.mxu0 %v1988_v33  ;;  %3237 = vmatprep.mubr.f32.mxu0 %v9172_v22  ;;  %1582 = vst [vmem:[#allocation2 + $0x6a0] sm:$0xff] %v9381_v62  ;;  %1584 = vst [vmem:[#allocation2 + $0x6b0] sm:$0xff] %v9383_v48  ;;  %v2174_v22 = vld [vmem:[%s11151_s2 + $0xb20] sm:$0xff] }
 0x1ec   :  { %5720 = vmatprep.mubr.msk.f32.mxu1 %vm1376_vm2, %v1745_v57  ;;  %3802 = vmatprep.subr.mxu1 %v2181_v60  ;;  %v9395_v50 = vpop.f32.mrf.mxu0  ;;  %v1360_v20 = vpop.f32.mrf.mxu1  ;;  %v2145_v57 = vld [vmem:[%s11151_s2 + $0xa38] sm:$0xff] }
 0x1ed   :  { %3571 = vmatprep.subr.mxu0 %v1983_v31  ;;  %3803 = vmatpush2.msra.mxu1 %v2180_v59  ;;  %1583 = vst [vmem:[#allocation2 + $0x6a8] sm:$0xff] %v9395_v50  ;;  %1585 = vst.msk [vmem:[#allocation2 + $0x6b8] sm:$0xff] %vm1376_vm2, %v1360_v20  ;;  %v1952_v59 = vld [vmem:[%s11151_s2 + $0x430] sm:$0xff] }
 0x1ee   :  { %3572 = vmatpush2.msra.mxu0 %v1982_v52  ;;  %3471 = vmatmul.mubr.f32.gmra.mxu1 %v9163_v54  ;;  %v9406_v12 = vpop.f32.mrf.mxu0  ;;  %v1785_v52 = vld [vmem:[#allocation2 + $0x5f8] sm:$0xff] }
 0x1ef   :  { %3238 = vmatmul.mubr.f32.gmra.mxu0 %v9161_v45  ;;  %3804 = vmatprep.subr.mxu1 %v2175_v13  ;;  %1590 = vst [vmem:[#allocation2 + $0x6e0] sm:$0xff] %v9406_v12  ;;  %v9413_v54 = vpop.f32.mrf.mxu1  ;;  %v2169_v45 = vld [vmem:[%s11151_s2 + $0xaf8] sm:$0xff]  ;;  %v1947_v13 = vld [vmem:[%s11151_s2 + $0x408] sm:$0xff] }
 0x1f0   :  { %3243 = vmatprep.mubr.f32.mxu0 %v9201_v17  ;;  %5721 = vmatprep.mubr.msk.f32.mxu1 %vm1376_vm2, %v1753_v36  ;;  %1592 = vst [vmem:[#allocation2 + $0x6f0] sm:$0xff] %v9413_v54  ;;  %v9421_v19 = vpop.f32.mrf.mxu0  ;;  %v1971_v17 = vld [vmem:[%s11151_s2 + $0x4c8] sm:$0xff] }
 0x1f1   :  { %3805 = vmatpush2.msra.mxu1 %v2174_v22  ;;  %3573 = vmatprep.subr.mxu0 %v1977_v0  ;;  %1591 = vst [vmem:[#allocation2 + $0x6e8] sm:$0xff] %v9421_v19  ;;  %v1366_v39 = vpop.f32.mrf.mxu1 }
 0x1f2   :  { %3574 = vmatpush2.msra.mxu0 %v1976_v10  ;;  %3477 = vmatmul.mubr.f32.gmra.mxu1 %v9189_v9  ;;  %1593 = vst.msk [vmem:[#allocation2 + $0x6f8] sm:$0xff] %vm1376_vm2, %v1366_v39  ;;  %v2665_v38 = vpop.f32.mrf.mxu0  ;;  %v2163_v9 = vld [vmem:[%s11151_s2 + $0xac8] sm:$0xff] }
 0x1f3   :  { %3244 = vmatmul.mubr.f32.gmra.mxu0 %v9187_v37  ;;  %3806 = vmatprep.subr.mxu1 %v2169_v45  ;;  %v2162_v37 = vld [vmem:[%s11151_s2 + $0xac0] sm:$0xff]  ;;  %v2139_v45 = vld [vmem:[%s11151_s2 + $0xa08] sm:$0xff] }
 0x1f4   :  { %3249 = vmatprep.mubr.f32.mxu0 %v9227_v24  ;;  %5722 = vmatprep.mubr.msk.f32.mxu1 %vm1376_vm2, %v1761_v41  ;;  %v2898_v40 = vpop.f32.mrf.mxu1  ;;  %v2667_v6 = vpop.f32.mrf.mxu0  ;;  %v1793_v41 = vld [vmem:[#allocation2 + $0x638] sm:$0xff] }
 0x1f5   :  { %3575 = vmatprep.subr.mxu0 %v1971_v17  ;;  %3807 = vmatpush2.msra.mxu1 %v2168_v34  ;;  %v9441_v49 = vadd.f32 %v2898_v40, %v2665_v38  ;;  %v1941_v17 = vld [vmem:[%s11151_s2 + $0x3d8] sm:$0xff] }
 0x1f6   :  { %3576 = vmatpush2.msra.mxu0 %v1970_v2  ;;  %3808 = vmatprep.subr.mxu1 %v2163_v9  ;;  %v2900_v18 = vpop.f32.mrf.mxu1  ;;  %v2671_v24 = vpop.f32.mrf.mxu0  ;;  %v2133_v40 = vld [vmem:[%s11151_s2 + $0x9d8] sm:$0xff] }
 0x1f7   :  { %3250 = vmatmul.mubr.f32.gmra.mxu0 %v9212_v7  ;;  %3483 = vmatmul.mubr.f32.gmra.mxu1 %v9219_v3  ;;  %v9451_v28 = vadd.f32 %v2900_v18, %v2667_v6  ;;  %v1959_v3 = vld [vmem:[%s11151_s2 + $0x468] sm:$0xff] }
 0x1f8   :  { %3809 = vmatpush2.msra.mxu1 %v2162_v37  ;;  %3255 = vmatprep.mubr.f32.mxu0 %v9253_v16  ;;  %v2904_v63 = vpop.f32.mrf.mxu1  ;;  %v2673_v27 = vpop.f32.mrf.mxu0  ;;  %v2132_v37 = vld [vmem:[%s11151_s2 + $0x9d0] sm:$0xff] }
 0x1f9   :  { %5723 = vmatprep.mubr.msk.f32.mxu1 %vm1376_vm2, %v1769_v46  ;;  %3577 = vmatprep.subr.mxu0 %v1965_v21  ;;  %v9461_v7 = vadd.f32 %v2904_v63, %v2671_v24  ;;  %v1801_v24 = vld [vmem:[#allocation2 + $0x678] sm:$0xff] }
 0x1fa   :  { %3578 = vmatpush2.msra.mxu0 %v1964_v51  ;;  %3810 = vmatprep.subr.mxu1 %v2157_v5  ;;  %v2906_v42 = vpop.f32.mrf.mxu1  ;;  %v2677_v16 = vpop.f32.mrf.mxu0 }
 0x1fb   :  { %3256 = vmatmul.mubr.f32.gmra.mxu0 %v9238_v1  ;;  %3489 = vmatmul.mubr.f32.gmra.mxu1 %v9248_v32  ;;  %v9474_v8 = vadd.f32 %v2906_v42, %v2673_v27  ;;  %v1929_v27 = vld [vmem:[%s11151_s2 + $0x378] sm:$0xff] }
 0x1fc   :  { %3579 = vmatprep.subr.mxu0 %v1959_v3  ;;  %3811 = vmatpush2.msra.mxu1 %v2156_v61  ;;  %v2910_v1 = vpop.f32.mrf.mxu1  ;;  %v2679_v33 = vpop.f32.mrf.mxu0  ;;  %v1809_v42 = vld [vmem:[#allocation2 + $0x6b8] sm:$0xff] }
 0x1fd   :  { %3261 = vmatprep.mubr.f32.mxu0 %v9285_v43  ;;  %5724 = vmatprep.mubr.msk.f32.mxu1 %vm1376_vm2, %v1777_v56  ;;  %v9484_v32 = vadd.f32 %v2910_v1, %v2677_v16  ;;  %v1928_v16 = vld [vmem:[%s11151_s2 + $0x370] sm:$0xff] }
 0x1fe   :  { %3580 = vmatpush2.msra.mxu0 %v1958_v4  ;;  %3812 = vmatprep.subr.mxu1 %v2151_v25  ;;  %v2912_v60 = vpop.f32.mrf.mxu1  ;;  %v2683_v31 = vpop.f32.mrf.mxu0 }
 0x1ff   :  { %3813 = vmatpush2.msra.mxu1 %v2150_v44  ;;  %3262 = vmatmul.mubr.f32.gmra.mxu0 %v9271_v47  ;;  %v9493_v43 = vadd.f32 %v2912_v60, %v2679_v33  ;;  %v2144_v47 = vld [vmem:[%s11151_s2 + $0xa30] sm:$0xff]  ;;  %v1923_v44 = vld [vmem:[%s11151_s2 + $0x348] sm:$0xff]  ;;  %v1922_v60 = vld [vmem:[%s11151_s2 + $0x340] sm:$0xff] }
 0x200   :  { %3495 = vmatmul.mubr.f32.gmra.mxu1 %v9273_v11  ;;  %3581 = vmatprep.subr.mxu0 %v1953_v15  ;;  %v2916_v20 = vpop.f32.mrf.mxu1  ;;  %v2685_v22 = vpop.f32.mrf.mxu0  ;;  %v1946_v11 = vld [vmem:[%s11151_s2 + $0x400] sm:$0xff]  ;;  %v1817_v15 = vld [vmem:[#allocation2 + $0x6f8] sm:$0xff] }
 0x201   :  { %3267 = vmatprep.mubr.f32.mxu0 %v9311_v14  ;;  %5725 = vmatprep.mubr.msk.f32.mxu1 %vm1376_vm2, %v1785_v52  ;;  %v9507_v0 = vadd.f32 %v2916_v20, %v2683_v31  ;;  %v2138_v14 = vld [vmem:[%s11151_s2 + $0xa00] sm:$0xff]  ;;  %v1917_v52 = vld [vmem:[%s11151_s2 + $0x318] sm:$0xff]  ;;  %v1916_v20 = vld [vmem:[%s11151_s2 + $0x310] sm:$0xff] }
 0x202   :  { %3582 = vmatpush2.msra.mxu0 %v1952_v59  ;;  %3814 = vmatprep.subr.mxu1 %v2145_v57  ;;  %v2918_v36 = vpop.f32.mrf.mxu1  ;;  %v2689_v10 = vpop.f32.mrf.mxu0 }
 0x203   :  { %3583 = vmatprep.subr.mxu0 %v1947_v13  ;;  %3815 = vmatpush2.msra.mxu1 %v2144_v47  ;;  %v9515_v39 = vadd.f32 %v2918_v36, %v2685_v22  ;;  %v2109_v22 = vld [vmem:[%s11151_s2 + $0x918] sm:$0xff]  ;;  %v2108_v36 = vld [vmem:[%s11151_s2 + $0x910] sm:$0xff] }
 0x204   :  { %3268 = vmatmul.mubr.f32.gmra.mxu0 %v9297_v58  ;;  %3501 = vmatmul.mubr.f32.gmra.mxu1 %v9303_v26  ;;  %v2922_v34 = vpop.f32.mrf.mxu1  ;;  %v2691_v38 = vpop.f32.mrf.mxu0  ;;  %v1940_v58 = vld [vmem:[%s11151_s2 + $0x3d0] sm:$0xff] }
 0x205   :  { %3584 = vmatpush2.msra.mxu0 %v1946_v11  ;;  %3273 = vmatprep.mubr.f32.mxu0 %v9337_v23  ;;  %v9526_v2 = vadd.f32 %v2922_v34, %v2689_v10  ;;  %v1935_v23 = vld [vmem:[%s11151_s2 + $0x3a8] sm:$0xff] }
 0x206   :  { %5726 = vmatprep.mubr.msk.f32.mxu1 %vm1376_vm2, %v1793_v41  ;;  %3816 = vmatprep.subr.mxu1 %v2139_v45  ;;  %v2924_v26 = vpop.f32.mrf.mxu1  ;;  %v2695_v9 = vpop.f32.mrf.mxu0  ;;  %v5793_v45 = vld [vmem:[#allocation2 + $0x8] sm:$0xff]  ;;  %v5795_v41 = vld [vmem:[#allocation2] sm:$0xff] }
 0x207   :  { %3817 = vmatpush2.msra.mxu1 %v2138_v14  ;;  %3585 = vmatprep.subr.mxu0 %v1941_v17  ;;  %v9535_v6 = vadd.f32 %v2924_v26, %v2691_v38  ;;  %v2295_v14 = vld [vmem:[%s11151_s2 + $0xee8] sm:$0xff] }
 0x208   :  { %3274 = vmatmul.mubr.f32.gmra.mxu0 %v9322_v53  ;;  %3507 = vmatmul.mubr.f32.gmra.mxu1 %v9332_v55  ;;  %v2928_v21 = vpop.f32.mrf.mxu1  ;;  %v2697_v18 = vpop.f32.mrf.mxu0  ;;  %v1934_v53 = vld [vmem:[%s11151_s2 + $0x3a0] sm:$0xff]  ;;  %v2127_v55 = vld [vmem:[%s11151_s2 + $0x9a8] sm:$0xff] }
 0x209   :  { %3586 = vmatpush2.msra.mxu0 %v1940_v58  ;;  %3279 = vmatprep.mubr.f32.mxu0 %v9366_v30  ;;  %v9549_v51 = vadd.f32 %v2928_v21, %v2695_v9  ;;  %v2126_v30 = vld [vmem:[%s11151_s2 + $0x9a0] sm:$0xff]  ;;  %v2487_v26 = vld [vmem:[%s11151_s2 + $0x14e8] sm:$0xff] }
 0x20a   :  { %5727 = vmatprep.mubr.msk.f32.mxu1 %vm1376_vm2, %v1801_v24  ;;  %3818 = vmatprep.subr.mxu1 %v2133_v40  ;;  %v2930_v5 = vpop.f32.mrf.mxu1  ;;  %v2701_v46 = vpop.f32.mrf.mxu0  ;;  %v2294_v58 = vld [vmem:[%s11151_s2 + $0xee0] sm:$0xff]  ;;  %v5796_v40 = vld [vmem:[#allocation2 + $0x10] sm:$0xff]  ;;  %v5798_v24 = vld [vmem:[#allocation2 + $0x58] sm:$0xff] }
 0x20b   :  { %3587 = vmatprep.subr.mxu0 %v1935_v23  ;;  %3819 = vmatpush2.msra.mxu1 %v2132_v37  ;;  %v9555_v63 = vadd.f32 %v2930_v5, %v2697_v18  ;;  %v2486_v23 = vld [vmem:[%s11151_s2 + $0x14e0] sm:$0xff]  ;;  %v5797_v18 = vld [vmem:[#allocation2 + $0x48] sm:$0xff] }
 0x20c   :  { %3588 = vmatpush2.msra.mxu0 %v1934_v53  ;;  %3513 = vmatmul.mubr.f32.gmra.mxu1 %v9357_v35  ;;  %v2934_v3 = vpop.f32.mrf.mxu1  ;;  %v2703_v61 = vpop.f32.mrf.mxu0  ;;  %v2121_v35 = vld [vmem:[%s11151_s2 + $0x978] sm:$0xff] }
 0x20d   :  { %3280 = vmatmul.mubr.f32.gmra.mxu0 %v9355_v29  ;;  %3820 = vmatprep.subr.mxu1 %v2127_v55  ;;  %v9568_v4 = vadd.f32 %v2934_v3, %v2701_v46  ;;  %v2289_v53 = vld [vmem:[%s11151_s2 + $0xeb8] sm:$0xff] }
 0x20e   :  { %3285 = vmatprep.mubr.f32.mxu0 %v9395_v50  ;;  %5728 = vmatprep.mubr.msk.f32.mxu1 %vm1376_vm2, %v1809_v42  ;;  %v2936_v25 = vpop.f32.mrf.mxu1  ;;  %v2707_v56 = vpop.f32.mrf.mxu0  ;;  %v2120_v50 = vld [vmem:[%s11151_s2 + $0x970] sm:$0xff] }
 0x20f   :  { %3821 = vmatpush2.msra.mxu1 %v2126_v30  ;;  %3589 = vmatprep.subr.mxu0 %v1929_v27  ;;  %v9575_v29 = vadd.f32 %v2936_v25, %v2703_v61  ;;  %v5799_v30 = vld [vmem:[#allocation2 + $0x40] sm:$0xff]  ;;  %v2288_v27 = vld [vmem:[%s11151_s2 + $0xeb0] sm:$0xff]  ;;  %v2481_v61 = vld [vmem:[%s11151_s2 + $0x14b8] sm:$0xff] }
 0x210   :  { %3590 = vmatpush2.msra.mxu0 %v1928_v16  ;;  %3519 = vmatmul.mubr.f32.gmra.mxu1 %v9383_v48  ;;  %v2940_v1 = vpop.f32.mrf.mxu1  ;;  %v2709_v33 = vpop.f32.mrf.mxu0  ;;  %v2115_v48 = vld [vmem:[%s11151_s2 + $0x948] sm:$0xff]  ;;  %v5800_v42 = vld [vmem:[#allocation2 + $0x50] sm:$0xff] }
 0x211   :  { %3286 = vmatmul.mubr.f32.gmra.mxu0 %v9381_v62  ;;  %3822 = vmatprep.subr.mxu1 %v2121_v35  ;;  %v9591_v31 = vadd.f32 %v2940_v1, %v2707_v56  ;;  %v2114_v62 = vld [vmem:[%s11151_s2 + $0x940] sm:$0xff]  ;;  %v2283_v16 = vld [vmem:[%s11151_s2 + $0xe88] sm:$0xff] }
 0x212   :  { %3291 = vmatprep.mubr.f32.mxu0 %v9421_v19  ;;  %5729 = vmatprep.mubr.msk.f32.mxu1 %vm1376_vm2, %v1817_v15  ;;  %v2942_v59 = vpop.f32.mrf.mxu1  ;;  %v2713_v57 = vpop.f32.mrf.mxu0  ;;  %v5801_v56 = vld [vmem:[#allocation2 + $0x88] sm:$0xff] }
 0x213   :  { %3591 = vmatprep.subr.mxu0 %v1923_v44  ;;  %3823 = vmatpush2.msra.mxu1 %v2120_v50  ;;  %v9601_v13 = vadd.f32 %v2942_v59, %v2709_v33  ;;  %v5802_v44 = vld [vmem:[#allocation2 + $0x98] sm:$0xff]  ;;  %v2282_v50 = vld [vmem:[%s11151_s2 + $0xe80] sm:$0xff] }
 0x214   :  { %3592 = vmatpush2.msra.mxu0 %v1922_v60  ;;  %3824 = vmatprep.subr.mxu1 %v2115_v48  ;;  %v2946_v47 = vpop.f32.mrf.mxu1  ;;  %v2715_v19 = vpop.f32.mrf.mxu0  ;;  %v5803_v60 = vld [vmem:[#allocation2 + $0x80] sm:$0xff]  ;;  %v2480_v48 = vld [vmem:[%s11151_s2 + $0x14b0] sm:$0xff]  ;;  %v2277_v59 = vld [vmem:[%s11151_s2 + $0xe58] sm:$0xff] }
 0x215   :  { %3292 = vmatmul.mubr.f32.gmra.mxu0 %v9406_v12  ;;  %3525 = vmatmul.mubr.f32.gmra.mxu1 %v9413_v54  ;;  %v9611_v11 = vadd.f32 %v2946_v47, %v2713_v57  ;;  %v5794_v54 = vld [vmem:[#allocation2 + $0x18] sm:$0xff] }
 0x216   :  { %3825 = vmatpush2.msra.mxu1 %v2114_v62  ;;  %3593 = vmatprep.subr.mxu0 %v1917_v52  ;;  %v2948_v10 = vpop.f32.mrf.mxu1  ;;  %v2719_v12 = vpop.f32.mrf.mxu0  ;;  %v5804_v62 = vld [vmem:[#allocation2 + $0x90] sm:$0xff] }
 0x217   :  { %3595 = vmatprep.mubr.f32.mxu0 %v5793_v45  ;;  %3828 = vmatprep.mubr.f32.mxu1 %v5794_v54  ;;  %v9619_v17 = vadd.f32 %v2948_v10, %v2715_v19  ;;  %v2475_v19 = vld [vmem:[%s11151_s2 + $0x1488] sm:$0xff]  ;;  %v5807_v54 = vld [vmem:[#allocation2 + $0xc0] sm:$0xff] }
 0x218   :  { %3594 = vmatpush2.msra.mxu0 %v1916_v20  ;;  %3826 = vmatprep.subr.mxu1 %v2109_v22  ;;  %v2952_v34 = vpop.f32.mrf.mxu1  ;;  %v2721_v38 = vpop.f32.mrf.mxu0  ;;  %v5805_v20 = vld [vmem:[#allocation2 + $0xc8] sm:$0xff]  ;;  %v5806_v22 = vld [vmem:[#allocation2 + $0xd8] sm:$0xff] }
 0x219   :  { %3827 = vmatpush2.msra.mxu1 %v2108_v36  ;;  %3596 = vmatmul.mubr.f32.vlgmr.msra.gmra.mxu0 %v5795_v41  ;;  %v9627_v9 = vadd.f32 %v2952_v34, %v2719_v12  ;;  %v2276_v36 = vld [vmem:[%s11151_s2 + $0xe50] sm:$0xff] }
 0x21a   :  { %3829 = vmatmul.mubr.f32.vlgmr.msra.gmra.mxu1 %v5796_v40  ;;  %3997 = vmatprep.subr.mxu0 %v2295_v14  ;;  %v2954_v37 = vpop.f32.mrf.mxu1  ;;  %v2725_v21 = vpop.f32.mrf.mxu0  ;;  %v2271_v14 = vld [vmem:[%s11151_s2 + $0xe28] sm:$0xff]  ;;  %v5808_v41 = vld [vmem:[#allocation2 + $0xd0] sm:$0xff] }
 0x21b   :  { %3601 = vmatprep.mubr.f32.mxu0 %v5797_v18  ;;  %3834 = vmatprep.mubr.f32.mxu1 %v5798_v24  ;;  %v9635_v55 = vadd.f32 %v2954_v37, %v2721_v38  ;;  %v2474_v38 = vld [vmem:[%s11151_s2 + $0x1480] sm:$0xff]  ;;  %v5809_v37 = vld [vmem:[#allocation2 + $0x108] sm:$0xff] }
 0x21c   :  { %3998 = vmatpush1.msra.mxu0 %v2294_v58  ;;  %4230 = vmatprep.subr.mxu1 %v2487_v26  ;;  %v2958_v5 = vpop.f32.mrf.mxu1  ;;  %v2727_v46 = vpop.f32.mrf.mxu0  ;;  %v2270_v58 = vld [vmem:[%s11151_s2 + $0xe20] sm:$0xff] }
 0x21d   :  { %4231 = vmatpush1.msra.mxu1 %v2486_v23  ;;  %3602 = vmatmul.mubr.f32.gmra.mxu0 %v5799_v30  ;;  %v9640_v3 = vadd.f32 %v2958_v5, %v2725_v21  ;;  %v2469_v23 = vld [vmem:[%s11151_s2 + $0x1458] sm:$0xff]  ;;  %v2468_v30 = vld [vmem:[%s11151_s2 + $0x1450] sm:$0xff] }
 0x21e   :  { %3835 = vmatmul.mubr.f32.gmra.mxu1 %v5800_v42  ;;  %3999 = vmatprep.subr.mxu0 %v2289_v53  ;;  %v2960_v35 = vpop.f32.mrf.mxu1  ;;  %v2731_v25 = vpop.f32.mrf.mxu0  ;;  %v5810_v21 = vld [vmem:[#allocation2 + $0x118] sm:$0xff]  ;;  %v2264_v42 = vld [vmem:[%s11151_s2 + $0xdf0] sm:$0xff] }
 0x21f   :  { %3607 = vmatprep.mubr.f32.mxu0 %v5801_v56  ;;  %3840 = vmatprep.mubr.f32.mxu1 %v5802_v44  ;;  %v9651_v1 = vadd.f32 %v2960_v35, %v2727_v46  ;;  %v2265_v5 = vld [vmem:[%s11151_s2 + $0xdf8] sm:$0xff]  ;;  %v5813_v56 = vld [vmem:[#allocation2 + $0x148] sm:$0xff] }
 0x220   :  { %4000 = vmatpush1.msra.mxu0 %v2288_v27  ;;  %4232 = vmatprep.subr.mxu1 %v2481_v61  ;;  %v2964_v33 = vpop.f32.mrf.mxu1  ;;  %v2733_v15 = vpop.f32.mrf.mxu0  ;;  %v5811_v27 = vld [vmem:[#allocation2 + $0x100] sm:$0xff]  ;;  %v5812_v61 = vld [vmem:[#allocation2 + $0x110] sm:$0xff]  ;;  %v5814_v44 = vld [vmem:[#allocation2 + $0x158] sm:$0xff] }
 0x221   :  { %4001 = vmatprep.subr.mxu0 %v2283_v16  ;;  %3608 = vmatmul.mubr.f32.gmra.mxu0 %v5803_v60  ;;  %v9659_v57 = vadd.f32 %v2964_v33, %v2731_v25  ;;  %v2463_v25 = vld [vmem:[%s11151_s2 + $0x1428] sm:$0xff] }
 0x222   :  { %3841 = vmatmul.mubr.f32.gmra.mxu1 %v5804_v62  ;;  %4002 = vmatpush1.msra.mxu0 %v2282_v50  ;;  %v2966_v52 = vpop.f32.mrf.mxu1  ;;  %v2737_v47 = vpop.f32.mrf.mxu0  ;;  %v2259_v60 = vld [vmem:[%s11151_s2 + $0xdc8] sm:$0xff]  ;;  %v5815_v62 = vld [vmem:[#allocation2 + $0x140] sm:$0xff] }
 0x223   :  { %3613 = vmatprep.mubr.f32.mxu0 %v5805_v20  ;;  %3846 = vmatprep.mubr.f32.mxu1 %v5806_v22  ;;  %v9667_v10 = vadd.f32 %v2966_v52, %v2733_v15  ;;  %v5816_v52 = vld [vmem:[#allocation2 + $0x150] sm:$0xff]  ;;  %v2457_v22 = vld [vmem:[%s11151_s2 + $0x13f8] sm:$0xff] }
 0x224   :  { %4233 = vmatpush1.msra.mxu1 %v2480_v48  ;;  %4003 = vmatprep.subr.mxu0 %v2277_v59  ;;  %v2970_v12 = vpop.f32.mrf.mxu1  ;;  %v2739_v45 = vpop.f32.mrf.mxu0  ;;  %v2462_v59 = vld [vmem:[%s11151_s2 + $0x1420] sm:$0xff] }
 0x225   :  { %3614 = vmatmul.mubr.f32.gmra.mxu0 %v5807_v54  ;;  %v9672_v34 = vadd.f32 %v2970_v12, %v2737_v47  ;;  %4234 = vmatprep.subr.mxu1 %v2475_v19  ;;  %v2258_v47 = vld [vmem:[%s11151_s2 + $0xdc0] sm:$0xff]  ;;  %v5818_v12 = vld [vmem:[#allocation2 + $0x198] sm:$0xff] }
 0x226   :  { %3847 = vmatmul.mubr.f32.gmra.mxu1 %v5808_v41  ;;  %4004 = vmatpush1.msra.mxu0 %v2276_v36  ;;  %v2972_v26 = vpop.f32.mrf.mxu1  ;;  %v2743_v40 = vpop.f32.mrf.mxu0  ;;  %v5817_v36 = vld [vmem:[#allocation2 + $0x188] sm:$0xff] }
 0x227   :  { %3619 = vmatprep.mubr.f32.mxu0 %v5809_v37  ;;  %3852 = vmatprep.mubr.f32.mxu1 %v5810_v21  ;;  %v9683_v18 = vadd.f32 %v2972_v26, %v2739_v45  ;;  %v5819_v26 = vld [vmem:[#allocation2 + $0x180] sm:$0xff] }
 0x228   :  { %4005 = vmatprep.subr.mxu0 %v2271_v14  ;;  %4235 = vmatpush1.msra.mxu1 %v2474_v38  ;;  %v2976_v24 = vpop.f32.mrf.mxu1  ;;  %v2745_v53 = vpop.f32.mrf.mxu0  ;;  %v2253_v38 = vld [vmem:[%s11151_s2 + $0xd98] sm:$0xff] }
 0x229   :  { %4006 = vmatpush1.msra.mxu0 %v2270_v58  ;;  %v9688_v46 = vadd.f32 %v2976_v24, %v2743_v40  ;;  %4236 = vmatprep.subr.mxu1 %v2469_v23  ;;  %v2456_v58 = vld [vmem:[%s11151_s2 + $0x13f0] sm:$0xff]  ;;  %v2451_v24 = vld [vmem:[%s11151_s2 + $0x13c8] sm:$0xff] }
 0x22a   :  { %3620 = vmatmul.mubr.f32.gmra.mxu0 %v5811_v27  ;;  %3853 = vmatmul.mubr.f32.gmra.mxu1 %v5812_v61  ;;  %v2978_v16 = vpop.f32.mrf.mxu1  ;;  %v2749_v35 = vpop.f32.mrf.mxu0  ;;  %v5820_v40 = vld [vmem:[#allocation2 + $0x190] sm:$0xff]  ;;  %v2247_v27 = vld [vmem:[%s11151_s2 + $0xd68] sm:$0xff] }
 0x22b   :  { %3625 = vmatprep.mubr.f32.mxu0 %v5813_v56  ;;  %3858 = vmatprep.mubr.f32.mxu1 %v5814_v44  ;;  %v9699_v50 = vadd.f32 %v2978_v16, %v2745_v53  ;;  %v2252_v23 = vld [vmem:[%s11151_s2 + $0xd90] sm:$0xff]  ;;  %v5821_v53 = vld [vmem:[#allocation2 + $0x1c8] sm:$0xff]  ;;  %v2246_v16 = vld [vmem:[%s11151_s2 + $0xd60] sm:$0xff] }
 0x22c   :  { %4007 = vmatprep.subr.mxu0 %v2265_v5  ;;  %4237 = vmatpush1.msra.mxu1 %v2468_v30  ;;  %v2982_v33 = vpop.f32.mrf.mxu1  ;;  %v2751_v15 = vpop.f32.mrf.mxu0  ;;  %v5822_v5 = vld [vmem:[#allocation2 + $0x1d8] sm:$0xff]  ;;  %v5824_v56 = vld [vmem:[#allocation2 + $0x1d0] sm:$0xff] }
 0x22d   :  { %4008 = vmatpush1.msra.mxu0 %v2264_v42  ;;  %v9704_v48 = vadd.f32 %v2982_v33, %v2749_v35  ;;  %4238 = vmatprep.subr.mxu1 %v2463_v25  ;;  %v5823_v25 = vld [vmem:[#allocation2 + $0x1c0] sm:$0xff]  ;;  %v2241_v44 = vld [vmem:[%s11151_s2 + $0xd38] sm:$0xff] }
 0x22e   :  { %3626 = vmatmul.mubr.f32.gmra.mxu0 %v5815_v62  ;;  %3859 = vmatmul.mubr.f32.gmra.mxu1 %v5816_v52  ;;  %v2984_v19 = vpop.f32.mrf.mxu1  ;;  %v2755_v20 = vpop.f32.mrf.mxu0  ;;  %v5826_v52 = vld [vmem:[#allocation2 + $0x218] sm:$0xff] }
 0x22f   :  { %3631 = vmatprep.mubr.f32.mxu0 %v5817_v36  ;;  %3864 = vmatprep.mubr.f32.mxu1 %v5818_v12  ;;  %v9715_v45 = vadd.f32 %v2984_v19, %v2751_v15  ;;  %v2445_v36 = vld [vmem:[%s11151_s2 + $0x1398] sm:$0xff]  ;;  %v5827_v12 = vld [vmem:[#allocation2 + $0x200] sm:$0xff] }
 0x230   :  { %4009 = vmatprep.subr.mxu0 %v2259_v60  ;;  %v2988_v54 = vpop.f32.mrf.mxu1  ;;  %v2757_v14 = vpop.f32.mrf.mxu0  ;;  %4239 = vmatpush1.msra.mxu1 %v2462_v59  ;;  %v2450_v60 = vld [vmem:[%s11151_s2 + $0x13c0] sm:$0xff]  ;;  %v5825_v59 = vld [vmem:[#allocation2 + $0x208] sm:$0xff] }
 0x231   :  { %4010 = vmatpush1.msra.mxu0 %v2258_v47  ;;  %v9720_v41 = vadd.f32 %v2988_v54, %v2755_v20  ;;  %4240 = vmatprep.subr.mxu1 %v2457_v22  ;;  %v2240_v20 = vld [vmem:[%s11151_s2 + $0xd30] sm:$0xff] }
 0x232   :  { %3632 = vmatmul.mubr.f32.gmra.mxu0 %v5819_v26  ;;  %3865 = vmatmul.mubr.f32.gmra.mxu1 %v5820_v40  ;;  %v2990_v37 = vpop.f32.mrf.mxu1  ;;  %v2761_v21 = vpop.f32.mrf.mxu0  ;;  %v5828_v54 = vld [vmem:[#allocation2 + $0x210] sm:$0xff]  ;;  %v5829_v40 = vld [vmem:[#allocation2 + $0x248] sm:$0xff] }
 0x233   :  { %3637 = vmatprep.mubr.f32.mxu0 %v5821_v53  ;;  %3870 = vmatprep.mubr.f32.mxu1 %v5822_v5  ;;  %v9731_v30 = vadd.f32 %v2990_v37, %v2757_v14  ;;  %v2235_v14 = vld [vmem:[%s11151_s2 + $0xd08] sm:$0xff]  ;;  %v2444_v26 = vld [vmem:[%s11151_s2 + $0x1390] sm:$0xff]  ;;  %v2229_v5 = vld [vmem:[%s11151_s2 + $0xcd8] sm:$0xff] }
 0x234   :  { %4011 = vmatprep.subr.mxu0 %v2253_v38  ;;  %v2994_v61 = vpop.f32.mrf.mxu1  ;;  %v2763_v42 = vpop.f32.mrf.mxu0  ;;  %4241 = vmatpush1.msra.mxu1 %v2456_v58 }
 0x235   :  { %4012 = vmatpush1.msra.mxu0 %v2252_v23  ;;  %v9739_v35 = vadd.f32 %v2994_v61, %v2761_v21  ;;  %4242 = vmatprep.subr.mxu1 %v2451_v24  ;;  %v5830_v23 = vld [vmem:[#allocation2 + $0x258] sm:$0xff]  ;;  %v2234_v21 = vld [vmem:[%s11151_s2 + $0xd00] sm:$0xff] }
 0x236   :  { %3638 = vmatmul.mubr.f32.gmra.mxu0 %v5823_v25  ;;  %3871 = vmatmul.mubr.f32.gmra.mxu1 %v5824_v56  ;;  %v2996_v33 = vpop.f32.mrf.mxu1  ;;  %v2767_v15 = vpop.f32.mrf.mxu0  ;;  %v5831_v61 = vld [vmem:[#allocation2 + $0x240] sm:$0xff] }
 0x237   :  { %4013 = vmatprep.subr.mxu0 %v2247_v27  ;;  %3643 = vmatprep.mubr.f32.mxu0 %v5825_v59  ;;  %v9747_v62 = vadd.f32 %v2996_v33, %v2763_v42  ;;  %v5832_v42 = vld [vmem:[#allocation2 + $0x250] sm:$0xff]  ;;  %v5833_v33 = vld [vmem:[#allocation2 + $0x288] sm:$0xff] }
 0x238   :  { %3876 = vmatprep.mubr.f32.mxu1 %v5826_v52  ;;  %4014 = vmatpush1.msra.mxu0 %v2246_v16  ;;  %v3000_v47 = vpop.f32.mrf.mxu1  ;;  %v2769_v19 = vpop.f32.mrf.mxu0  ;;  %v2228_v16 = vld [vmem:[%s11151_s2 + $0xcd0] sm:$0xff] }
 0x239   :  { %4015 = vmatprep.subr.mxu0 %v2241_v44  ;;  %v9752_v22 = vadd.f32 %v3000_v47, %v2767_v15  ;;  %4243 = vmatpush1.msra.mxu1 %v2450_v60  ;;  %v2439_v44 = vld [vmem:[%s11151_s2 + $0x1368] sm:$0xff]  ;;  %v5834_v60 = vld [vmem:[#allocation2 + $0x298] sm:$0xff] }
 0x23a   :  { %3644 = vmatmul.mubr.f32.gmra.mxu0 %v5827_v12  ;;  %3877 = vmatmul.mubr.f32.gmra.mxu1 %v5828_v54  ;;  %v3002_v38 = vpop.f32.mrf.mxu1  ;;  %v2773_v58 = vpop.f32.mrf.mxu0  ;;  %v2223_v47 = vld [vmem:[%s11151_s2 + $0xca8] sm:$0xff]  ;;  %v5836_v12 = vld [vmem:[#allocation2 + $0x290] sm:$0xff]  ;;  %v2222_v54 = vld [vmem:[%s11151_s2 + $0xca0] sm:$0xff] }
 0x23b   :  { %3649 = vmatprep.mubr.f32.mxu0 %v5829_v40  ;;  %3882 = vmatprep.mubr.f32.mxu1 %v5830_v23  ;;  %v9763_v37 = vadd.f32 %v3002_v38, %v2769_v19  ;;  %v5838_v40 = vld [vmem:[#allocation2 + $0x2d8] sm:$0xff] }
 0x23c   :  { %4016 = vmatpush1.msra.mxu0 %v2240_v20  ;;  %v3006_v24 = vpop.f32.mrf.mxu1  ;;  %v2775_v53 = vpop.f32.mrf.mxu0  ;;  %4244 = vmatprep.subr.mxu1 %v2445_v36  ;;  %v2438_v20 = vld [vmem:[%s11151_s2 + $0x1360] sm:$0xff] }
 0x23d   :  { %4017 = vmatprep.subr.mxu0 %v2235_v14  ;;  %v9771_v27 = vadd.f32 %v3006_v24, %v2773_v58  ;;  %4245 = vmatpush1.msra.mxu1 %v2444_v26  ;;  %v5835_v36 = vld [vmem:[#allocation2 + $0x280] sm:$0xff]  ;;  %v2433_v58 = vld [vmem:[%s11151_s2 + $0x1338] sm:$0xff]  ;;  %v5837_v26 = vld [vmem:[#allocation2 + $0x2c8] sm:$0xff] }
 0x23e   :  { %3650 = vmatmul.mubr.f32.gmra.mxu0 %v5831_v61  ;;  %3883 = vmatmul.mubr.f32.gmra.mxu1 %v5832_v42  ;;  %v3008_v25 = vpop.f32.mrf.mxu1  ;;  %v2779_v56 = vpop.f32.mrf.mxu0  ;;  %v2432_v61 = vld [vmem:[%s11151_s2 + $0x1330] sm:$0xff]  ;;  %v5839_v42 = vld [vmem:[#allocation2 + $0x2c0] sm:$0xff] }
 0x23f   :  { %4018 = vmatpush1.msra.mxu0 %v2234_v21  ;;  %3655 = vmatprep.mubr.f32.mxu0 %v5833_v33  ;;  %v9779_v15 = vadd.f32 %v3008_v25, %v2775_v53  ;;  %v2217_v53 = vld [vmem:[%s11151_s2 + $0xc78] sm:$0xff]  ;;  %v2216_v25 = vld [vmem:[%s11151_s2 + $0xc70] sm:$0xff]  ;;  %v2427_v33 = vld [vmem:[%s11151_s2 + $0x1308] sm:$0xff] }
 0x240   :  { %3888 = vmatprep.mubr.f32.mxu1 %v5834_v60  ;;  %4019 = vmatprep.subr.mxu0 %v2229_v5  ;;  %v3012_v59 = vpop.f32.mrf.mxu1  ;;  %v2781_v52 = vpop.f32.mrf.mxu0  ;;  %v5841_v60 = vld [vmem:[#allocation2 + $0x308] sm:$0xff] }
 0x241   :  { %4020 = vmatpush1.msra.mxu0 %v2228_v16  ;;  %v9784_v19 = vadd.f32 %v3012_v59, %v2779_v56  ;;  %4246 = vmatprep.subr.mxu1 %v2439_v44  ;;  %v5840_v16 = vld [vmem:[#allocation2 + $0x2d0] sm:$0xff]  ;;  %v5842_v59 = vld [vmem:[#allocation2 + $0x318] sm:$0xff] }
 0x242   :  { %3656 = vmatmul.mubr.f32.gmra.mxu0 %v5835_v36  ;;  %3889 = vmatmul.mubr.f32.gmra.mxu1 %v5836_v12  ;;  %v3014_v14 = vpop.f32.mrf.mxu1  ;;  %v2785_v38 = vpop.f32.mrf.mxu0  ;;  %v2211_v36 = vld [vmem:[%s11151_s2 + $0xc48] sm:$0xff] }
 0x243   :  { %3661 = vmatprep.mubr.f32.mxu0 %v5837_v26  ;;  %3894 = vmatprep.mubr.f32.mxu1 %v5838_v40  ;;  %v9795_v23 = vadd.f32 %v3014_v14, %v2781_v52  ;;  %v5843_v14 = vld [vmem:[#allocation2 + $0x300] sm:$0xff] }
 0x244   :  { %4021 = vmatprep.subr.mxu0 %v2223_v47  ;;  %v3018_v21 = vpop.f32.mrf.mxu1  ;;  %v2787_v24 = vpop.f32.mrf.mxu0  ;;  %4247 = vmatpush1.msra.mxu1 %v2438_v20 }
 0x245   :  { %4022 = vmatpush1.msra.mxu0 %v2222_v54  ;;  %v9800_v5 = vadd.f32 %v3018_v21, %v2785_v38  ;;  %4248 = vmatprep.subr.mxu1 %v2433_v58  ;;  %v2426_v54 = vld [vmem:[%s11151_s2 + $0x1300] sm:$0xff]  ;;  %v5844_v38 = vld [vmem:[#allocation2 + $0x310] sm:$0xff]  ;;  %v2421_v21 = vld [vmem:[%s11151_s2 + $0x12d8] sm:$0xff] }
 0x246   :  { %3662 = vmatmul.mubr.f32.gmra.mxu0 %v5839_v42  ;;  %3895 = vmatmul.mubr.f32.gmra.mxu1 %v5840_v16  ;;  %v3020_v56 = vpop.f32.mrf.mxu1  ;;  %v2791_v44 = vpop.f32.mrf.mxu0  ;;  %v2210_v58 = vld [vmem:[%s11151_s2 + $0xc40] sm:$0xff] }
 0x247   :  { %3667 = vmatprep.mubr.f32.mxu0 %v5841_v60  ;;  %3900 = vmatprep.mubr.f32.mxu1 %v5842_v59  ;;  %v9811_v52 = vadd.f32 %v3020_v56, %v2787_v24  ;;  %v5845_v24 = vld [vmem:[#allocation2 + $0x348] sm:$0xff]  ;;  %v5848_v60 = vld [vmem:[#allocation2 + $0x350] sm:$0xff] }
 0x248   :  { %4023 = vmatprep.subr.mxu0 %v2217_v53  ;;  %v3024_v47 = vpop.f32.mrf.mxu1  ;;  %v2793_v20 = vpop.f32.mrf.mxu0  ;;  %4249 = vmatpush1.msra.mxu1 %v2432_v61  ;;  %v5846_v53 = vld [vmem:[#allocation2 + $0x358] sm:$0xff]  ;;  %v2204_v59 = vld [vmem:[%s11151_s2 + $0xc10] sm:$0xff] }
 0x249   :  { %4024 = vmatpush1.msra.mxu0 %v2216_v25  ;;  %v9816_v12 = vadd.f32 %v3024_v47, %v2791_v44  ;;  %4250 = vmatprep.subr.mxu1 %v2427_v33  ;;  %v2205_v25 = vld [vmem:[%s11151_s2 + $0xc18] sm:$0xff]  ;;  %v2420_v44 = vld [vmem:[%s11151_s2 + $0x12d0] sm:$0xff]  ;;  %v5847_v33 = vld [vmem:[#allocation2 + $0x340] sm:$0xff] }
 0x24a   :  { %3668 = vmatmul.mubr.f32.gmra.mxu0 %v5843_v14  ;;  %3901 = vmatmul.mubr.f32.gmra.mxu1 %v5844_v38  ;;  %v3026_v26 = vpop.f32.mrf.mxu1  ;;  %v2797_v40 = vpop.f32.mrf.mxu0  ;;  %v5850_v14 = vld [vmem:[#allocation2 + $0x398] sm:$0xff] }
 0x24b   :  { %3673 = vmatprep.mubr.f32.mxu0 %v5845_v24  ;;  %3906 = vmatprep.mubr.f32.mxu1 %v5846_v53  ;;  %v9827_v61 = vadd.f32 %v3026_v26, %v2793_v20  ;;  %v5851_v53 = vld [vmem:[#allocation2 + $0x380] sm:$0xff] }
 0x24c   :  { %4025 = vmatprep.subr.mxu0 %v2211_v36  ;;  %v3030_v42 = vpop.f32.mrf.mxu1  ;;  %v2799_v16 = vpop.f32.mrf.mxu0  ;;  %4251 = vmatpush1.msra.mxu1 %v2426_v54  ;;  %v2415_v36 = vld [vmem:[%s11151_s2 + $0x12a8] sm:$0xff] }
 0x24d   :  { %4026 = vmatpush1.msra.mxu0 %v2210_v58  ;;  %v9832_v56 = vadd.f32 %v3030_v42, %v2797_v40  ;;  %4252 = vmatprep.subr.mxu1 %v2421_v21  ;;  %v5849_v54 = vld [vmem:[#allocation2 + $0x388] sm:$0xff]  ;;  %v2390_v21 = vld [vmem:[%s11151_s2 + $0x11e0] sm:$0xff]  ;;  %v5852_v42 = vld [vmem:[#allocation2 + $0x390] sm:$0xff] }
 0x24e   :  { %3674 = vmatmul.mubr.f32.gmra.mxu0 %v5847_v33  ;;  %3907 = vmatmul.mubr.f32.gmra.mxu1 %v5848_v60  ;;  %v3032_v47 = vpop.f32.mrf.mxu1  ;;  %v2803_v20 = vpop.f32.mrf.mxu0  ;;  %v2391_v58 = vld [vmem:[%s11151_s2 + $0x11e8] sm:$0xff] }
 0x24f   :  { %3679 = vmatprep.mubr.f32.mxu0 %v5849_v54  ;;  %3912 = vmatprep.mubr.f32.mxu1 %v5850_v14  ;;  %v9843_v38 = vadd.f32 %v3032_v47, %v2799_v16  ;;  %v2385_v16 = vld [vmem:[%s11151_s2 + $0x11b8] sm:$0xff]  ;;  %v5853_v60 = vld [vmem:[#allocation2 + $0x3c8] sm:$0xff]  ;;  %v2384_v54 = vld [vmem:[%s11151_s2 + $0x11b0] sm:$0xff] }
 0x250   :  { %4027 = vmatprep.subr.mxu0 %v2205_v25  ;;  %v3036_v26 = vpop.f32.mrf.mxu1  ;;  %v2805_v40 = vpop.f32.mrf.mxu0  ;;  %4253 = vmatpush1.msra.mxu1 %v2420_v44  ;;  %v2414_v44 = vld [vmem:[%s11151_s2 + $0x12a0] sm:$0xff]  ;;  %v5854_v47 = vld [vmem:[#allocation2 + $0x3d8] sm:$0xff] }
 0x251   :  { %4028 = vmatpush1.msra.mxu0 %v2204_v59  ;;  %v9851_v24 = vadd.f32 %v3036_v26, %v2803_v20  ;;  %4254 = vmatprep.subr.mxu1 %v2415_v36  ;;  %v5855_v26 = vld [vmem:[#allocation2 + $0x3c0] sm:$0xff] }
 0x252   :  { %3680 = vmatmul.mubr.f32.gmra.mxu0 %v5851_v53  ;;  %3913 = vmatmul.mubr.f32.gmra.mxu1 %v5852_v42  ;;  %v3038_v25 = vpop.f32.mrf.mxu1  ;;  %v2809_v33 = vpop.f32.mrf.mxu0 }
 0x253   :  { %4029 = vmatprep.subr.mxu0 %v2391_v58  ;;  %3685 = vmatprep.mubr.f32.mxu0 %v5853_v60  ;;  %v9859_v59 = vadd.f32 %v3038_v25, %v2805_v40  ;;  %v2409_v58 = vld [vmem:[%s11151_s2 + $0x1278] sm:$0xff]  ;;  %v5856_v40 = vld [vmem:[#allocation2 + $0x3d0] sm:$0xff]  ;;  %v5857_v25 = vld [vmem:[#allocation2 + $0x408] sm:$0xff] }
 0x254   :  { %3918 = vmatprep.mubr.f32.mxu1 %v5854_v47  ;;  %4030 = vmatpush2.msra.mxu0 %v2390_v21  ;;  %v3042_v20 = vpop.f32.mrf.mxu1  ;;  %v2811_v36 = vpop.f32.mrf.mxu0  ;;  %v2379_v21 = vld [vmem:[%s11151_s2 + $0x1188] sm:$0xff]  ;;  %v2378_v60 = vld [vmem:[%s11151_s2 + $0x1180] sm:$0xff] }
 0x255   :  { %4031 = vmatprep.subr.mxu0 %v2385_v16  ;;  %v9864_v14 = vadd.f32 %v3042_v20, %v2809_v33  ;;  %4255 = vmatpush1.msra.mxu1 %v2414_v44  ;;  %v2408_v16 = vld [vmem:[%s11151_s2 + $0x1270] sm:$0xff]  ;;  %v5858_v33 = vld [vmem:[#allocation2 + $0x418] sm:$0xff] }
 0x256   :  { %3686 = vmatmul.mubr.f32.gmra.mxu0 %v5855_v26  ;;  %3919 = vmatmul.mubr.f32.gmra.mxu1 %v5856_v40  ;;  %v3044_v53 = vpop.f32.mrf.mxu1  ;;  %v2815_v42 = vpop.f32.mrf.mxu0  ;;  %v2373_v26 = vld [vmem:[%s11151_s2 + $0x1158] sm:$0xff] }
 0x257   :  { %11153 = vst [vmem:[#allocation6_spill] sm:$0xff] %v9864_v14  ;;  %3691 = vmatprep.mubr.f32.mxu0 %v5857_v25  ;;  %3924 = vmatprep.mubr.f32.mxu1 %v5858_v33  ;;  %v9875_v44 = vadd.f32 %v3044_v53, %v2811_v36  ;;  %v5859_v25 = vld [vmem:[#allocation2 + $0x400] sm:$0xff]  ;;  %v5860_v36 = vld [vmem:[#allocation2 + $0x410] sm:$0xff] }
 0x258   :  { %4032 = vmatpush2.msra.mxu0 %v2384_v54  ;;  %v3048_v47 = vpop.f32.mrf.mxu1  ;;  %v2817_v20 = vpop.f32.mrf.mxu0  ;;  %4256 = vmatprep.subr.mxu1 %v2409_v58  ;;  %v2372_v54 = vld [vmem:[%s11151_s2 + $0x1150] sm:$0xff]  ;;  %v2403_v58 = vld [vmem:[%s11151_s2 + $0x1248] sm:$0xff] }
 0x259   :  { %11154 = vst [vmem:[#allocation7_spill] sm:$0xff] %v9875_v44  ;;  %4033 = vmatprep.subr.mxu0 %v2379_v21  ;;  %v9883_v40 = vadd.f32 %v3048_v47, %v2815_v42  ;;  %4257 = vmatpush1.msra.mxu1 %v2408_v16  ;;  %v5861_v21 = vld [vmem:[#allocation2 + $0x448] sm:$0xff]  ;;  %v5862_v16 = vld [vmem:[#allocation2 + $0x458] sm:$0xff]  ;;  %v5867_v44 = vld [vmem:[#allocation2 + $0x480] sm:$0xff] }
 0x25a   :  { %3692 = vmatmul.mubr.f32.gmra.mxu0 %v5859_v25  ;;  %3925 = vmatmul.mubr.f32.gmra.mxu1 %v5860_v36  ;;  %v3050_v53 = vpop.f32.mrf.mxu1  ;;  %v2821_v33 = vpop.f32.mrf.mxu0  ;;  %v2367_v36 = vld [vmem:[%s11151_s2 + $0x1128] sm:$0xff] }
 0x25b   :  { %11155 = vst [vmem:[#allocation8_spill] sm:$0xff] %v9883_v40  ;;  %4034 = vmatpush2.msra.mxu0 %v2378_v60  ;;  %3697 = vmatprep.mubr.f32.mxu0 %v5861_v21  ;;  %v9891_v42 = vadd.f32 %v3050_v53, %v2817_v20  ;;  %v2402_v60 = vld [vmem:[%s11151_s2 + $0x1240] sm:$0xff]  ;;  %v5864_v20 = vld [vmem:[#allocation2 + $0x450] sm:$0xff] }
 0x25c   :  { %3930 = vmatprep.mubr.f32.mxu1 %v5862_v16  ;;  %4035 = vmatprep.subr.mxu0 %v2373_v26  ;;  %v3054_v47 = vpop.f32.mrf.mxu1  ;;  %v2823_v25 = vpop.f32.mrf.mxu0  ;;  %v5863_v21 = vld [vmem:[#allocation2 + $0x440] sm:$0xff]  ;;  %v5865_v16 = vld [vmem:[#allocation2 + $0x488] sm:$0xff] }
 0x25d   :  { %11156 = vst [vmem:[#allocation9_spill] sm:$0xff] %v9891_v42  ;;  %4036 = vmatpush2.msra.mxu0 %v2372_v54  ;;  %v9896_v40 = vadd.f32 %v3054_v47, %v2821_v33  ;;  %4258 = vmatprep.subr.mxu1 %v2403_v58  ;;  %v2366_v26 = vld [vmem:[%s11151_s2 + $0x1120] sm:$0xff]  ;;  %v2397_v33 = vld [vmem:[%s11151_s2 + $0x1218] sm:$0xff] }
 0x25e   :  { %3698 = vmatmul.mubr.f32.gmra.mxu0 %v5863_v21  ;;  %3931 = vmatmul.mubr.f32.gmra.mxu1 %v5864_v20  ;;  %v3056_v54 = vpop.f32.mrf.mxu1  ;;  %v2827_v53 = vpop.f32.mrf.mxu0  ;;  %v5866_v58 = vld [vmem:[#allocation2 + $0x498] sm:$0xff] }
 0x25f   :  { %11157 = vst [vmem:[#allocation10_spill] sm:$0xff] %v9896_v40  ;;  %3703 = vmatprep.mubr.f32.mxu0 %v5865_v16  ;;  %3936 = vmatprep.mubr.f32.mxu1 %v5866_v58  ;;  %v9907_v47 = vadd.f32 %v3056_v54, %v2823_v25  ;;  %v2361_v20 = vld [vmem:[%s11151_s2 + $0x10f8] sm:$0xff]  ;;  %v2396_v16 = vld [vmem:[%s11151_s2 + $0x1210] sm:$0xff] }
 0x260   :  { %4037 = vmatprep.subr.mxu0 %v2367_v36  ;;  %v3060_v21 = vpop.f32.mrf.mxu1  ;;  %v2829_v40 = vpop.f32.mrf.mxu0  ;;  %4259 = vmatpush1.msra.mxu1 %v2402_v60  ;;  %v5868_v25 = vld [vmem:[#allocation2 + $0x490] sm:$0xff]  ;;  %v2493_v54 = vld [vmem:[%s11151_s2 + $0x1518] sm:$0xf] }
 0x261   :  { %11158 = vst [vmem:[#allocation11_spill] sm:$0xff] %v9907_v47  ;;  %4038 = vmatpush2.msra.mxu0 %v2366_v26  ;;  %v9912_v42 = vadd.f32 %v3060_v21, %v2827_v53  ;;  %4260 = vmatprep.subr.mxu1 %v2397_v33  ;;  %v2360_v36 = vld [vmem:[%s11151_s2 + $0x10f0] sm:$0xff]  ;;  %v5869_v53 = vld [vmem:[#allocation2 + $0x4c8] sm:$0xff]  ;;  %v5870_v33 = vld [vmem:[#allocation2 + $0x4d8] sm:$0xff] }
 0x262   :  { %3704 = vmatmul.mubr.f32.gmra.mxu0 %v5867_v44  ;;  %3937 = vmatmul.mubr.f32.gmra.mxu1 %v5868_v25  ;;  %v3062_v60 = vpop.f32.mrf.mxu1  ;;  %v3131_v26 = vpop.f32.mrf.mxu0 }
 0x263   :  { %11159 = vst [vmem:[#allocation12_spill] sm:$0xff] %v9912_v42  ;;  %3709 = vmatprep.mubr.f32.mxu0 %v5869_v53  ;;  %3942 = vmatprep.mubr.f32.mxu1 %v5870_v33  ;;  %v9923_v58 = vadd.f32 %v3062_v60, %v2829_v40  ;;  %v3132_v44 = vadd.f32 %v3131_v26, %v9441_v49  ;;  %v2355_v42 = vld [vmem:[%s11151_s2 + $0x10c8] sm:$0xff]  ;;  %v2492_v40 = vld [vmem:[%s11151_s2 + $0x1510] sm:$0xf]  ;;  %v5871_v60 = vld [vmem:[#allocation2 + $0x4c0] sm:$0xff] }
 0x264   :  { %4039 = vmatprep.subr.mxu0 %v2361_v20  ;;  %v3364_v21 = vpop.f32.mrf.mxu1  ;;  %v3133_v25 = vpop.f32.mrf.mxu0  ;;  %4261 = vmatpush1.msra.mxu1 %v2396_v16  ;;  %v5872_v49 = vld [vmem:[#allocation2 + $0x4d0] sm:$0xff]  ;;  %v2354_v20 = vld [vmem:[%s11151_s2 + $0x10c0] sm:$0xff]  ;;  %v5873_v26 = vld [vmem:[#allocation2 + $0x508] sm:$0xff] }
 0x265   :  { %4040 = vmatpush2.msra.mxu0 %v2360_v36  ;;  %v3365_v47 = vadd.f32 %v3364_v21, %v3132_v44  ;;  %v3134_v14 = vadd.f32 %v3133_v25, %v9451_v28  ;;  %5730 = vmatprep.subr.msk.mxu1 %vm2580_vm3, %v2493_v54  ;;  %v2105_v28 = vld [vmem:[%s11151_s2 + $0x8f8] sm:$0xff] }
 0x266   :  { %3710 = vmatmul.mubr.f32.gmra.mxu0 %v5871_v60  ;;  %3943 = vmatmul.mubr.f32.gmra.mxu1 %v5872_v49  ;;  %v3366_v16 = vpop.f32.mrf.mxu1  ;;  %v3137_v36 = vpop.f32.mrf.mxu0  ;;  %v5874_v54 = vld [vmem:[#allocation2 + $0x518] sm:$0xff] }
 0x267   :  { %3715 = vmatprep.mubr.f32.mxu0 %v5873_v26  ;;  %3948 = vmatprep.mubr.f32.mxu1 %v5874_v54  ;;  %5395 = vst [vmem:[#allocation3] sm:$0xff] %v3365_v47  ;;  %v3367_v53 = vadd.f32 %v3366_v16, %v3134_v14  ;;  %v3138_v33 = vadd.f32 %v3137_v36, %v9461_v7  ;;  %v2349_v25 = vld [vmem:[%s11151_s2 + $0x1098] sm:$0xff]  ;;  %v5875_v26 = vld [vmem:[#allocation2 + $0x500] sm:$0xff]  ;;  %v5876_v14 = vld [vmem:[#allocation2 + $0x510] sm:$0xff] }
 0x268   :  { %4041 = vmatprep.subr.mxu0 %v2355_v42  ;;  %v3370_v44 = vpop.f32.mrf.mxu1  ;;  %v3139_v21 = vpop.f32.mrf.mxu0  ;;  %5731 = vmatpush2.msk.msra.mxu1 %vm2580_vm3, %v2492_v40  ;;  %v2348_v7 = vld [vmem:[%s11151_s2 + $0x1090] sm:$0xff]  ;;  %v5877_v40 = vld [vmem:[#allocation2 + $0x548] sm:$0xff] }
 0x269   :  { %4042 = vmatpush2.msra.mxu0 %v2354_v20  ;;  %5396 = vst [vmem:[#allocation3 + $0x8] sm:$0xff] %v3367_v53  ;;  %v3371_v60 = vadd.f32 %v3370_v44, %v3138_v33  ;;  %v3140_v49 = vadd.f32 %v3139_v21, %v9474_v8  ;;  %4696 = vmatprep.subr.mxu1 %v2105_v28  ;;  %v5878_v20 = vld [vmem:[#allocation2 + $0x558] sm:$0xff]  ;;  %v2343_v8 = vld [vmem:[%s11151_s2 + $0x1068] sm:$0xff]  ;;  %v2342_v53 = vld [vmem:[%s11151_s2 + $0x1060] sm:$0xff] }
 0x26a   :  { %3716 = vmatmul.mubr.f32.gmra.mxu0 %v5875_v26  ;;  %3949 = vmatmul.mubr.f32.gmra.mxu1 %v5876_v14  ;;  %v3372_v42 = vpop.f32.mrf.mxu1  ;;  %v3143_v47 = vpop.f32.mrf.mxu0  ;;  %v5879_v21 = vld [vmem:[#allocation2 + $0x540] sm:$0xff]  ;;  %v5881_v26 = vld [vmem:[#allocation2 + $0x588] sm:$0xff] }
 0x26b   :  { %3721 = vmatprep.mubr.f32.mxu0 %v5877_v40  ;;  %3954 = vmatprep.mubr.f32.mxu1 %v5878_v20  ;;  %5402 = vst [vmem:[#allocation3 + $0x30] sm:$0xff] %v3371_v60  ;;  %v3373_v16 = vadd.f32 %v3372_v42, %v3140_v49  ;;  %v3144_v36 = vadd.f32 %v3143_v47, %v9484_v32  ;;  %v5880_v60 = vld [vmem:[#allocation2 + $0x550] sm:$0xff]  ;;  %v2337_v32 = vld [vmem:[%s11151_s2 + $0x1038] sm:$0xff] }
 0x26c   :  { %4043 = vmatprep.subr.mxu0 %v2349_v25  ;;  %v3376_v28 = vpop.f32.mrf.mxu1  ;;  %v3145_v54 = vpop.f32.mrf.mxu0  ;;  %v5882_v42 = vld [vmem:[#allocation2 + $0x598] sm:$0xff]  ;;  %v2336_v40 = vld [vmem:[%s11151_s2 + $0x1030] sm:$0xff] }
 0x26d   :  { %4044 = vmatpush2.msra.mxu0 %v2348_v7  ;;  %5403 = vst [vmem:[#allocation3 + $0x38] sm:$0xff] %v3373_v16  ;;  %v3377_v33 = vadd.f32 %v3376_v28, %v3144_v36  ;;  %v3146_v44 = vadd.f32 %v3145_v54, %v9493_v43  ;;  %v5883_v36 = vld [vmem:[#allocation2 + $0x580] sm:$0xff]  ;;  %v5885_v54 = vld [vmem:[#allocation2 + $0x5c8] sm:$0xff] }
 0x26e   :  { %3722 = vmatmul.mubr.f32.gmra.mxu0 %v5879_v21  ;;  %3955 = vmatmul.mubr.f32.gmra.mxu1 %v5880_v60  ;;  %v3378_v25 = vpop.f32.mrf.mxu1  ;;  %v3149_v49 = vpop.f32.mrf.mxu0 }
 0x26f   :  { %4045 = vmatprep.subr.mxu0 %v2343_v8  ;;  %3727 = vmatprep.mubr.f32.mxu0 %v5881_v26  ;;  %5408 = vst [vmem:[#allocation3 + $0x60] sm:$0xff] %v3377_v33  ;;  %v3379_v14 = vadd.f32 %v3378_v25, %v3146_v44  ;;  %v3150_v7 = vadd.f32 %v3149_v49, %v9507_v0  ;;  %v5884_v8 = vld [vmem:[#allocation2 + $0x590] sm:$0xff]  ;;  %v2331_v0 = vld [vmem:[%s11151_s2 + $0x1008] sm:$0xff]  ;;  %v5887_v49 = vld [vmem:[#allocation2 + $0x5c0] sm:$0xff] }
 0x270   :  { %3960 = vmatprep.mubr.f32.mxu1 %v5882_v42  ;;  %4046 = vmatpush2.msra.mxu0 %v2342_v53  ;;  %v3382_v43 = vpop.f32.mrf.mxu1  ;;  %v3151_v47 = vpop.f32.mrf.mxu0  ;;  %v5886_v53 = vld [vmem:[#allocation2 + $0x5d8] sm:$0xff]  ;;  %v5888_v26 = vld [vmem:[#allocation2 + $0x5d0] sm:$0xff] }
 0x271   :  { %4047 = vmatprep.subr.mxu0 %v2337_v32  ;;  %5409 = vst [vmem:[#allocation3 + $0x68] sm:$0xff] %v3379_v14  ;;  %v3383_v20 = vadd.f32 %v3382_v43, %v3150_v7  ;;  %v3152_v16 = vadd.f32 %v3151_v47, %v9515_v39  ;;  %v2330_v39 = vld [vmem:[%s11151_s2 + $0x1000] sm:$0xff]  ;;  %v2325_v32 = vld [vmem:[%s11151_s2 + $0xfd8] sm:$0xff]  ;;  %v2324_v7 = vld [vmem:[%s11151_s2 + $0xfd0] sm:$0xff] }
 0x272   :  { %3728 = vmatmul.mubr.f32.gmra.mxu0 %v5883_v36  ;;  %3961 = vmatmul.mubr.f32.gmra.mxu1 %v5884_v8  ;;  %v3384_v28 = vpop.f32.mrf.mxu1  ;;  %v5889_v43 = vld [vmem:[#allocation2 + $0x608] sm:$0xff] }
 0x273   :  { %3733 = vmatprep.mubr.f32.mxu0 %v5885_v54  ;;  %3966 = vmatprep.mubr.f32.mxu1 %v5886_v53  ;;  %5414 = vst [vmem:[#allocation3 + $0x90] sm:$0xff] %v3383_v20  ;;  %v3385_v33 = vadd.f32 %v3384_v28, %v3152_v16  ;;  %v3155_v44 = vpop.f32.mrf.mxu0  ;;  %v2319_v8 = vld [vmem:[%s11151_s2 + $0xfa8] sm:$0xff]  ;;  %v5892_v28 = vld [vmem:[#allocation2 + $0x610] sm:$0xff]  ;;  %v2318_v54 = vld [vmem:[%s11151_s2 + $0xfa0] sm:$0xff] }
 0x274   :  { %4048 = vmatpush2.msra.mxu0 %v2336_v40  ;;  %v3156_v21 = vadd.f32 %v3155_v44, %v9526_v2  ;;  %v3388_v60 = vpop.f32.mrf.mxu1  ;;  %v5890_v40 = vld [vmem:[#allocation2 + $0x618] sm:$0xff]  ;;  %v5893_v44 = vld [vmem:[#allocation2 + $0x648] sm:$0xff] }
 0x275   :  { %4049 = vmatprep.subr.mxu0 %v2331_v0  ;;  %5415 = vst [vmem:[#allocation3 + $0x98] sm:$0xff] %v3385_v33  ;;  %v3157_v25 = vpop.f32.mrf.mxu0 }
 0x276   :  { %3734 = vmatmul.mubr.f32.gmra.mxu0 %v5887_v49  ;;  %3967 = vmatmul.mubr.f32.gmra.mxu1 %v5888_v26  ;;  %v3389_v14 = vadd.f32 %v3388_v60, %v3156_v21  ;;  %v3158_v42 = vadd.f32 %v3157_v25, %v9535_v6  ;;  %v3390_v2 = vpop.f32.mrf.mxu1  ;;  %v5891_v6 = vld [vmem:[#allocation2 + $0x600] sm:$0xff]  ;;  %v2313_v49 = vld [vmem:[%s11151_s2 + $0xf78] sm:$0xff] }
 0x277   :  { %4050 = vmatpush2.msra.mxu0 %v2330_v39  ;;  %3739 = vmatprep.mubr.f32.mxu0 %v5889_v43  ;;  %v3161_v47 = vpop.f32.mrf.mxu0  ;;  %v5894_v39 = vld [vmem:[#allocation2 + $0x658] sm:$0xff]  ;;  %v5897_v43 = vld [vmem:[#allocation2 + $0x688] sm:$0xff] }
 0x278   :  { %3972 = vmatprep.mubr.f32.mxu1 %v5890_v40  ;;  %4051 = vmatprep.subr.mxu0 %v2325_v32  ;;  %5420 = vst [vmem:[#allocation3 + $0xc0] sm:$0xff] %v3389_v14  ;;  %v3391_v20 = vadd.f32 %v3390_v2, %v3158_v42  ;;  %v3162_v16 = vadd.f32 %v3161_v47, %v9549_v51  ;;  %v3394_v36 = vpop.f32.mrf.mxu1  ;;  %v5895_v14 = vld [vmem:[#allocation2 + $0x640] sm:$0xff]  ;;  %v5898_v47 = vld [vmem:[#allocation2 + $0x698] sm:$0xff] }
 0x279   :  { %4052 = vmatpush2.msra.mxu0 %v2324_v7  ;;  %v3163_v0 = vpop.f32.mrf.mxu0  ;;  %v2312_v7 = vld [vmem:[%s11151_s2 + $0xf70] sm:$0xff] }
 0x27a   :  { %3740 = vmatmul.mubr.f32.gmra.mxu0 %v5891_v6  ;;  %3973 = vmatmul.mubr.f32.gmra.mxu1 %v5892_v28  ;;  %5421 = vst [vmem:[#allocation3 + $0xc8] sm:$0xff] %v3391_v20  ;;  %v3395_v53 = vadd.f32 %v3394_v36, %v3162_v16  ;;  %v3164_v33 = vadd.f32 %v3163_v0, %v9555_v63  ;;  %v3396_v51 = vpop.f32.mrf.mxu1  ;;  %v5896_v63 = vld [vmem:[#allocation2 + $0x650] sm:$0xff]  ;;  %v5899_v6 = vld [vmem:[#allocation2 + $0x680] sm:$0xff] }
 0x27b   :  { %3745 = vmatprep.mubr.f32.mxu0 %v5893_v44  ;;  %3978 = vmatprep.mubr.f32.mxu1 %v5894_v39  ;;  %v3167_v21 = vpop.f32.mrf.mxu0  ;;  %v2306_v28 = vld [vmem:[%s11151_s2 + $0xf40] sm:$0xff]  ;;  %v2301_v39 = vld [vmem:[%s11151_s2 + $0xf18] sm:$0xff] }
 0x27c   :  { %4053 = vmatprep.subr.mxu0 %v2319_v8  ;;  %5426 = vst [vmem:[#allocation3 + $0xf0] sm:$0xff] %v3395_v53  ;;  %v3397_v60 = vadd.f32 %v3396_v51, %v3164_v33  ;;  %v3168_v32 = vadd.f32 %v3167_v21, %v9568_v4  ;;  %v3400_v25 = vpop.f32.mrf.mxu1  ;;  %v2307_v8 = vld [vmem:[%s11151_s2 + $0xf48] sm:$0xff]  ;;  %v5902_v51 = vld [vmem:[#allocation2 + $0x6d8] sm:$0xff] }
 0x27d   :  { %4054 = vmatpush2.msra.mxu0 %v2318_v54  ;;  %v3169_v26 = vpop.f32.mrf.mxu0  ;;  %v5901_v33 = vld [vmem:[#allocation2 + $0x6c8] sm:$0xff] }
 0x27e   :  { %3746 = vmatmul.mubr.f32.gmra.mxu0 %v5895_v14  ;;  %3979 = vmatmul.mubr.f32.gmra.mxu1 %v5896_v63  ;;  %5427 = vst [vmem:[#allocation3 + $0xf8] sm:$0xff] %v3397_v60  ;;  %v3401_v42 = vadd.f32 %v3400_v25, %v3168_v32  ;;  %v3170_v2 = vadd.f32 %v3169_v26, %v9575_v29  ;;  %v3402_v4 = vpop.f32.mrf.mxu1  ;;  %v5900_v29 = vld [vmem:[#allocation2 + $0x690] sm:$0xff]  ;;  %v1913_v63 = vld [vmem:[%s11151_s2 + $0x2f8] sm:$0xff] }
 0x27f   :  { %3751 = vmatprep.mubr.f32.mxu0 %v5897_v43  ;;  %3984 = vmatprep.mubr.f32.mxu1 %v5898_v47  ;;  %v3173_v40 = vpop.f32.mrf.mxu0  ;;  %v5904_v26 = vld [vmem:[#allocation2 + $0x6d0] sm:$0xff] }
 0x280   :  { %4055 = vmatprep.subr.mxu0 %v2313_v49  ;;  %5432 = vst [vmem:[#allocation3 + $0x120] sm:$0xff] %v3401_v42  ;;  %v3403_v20 = vadd.f32 %v3402_v4, %v3170_v2  ;;  %v3174_v16 = vadd.f32 %v3173_v40, %v9591_v31  ;;  %v3406_v36 = vpop.f32.mrf.mxu1  ;;  %v5903_v49 = vld [vmem:[#allocation2 + $0x6c0] sm:$0xff]  ;;  %v5905_v42 = vld [vmem:[#allocation2 + $0x28] sm:$0xff]  ;;  %v5906_v2 = vld [vmem:[#allocation2 + $0x38] sm:$0xff] }
 0x281   :  { %4056 = vmatpush2.msra.mxu0 %v2312_v7  ;;  %v3175_v0 = vpop.f32.mrf.mxu0  ;;  %v1912_v40 = vld [vmem:[%s11151_s2 + $0x2f0] sm:$0xff] }
 0x282   :  { %3752 = vmatmul.mubr.f32.gmra.mxu0 %v5899_v6  ;;  %3985 = vmatmul.mubr.f32.gmra.mxu1 %v5900_v29  ;;  %5433 = vst [vmem:[#allocation3 + $0x128] sm:$0xff] %v3403_v20  ;;  %v3407_v54 = vadd.f32 %v3406_v36, %v3174_v16  ;;  %v3176_v53 = vadd.f32 %v3175_v0, %v9601_v13  ;;  %v3408_v31 = vpop.f32.mrf.mxu1  ;;  %v2300_v13 = vld [vmem:[%s11151_s2 + $0xf10] sm:$0xff]  ;;  %v5907_v16 = vld [vmem:[#allocation2 + $0x20] sm:$0xff]  ;;  %v2099_v29 = vld [vmem:[%s11151_s2 + $0x8c8] sm:$0xff] }
 0x283   :  { %3757 = vmatprep.mubr.f32.mxu0 %v5901_v33  ;;  %3990 = vmatprep.mubr.f32.mxu1 %v5902_v51  ;;  %v3179_v44 = vpop.f32.mrf.mxu0  ;;  %v5908_v36 = vld [vmem:[#allocation2 + $0x30] sm:$0xff]  ;;  %v1906_v51 = vld [vmem:[%s11151_s2 + $0x2c0] sm:$0xff] }
 0x284   :  { %4057 = vmatprep.subr.mxu0 %v2307_v8  ;;  %5438 = vst [vmem:[#allocation3 + $0x150] sm:$0xff] %v3407_v54  ;;  %v3409_v21 = vadd.f32 %v3408_v31, %v3176_v53  ;;  %v3180_v60 = vadd.f32 %v3179_v44, %v9611_v11  ;;  %v3412_v32 = vpop.f32.mrf.mxu1  ;;  %v1907_v8 = vld [vmem:[%s11151_s2 + $0x2c8] sm:$0xff]  ;;  %v5910_v54 = vld [vmem:[#allocation2 + $0x78] sm:$0xff] }
 0x285   :  { %4058 = vmatpush2.msra.mxu0 %v2306_v28  ;;  %v3181_v25 = vpop.f32.mrf.mxu0  ;;  %v5909_v28 = vld [vmem:[#allocation2 + $0x68] sm:$0xff] }
 0x286   :  { %3758 = vmatmul.mubr.f32.gmra.mxu0 %v5903_v49  ;;  %3991 = vmatmul.mubr.f32.gmra.mxu1 %v5904_v26  ;;  %5439 = vst [vmem:[#allocation3 + $0x158] sm:$0xff] %v3409_v21  ;;  %v3413_v14 = vadd.f32 %v3412_v32, %v3180_v60  ;;  %v3182_v7 = vadd.f32 %v3181_v25, %v9619_v17  ;;  %v3414_v11 = vpop.f32.mrf.mxu1  ;;  %v2104_v17 = vld [vmem:[%s11151_s2 + $0x8f0] sm:$0xff]  ;;  %v5911_v60 = vld [vmem:[#allocation2 + $0x60] sm:$0xff]  ;;  %v1901_v32 = vld [vmem:[%s11151_s2 + $0x298] sm:$0xff] }
 0x287   :  { %4059 = vmatprep.subr.mxu0 %v2301_v39  ;;  %4061 = vmatprep.mubr.f32.mxu0 %v5905_v42  ;;  %v2098_v39 = vld [vmem:[%s11151_s2 + $0x8c0] sm:$0xff]  ;;  %v5913_v26 = vld [vmem:[#allocation2 + $0xa8] sm:$0xff] }
 0x288   :  { %5732 = vmatprep.mubr.msk.f32.mxu1 %vm1376_vm2, %v5906_v2  ;;  %4060 = vmatpush2.msra.mxu0 %v2300_v13  ;;  %5444 = vst [vmem:[#allocation3 + $0x180] sm:$0xff] %v3413_v14  ;;  %v3415_v4 = vadd.f32 %v3414_v11, %v3182_v7  ;;  %v3185_v43 = vpop.f32.mrf.mxu0  ;;  %v3418_v47 = vpop.f32.mrf.mxu1  ;;  %v2093_v13 = vld [vmem:[%s11151_s2 + $0x898] sm:$0xff]  ;;  %v1900_v7 = vld [vmem:[%s11151_s2 + $0x290] sm:$0xff] }
 0x289   :  { %4463 = vmatprep.subr.mxu0 %v1913_v63  ;;  %v3186_v20 = vadd.f32 %v3185_v43, %v9627_v9  ;;  %v5914_v14 = vld [vmem:[#allocation2 + $0xb8] sm:$0xff]  ;;  %v2092_v2 = vld [vmem:[%s11151_s2 + $0x890] sm:$0xff]  ;;  %v5915_v43 = vld [vmem:[#allocation2 + $0xa0] sm:$0xff] }
 0x28a   :  { %4062 = vmatmul.mubr.f32.vlgmr.msra.gmra.mxu0 %v5907_v16  ;;  %4295 = vmatmul.mubr.f32.vlgmr.msra.gmra.mxu1 %v5908_v36  ;;  %5445 = vst [vmem:[#allocation3 + $0x188] sm:$0xff] %v3415_v4  ;;  %v3187_v0 = vpop.f32.mrf.mxu0  ;;  %v3420_v6 = vpop.f32.mrf.mxu1  ;;  %v5917_v16 = vld [vmem:[#allocation2 + $0xe8] sm:$0xff] }
 0x28b   :  { %4067 = vmatprep.mubr.f32.mxu0 %v5909_v28  ;;  %5733 = vmatprep.mubr.msk.f32.mxu1 %vm1376_vm2, %v5910_v54  ;;  %v3419_v9 = vadd.f32 %v3418_v47, %v3186_v20  ;;  %v3188_v53 = vadd.f32 %v3187_v0, %v9635_v55  ;;  %v5912_v55 = vld [vmem:[#allocation2 + $0x70] sm:$0xff]  ;;  %v1889_v28 = vld [vmem:[%s11151_s2 + $0x238] sm:$0xff] }
 0x28c   :  { %4464 = vmatpush1.msra.mxu0 %v1912_v40  ;;  %4697 = vmatpush1.msra.mxu1 %v2104_v17  ;;  %v3191_v31 = vpop.f32.mrf.mxu0  ;;  %v3424_v33 = vpop.f32.mrf.mxu1  ;;  %v5916_v47 = vld [vmem:[#allocation2 + $0xb0] sm:$0xff]  ;;  %v2087_v17 = vld [vmem:[%s11151_s2 + $0x868] sm:$0xff] }
 0x28d   :  { %5450 = vst [vmem:[#allocation3 + $0x1b0] sm:$0xff] %v3419_v9  ;;  %4465 = vmatprep.subr.mxu0 %v1907_v8  ;;  %v3421_v44 = vadd.f32 %v3420_v6, %v3188_v53  ;;  %4698 = vmatprep.subr.mxu1 %v2099_v29  ;;  %v3192_v21 = vadd.f32 %v3191_v31, %v9640_v3  ;;  %v5918_v8 = vld [vmem:[#allocation2 + $0xf8] sm:$0xff]  ;;  %v1894_v6 = vld [vmem:[%s11151_s2 + $0x260] sm:$0xff]  ;;  %v5920_v53 = vld [vmem:[#allocation2 + $0xf0] sm:$0xff] }
 0x28e   :  { %4068 = vmatmul.mubr.f32.gmra.mxu0 %v5911_v60  ;;  %4301 = vmatmul.mubr.f32.gmra.mxu1 %v5912_v55  ;;  %v3193_v25 = vpop.f32.mrf.mxu0  ;;  %v3426_v49 = vpop.f32.mrf.mxu1  ;;  %v5919_v9 = vld [vmem:[#allocation2 + $0xe0] sm:$0xff]  ;;  %v5922_v60 = vld [vmem:[#allocation2 + $0x138] sm:$0xff] }
 0x28f   :  { %4073 = vmatprep.mubr.f32.mxu0 %v5913_v26  ;;  %5734 = vmatprep.mubr.msk.f32.mxu1 %vm1376_vm2, %v5914_v14  ;;  %5451 = vst [vmem:[#allocation3 + $0x1b8] sm:$0xff] %v3421_v44  ;;  %v3425_v3 = vadd.f32 %v3424_v33, %v3192_v21  ;;  %v3194_v63 = vadd.f32 %v3193_v25, %v9651_v1  ;;  %v1895_v1 = vld [vmem:[%s11151_s2 + $0x268] sm:$0xff]  ;;  %v2086_v33 = vld [vmem:[%s11151_s2 + $0x860] sm:$0xff]  ;;  %v5924_v14 = vld [vmem:[#allocation2 + $0x130] sm:$0xff] }
 0x290   :  { %4466 = vmatpush1.msra.mxu0 %v1906_v51  ;;  %4699 = vmatpush1.msra.mxu1 %v2098_v39  ;;  %v3430_v11 = vpop.f32.mrf.mxu1  ;;  %v5921_v39 = vld [vmem:[#allocation2 + $0x128] sm:$0xff]  ;;  %v5923_v26 = vld [vmem:[#allocation2 + $0x120] sm:$0xff] }
 0x291   :  { %4467 = vmatprep.subr.mxu0 %v1901_v32  ;;  %5456 = vst [vmem:[#allocation3 + $0x1e0] sm:$0xff] %v3425_v3  ;;  %4700 = vmatprep.subr.mxu1 %v2093_v13  ;;  %v3427_v42 = vadd.f32 %v3426_v49, %v3194_v63  ;;  %v3197_v4 = vpop.f32.mrf.mxu0  ;;  %v2081_v32 = vld [vmem:[%s11151_s2 + $0x838] sm:$0xff]  ;;  %v1883_v63 = vld [vmem:[%s11151_s2 + $0x208] sm:$0xff] }
 0x292   :  { %4074 = vmatmul.mubr.f32.gmra.mxu0 %v5915_v43  ;;  %4307 = vmatmul.mubr.f32.gmra.mxu1 %v5916_v47  ;;  %v3198_v40 = vadd.f32 %v3197_v4, %v9659_v57  ;;  %v3432_v20 = vpop.f32.mrf.mxu1  ;;  %v5926_v43 = vld [vmem:[#allocation2 + $0x178] sm:$0xff] }
 0x293   :  { %4468 = vmatpush1.msra.mxu0 %v1900_v7  ;;  %4079 = vmatprep.mubr.f32.mxu0 %v5917_v16  ;;  %5457 = vst [vmem:[#allocation3 + $0x1e8] sm:$0xff] %v3427_v42  ;;  %v3199_v36 = vpop.f32.mrf.mxu0  ;;  %v2075_v7 = vld [vmem:[%s11151_s2 + $0x808] sm:$0xff]  ;;  %v1882_v42 = vld [vmem:[%s11151_s2 + $0x200] sm:$0xff] }
 0x294   :  { %5735 = vmatprep.mubr.msk.f32.mxu1 %vm1376_vm2, %v5918_v8  ;;  %4701 = vmatpush1.msra.mxu1 %v2092_v2  ;;  %v3431_v0 = vadd.f32 %v3430_v11, %v3198_v40  ;;  %v3200_v57 = vadd.f32 %v3199_v36, %v9667_v10  ;;  %v3436_v29 = vpop.f32.mrf.mxu1  ;;  %v1888_v10 = vld [vmem:[%s11151_s2 + $0x230] sm:$0xff]  ;;  %v5925_v11 = vld [vmem:[#allocation2 + $0x168] sm:$0xff]  ;;  %v2074_v16 = vld [vmem:[%s11151_s2 + $0x800] sm:$0xff] }
 0x295   :  { %4469 = vmatprep.subr.mxu0 %v1895_v1  ;;  %4702 = vmatprep.subr.mxu1 %v2087_v17  ;;  %v3203_v54 = vpop.f32.mrf.mxu0  ;;  %v1877_v1 = vld [vmem:[%s11151_s2 + $0x1d8] sm:$0xff] }
 0x296   :  { %5462 = vst [vmem:[#allocation3 + $0x210] sm:$0xff] %v3431_v0  ;;  %4080 = vmatmul.mubr.f32.gmra.mxu0 %v5919_v9  ;;  %4313 = vmatmul.mubr.f32.gmra.mxu1 %v5920_v53  ;;  %v3433_v31 = vadd.f32 %v3432_v20, %v3200_v57  ;;  %v3204_v51 = vadd.f32 %v3203_v54, %v9672_v34  ;;  %v3438_v44 = vpop.f32.mrf.mxu1  ;;  %v2080_v34 = vld [vmem:[%s11151_s2 + $0x830] sm:$0xff]  ;;  %v5928_v0 = vld [vmem:[#allocation2 + $0x160] sm:$0xff]  ;;  %v2069_v57 = vld [vmem:[%s11151_s2 + $0x7d8] sm:$0xff] }
 0x297   :  { %4470 = vmatpush1.msra.mxu0 %v1894_v6  ;;  %4085 = vmatprep.mubr.f32.mxu0 %v5921_v39  ;;  %v3205_v21 = vpop.f32.mrf.mxu0  ;;  %v5927_v20 = vld [vmem:[#allocation2 + $0x170] sm:$0xff]  ;;  %v5929_v6 = vld [vmem:[#allocation2 + $0x1b8] sm:$0xff]  ;;  %v5930_v54 = vld [vmem:[#allocation2 + $0x1a8] sm:$0xff] }
 0x298   :  { %5736 = vmatprep.mubr.msk.f32.mxu1 %vm1376_vm2, %v5922_v60  ;;  %5463 = vst [vmem:[#allocation3 + $0x218] sm:$0xff] %v3433_v31  ;;  %4471 = vmatprep.subr.mxu0 %v1889_v28  ;;  %v3437_v55 = vadd.f32 %v3436_v29, %v3204_v51  ;;  %v3206_v13 = vadd.f32 %v3205_v21, %v9683_v18  ;;  %v1870_v60 = vld [vmem:[%s11151_s2 + $0x1a0] sm:$0xff] }
 0x299   :  { %4703 = vmatpush1.msra.mxu1 %v2086_v33  ;;  %4472 = vmatpush1.msra.mxu0 %v1888_v10  ;;  %v3209_v25 = vpop.f32.mrf.mxu0  ;;  %v3442_v49 = vpop.f32.mrf.mxu1  ;;  %v5931_v33 = vld [vmem:[#allocation2 + $0x1b0] sm:$0xff]  ;;  %v1871_v10 = vld [vmem:[%s11151_s2 + $0x1a8] sm:$0xff] }
 0x29a   :  { %5468 = vst [vmem:[#allocation3 + $0x240] sm:$0xff] %v3437_v55  ;;  %4086 = vmatmul.mubr.f32.gmra.mxu0 %v5923_v26  ;;  %4319 = vmatmul.mubr.f32.gmra.mxu1 %v5924_v14  ;;  %v3439_v3 = vadd.f32 %v3438_v44, %v3206_v13  ;;  %v3210_v18 = vadd.f32 %v3209_v25, %v9688_v46  ;;  %v2063_v44 = vld [vmem:[%s11151_s2 + $0x7a8] sm:$0xff]  ;;  %v5934_v13 = vld [vmem:[#allocation2 + $0x1f8] sm:$0xff]  ;;  %v2062_v26 = vld [vmem:[%s11151_s2 + $0x7a0] sm:$0xff] }
 0x29b   :  { %4704 = vmatprep.subr.mxu1 %v2081_v32  ;;  %4091 = vmatprep.mubr.f32.mxu0 %v5925_v11  ;;  %v3211_v2 = vpop.f32.mrf.mxu0  ;;  %v3444_v4 = vpop.f32.mrf.mxu1  ;;  %v5933_v32 = vld [vmem:[#allocation2 + $0x1e8] sm:$0xff]  ;;  %v5935_v14 = vld [vmem:[#allocation2 + $0x1f0] sm:$0xff]  ;;  %v5936_v11 = vld [vmem:[#allocation2 + $0x1e0] sm:$0xff] }
 0x29c   :  { %5737 = vmatprep.mubr.msk.f32.mxu1 %vm1376_vm2, %v5926_v43  ;;  %4705 = vmatpush1.msra.mxu1 %v2080_v34  ;;  %5469 = vst [vmem:[#allocation3 + $0x248] sm:$0xff] %v3439_v3  ;;  %v3443_v47 = vadd.f32 %v3442_v49, %v3210_v18  ;;  %v3212_v46 = vadd.f32 %v3211_v2, %v9699_v50  ;;  %v1876_v50 = vld [vmem:[%s11151_s2 + $0x1d0] sm:$0xff]  ;;  %v5937_v2 = vld [vmem:[#allocation2 + $0x228] sm:$0xff] }
 0x29d   :  { %4473 = vmatprep.subr.mxu0 %v1883_v63  ;;  %4706 = vmatprep.subr.mxu1 %v2075_v7  ;;  %v3215_v40 = vpop.f32.mrf.mxu0  ;;  %v3448_v17 = vpop.f32.mrf.mxu1  ;;  %v1864_v3 = vld [vmem:[%s11151_s2 + $0x170] sm:$0xff] }
 0x29e   :  { %4474 = vmatpush1.msra.mxu0 %v1882_v42  ;;  %5474 = vst [vmem:[#allocation3 + $0x270] sm:$0xff] %v3443_v47  ;;  %4325 = vmatmul.mubr.f32.gmra.mxu1 %v5927_v20  ;;  %v3445_v36 = vadd.f32 %v3444_v4, %v3212_v46  ;;  %v3216_v8 = vadd.f32 %v3215_v40, %v9704_v48  ;;  %v2068_v48 = vld [vmem:[%s11151_s2 + $0x7d0] sm:$0xff]  ;;  %v5938_v46 = vld [vmem:[#allocation2 + $0x238] sm:$0xff]  ;;  %v1859_v40 = vld [vmem:[%s11151_s2 + $0x148] sm:$0xff] }
 0x29f   :  { %4092 = vmatmul.mubr.f32.gmra.mxu0 %v5928_v0  ;;  %5738 = vmatprep.mubr.msk.f32.mxu1 %vm1376_vm2, %v5929_v6  ;;  %v3217_v29 = vpop.f32.mrf.mxu0  ;;  %v3450_v28 = vpop.f32.mrf.mxu1  ;;  %v2056_v4 = vld [vmem:[%s11151_s2 + $0x770] sm:$0xff]  ;;  %v1858_v20 = vld [vmem:[%s11151_s2 + $0x140] sm:$0xff]  ;;  %v2051_v0 = vld [vmem:[%s11151_s2 + $0x748] sm:$0xff] }
 0x2a0   :  { %4097 = vmatprep.mubr.f32.mxu0 %v5930_v54  ;;  %4475 = vmatprep.subr.mxu0 %v1877_v1  ;;  %5475 = vst [vmem:[#allocation3 + $0x278] sm:$0xff] %v3445_v36  ;;  %v3449_v9 = vadd.f32 %v3448_v17, %v3216_v8  ;;  %v3218_v53 = vadd.f32 %v3217_v29, %v9715_v45  ;;  %v5932_v45 = vld [vmem:[#allocation2 + $0x1a0] sm:$0xff]  ;;  %v5939_v17 = vld [vmem:[#allocation2 + $0x230] sm:$0xff] }
 0x2a1   :  { %4707 = vmatpush1.msra.mxu1 %v2074_v16  ;;  %4476 = vmatpush1.msra.mxu0 %v1876_v50  ;;  %v3221_v31 = vpop.f32.mrf.mxu0  ;;  %v5940_v50 = vld [vmem:[#allocation2 + $0x220] sm:$0xff] }
 0x2a2   :  { %4708 = vmatprep.subr.mxu1 %v2069_v57  ;;  %5480 = vst [vmem:[#allocation3 + $0x2a0] sm:$0xff] %v3449_v9  ;;  %4331 = vmatmul.mubr.f32.gmra.mxu1 %v5931_v33  ;;  %v3451_v51 = vadd.f32 %v3450_v28, %v3218_v53  ;;  %v3222_v39 = vadd.f32 %v3221_v31, %v9720_v41  ;;  %v3454_v21 = vpop.f32.mrf.mxu1  ;;  %v1865_v41 = vld [vmem:[%s11151_s2 + $0x178] sm:$0xff]  ;;  %v5941_v57 = vld [vmem:[#allocation2 + $0x268] sm:$0xff]  ;;  %v2050_v29 = vld [vmem:[%s11151_s2 + $0x740] sm:$0xff] }
 0x2a3   :  { %4098 = vmatmul.mubr.f32.gmra.mxu0 %v5932_v45  ;;  %4709 = vmatpush1.msra.mxu1 %v2068_v48  ;;  %v3223_v55 = vpop.f32.mrf.mxu0  ;;  %v5942_v9 = vld [vmem:[#allocation2 + $0x278] sm:$0xff]  ;;  %v1852_v53 = vld [vmem:[%s11151_s2 + $0x110] sm:$0xff]  ;;  %v5943_v33 = vld [vmem:[#allocation2 + $0x260] sm:$0xff] }
 0x2a4   :  { %4103 = vmatprep.mubr.f32.mxu0 %v5933_v32  ;;  %5739 = vmatprep.mubr.msk.f32.mxu1 %vm1376_vm2, %v5934_v13  ;;  %5481 = vst [vmem:[#allocation3 + $0x2a8] sm:$0xff] %v3451_v51  ;;  %v3455_v34 = vadd.f32 %v3454_v21, %v3222_v39  ;;  %v3224_v25 = vadd.f32 %v3223_v55, %v9731_v30  ;;  %v3456_v49 = vpop.f32.mrf.mxu1  ;;  %v2057_v30 = vld [vmem:[%s11151_s2 + $0x778] sm:$0xff]  ;;  %v5944_v21 = vld [vmem:[#allocation2 + $0x270] sm:$0xff]  ;;  %v5945_v55 = vld [vmem:[#allocation2 + $0x2a8] sm:$0xff] }
 0x2a5   :  { %4477 = vmatprep.subr.mxu0 %v1871_v10  ;;  %4710 = vmatprep.subr.mxu1 %v2063_v44  ;;  %v2045_v10 = vld [vmem:[%s11151_s2 + $0x718] sm:$0xff]  ;;  %v1847_v44 = vld [vmem:[%s11151_s2 + $0xe8] sm:$0xff]  ;;  %v1846_v13 = vld [vmem:[%s11151_s2 + $0xe0] sm:$0xff] }
 0x2a6   :  { %4478 = vmatpush1.msra.mxu0 %v1870_v60  ;;  %5486 = vst [vmem:[#allocation3 + $0x2d0] sm:$0xff] %v3455_v34  ;;  %4337 = vmatmul.mubr.f32.gmra.mxu1 %v5935_v14  ;;  %v3457_v63 = vadd.f32 %v3456_v49, %v3224_v25  ;;  %v3227_v18 = vpop.f32.mrf.mxu0  ;;  %v3460_v7 = vpop.f32.mrf.mxu1  ;;  %v5946_v32 = vld [vmem:[#allocation2 + $0x2b8] sm:$0xff] }
 0x2a7   :  { %4104 = vmatmul.mubr.f32.gmra.mxu0 %v5936_v11  ;;  %4479 = vmatprep.subr.mxu0 %v1865_v41  ;;  %v3228_v42 = vadd.f32 %v3227_v18, %v9739_v35  ;;  %v1841_v14 = vld [vmem:[%s11151_s2 + $0xb8] sm:$0xff] }
 0x2a8   :  { %4711 = vmatpush1.msra.mxu1 %v2062_v26  ;;  %4109 = vmatprep.mubr.f32.mxu0 %v5937_v2  ;;  %5487 = vst [vmem:[#allocation3 + $0x2d8] sm:$0xff] %v3457_v63  ;;  %v3229_v43 = vpop.f32.mrf.mxu0  ;;  %v3462_v47 = vpop.f32.mrf.mxu1  ;;  %v2039_v26 = vld [vmem:[%s11151_s2 + $0x6e8] sm:$0xff]  ;;  %v5948_v63 = vld [vmem:[#allocation2 + $0x2b0] sm:$0xff]  ;;  %v5950_v2 = vld [vmem:[#allocation2 + $0x2f8] sm:$0xff] }
 0x2a9   :  { %5740 = vmatprep.mubr.msk.f32.mxu1 %vm1376_vm2, %v5938_v46  ;;  %4480 = vmatpush1.msra.mxu0 %v1864_v3  ;;  %v3461_v1 = vadd.f32 %v3460_v7, %v3228_v42  ;;  %v3230_v35 = vadd.f32 %v3229_v43, %v9747_v62  ;;  %v1853_v62 = vld [vmem:[%s11151_s2 + $0x118] sm:$0xff]  ;;  %v1840_v7 = vld [vmem:[%s11151_s2 + $0xb0] sm:$0xff]  ;;  %v5949_v42 = vld [vmem:[#allocation2 + $0x2e8] sm:$0xff] }
 0x2aa   :  { %4712 = vmatprep.subr.mxu1 %v2057_v30  ;;  %4343 = vmatmul.mubr.f32.gmra.mxu1 %v5939_v17  ;;  %v3233_v16 = vpop.f32.mrf.mxu0  ;;  %v3466_v36 = vpop.f32.mrf.mxu1  ;;  %v5952_v17 = vld [vmem:[#allocation2 + $0x2f0] sm:$0xff] }
 0x2ab   :  { %4713 = vmatpush1.msra.mxu1 %v2056_v4  ;;  %5492 = vst [vmem:[#allocation3 + $0x300] sm:$0xff] %v3461_v1  ;;  %4110 = vmatmul.mubr.f32.gmra.mxu0 %v5940_v50  ;;  %v3463_v8 = vadd.f32 %v3462_v47, %v3230_v35  ;;  %v3234_v6 = vadd.f32 %v3233_v16, %v9752_v22  ;;  %v2033_v47 = vld [vmem:[%s11151_s2 + $0x6b8] sm:$0xff]  ;;  %v5951_v35 = vld [vmem:[#allocation2 + $0x2e0] sm:$0xff]  ;;  %v1835_v16 = vld [vmem:[%s11151_s2 + $0x88] sm:$0xff] }
 0x2ac   :  { %4481 = vmatprep.subr.mxu0 %v1859_v40  ;;  %4115 = vmatprep.mubr.f32.mxu0 %v5941_v57  ;;  %v3235_v28 = vpop.f32.mrf.mxu0  ;;  %v3468_v54 = vpop.f32.mrf.mxu1  ;;  %v5953_v50 = vld [vmem:[#allocation2 + $0x328] sm:$0xff] }
 0x2ad   :  { %5741 = vmatprep.mubr.msk.f32.mxu1 %vm1376_vm2, %v5942_v9  ;;  %4482 = vmatpush1.msra.mxu0 %v1858_v20  ;;  %5493 = vst [vmem:[#allocation3 + $0x308] sm:$0xff] %v3463_v8  ;;  %v3467_v48 = vadd.f32 %v3466_v36, %v3234_v6  ;;  %v3236_v22 = vadd.f32 %v3235_v28, %v9763_v37  ;;  %v2044_v37 = vld [vmem:[%s11151_s2 + $0x710] sm:$0xff]  ;;  %v2027_v36 = vld [vmem:[%s11151_s2 + $0x688] sm:$0xff]  ;;  %v1834_v8 = vld [vmem:[%s11151_s2 + $0x80] sm:$0xff] }
 0x2ae   :  { %4714 = vmatprep.subr.mxu1 %v2051_v0  ;;  %4483 = vmatprep.subr.mxu0 %v1853_v62  ;;  %v3472_v31 = vpop.f32.mrf.mxu1  ;;  %v5954_v6 = vld [vmem:[#allocation2 + $0x338] sm:$0xff]  ;;  %v5955_v9 = vld [vmem:[#allocation2 + $0x330] sm:$0xff] }
 0x2af   :  { %4715 = vmatpush1.msra.mxu1 %v2050_v29  ;;  %5498 = vst [vmem:[#allocation3 + $0x330] sm:$0xff] %v3467_v48  ;;  %4116 = vmatmul.mubr.f32.gmra.mxu0 %v5943_v33  ;;  %v3469_v51 = vadd.f32 %v3468_v54, %v3236_v22  ;;  %v3239_v39 = vpop.f32.mrf.mxu0  ;;  %v1829_v29 = vld [vmem:[%s11151_s2 + $0x58] sm:$0xff]  ;;  %v2026_v48 = vld [vmem:[%s11151_s2 + $0x680] sm:$0xff] }
 0x2b0   :  { %4349 = vmatmul.mubr.f32.gmra.mxu1 %v5944_v21  ;;  %4484 = vmatpush1.msra.mxu0 %v1852_v53  ;;  %v3240_v45 = vadd.f32 %v3239_v39, %v9771_v27  ;;  %v3474_v60 = vpop.f32.mrf.mxu1  ;;  %v5947_v27 = vld [vmem:[#allocation2 + $0x2a0] sm:$0xff]  ;;  %v5957_v33 = vld [vmem:[#allocation2 + $0x378] sm:$0xff]  ;;  %v5958_v39 = vld [vmem:[#allocation2 + $0x368] sm:$0xff] }
 0x2b1   :  { %4121 = vmatprep.mubr.f32.mxu0 %v5945_v55  ;;  %5742 = vmatprep.mubr.msk.f32.mxu1 %vm1376_vm2, %v5946_v32  ;;  %5499 = vst [vmem:[#allocation3 + $0x338] sm:$0xff] %v3469_v51  ;;  %v3241_v34 = vpop.f32.mrf.mxu0  ;;  %v1823_v55 = vld [vmem:[%s11151_s2 + $0x28] sm:$0xff] }
 0x2b2   :  { %4716 = vmatprep.subr.mxu1 %v2045_v10  ;;  %4485 = vmatprep.subr.mxu0 %v1847_v44  ;;  %v3473_v41 = vadd.f32 %v3472_v31, %v3240_v45  ;;  %v3242_v25 = vadd.f32 %v3241_v34, %v9779_v15  ;;  %v3478_v49 = vpop.f32.mrf.mxu1  ;;  %v2038_v15 = vld [vmem:[%s11151_s2 + $0x6e0] sm:$0xff]  ;;  %v2021_v10 = vld [vmem:[%s11151_s2 + $0x658] sm:$0xff] }
 0x2b3   :  { %4717 = vmatpush1.msra.mxu1 %v2044_v37  ;;  %4122 = vmatmul.mubr.f32.gmra.mxu0 %v5947_v27  ;;  %v3245_v3 = vpop.f32.mrf.mxu0  ;;  %v5956_v31 = vld [vmem:[#allocation2 + $0x320] sm:$0xff]  ;;  %v5961_v27 = vld [vmem:[#allocation2 + $0x3a8] sm:$0xff] }
 0x2b4   :  { %5504 = vst [vmem:[#allocation3 + $0x360] sm:$0xff] %v3473_v41  ;;  %4355 = vmatmul.mubr.f32.gmra.mxu1 %v5948_v63  ;;  %4486 = vmatpush1.msra.mxu0 %v1846_v13  ;;  %v3475_v18 = vadd.f32 %v3474_v60, %v3242_v25  ;;  %v3246_v11 = vadd.f32 %v3245_v3, %v9784_v19  ;;  %v3480_v30 = vpop.f32.mrf.mxu1  ;;  %v2032_v19 = vld [vmem:[%s11151_s2 + $0x6b0] sm:$0xff]  ;;  %v2015_v13 = vld [vmem:[%s11151_s2 + $0x628] sm:$0xff]  ;;  %v1822_v25 = vld [vmem:[%s11151_s2 + $0x20] sm:$0xff] }
 0x2b5   :  { %4127 = vmatprep.mubr.f32.mxu0 %v5949_v42  ;;  %5743 = vmatprep.mubr.msk.f32.mxu1 %vm1376_vm2, %v5950_v2  ;;  %v3247_v4 = vpop.f32.mrf.mxu0  ;;  %v5959_v60 = vld [vmem:[#allocation2 + $0x370] sm:$0xff]  ;;  %v5964_v2 = vld [vmem:[#allocation2 + $0x3a0] sm:$0xff] }
 0x2b6   :  { %4718 = vmatprep.subr.mxu1 %v2039_v26  ;;  %5505 = vst [vmem:[#allocation3 + $0x368] sm:$0xff] %v3475_v18  ;;  %4487 = vmatprep.subr.mxu0 %v1841_v14  ;;  %v3479_v43 = vadd.f32 %v3478_v49, %v3246_v11  ;;  %v3248_v46 = vadd.f32 %v3247_v4, %v9795_v23  ;;  %v5962_v26 = vld [vmem:[#allocation2 + $0x3b8] sm:$0xff]  ;;  %v2014_v18 = vld [vmem:[%s11151_s2 + $0x620] sm:$0xff] }
 0x2b7   :  { %4719 = vmatpush1.msra.mxu1 %v2038_v15  ;;  %4488 = vmatpush1.msra.mxu0 %v1840_v7  ;;  %v3251_v1 = vpop.f32.mrf.mxu0  ;;  %v3484_v40 = vpop.f32.mrf.mxu1  ;;  %v5963_v15 = vld [vmem:[#allocation2 + $0x3b0] sm:$0xff] }
 0x2b8   :  { %5510 = vst [vmem:[#allocation3 + $0x390] sm:$0xff] %v3479_v43  ;;  %4128 = vmatmul.mubr.f32.gmra.mxu0 %v5951_v35  ;;  %4361 = vmatmul.mubr.f32.gmra.mxu1 %v5952_v17  ;;  %v3481_v20 = vadd.f32 %v3480_v30, %v3248_v46  ;;  %v3252_v23 = vadd.f32 %v3251_v1, %v9800_v5  ;;  %v2008_v7 = vld [vmem:[%s11151_s2 + $0x5f0] sm:$0xff]  ;;  %v5965_v43 = vld [vmem:[#allocation2 + $0x3e8] sm:$0xff]  ;;  %v5966_v1 = vld [vmem:[#allocation2 + $0x3f8] sm:$0xff] }
 0x2b9   :  { %4720 = vmatprep.subr.mxu1 %v2033_v47  ;;  %4133 = vmatprep.mubr.f32.mxu0 %v5953_v50  ;;  %v3253_v0 = vpop.f32.mrf.mxu0  ;;  %v3486_v62 = vpop.f32.mrf.mxu1  ;;  %v2200_v47 = vld [vmem:[%s11151_s2 + $0xbf0] sm:$0xff]  ;;  %v2003_v35 = vld [vmem:[%s11151_s2 + $0x5c8] sm:$0xff] }
 0x2ba   :  { %5744 = vmatprep.mubr.msk.f32.mxu1 %vm1376_vm2, %v5954_v6  ;;  %4721 = vmatpush1.msra.mxu1 %v2032_v19  ;;  %5511 = vst [vmem:[#allocation3 + $0x398] sm:$0xff] %v3481_v20  ;;  %v3485_v57 = vadd.f32 %v3484_v40, %v3252_v23  ;;  %v3254_v5 = vadd.f32 %v3253_v0, %v9811_v52  ;;  %v1828_v52 = vld [vmem:[%s11151_s2 + $0x50] sm:$0xff]  ;;  %v2002_v20 = vld [vmem:[%s11151_s2 + $0x5c0] sm:$0xff]  ;;  %v5969_v6 = vld [vmem:[#allocation2 + $0x428] sm:$0xff] }
 0x2bb   :  { %4489 = vmatprep.subr.mxu0 %v1835_v16  ;;  %4722 = vmatprep.subr.mxu1 %v2027_v36  ;;  %v3257_v28 = vpop.f32.mrf.mxu0  ;;  %v3490_v54 = vpop.f32.mrf.mxu1  ;;  %v5967_v17 = vld [vmem:[#allocation2 + $0x3f0] sm:$0xff]  ;;  %v5968_v36 = vld [vmem:[#allocation2 + $0x3e0] sm:$0xff] }
 0x2bc   :  { %4490 = vmatpush1.msra.mxu0 %v1834_v8  ;;  %5516 = vst [vmem:[#allocation3 + $0x3c0] sm:$0xff] %v3485_v57  ;;  %4367 = vmatmul.mubr.f32.gmra.mxu1 %v5955_v9  ;;  %v3487_v53 = vadd.f32 %v3486_v62, %v3254_v5  ;;  %v3258_v22 = vadd.f32 %v3257_v28, %v9816_v12  ;;  %v2020_v12 = vld [vmem:[%s11151_s2 + $0x650] sm:$0xff]  ;;  %v2195_v8 = vld [vmem:[%s11151_s2 + $0xbc8] sm:$0xff]  ;;  %v11160_v0 = vld [vmem:[#allocation6_spill] sm:$0xff] }
 0x2bd   :  { %4134 = vmatmul.mubr.f32.gmra.mxu0 %v5956_v31  ;;  %5745 = vmatprep.mubr.msk.f32.mxu1 %vm1376_vm2, %v5957_v33  ;;  %v3259_v51 = vpop.f32.mrf.mxu0  ;;  %v3492_v44 = vpop.f32.mrf.mxu1  ;;  %v2194_v57 = vld [vmem:[%s11151_s2 + $0xbc0] sm:$0xff]  ;;  %v5970_v28 = vld [vmem:[#allocation2 + $0x438] sm:$0xff]  ;;  %v1996_v9 = vld [vmem:[%s11151_s2 + $0x590] sm:$0xff] }
 0x2be   :  { %4139 = vmatprep.mubr.f32.mxu0 %v5958_v39  ;;  %4491 = vmatprep.subr.mxu0 %v1829_v29  ;;  %5517 = vst [vmem:[#allocation3 + $0x3c8] sm:$0xff] %v3487_v53  ;;  %v3491_v21 = vadd.f32 %v3490_v54, %v3258_v22  ;;  %v3260_v37 = vadd.f32 %v3259_v51, %v9827_v61  ;;  %v5960_v61 = vld [vmem:[#allocation2 + $0x360] sm:$0xff]  ;;  %v2189_v31 = vld [vmem:[%s11151_s2 + $0xb98] sm:$0xff]  ;;  %v2188_v39 = vld [vmem:[%s11151_s2 + $0xb90] sm:$0xff] }
 0x2bf   :  { %4723 = vmatpush1.msra.mxu1 %v2026_v48  ;;  %4492 = vmatpush1.msra.mxu0 %v1828_v52  ;;  %v3263_v45 = vpop.f32.mrf.mxu0  ;;  %v11161_v48 = vld [vmem:[#allocation7_spill] sm:$0xff]  ;;  %v5971_v22 = vld [vmem:[#allocation2 + $0x420] sm:$0xff] }
 0x2c0   :  { %4724 = vmatprep.subr.mxu1 %v2021_v10  ;;  %5522 = vst [vmem:[#allocation3 + $0x3f0] sm:$0xff] %v3491_v21  ;;  %4373 = vmatmul.mubr.f32.gmra.mxu1 %v5959_v60  ;;  %v3493_v32 = vadd.f32 %v3492_v44, %v3260_v37  ;;  %v3264_v34 = vadd.f32 %v3263_v45, %v9832_v56  ;;  %v3496_v41 = vpop.f32.mrf.mxu1  ;;  %v2009_v56 = vld [vmem:[%s11151_s2 + $0x5f8] sm:$0xff]  ;;  %v1991_v10 = vld [vmem:[%s11151_s2 + $0x568] sm:$0xff]  ;;  %v5972_v44 = vld [vmem:[#allocation2 + $0x430] sm:$0xff] }
 0x2c1   :  { %4140 = vmatmul.mubr.f32.gmra.mxu0 %v5960_v61  ;;  %4725 = vmatpush1.msra.mxu1 %v2020_v12  ;;  %v3265_v49 = vpop.f32.mrf.mxu0  ;;  %v11162_v21 = vld [vmem:[#allocation8_spill] sm:$0xff]  ;;  %v5973_v45 = vld [vmem:[#allocation2 + $0x468] sm:$0xff]  ;;  %v5974_v60 = vld [vmem:[#allocation2 + $0x478] sm:$0xff] }
 0x2c2   :  { %4145 = vmatprep.mubr.f32.mxu0 %v5961_v27  ;;  %5746 = vmatprep.mubr.msk.f32.mxu1 %vm1376_vm2, %v5962_v26  ;;  %5523 = vst [vmem:[#allocation3 + $0x3f8] sm:$0xff] %v3493_v32  ;;  %v3497_v14 = vadd.f32 %v3496_v41, %v3264_v34  ;;  %v3266_v3 = vadd.f32 %v3265_v49, %v9843_v38  ;;  %v3498_v63 = vpop.f32.mrf.mxu1  ;;  %v2201_v38 = vld [vmem:[%s11151_s2 + $0xbf8] sm:$0xff]  ;;  %v2183_v49 = vld [vmem:[%s11151_s2 + $0xb68] sm:$0xff] }
 0x2c3   :  { %4493 = vmatprep.subr.mxu0 %v1823_v55  ;;  %4726 = vmatprep.subr.mxu1 %v2015_v13  ;;  %v1990_v55 = vld [vmem:[%s11151_s2 + $0x560] sm:$0xff]  ;;  %v11163_v34 = vld [vmem:[#allocation9_spill] sm:$0xff] }
 0x2c4   :  { %4494 = vmatpush1.msra.mxu0 %v1822_v25  ;;  %5528 = vst [vmem:[#allocation3 + $0x420] sm:$0xff] %v3497_v14  ;;  %4379 = vmatmul.mubr.f32.gmra.mxu1 %v5963_v15  ;;  %v3499_v11 = vadd.f32 %v3498_v63, %v3266_v3  ;;  %v3269_v30 = vpop.f32.mrf.mxu0  ;;  %v3502_v42 = vpop.f32.mrf.mxu1  ;;  %v5975_v25 = vld [vmem:[#allocation2 + $0x460] sm:$0xff]  ;;  %v1985_v27 = vld [vmem:[%s11151_s2 + $0x538] sm:$0xff]  ;;  %v5976_v14 = vld [vmem:[#allocation2 + $0x470] sm:$0xff] }
 0x2c5   :  { %4146 = vmatmul.mubr.f32.gmra.mxu0 %v5964_v2  ;;  %4495 = vmatprep.subr.mxu0 %v2009_v56  ;;  %v3270_v4 = vadd.f32 %v3269_v30, %v9851_v24  ;;  %v2182_v3 = vld [vmem:[%s11151_s2 + $0xb60] sm:$0xff]  ;;  %v1984_v63 = vld [vmem:[%s11151_s2 + $0x530] sm:$0xff]  ;;  %v5978_v30 = vld [vmem:[#allocation2 + $0x4b8] sm:$0xff] }
 0x2c6   :  { %4727 = vmatpush1.msra.mxu1 %v2014_v18  ;;  %4151 = vmatprep.mubr.f32.mxu0 %v5965_v43  ;;  %5529 = vst [vmem:[#allocation3 + $0x428] sm:$0xff] %v3499_v11  ;;  %v3271_v46 = vpop.f32.mrf.mxu0  ;;  %v3504_v19 = vpop.f32.mrf.mxu1  ;;  %v11164_v18 = vld [vmem:[#allocation10_spill] sm:$0xff]  ;;  %v5977_v11 = vld [vmem:[#allocation2 + $0x4a8] sm:$0xff] }
 0x2c7   :  { %5747 = vmatprep.mubr.msk.f32.mxu1 %vm1376_vm2, %v5966_v1  ;;  %4496 = vmatpush2.msra.mxu0 %v2008_v7  ;;  %v3503_v40 = vadd.f32 %v3502_v42, %v3270_v4  ;;  %v3272_v24 = vadd.f32 %v3271_v46, %v9859_v59  ;;  %v1997_v59 = vld [vmem:[%s11151_s2 + $0x598] sm:$0xff]  ;;  %v11165_v4 = vld [vmem:[#allocation11_spill] sm:$0xff]  ;;  %v5979_v1 = vld [vmem:[#allocation2 + $0x4a0] sm:$0xff] }
 0x2c8   :  { %4728 = vmatprep.subr.mxu1 %v2201_v38  ;;  %4385 = vmatmul.mubr.f32.gmra.mxu1 %v5967_v17  ;;  %v3275_v16 = vpop.f32.mrf.mxu0  ;;  %v3508_v23 = vpop.f32.mrf.mxu1  ;;  %v2177_v38 = vld [vmem:[%s11151_s2 + $0xb38] sm:$0xff]  ;;  %v11166_v17 = vld [vmem:[#allocation12_spill] sm:$0xff] }
 0x2c9   :  { %4729 = vmatpush2.msra.mxu1 %v2200_v47  ;;  %5534 = vst [vmem:[#allocation3 + $0x450] sm:$0xff] %v3503_v40  ;;  %4152 = vmatmul.mubr.f32.gmra.mxu0 %v5968_v36  ;;  %v3505_v50 = vadd.f32 %v3504_v19, %v3272_v24  ;;  %v3276_v62 = vadd.f32 %v3275_v16, %v11160_v0  ;;  %v2176_v47 = vld [vmem:[%s11151_s2 + $0xb30] sm:$0xff]  ;;  %v1979_v24 = vld [vmem:[%s11151_s2 + $0x508] sm:$0xff]  ;;  %v1978_v36 = vld [vmem:[%s11151_s2 + $0x500] sm:$0xff] }
 0x2ca   :  { %4497 = vmatprep.subr.mxu0 %v2003_v35  ;;  %4157 = vmatprep.mubr.f32.mxu0 %v5969_v6  ;;  %v3277_v5 = vpop.f32.mrf.mxu0  ;;  %v3510_v29 = vpop.f32.mrf.mxu1  ;;  %v5980_v40 = vld [vmem:[#allocation2 + $0x4b0] sm:$0xff]  ;;  %v2171_v16 = vld [vmem:[%s11151_s2 + $0xb08] sm:$0xff]  ;;  %v1973_v6 = vld [vmem:[%s11151_s2 + $0x4d8] sm:$0xff] }
 0x2cb   :  { %5748 = vmatprep.mubr.msk.f32.mxu1 %vm1376_vm2, %v5970_v28  ;;  %4498 = vmatpush2.msra.mxu0 %v2002_v20  ;;  %5535 = vst [vmem:[#allocation3 + $0x458] sm:$0xff] %v3505_v50  ;;  %v3509_v54 = vadd.f32 %v3508_v23, %v3276_v62  ;;  %v3278_v53 = vadd.f32 %v3277_v5, %v11161_v48  ;;  %v5981_v23 = vld [vmem:[#allocation2 + $0x4e8] sm:$0xff]  ;;  %v5983_v5 = vld [vmem:[#allocation2 + $0x4f0] sm:$0xff]  ;;  %v5985_v48 = vld [vmem:[#allocation2 + $0x538] sm:$0xff] }
 0x2cc   :  { %4730 = vmatprep.subr.mxu1 %v2195_v8  ;;  %4499 = vmatprep.subr.mxu0 %v1997_v59  ;;  %v3514_v52 = vpop.f32.mrf.mxu1  ;;  %v5982_v59 = vld [vmem:[#allocation2 + $0x4f8] sm:$0xff] }
 0x2cd   :  { %4731 = vmatpush2.msra.mxu1 %v2194_v57  ;;  %5540 = vst [vmem:[#allocation3 + $0x480] sm:$0xff] %v3509_v54  ;;  %4158 = vmatmul.mubr.f32.gmra.mxu0 %v5971_v22  ;;  %v3511_v33 = vadd.f32 %v3510_v29, %v3278_v53  ;;  %v3281_v51 = vpop.f32.mrf.mxu0  ;;  %v2170_v29 = vld [vmem:[%s11151_s2 + $0xb00] sm:$0xff]  ;;  %v2165_v53 = vld [vmem:[%s11151_s2 + $0xad8] sm:$0xff] }
 0x2ce   :  { %4391 = vmatmul.mubr.f32.gmra.mxu1 %v5972_v44  ;;  %4500 = vmatpush2.msra.mxu0 %v1996_v9  ;;  %v3282_v12 = vadd.f32 %v3281_v51, %v11162_v21  ;;  %v3516_v37 = vpop.f32.mrf.mxu1  ;;  %v5984_v9 = vld [vmem:[#allocation2 + $0x4e0] sm:$0xff]  ;;  %v1967_v21 = vld [vmem:[%s11151_s2 + $0x4a8] sm:$0xff] }
 0x2cf   :  { %4163 = vmatprep.mubr.f32.mxu0 %v5973_v45  ;;  %5749 = vmatprep.mubr.msk.f32.mxu1 %vm1376_vm2, %v5974_v60  ;;  %5541 = vst [vmem:[#allocation3 + $0x488] sm:$0xff] %v3511_v33  ;;  %v3283_v32 = vpop.f32.mrf.mxu0  ;;  %v2164_v33 = vld [vmem:[%s11151_s2 + $0xad0] sm:$0xff]  ;;  %v5988_v45 = vld [vmem:[#allocation2 + $0x520] sm:$0xff] }
 0x2d0   :  { %4732 = vmatprep.subr.mxu1 %v2189_v31  ;;  %4501 = vmatprep.subr.mxu0 %v1991_v10  ;;  %v3515_v13 = vadd.f32 %v3514_v52, %v3282_v12  ;;  %v3284_v41 = vadd.f32 %v3283_v32, %v11163_v34  ;;  %v3520_v61 = vpop.f32.mrf.mxu1  ;;  %v5986_v31 = vld [vmem:[#allocation2 + $0x528] sm:$0xff]  ;;  %v1966_v60 = vld [vmem:[%s11151_s2 + $0x4a0] sm:$0xff]  ;;  %v5990_v34 = vld [vmem:[#allocation2 + $0x578] sm:$0xff] }
 0x2d1   :  { %4733 = vmatpush2.msra.mxu1 %v2188_v39  ;;  %4164 = vmatmul.mubr.f32.gmra.mxu0 %v5975_v25  ;;  %v3287_v26 = vpop.f32.mrf.mxu0  ;;  %v5987_v39 = vld [vmem:[#allocation2 + $0x530] sm:$0xff]  ;;  %v2159_v12 = vld [vmem:[%s11151_s2 + $0xaa8] sm:$0xff]  ;;  %v2158_v25 = vld [vmem:[%s11151_s2 + $0xaa0] sm:$0xff] }
 0x2d2   :  { %5546 = vst [vmem:[#allocation3 + $0x4b0] sm:$0xff] %v3515_v13  ;;  %4397 = vmatmul.mubr.f32.gmra.mxu1 %v5976_v14  ;;  %4502 = vmatpush2.msra.mxu0 %v1990_v55  ;;  %v3517_v56 = vadd.f32 %v3516_v37, %v3284_v41  ;;  %v3288_v15 = vadd.f32 %v3287_v26, %v11164_v18  ;;  %v3522_v7 = vpop.f32.mrf.mxu1  ;;  %v5989_v13 = vld [vmem:[#allocation2 + $0x568] sm:$0xff]  ;;  %v1961_v41 = vld [vmem:[%s11151_s2 + $0x478] sm:$0xff]  ;;  %v5991_v26 = vld [vmem:[#allocation2 + $0x570] sm:$0xff] }
 0x2d3   :  { %4169 = vmatprep.mubr.f32.mxu0 %v5977_v11  ;;  %5750 = vmatprep.mubr.msk.f32.mxu1 %vm1376_vm2, %v5978_v30  ;;  %v3289_v42 = vpop.f32.mrf.mxu0  ;;  %v1960_v14 = vld [vmem:[%s11151_s2 + $0x470] sm:$0xff] }
 0x2d4   :  { %4734 = vmatprep.subr.mxu1 %v2183_v49  ;;  %5547 = vst [vmem:[#allocation3 + $0x4b8] sm:$0xff] %v3517_v56  ;;  %4503 = vmatprep.subr.mxu0 %v1985_v27  ;;  %v3521_v2 = vadd.f32 %v3520_v61, %v3288_v15  ;;  %v3290_v43 = vadd.f32 %v3289_v42, %v11165_v4  ;;  %v2152_v11 = vld [vmem:[%s11151_s2 + $0xa70] sm:$0xff]  ;;  %v5994_v42 = vld [vmem:[#allocation2 + $0x5b8] sm:$0xff] }
 0x2d5   :  { %4735 = vmatpush2.msra.mxu1 %v2182_v3  ;;  %4504 = vmatpush2.msra.mxu0 %v1984_v63  ;;  %v3293_v46 = vpop.f32.mrf.mxu0  ;;  %v3526_v19 = vpop.f32.mrf.mxu1  ;;  %v5992_v3 = vld [vmem:[#allocation2 + $0x560] sm:$0xff]  ;;  %v2153_v63 = vld [vmem:[%s11151_s2 + $0xa78] sm:$0xff] }
 0x2d6   :  { %5552 = vst [vmem:[#allocation3 + $0x4e0] sm:$0xff] %v3521_v2  ;;  %4170 = vmatmul.mubr.f32.gmra.mxu0 %v5979_v1  ;;  %4403 = vmatmul.mubr.f32.gmra.mxu1 %v5980_v40  ;;  %v3523_v35 = vadd.f32 %v3522_v7, %v3290_v43  ;;  %v3294_v20 = vadd.f32 %v3293_v46, %v11166_v17  ;;  %v5993_v7 = vld [vmem:[#allocation2 + $0x5a8] sm:$0xff]  ;;  %v5995_v43 = vld [vmem:[#allocation2 + $0x5b0] sm:$0xff]  ;;  %v1949_v40 = vld [vmem:[%s11151_s2 + $0x418] sm:$0xff] }
 0x2d7   :  { %4736 = vmatprep.subr.mxu1 %v2177_v38  ;;  %4175 = vmatprep.mubr.f32.mxu0 %v5981_v23  ;;  %v3295_v50 = vpop.f32.mrf.mxu0  ;;  %v3528_v8 = vpop.f32.mrf.mxu1  ;;  %v1955_v2 = vld [vmem:[%s11151_s2 + $0x448] sm:$0xff]  ;;  %v5998_v23 = vld [vmem:[#allocation2 + $0x5f8] sm:$0xff] }
 0x2d8   :  { %5751 = vmatprep.mubr.msk.f32.mxu1 %vm1376_vm2, %v5982_v59  ;;  %4737 = vmatpush2.msra.mxu1 %v2176_v47  ;;  %5553 = vst [vmem:[#allocation3 + $0x4e8] sm:$0xff] %v3523_v35  ;;  %v3527_v0 = vadd.f32 %v3526_v19, %v3294_v20  ;;  %v3296_v62 = vadd.f32 %v3295_v50, %v9923_v58  ;;  %v1972_v58 = vld [vmem:[%s11151_s2 + $0x4d0] sm:$0xff]  ;;  %v1954_v47 = vld [vmem:[%s11151_s2 + $0x440] sm:$0xff]  ;;  %v2147_v1 = vld [vmem:[%s11151_s2 + $0xa48] sm:$0xff] }
 0x2d9   :  { %4505 = vmatprep.subr.mxu0 %v1979_v24  ;;  %4738 = vmatprep.subr.mxu1 %v2171_v16  ;;  %v3597_v57 = vpop.f32.mrf.mxu0  ;;  %v5996_v19 = vld [vmem:[#allocation2 + $0x5a0] sm:$0xff]  ;;  %v5997_v17 = vld [vmem:[#allocation2 + $0x5e8] sm:$0xff] }
 0x2da   :  { %4506 = vmatpush2.msra.mxu0 %v1978_v36  ;;  %5558 = vst [vmem:[#allocation3 + $0x510] sm:$0xff] %v3527_v0  ;;  %4409 = vmatmul.mubr.f32.gmra.mxu1 %v5983_v5  ;;  %v3529_v28 = vadd.f32 %v3528_v8, %v3296_v62  ;;  %v3830_v54 = vpop.f32.mrf.mxu1  ;;  %v2146_v20 = vld [vmem:[%s11151_s2 + $0xa40] sm:$0xff]  ;;  %v1948_v36 = vld [vmem:[%s11151_s2 + $0x410] sm:$0xff]  ;;  %v2141_v62 = vld [vmem:[%s11151_s2 + $0xa18] sm:$0xff] }
 0x2db   :  { %4176 = vmatmul.mubr.f32.gmra.mxu0 %v5984_v9  ;;  %5752 = vmatprep.mubr.msk.f32.mxu1 %vm1376_vm2, %v5985_v48  ;;  %v10340_v52 = vadd.f32 %v3830_v54, %v3597_v57  ;;  %v3599_v22 = vpop.f32.mrf.mxu0  ;;  %v5999_v0 = vld [vmem:[#allocation2 + $0x5e0] sm:$0xff]  ;;  %v6000_v5 = vld [vmem:[#allocation2 + $0x5f0] sm:$0xff]  ;;  %v6001_v54 = vld [vmem:[#allocation2 + $0x628] sm:$0xff] }
 0x2dc   :  { %4181 = vmatprep.mubr.f32.mxu0 %v5986_v31  ;;  %4507 = vmatprep.subr.mxu0 %v1973_v6  ;;  %5559 = vst [vmem:[#allocation3 + $0x518] sm:$0xff] %v3529_v28  ;;  %v3832_v10 = vpop.f32.mrf.mxu1  ;;  %v1943_v6 = vld [vmem:[%s11151_s2 + $0x3e8] sm:$0xff]  ;;  %v6002_v9 = vld [vmem:[#allocation2 + $0x638] sm:$0xff]  ;;  %v1942_v48 = vld [vmem:[%s11151_s2 + $0x3e0] sm:$0xff] }
 0x2dd   :  { %4739 = vmatpush2.msra.mxu1 %v2170_v29  ;;  %4508 = vmatpush2.msra.mxu0 %v1972_v58  ;;  %v10345_v51 = vadd.f32 %v3832_v10, %v3599_v22  ;;  %v3603_v44 = vpop.f32.mrf.mxu0  ;;  %v2140_v29 = vld [vmem:[%s11151_s2 + $0xa10] sm:$0xff]  ;;  %v2135_v10 = vld [vmem:[%s11151_s2 + $0x9e8] sm:$0xff] }
 0x2de   :  { %4740 = vmatprep.subr.mxu1 %v2165_v53  ;;  %4415 = vmatmul.mubr.f32.gmra.mxu1 %v5987_v39  ;;  %v3836_v37 = vpop.f32.mrf.mxu1 }
 0x2df   :  { %4182 = vmatmul.mubr.f32.gmra.mxu0 %v5988_v45  ;;  %4741 = vmatpush2.msra.mxu1 %v2164_v33  ;;  %v10356_v55 = vadd.f32 %v3836_v37, %v3603_v44  ;;  %v3605_v32 = vpop.f32.mrf.mxu0  ;;  %v6003_v33 = vld [vmem:[#allocation2 + $0x620] sm:$0xff]  ;;  %v1937_v44 = vld [vmem:[%s11151_s2 + $0x3b8] sm:$0xff]  ;;  %v1936_v37 = vld [vmem:[%s11151_s2 + $0x3b0] sm:$0xff] }
 0x2e0   :  { %4187 = vmatprep.mubr.f32.mxu0 %v5989_v13  ;;  %5753 = vmatprep.mubr.msk.f32.mxu1 %vm1376_vm2, %v5990_v34  ;;  %v3838_v61 = vpop.f32.mrf.mxu1  ;;  %v6006_v13 = vld [vmem:[#allocation2 + $0x678] sm:$0xff] }
 0x2e1   :  { %4509 = vmatprep.subr.mxu0 %v1967_v21  ;;  %4742 = vmatprep.subr.mxu1 %v2159_v12  ;;  %v10365_v49 = vadd.f32 %v3838_v61, %v3605_v32  ;;  %v3609_v27 = vpop.f32.mrf.mxu0  ;;  %v6004_v21 = vld [vmem:[#allocation2 + $0x630] sm:$0xff]  ;;  %v2134_v12 = vld [vmem:[%s11151_s2 + $0x9e0] sm:$0xff]  ;;  %v6005_v32 = vld [vmem:[#allocation2 + $0x668] sm:$0xff] }
 0x2e2   :  { %4510 = vmatpush2.msra.mxu0 %v1966_v60  ;;  %4421 = vmatmul.mubr.f32.gmra.mxu1 %v5991_v26  ;;  %v3842_v56 = vpop.f32.mrf.mxu1 }
 0x2e3   :  { %4188 = vmatmul.mubr.f32.gmra.mxu0 %v5992_v3  ;;  %4511 = vmatprep.subr.mxu0 %v1961_v41  ;;  %v10373_v18 = vadd.f32 %v3842_v56, %v3609_v27  ;;  %v3611_v15 = vpop.f32.mrf.mxu0  ;;  %v2129_v41 = vld [vmem:[%s11151_s2 + $0x9b8] sm:$0xff]  ;;  %v2128_v27 = vld [vmem:[%s11151_s2 + $0x9b0] sm:$0xff]  ;;  %v1931_v3 = vld [vmem:[%s11151_s2 + $0x388] sm:$0xff] }
 0x2e4   :  { %4743 = vmatpush2.msra.mxu1 %v2158_v25  ;;  %4193 = vmatprep.mubr.f32.mxu0 %v5993_v7  ;;  %v3844_v30 = vpop.f32.mrf.mxu1  ;;  %v6008_v56 = vld [vmem:[#allocation2 + $0x670] sm:$0xff] }
 0x2e5   :  { %5754 = vmatprep.mubr.msk.f32.mxu1 %vm1376_vm2, %v5994_v42  ;;  %4512 = vmatpush2.msra.mxu0 %v1960_v14  ;;  %v10382_v38 = vadd.f32 %v3844_v30, %v3611_v15  ;;  %v3615_v4 = vpop.f32.mrf.mxu0  ;;  %v6007_v14 = vld [vmem:[#allocation2 + $0x660] sm:$0xff] }
 0x2e6   :  { %4744 = vmatprep.subr.mxu1 %v2153_v63  ;;  %4427 = vmatmul.mubr.f32.gmra.mxu1 %v5995_v43  ;;  %v3848_v46 = vpop.f32.mrf.mxu1  ;;  %v2123_v63 = vld [vmem:[%s11151_s2 + $0x988] sm:$0xff]  ;;  %v1930_v30 = vld [vmem:[%s11151_s2 + $0x380] sm:$0xff] }
 0x2e7   :  { %4745 = vmatpush2.msra.mxu1 %v2152_v11  ;;  %4194 = vmatmul.mubr.f32.gmra.mxu0 %v5996_v19  ;;  %v10393_v35 = vadd.f32 %v3848_v46, %v3615_v4  ;;  %v3617_v24 = vpop.f32.mrf.mxu0  ;;  %v6009_v11 = vld [vmem:[#allocation2 + $0x6a8] sm:$0xff]  ;;  %v6011_v19 = vld [vmem:[#allocation2 + $0x6b0] sm:$0xff] }
 0x2e8   :  { %4513 = vmatprep.subr.mxu0 %v1955_v2  ;;  %4199 = vmatprep.mubr.f32.mxu0 %v5997_v17  ;;  %v3850_v16 = vpop.f32.mrf.mxu1  ;;  %v6010_v2 = vld [vmem:[#allocation2 + $0x6b8] sm:$0xff] }
 0x2e9   :  { %5755 = vmatprep.mubr.msk.f32.mxu1 %vm1376_vm2, %v5998_v23  ;;  %4514 = vmatpush2.msra.mxu0 %v1954_v47  ;;  %v10402_v50 = vadd.f32 %v3850_v16, %v3617_v24  ;;  %v1925_v47 = vld [vmem:[%s11151_s2 + $0x358] sm:$0xff] }
 0x2ea   :  { %4746 = vmatprep.subr.mxu1 %v2147_v1  ;;  %4515 = vmatprep.subr.mxu0 %v1949_v40  ;;  %v3621_v8 = vpop.f32.mrf.mxu0  ;;  %v3854_v59 = vpop.f32.mrf.mxu1  ;;  %v2122_v1 = vld [vmem:[%s11151_s2 + $0x980] sm:$0xff]  ;;  %v1924_v40 = vld [vmem:[%s11151_s2 + $0x350] sm:$0xff]  ;;  %v6013_v16 = vld [vmem:[#allocation2 + $0x6f8] sm:$0xff] }
 0x2eb   :  { %4747 = vmatpush2.msra.mxu1 %v2146_v20  ;;  %4200 = vmatmul.mubr.f32.gmra.mxu0 %v5999_v0  ;;  %v10410_v57 = vadd.f32 %v3854_v59, %v3621_v8  ;;  %v6012_v20 = vld [vmem:[#allocation2 + $0x6a0] sm:$0xff]  ;;  %v2117_v23 = vld [vmem:[%s11151_s2 + $0x958] sm:$0xff]  ;;  %v6014_v8 = vld [vmem:[#allocation2 + $0x6e8] sm:$0xff] }
 0x2ec   :  { %4433 = vmatmul.mubr.f32.gmra.mxu1 %v6000_v5  ;;  %4516 = vmatpush2.msra.mxu0 %v1948_v36  ;;  %v3623_v28 = vpop.f32.mrf.mxu0  ;;  %v3856_v58 = vpop.f32.mrf.mxu1  ;;  %v2116_v59 = vld [vmem:[%s11151_s2 + $0x950] sm:$0xff] }
 0x2ed   :  { %4205 = vmatprep.mubr.f32.mxu0 %v6001_v54  ;;  %5756 = vmatprep.mubr.msk.f32.mxu1 %vm1376_vm2, %v6002_v9  ;;  %v10419_v53 = vadd.f32 %v3856_v58, %v3623_v28  ;;  %v1918_v28 = vld [vmem:[%s11151_s2 + $0x320] sm:$0xff] }
 0x2ee   :  { %4748 = vmatprep.subr.mxu1 %v2141_v62  ;;  %4517 = vmatprep.subr.mxu0 %v1943_v6  ;;  %v3627_v22 = vpop.f32.mrf.mxu0  ;;  %v3860_v31 = vpop.f32.mrf.mxu1  ;;  %v1919_v6 = vld [vmem:[%s11151_s2 + $0x328] sm:$0xff]  ;;  %v6016_v9 = vld [vmem:[#allocation2 + $0x6e0] sm:$0xff] }
 0x2ef   :  { %4749 = vmatpush2.msra.mxu1 %v2140_v29  ;;  %4206 = vmatmul.mubr.f32.gmra.mxu0 %v6003_v33  ;;  %v10427_v39 = vadd.f32 %v3860_v31, %v3627_v22  ;;  %v6015_v29 = vld [vmem:[#allocation2 + $0x6f0] sm:$0xff]  ;;  %v2297_v22 = vld [vmem:[%s11151_s2 + $0xef8] sm:$0xff]  ;;  %v6017_v33 = vld [vmem:[#allocation2 + $0x8] sm:$0xff] }
 0x2f0   :  { %4439 = vmatmul.mubr.f32.gmra.mxu1 %v6004_v21  ;;  %4518 = vmatpush2.msra.mxu0 %v1942_v48  ;;  %v3629_v45 = vpop.f32.mrf.mxu0  ;;  %v3862_v60 = vpop.f32.mrf.mxu1  ;;  %v2111_v48 = vld [vmem:[%s11151_s2 + $0x928] sm:$0xff] }
 0x2f1   :  { %4211 = vmatprep.mubr.f32.mxu0 %v6005_v32  ;;  %5757 = vmatprep.mubr.msk.f32.mxu1 %vm1376_vm2, %v6006_v13  ;;  %v10436_v34 = vadd.f32 %v3862_v60, %v3629_v45  ;;  %v2296_v45 = vld [vmem:[%s11151_s2 + $0xef0] sm:$0xff]  ;;  %v6019_v13 = vld [vmem:[#allocation2] sm:$0xff] }
 0x2f2   :  { %4750 = vmatprep.subr.mxu1 %v2135_v10  ;;  %4519 = vmatprep.subr.mxu0 %v1937_v44  ;;  %v3633_v61 = vpop.f32.mrf.mxu0  ;;  %v3866_v25 = vpop.f32.mrf.mxu1  ;;  %v2110_v10 = vld [vmem:[%s11151_s2 + $0x920] sm:$0xff] }
 0x2f3   :  { %4751 = vmatpush2.msra.mxu1 %v2134_v12  ;;  %4520 = vmatpush2.msra.mxu0 %v1936_v37  ;;  %v10444_v26 = vadd.f32 %v3866_v25, %v3633_v61  ;;  %v6018_v12 = vld [vmem:[#allocation2 + $0x18] sm:$0xff]  ;;  %v2291_v61 = vld [vmem:[%s11151_s2 + $0xec8] sm:$0xff] }
 0x2f4   :  { %4212 = vmatmul.mubr.f32.gmra.mxu0 %v6007_v14  ;;  %4445 = vmatmul.mubr.f32.gmra.mxu1 %v6008_v56  ;;  %v3635_v15 = vpop.f32.mrf.mxu0  ;;  %v3868_v7 = vpop.f32.mrf.mxu1  ;;  %v6021_v14 = vld [vmem:[#allocation2 + $0x48] sm:$0xff]  ;;  %v2488_v56 = vld [vmem:[%s11151_s2 + $0x14f0] sm:$0xff] }
 0x2f5   :  { %4752 = vmatprep.subr.mxu1 %v2129_v41  ;;  %4217 = vmatprep.mubr.f32.mxu0 %v6009_v11  ;;  %v10455_v42 = vadd.f32 %v3868_v7, %v3635_v15  ;;  %v2489_v41 = vld [vmem:[%s11151_s2 + $0x14f8] sm:$0xff]  ;;  %v2290_v11 = vld [vmem:[%s11151_s2 + $0xec0] sm:$0xff] }
 0x2f6   :  { %5758 = vmatprep.mubr.msk.f32.mxu1 %vm1376_vm2, %v6010_v2  ;;  %4753 = vmatpush2.msra.mxu1 %v2128_v27  ;;  %v3639_v4 = vpop.f32.mrf.mxu0  ;;  %v3872_v43 = vpop.f32.mrf.mxu1  ;;  %v6020_v27 = vld [vmem:[#allocation2 + $0x10] sm:$0xff]  ;;  %v6022_v15 = vld [vmem:[#allocation2 + $0x58] sm:$0xff] }
 0x2f7   :  { %4521 = vmatprep.subr.mxu0 %v1931_v3  ;;  %4754 = vmatprep.subr.mxu1 %v2123_v63  ;;  %v10461_v46 = vadd.f32 %v3872_v43, %v3639_v4  ;;  %v6023_v4 = vld [vmem:[#allocation2 + $0x40] sm:$0xff]  ;;  %v2285_v43 = vld [vmem:[%s11151_s2 + $0xe98] sm:$0xff] }
 0x2f8   :  { %4522 = vmatpush2.msra.mxu0 %v1930_v30  ;;  %4451 = vmatmul.mubr.f32.gmra.mxu1 %v6011_v19  ;;  %v3641_v24 = vpop.f32.mrf.mxu0  ;;  %v3874_v17 = vpop.f32.mrf.mxu1 }
 0x2f9   :  { %4218 = vmatmul.mubr.f32.gmra.mxu0 %v6012_v20  ;;  %5759 = vmatprep.mubr.msk.f32.mxu1 %vm1376_vm2, %v6013_v16  ;;  %v10473_v36 = vadd.f32 %v3874_v17, %v3641_v24  ;;  %v2482_v24 = vld [vmem:[%s11151_s2 + $0x14c0] sm:$0xff]  ;;  %v6026_v16 = vld [vmem:[#allocation2 + $0x98] sm:$0xff] }
 0x2fa   :  { %4223 = vmatprep.mubr.f32.mxu0 %v6014_v8  ;;  %4523 = vmatprep.subr.mxu0 %v1925_v47  ;;  %v3645_v0 = vpop.f32.mrf.mxu0  ;;  %v3878_v62 = vpop.f32.mrf.mxu1  ;;  %v2483_v47 = vld [vmem:[%s11151_s2 + $0x14c8] sm:$0xff] }
 0x2fb   :  { %4755 = vmatpush2.msra.mxu1 %v2122_v1  ;;  %4524 = vmatpush2.msra.mxu0 %v1924_v40  ;;  %v10481_v5 = vadd.f32 %v3878_v62, %v3645_v0  ;;  %v6024_v1 = vld [vmem:[#allocation2 + $0x50] sm:$0xff]  ;;  %v6025_v40 = vld [vmem:[#allocation2 + $0x88] sm:$0xff]  ;;  %v6027_v62 = vld [vmem:[#allocation2 + $0x80] sm:$0xff] }
 0x2fc   :  { %4756 = vmatprep.subr.mxu1 %v2117_v23  ;;  %4457 = vmatmul.mubr.f32.gmra.mxu1 %v6015_v29  ;;  %v3647_v58 = vpop.f32.mrf.mxu0  ;;  %v3880_v54 = vpop.f32.mrf.mxu1  ;;  %v2284_v23 = vld [vmem:[%s11151_s2 + $0xe90] sm:$0xff] }
 0x2fd   :  { %4224 = vmatmul.mubr.f32.gmra.mxu0 %v6016_v9  ;;  %4757 = vmatpush2.msra.mxu1 %v2116_v59  ;;  %v10492_v31 = vadd.f32 %v3880_v54, %v3647_v58  ;;  %v6028_v58 = vld [vmem:[#allocation2 + $0x90] sm:$0xff] }
 0x2fe   :  { %4525 = vmatprep.subr.mxu0 %v1919_v6  ;;  %4527 = vmatprep.mubr.f32.mxu0 %v6017_v33  ;;  %v3651_v44 = vpop.f32.mrf.mxu0  ;;  %v3884_v21 = vpop.f32.mrf.mxu1  ;;  %v2279_v6 = vld [vmem:[%s11151_s2 + $0xe68] sm:$0xff]  ;;  %v6030_v33 = vld [vmem:[#allocation2 + $0xd8] sm:$0xff] }
 0x2ff   :  { %4760 = vmatprep.mubr.f32.mxu1 %v6018_v12  ;;  %4526 = vmatpush2.msra.mxu0 %v1918_v28  ;;  %v10497_v37 = vadd.f32 %v3884_v21, %v3651_v44  ;;  %v2477_v28 = vld [vmem:[%s11151_s2 + $0x1498] sm:$0xff] }
 0x300   :  { %4758 = vmatprep.subr.mxu1 %v2111_v48  ;;  %4929 = vmatprep.subr.mxu0 %v2297_v22  ;;  %v3653_v60 = vpop.f32.mrf.mxu0  ;;  %v3886_v32 = vpop.f32.mrf.mxu1  ;;  %v2476_v48 = vld [vmem:[%s11151_s2 + $0x1490] sm:$0xff]  ;;  %v6029_v22 = vld [vmem:[#allocation2 + $0xc8] sm:$0xff] }
 0x301   :  { %4759 = vmatpush2.msra.mxu1 %v2110_v10  ;;  %4528 = vmatmul.mubr.f32.vlgmr.msra.gmra.mxu0 %v6019_v13  ;;  %v10508_v25 = vadd.f32 %v3886_v32, %v3653_v60  ;;  %v2278_v10 = vld [vmem:[%s11151_s2 + $0xe60] sm:$0xff]  ;;  %v2273_v60 = vld [vmem:[%s11151_s2 + $0xe38] sm:$0xff]  ;;  %v2471_v13 = vld [vmem:[%s11151_s2 + $0x1468] sm:$0xff] }
 0x302   :  { %4761 = vmatmul.mubr.f32.vlgmr.msra.gmra.mxu1 %v6020_v27  ;;  %4533 = vmatprep.mubr.f32.mxu0 %v6021_v14  ;;  %v3657_v3 = vpop.f32.mrf.mxu0  ;;  %v3890_v63 = vpop.f32.mrf.mxu1 }
 0x303   :  { %4766 = vmatprep.mubr.f32.mxu1 %v6022_v15  ;;  %4930 = vmatpush1.msra.mxu0 %v2296_v45  ;;  %v10513_v7 = vadd.f32 %v3890_v63, %v3657_v3  ;;  %v6031_v45 = vld [vmem:[#allocation2 + $0xc0] sm:$0xff]  ;;  %v6033_v3 = vld [vmem:[#allocation2 + $0x108] sm:$0xff]  ;;  %v6034_v63 = vld [vmem:[#allocation2 + $0x118] sm:$0xff] }
 0x304   :  { %5162 = vmatprep.subr.mxu1 %v2489_v41  ;;  %4931 = vmatprep.subr.mxu0 %v2291_v61  ;;  %v3659_v30 = vpop.f32.mrf.mxu0  ;;  %v3892_v2 = vpop.f32.mrf.mxu1  ;;  %v6032_v41 = vld [vmem:[#allocation2 + $0xd0] sm:$0xff] }
 0x305   :  { %5163 = vmatpush1.msra.mxu1 %v2488_v56  ;;  %4534 = vmatmul.mubr.f32.gmra.mxu0 %v6023_v4  ;;  %v10524_v19 = vadd.f32 %v3892_v2, %v3659_v30  ;;  %v2272_v61 = vld [vmem:[%s11151_s2 + $0xe30] sm:$0xff]  ;;  %v2470_v56 = vld [vmem:[%s11151_s2 + $0x1460] sm:$0xff]  ;;  %v2267_v2 = vld [vmem:[%s11151_s2 + $0xe08] sm:$0xff] }
 0x306   :  { %4767 = vmatmul.mubr.f32.gmra.mxu1 %v6024_v1  ;;  %4539 = vmatprep.mubr.f32.mxu0 %v6025_v40  ;;  %v3663_v17 = vpop.f32.mrf.mxu0  ;;  %v3896_v20 = vpop.f32.mrf.mxu1  ;;  %v6036_v1 = vld [vmem:[#allocation2 + $0x110] sm:$0xff]  ;;  %v2266_v40 = vld [vmem:[%s11151_s2 + $0xe00] sm:$0xff] }
 0x307   :  { %4772 = vmatprep.mubr.f32.mxu1 %v6026_v16  ;;  %4932 = vmatpush1.msra.mxu0 %v2290_v11  ;;  %v10532_v8 = vadd.f32 %v3896_v20, %v3663_v17  ;;  %v2464_v20 = vld [vmem:[%s11151_s2 + $0x1430] sm:$0xff]  ;;  %v6037_v16 = vld [vmem:[#allocation2 + $0x148] sm:$0xff] }
 0x308   :  { %4933 = vmatprep.subr.mxu0 %v2285_v43  ;;  %5164 = vmatprep.subr.mxu1 %v2483_v47  ;;  %v3665_v59 = vpop.f32.mrf.mxu0  ;;  %v3898_v0 = vpop.f32.mrf.mxu1  ;;  %v2465_v43 = vld [vmem:[%s11151_s2 + $0x1438] sm:$0xff]  ;;  %v6035_v47 = vld [vmem:[#allocation2 + $0x100] sm:$0xff] }
 0x309   :  { %4540 = vmatmul.mubr.f32.gmra.mxu0 %v6027_v62  ;;  %5165 = vmatpush1.msra.mxu1 %v2482_v24  ;;  %v10537_v29 = vadd.f32 %v3898_v0, %v3665_v59 }
 0x30a   :  { %4773 = vmatmul.mubr.f32.gmra.mxu1 %v6028_v58  ;;  %4934 = vmatpush1.msra.mxu0 %v2284_v23  ;;  %v3669_v54 = vpop.f32.mrf.mxu0  ;;  %v3902_v9 = vpop.f32.mrf.mxu1  ;;  %v6038_v23 = vld [vmem:[#allocation2 + $0x158] sm:$0xff]  ;;  %v2459_v58 = vld [vmem:[%s11151_s2 + $0x1408] sm:$0xff] }
 0x30b   :  { %4545 = vmatprep.mubr.f32.mxu0 %v6029_v22  ;;  %4778 = vmatprep.mubr.f32.mxu1 %v6030_v33  ;;  %v10548_v44 = vadd.f32 %v3902_v9, %v3669_v54  ;;  %v6039_v54 = vld [vmem:[#allocation2 + $0x140] sm:$0xff]  ;;  %v6040_v9 = vld [vmem:[#allocation2 + $0x150] sm:$0xff] }
 0x30c   :  { %4935 = vmatprep.subr.mxu0 %v2279_v6  ;;  %5166 = vmatprep.subr.mxu1 %v2477_v28  ;;  %v3671_v21 = vpop.f32.mrf.mxu0  ;;  %v3904_v12 = vpop.f32.mrf.mxu1  ;;  %v2261_v6 = vld [vmem:[%s11151_s2 + $0xdd8] sm:$0xff] }
 0x30d   :  { %4546 = vmatmul.mubr.f32.gmra.mxu0 %v6031_v45  ;;  %5167 = vmatpush1.msra.mxu1 %v2476_v48  ;;  %v10553_v32 = vadd.f32 %v3904_v12, %v3671_v21  ;;  %v2260_v48 = vld [vmem:[%s11151_s2 + $0xdd0] sm:$0xff]  ;;  %v6041_v21 = vld [vmem:[#allocation2 + $0x188] sm:$0xff]  ;;  %v6042_v12 = vld [vmem:[#allocation2 + $0x198] sm:$0xff] }
 0x30e   :  { %4779 = vmatmul.mubr.f32.gmra.mxu1 %v6032_v41  ;;  %4936 = vmatpush1.msra.mxu0 %v2278_v10  ;;  %v3675_v27 = vpop.f32.mrf.mxu0  ;;  %v3908_v14 = vpop.f32.mrf.mxu1  ;;  %v2458_v10 = vld [vmem:[%s11151_s2 + $0x1400] sm:$0xff]  ;;  %v2255_v41 = vld [vmem:[%s11151_s2 + $0xda8] sm:$0xff] }
 0x30f   :  { %4551 = vmatprep.mubr.f32.mxu0 %v6033_v3  ;;  %4784 = vmatprep.mubr.f32.mxu1 %v6034_v63  ;;  %v10564_v15 = vadd.f32 %v3908_v14, %v3675_v27  ;;  %v2453_v27 = vld [vmem:[%s11151_s2 + $0x13d8] sm:$0xff]  ;;  %v6043_v14 = vld [vmem:[#allocation2 + $0x180] sm:$0xff] }
 0x310   :  { %4937 = vmatprep.subr.mxu0 %v2273_v60  ;;  %v3677_v11 = vpop.f32.mrf.mxu0  ;;  %v3910_v30 = vpop.f32.mrf.mxu1  ;;  %5168 = vmatprep.subr.mxu1 %v2471_v13  ;;  %v2254_v3 = vld [vmem:[%s11151_s2 + $0xda0] sm:$0xff] }
 0x311   :  { %4938 = vmatpush1.msra.mxu0 %v2272_v61  ;;  %v10569_v4 = vadd.f32 %v3910_v30, %v3677_v11  ;;  %5169 = vmatpush1.msra.mxu1 %v2470_v56  ;;  %v6044_v56 = vld [vmem:[#allocation2 + $0x190] sm:$0xff] }
 0x312   :  { %4552 = vmatmul.mubr.f32.gmra.mxu0 %v6035_v47  ;;  %4785 = vmatmul.mubr.f32.gmra.mxu1 %v6036_v1  ;;  %v3681_v24 = vpop.f32.mrf.mxu0  ;;  %v3914_v17 = vpop.f32.mrf.mxu1  ;;  %v2452_v30 = vld [vmem:[%s11151_s2 + $0x13d0] sm:$0xff]  ;;  %v2249_v1 = vld [vmem:[%s11151_s2 + $0xd78] sm:$0xff] }
 0x313   :  { %4557 = vmatprep.mubr.f32.mxu0 %v6037_v16  ;;  %4790 = vmatprep.mubr.f32.mxu1 %v6038_v23  ;;  %v10580_v59 = vadd.f32 %v3914_v17, %v3681_v24  ;;  %v2248_v17 = vld [vmem:[%s11151_s2 + $0xd70] sm:$0xff]  ;;  %v6047_v16 = vld [vmem:[#allocation2 + $0x1c0] sm:$0xff] }
 0x314   :  { %4939 = vmatprep.subr.mxu0 %v2267_v2  ;;  %v3683_v0 = vpop.f32.mrf.mxu0  ;;  %v3916_v62 = vpop.f32.mrf.mxu1  ;;  %5170 = vmatprep.subr.mxu1 %v2465_v43  ;;  %v6045_v2 = vld [vmem:[#allocation2 + $0x1c8] sm:$0xff]  ;;  %v6046_v43 = vld [vmem:[#allocation2 + $0x1d8] sm:$0xff]  ;;  %v6048_v23 = vld [vmem:[#allocation2 + $0x1d0] sm:$0xff] }
 0x315   :  { %4940 = vmatpush1.msra.mxu0 %v2266_v40  ;;  %v10585_v28 = vadd.f32 %v3916_v62, %v3683_v0  ;;  %5171 = vmatpush1.msra.mxu1 %v2464_v20  ;;  %v2243_v0 = vld [vmem:[%s11151_s2 + $0xd48] sm:$0xff] }
 0x316   :  { %4558 = vmatmul.mubr.f32.gmra.mxu0 %v6039_v54  ;;  %4791 = vmatmul.mubr.f32.gmra.mxu1 %v6040_v9  ;;  %v3687_v22 = vpop.f32.mrf.mxu0  ;;  %v3920_v33 = vpop.f32.mrf.mxu1  ;;  %v6049_v54 = vld [vmem:[#allocation2 + $0x208] sm:$0xff] }
 0x317   :  { %4563 = vmatprep.mubr.f32.mxu0 %v6041_v21  ;;  %4796 = vmatprep.mubr.f32.mxu1 %v6042_v12  ;;  %v10596_v45 = vadd.f32 %v3920_v33, %v3687_v22  ;;  %v2446_v12 = vld [vmem:[%s11151_s2 + $0x13a0] sm:$0xff] }
 0x318   :  { %4941 = vmatprep.subr.mxu0 %v2261_v6  ;;  %v3689_v60 = vpop.f32.mrf.mxu0  ;;  %v3922_v13 = vpop.f32.mrf.mxu1  ;;  %5172 = vmatprep.subr.mxu1 %v2459_v58  ;;  %v2447_v58 = vld [vmem:[%s11151_s2 + $0x13a8] sm:$0xff] }
 0x319   :  { %4942 = vmatpush1.msra.mxu0 %v2260_v48  ;;  %v10601_v61 = vadd.f32 %v3922_v13, %v3689_v60  ;;  %5173 = vmatpush1.msra.mxu1 %v2458_v10  ;;  %v6050_v48 = vld [vmem:[#allocation2 + $0x218] sm:$0xff]  ;;  %v2242_v10 = vld [vmem:[%s11151_s2 + $0xd40] sm:$0xff]  ;;  %v6052_v13 = vld [vmem:[#allocation2 + $0x210] sm:$0xff] }
 0x31a   :  { %4564 = vmatmul.mubr.f32.gmra.mxu0 %v6043_v14  ;;  %4797 = vmatmul.mubr.f32.gmra.mxu1 %v6044_v56  ;;  %v3693_v63 = vpop.f32.mrf.mxu0  ;;  %v3926_v11 = vpop.f32.mrf.mxu1  ;;  %v6051_v60 = vld [vmem:[#allocation2 + $0x200] sm:$0xff]  ;;  %v2441_v56 = vld [vmem:[%s11151_s2 + $0x1378] sm:$0xff] }
 0x31b   :  { %4569 = vmatprep.mubr.f32.mxu0 %v6045_v2  ;;  %4802 = vmatprep.mubr.f32.mxu1 %v6046_v43  ;;  %v10612_v47 = vadd.f32 %v3926_v11, %v3693_v63  ;;  %v6054_v63 = vld [vmem:[#allocation2 + $0x258] sm:$0xff] }
 0x31c   :  { %4943 = vmatprep.subr.mxu0 %v2255_v41  ;;  %v3695_v40 = vpop.f32.mrf.mxu0  ;;  %v3928_v24 = vpop.f32.mrf.mxu1  ;;  %5174 = vmatprep.subr.mxu1 %v2453_v27  ;;  %v2237_v41 = vld [vmem:[%s11151_s2 + $0xd18] sm:$0xff] }
 0x31d   :  { %4944 = vmatpush1.msra.mxu0 %v2254_v3  ;;  %v10620_v20 = vadd.f32 %v3928_v24, %v3695_v40  ;;  %5175 = vmatpush1.msra.mxu1 %v2452_v30  ;;  %v6053_v3 = vld [vmem:[#allocation2 + $0x248] sm:$0xff]  ;;  %v2236_v30 = vld [vmem:[%s11151_s2 + $0xd10] sm:$0xff]  ;;  %v6055_v24 = vld [vmem:[#allocation2 + $0x240] sm:$0xff] }
 0x31e   :  { %4570 = vmatmul.mubr.f32.gmra.mxu0 %v6047_v16  ;;  %4803 = vmatmul.mubr.f32.gmra.mxu1 %v6048_v23  ;;  %v3699_v62 = vpop.f32.mrf.mxu0  ;;  %v3932_v6 = vpop.f32.mrf.mxu1  ;;  %v2230_v16 = vld [vmem:[%s11151_s2 + $0xce0] sm:$0xff] }
 0x31f   :  { %4945 = vmatprep.subr.mxu0 %v2249_v1  ;;  %4575 = vmatprep.mubr.f32.mxu0 %v6049_v54  ;;  %v10628_v9 = vadd.f32 %v3932_v6, %v3699_v62  ;;  %v2231_v1 = vld [vmem:[%s11151_s2 + $0xce8] sm:$0xff]  ;;  %v2440_v62 = vld [vmem:[%s11151_s2 + $0x1370] sm:$0xff]  ;;  %v6058_v54 = vld [vmem:[#allocation2 + $0x298] sm:$0xff] }
 0x320   :  { %4808 = vmatprep.mubr.f32.mxu1 %v6050_v48  ;;  %4946 = vmatpush1.msra.mxu0 %v2248_v17  ;;  %v3701_v22 = vpop.f32.mrf.mxu0  ;;  %v3934_v33 = vpop.f32.mrf.mxu1  ;;  %v6056_v17 = vld [vmem:[#allocation2 + $0x250] sm:$0xff]  ;;  %v6057_v6 = vld [vmem:[#allocation2 + $0x288] sm:$0xff] }
 0x321   :  { %4947 = vmatprep.subr.mxu0 %v2243_v0  ;;  %v10633_v21 = vadd.f32 %v3934_v33, %v3701_v22  ;;  %5176 = vmatprep.subr.mxu1 %v2447_v58  ;;  %v2225_v33 = vld [vmem:[%s11151_s2 + $0xcb8] sm:$0xff] }
 0x322   :  { %4576 = vmatmul.mubr.f32.gmra.mxu0 %v6051_v60  ;;  %4809 = vmatmul.mubr.f32.gmra.mxu1 %v6052_v13  ;;  %v3705_v27 = vpop.f32.mrf.mxu0  ;;  %v3938_v14 = vpop.f32.mrf.mxu1  ;;  %v6059_v60 = vld [vmem:[#allocation2 + $0x280] sm:$0xff]  ;;  %v6060_v13 = vld [vmem:[#allocation2 + $0x290] sm:$0xff] }
 0x323   :  { %4581 = vmatprep.mubr.f32.mxu0 %v6053_v3  ;;  %4814 = vmatprep.mubr.f32.mxu1 %v6054_v63  ;;  %v10644_v11 = vadd.f32 %v3938_v14, %v3705_v27  ;;  %v6061_v3 = vld [vmem:[#allocation2 + $0x2c8] sm:$0xff]  ;;  %v6062_v63 = vld [vmem:[#allocation2 + $0x2d8] sm:$0xff] }
 0x324   :  { %4948 = vmatpush1.msra.mxu0 %v2242_v10  ;;  %v3707_v2 = vpop.f32.mrf.mxu0  ;;  %v3940_v43 = vpop.f32.mrf.mxu1  ;;  %5177 = vmatpush1.msra.mxu1 %v2446_v12  ;;  %v2435_v12 = vld [vmem:[%s11151_s2 + $0x1348] sm:$0xff] }
 0x325   :  { %4949 = vmatprep.subr.mxu0 %v2237_v41  ;;  %v10652_v40 = vadd.f32 %v3940_v43, %v3707_v2  ;;  %5178 = vmatprep.subr.mxu1 %v2441_v56  ;;  %v2224_v41 = vld [vmem:[%s11151_s2 + $0xcb0] sm:$0xff]  ;;  %v2434_v56 = vld [vmem:[%s11151_s2 + $0x1340] sm:$0xff] }
 0x326   :  { %4582 = vmatmul.mubr.f32.gmra.mxu0 %v6055_v24  ;;  %4815 = vmatmul.mubr.f32.gmra.mxu1 %v6056_v17  ;;  %v3711_v23 = vpop.f32.mrf.mxu0  ;;  %v3944_v0 = vpop.f32.mrf.mxu1  ;;  %v2429_v17 = vld [vmem:[%s11151_s2 + $0x1318] sm:$0xff] }
 0x327   :  { %4950 = vmatpush1.msra.mxu0 %v2236_v30  ;;  %4587 = vmatprep.mubr.f32.mxu0 %v6057_v6  ;;  %v10660_v58 = vadd.f32 %v3944_v0, %v3711_v23  ;;  %v6064_v23 = vld [vmem:[#allocation2 + $0x2d0] sm:$0xff]  ;;  %v2218_v0 = vld [vmem:[%s11151_s2 + $0xc80] sm:$0xff] }
 0x328   :  { %4820 = vmatprep.mubr.f32.mxu1 %v6058_v54  ;;  %4951 = vmatprep.subr.mxu0 %v2231_v1  ;;  %v3713_v48 = vpop.f32.mrf.mxu0  ;;  %v3946_v22 = vpop.f32.mrf.mxu1  ;;  %v2219_v1 = vld [vmem:[%s11151_s2 + $0xc88] sm:$0xff]  ;;  %v2428_v54 = vld [vmem:[%s11151_s2 + $0x1310] sm:$0xff] }
 0x329   :  { %4952 = vmatpush1.msra.mxu0 %v2230_v16  ;;  %v10665_v10 = vadd.f32 %v3946_v22, %v3713_v48  ;;  %5179 = vmatpush1.msra.mxu1 %v2440_v62  ;;  %v6063_v16 = vld [vmem:[#allocation2 + $0x2c0] sm:$0xff]  ;;  %v6065_v48 = vld [vmem:[#allocation2 + $0x308] sm:$0xff]  ;;  %v6066_v22 = vld [vmem:[#allocation2 + $0x318] sm:$0xff] }
 0x32a   :  { %4588 = vmatmul.mubr.f32.gmra.mxu0 %v6059_v60  ;;  %4821 = vmatmul.mubr.f32.gmra.mxu1 %v6060_v13  ;;  %v3717_v27 = vpop.f32.mrf.mxu0  ;;  %v3950_v14 = vpop.f32.mrf.mxu1  ;;  %v2213_v13 = vld [vmem:[%s11151_s2 + $0xc58] sm:$0xff] }
 0x32b   :  { %4593 = vmatprep.mubr.f32.mxu0 %v6061_v3  ;;  %4826 = vmatprep.mubr.f32.mxu1 %v6062_v63  ;;  %v10676_v30 = vadd.f32 %v3950_v14, %v3717_v27  ;;  %v2423_v27 = vld [vmem:[%s11151_s2 + $0x12e8] sm:$0xff]  ;;  %v6067_v14 = vld [vmem:[#allocation2 + $0x300] sm:$0xff]  ;;  %v2212_v3 = vld [vmem:[%s11151_s2 + $0xc50] sm:$0xff] }
 0x32c   :  { %4953 = vmatprep.subr.mxu0 %v2225_v33  ;;  %v3719_v2 = vpop.f32.mrf.mxu0  ;;  %v3952_v43 = vpop.f32.mrf.mxu1  ;;  %5180 = vmatprep.subr.mxu1 %v2435_v12 }
 0x32d   :  { %4954 = vmatpush1.msra.mxu0 %v2224_v41  ;;  %v10681_v24 = vadd.f32 %v3952_v43, %v3719_v2  ;;  %5181 = vmatpush1.msra.mxu1 %v2434_v56  ;;  %v6068_v56 = vld [vmem:[#allocation2 + $0x310] sm:$0xff]  ;;  %v2422_v43 = vld [vmem:[%s11151_s2 + $0x12e0] sm:$0xff] }
 0x32e   :  { %4594 = vmatmul.mubr.f32.gmra.mxu0 %v6063_v16  ;;  %4827 = vmatmul.mubr.f32.gmra.mxu1 %v6064_v23  ;;  %v3723_v62 = vpop.f32.mrf.mxu0  ;;  %v3956_v6 = vpop.f32.mrf.mxu1 }
 0x32f   :  { %4599 = vmatprep.mubr.f32.mxu0 %v6065_v48  ;;  %4832 = vmatprep.mubr.f32.mxu1 %v6066_v22  ;;  %v10692_v33 = vadd.f32 %v3956_v6, %v3723_v62  ;;  %v2207_v62 = vld [vmem:[%s11151_s2 + $0xc28] sm:$0xff]  ;;  %v6071_v48 = vld [vmem:[#allocation2 + $0x340] sm:$0xff]  ;;  %v6072_v22 = vld [vmem:[#allocation2 + $0x350] sm:$0xff] }
 0x330   :  { %4955 = vmatprep.subr.mxu0 %v2219_v1  ;;  %v3725_v12 = vpop.f32.mrf.mxu0  ;;  %v3958_v60 = vpop.f32.mrf.mxu1  ;;  %5182 = vmatprep.subr.mxu1 %v2429_v17  ;;  %v6069_v1 = vld [vmem:[#allocation2 + $0x348] sm:$0xff]  ;;  %v6070_v17 = vld [vmem:[#allocation2 + $0x358] sm:$0xff] }
 0x331   :  { %4956 = vmatpush1.msra.mxu0 %v2218_v0  ;;  %v10697_v41 = vadd.f32 %v3958_v60, %v3725_v12  ;;  %5183 = vmatpush1.msra.mxu1 %v2428_v54  ;;  %v2417_v54 = vld [vmem:[%s11151_s2 + $0x12b8] sm:$0xff]  ;;  %v2206_v12 = vld [vmem:[%s11151_s2 + $0xc20] sm:$0xff] }
 0x332   :  { %4600 = vmatmul.mubr.f32.gmra.mxu0 %v6067_v14  ;;  %4833 = vmatmul.mubr.f32.gmra.mxu1 %v6068_v56  ;;  %v3729_v63 = vpop.f32.mrf.mxu0  ;;  %v3962_v2 = vpop.f32.mrf.mxu1  ;;  %v6073_v14 = vld [vmem:[#allocation2 + $0x388] sm:$0xff]  ;;  %v6074_v56 = vld [vmem:[#allocation2 + $0x398] sm:$0xff] }
 0x333   :  { %4605 = vmatprep.mubr.f32.mxu0 %v6069_v1  ;;  %4838 = vmatprep.mubr.f32.mxu1 %v6070_v17  ;;  %v10708_v16 = vadd.f32 %v3962_v2, %v3729_v63  ;;  %v2393_v63 = vld [vmem:[%s11151_s2 + $0x11f8] sm:$0xff]  ;;  %v2392_v1 = vld [vmem:[%s11151_s2 + $0x11f0] sm:$0xff] }
 0x334   :  { %4957 = vmatprep.subr.mxu0 %v2213_v13  ;;  %v3731_v23 = vpop.f32.mrf.mxu0  ;;  %v3964_v0 = vpop.f32.mrf.mxu1  ;;  %5184 = vmatprep.subr.mxu1 %v2423_v27  ;;  %v2416_v27 = vld [vmem:[%s11151_s2 + $0x12b0] sm:$0xff] }
 0x335   :  { %4958 = vmatpush1.msra.mxu0 %v2212_v3  ;;  %v10713_v6 = vadd.f32 %v3964_v0, %v3731_v23  ;;  %5185 = vmatpush1.msra.mxu1 %v2422_v43  ;;  %v6075_v23 = vld [vmem:[#allocation2 + $0x380] sm:$0xff]  ;;  %v6076_v0 = vld [vmem:[#allocation2 + $0x390] sm:$0xff] }
 0x336   :  { %4606 = vmatmul.mubr.f32.gmra.mxu0 %v6071_v48  ;;  %4839 = vmatmul.mubr.f32.gmra.mxu1 %v6072_v22  ;;  %v3735_v60 = vpop.f32.mrf.mxu0  ;;  %v3968_v13 = vpop.f32.mrf.mxu1 }
 0x337   :  { %4611 = vmatprep.mubr.f32.mxu0 %v6073_v14  ;;  %4844 = vmatprep.mubr.f32.mxu1 %v6074_v56  ;;  %v10724_v3 = vadd.f32 %v3968_v13, %v3735_v60  ;;  %v6078_v13 = vld [vmem:[#allocation2 + $0x3d8] sm:$0xff]  ;;  %v2386_v56 = vld [vmem:[%s11151_s2 + $0x11c0] sm:$0xff] }
 0x338   :  { %4959 = vmatprep.subr.mxu0 %v2207_v62  ;;  %v3737_v2 = vpop.f32.mrf.mxu0  ;;  %v3970_v43 = vpop.f32.mrf.mxu1  ;;  %5186 = vmatprep.subr.mxu1 %v2417_v54  ;;  %v2387_v62 = vld [vmem:[%s11151_s2 + $0x11c8] sm:$0xff] }
 0x339   :  { %4960 = vmatpush1.msra.mxu0 %v2206_v12  ;;  %v10732_v17 = vadd.f32 %v3970_v43, %v3737_v2  ;;  %5187 = vmatpush1.msra.mxu1 %v2416_v27  ;;  %v2411_v54 = vld [vmem:[%s11151_s2 + $0x1288] sm:$0xff]  ;;  %v6079_v43 = vld [vmem:[#allocation2 + $0x3c0] sm:$0xff] }
 0x33a   :  { %4612 = vmatmul.mubr.f32.gmra.mxu0 %v6075_v23  ;;  %4845 = vmatmul.mubr.f32.gmra.mxu1 %v6076_v0  ;;  %v3741_v48 = vpop.f32.mrf.mxu0  ;;  %v3974_v22 = vpop.f32.mrf.mxu1  ;;  %v6077_v12 = vld [vmem:[#allocation2 + $0x3c8] sm:$0xff]  ;;  %v6080_v23 = vld [vmem:[#allocation2 + $0x3d0] sm:$0xff] }
 0x33b   :  { %4961 = vmatprep.subr.mxu0 %v2393_v63  ;;  %4617 = vmatprep.mubr.f32.mxu0 %v6077_v12  ;;  %v10740_v60 = vadd.f32 %v3974_v22, %v3741_v48  ;;  %v2410_v63 = vld [vmem:[%s11151_s2 + $0x1280] sm:$0xff]  ;;  %v2405_v48 = vld [vmem:[%s11151_s2 + $0x1258] sm:$0xff]  ;;  %v6081_v22 = vld [vmem:[#allocation2 + $0x408] sm:$0xff] }
 0x33c   :  { %4850 = vmatprep.mubr.f32.mxu1 %v6078_v13  ;;  %4962 = vmatpush2.msra.mxu0 %v2392_v1  ;;  %v3743_v27 = vpop.f32.mrf.mxu0  ;;  %v3976_v14 = vpop.f32.mrf.mxu1  ;;  %v2381_v1 = vld [vmem:[%s11151_s2 + $0x1198] sm:$0xff]  ;;  %v2380_v13 = vld [vmem:[%s11151_s2 + $0x1190] sm:$0xff] }
 0x33d   :  { %4963 = vmatprep.subr.mxu0 %v2387_v62  ;;  %v10745_v2 = vadd.f32 %v3976_v14, %v3743_v27  ;;  %5188 = vmatprep.subr.mxu1 %v2411_v54  ;;  %v6082_v54 = vld [vmem:[#allocation2 + $0x418] sm:$0xff] }
 0x33e   :  { %4618 = vmatmul.mubr.f32.gmra.mxu0 %v6079_v43  ;;  %4851 = vmatmul.mubr.f32.gmra.mxu1 %v6080_v23  ;;  %v3747_v0 = vpop.f32.mrf.mxu0  ;;  %v3980_v62 = vpop.f32.mrf.mxu1  ;;  %v2375_v43 = vld [vmem:[%s11151_s2 + $0x1168] sm:$0xff] }
 0x33f   :  { %11167 = vst [vmem:[#allocation6_spill] sm:$0xff] %v10745_v2  ;;  %4623 = vmatprep.mubr.f32.mxu0 %v6081_v22  ;;  %4856 = vmatprep.mubr.f32.mxu1 %v6082_v54  ;;  %v10756_v12 = vadd.f32 %v3980_v62, %v3747_v0  ;;  %v6083_v22 = vld [vmem:[#allocation2 + $0x400] sm:$0xff]  ;;  %v6084_v0 = vld [vmem:[#allocation2 + $0x410] sm:$0xff] }
 0x340   :  { %4964 = vmatpush2.msra.mxu0 %v2386_v56  ;;  %v3749_v27 = vpop.f32.mrf.mxu0  ;;  %v3982_v14 = vpop.f32.mrf.mxu1  ;;  %5189 = vmatpush1.msra.mxu1 %v2410_v63  ;;  %v2374_v56 = vld [vmem:[%s11151_s2 + $0x1160] sm:$0xff]  ;;  %v2404_v63 = vld [vmem:[%s11151_s2 + $0x1250] sm:$0xff] }
 0x341   :  { %11168 = vst [vmem:[#allocation7_spill] sm:$0xff] %v10756_v12  ;;  %4965 = vmatprep.subr.mxu0 %v2381_v1  ;;  %v10764_v23 = vadd.f32 %v3982_v14, %v3749_v27  ;;  %5190 = vmatprep.subr.mxu1 %v2405_v48  ;;  %v6085_v1 = vld [vmem:[#allocation2 + $0x448] sm:$0xff]  ;;  %v6086_v48 = vld [vmem:[#allocation2 + $0x458] sm:$0xff]  ;;  %v6091_v12 = vld [vmem:[#allocation2 + $0x480] sm:$0xff] }
 0x342   :  { %4624 = vmatmul.mubr.f32.gmra.mxu0 %v6083_v22  ;;  %4857 = vmatmul.mubr.f32.gmra.mxu1 %v6084_v0  ;;  %v3753_v62 = vpop.f32.mrf.mxu0  ;;  %v3986_v54 = vpop.f32.mrf.mxu1  ;;  %v2369_v0 = vld [vmem:[%s11151_s2 + $0x1138] sm:$0xff]  ;;  %v6099_v2 = vld [vmem:[#allocation2 + $0x500] sm:$0xff] }
 0x343   :  { %11169 = vst [vmem:[#allocation8_spill] sm:$0xff] %v10764_v23  ;;  %4966 = vmatpush2.msra.mxu0 %v2380_v13  ;;  %4629 = vmatprep.mubr.f32.mxu0 %v6085_v1  ;;  %v10772_v27 = vadd.f32 %v3986_v54, %v3753_v62  ;;  %v2399_v13 = vld [vmem:[%s11151_s2 + $0x1228] sm:$0xff]  ;;  %v6087_v1 = vld [vmem:[#allocation2 + $0x440] sm:$0xff]  ;;  %v6088_v62 = vld [vmem:[#allocation2 + $0x450] sm:$0xff] }
 0x344   :  { %4862 = vmatprep.mubr.f32.mxu1 %v6086_v48  ;;  %4967 = vmatprep.subr.mxu0 %v2375_v43  ;;  %v3755_v14 = vpop.f32.mrf.mxu0  ;;  %v3988_v22 = vpop.f32.mrf.mxu1  ;;  %v2368_v43 = vld [vmem:[%s11151_s2 + $0x1130] sm:$0xff]  ;;  %v2398_v48 = vld [vmem:[%s11151_s2 + $0x1220] sm:$0xff] }
 0x345   :  { %11170 = vst [vmem:[#allocation9_spill] sm:$0xff] %v10772_v27  ;;  %4968 = vmatpush2.msra.mxu0 %v2374_v56  ;;  %v10777_v23 = vadd.f32 %v3988_v22, %v3755_v14  ;;  %5191 = vmatpush1.msra.mxu1 %v2404_v63  ;;  %v6089_v14 = vld [vmem:[#allocation2 + $0x488] sm:$0xff]  ;;  %v6090_v63 = vld [vmem:[#allocation2 + $0x498] sm:$0xff] }
 0x346   :  { %4630 = vmatmul.mubr.f32.gmra.mxu0 %v6087_v1  ;;  %4863 = vmatmul.mubr.f32.gmra.mxu1 %v6088_v62  ;;  %v3759_v56 = vpop.f32.mrf.mxu0  ;;  %v3992_v54 = vpop.f32.mrf.mxu1  ;;  %v2363_v62 = vld [vmem:[%s11151_s2 + $0x1108] sm:$0xff] }
 0x347   :  { %11171 = vst [vmem:[#allocation10_spill] sm:$0xff] %v10777_v23  ;;  %4635 = vmatprep.mubr.f32.mxu0 %v6089_v14  ;;  %4868 = vmatprep.mubr.f32.mxu1 %v6090_v63  ;;  %v10788_v22 = vadd.f32 %v3992_v54, %v3759_v56  ;;  %v2495_v14 = vld [vmem:[%s11151_s2 + $0x1528] sm:$0xf]  ;;  %v6092_v56 = vld [vmem:[#allocation2 + $0x490] sm:$0xff] }
 0x348   :  { %4969 = vmatprep.subr.mxu0 %v2369_v0  ;;  %v3761_v1 = vpop.f32.mrf.mxu0  ;;  %v3994_v23 = vpop.f32.mrf.mxu1  ;;  %5192 = vmatprep.subr.mxu1 %v2399_v13  ;;  %v2362_v0 = vld [vmem:[%s11151_s2 + $0x1100] sm:$0xff]  ;;  %v6093_v54 = vld [vmem:[#allocation2 + $0x4c8] sm:$0xff] }
 0x349   :  { %11172 = vst [vmem:[#allocation11_spill] sm:$0xff] %v10788_v22  ;;  %4970 = vmatpush2.msra.mxu0 %v2368_v43  ;;  %v10793_v27 = vadd.f32 %v3994_v23, %v3761_v1  ;;  %5193 = vmatpush1.msra.mxu1 %v2398_v48  ;;  %v2494_v23 = vld [vmem:[%s11151_s2 + $0x1520] sm:$0xf]  ;;  %v6094_v48 = vld [vmem:[#allocation2 + $0x4d8] sm:$0xff] }
 0x34a   :  { %4636 = vmatmul.mubr.f32.gmra.mxu0 %v6091_v12  ;;  %4869 = vmatmul.mubr.f32.gmra.mxu1 %v6092_v56  ;;  %v4063_v13 = vpop.f32.mrf.mxu0  ;;  %v4296_v43 = vpop.f32.mrf.mxu1  ;;  %v2357_v56 = vld [vmem:[%s11151_s2 + $0x10d8] sm:$0xff] }
 0x34b   :  { %11173 = vst [vmem:[#allocation12_spill] sm:$0xff] %v10793_v27  ;;  %4641 = vmatprep.mubr.f32.mxu0 %v6093_v54  ;;  %4874 = vmatprep.mubr.f32.mxu1 %v6094_v48  ;;  %v4064_v63 = vadd.f32 %v4063_v13, %v10340_v52  ;;  %v6095_v54 = vld [vmem:[#allocation2 + $0x4c0] sm:$0xff]  ;;  %v6096_v48 = vld [vmem:[#allocation2 + $0x4d0] sm:$0xff]  ;;  %v6098_v13 = vld [vmem:[#allocation2 + $0x518] sm:$0xff] }
 0x34c   :  { %4971 = vmatprep.subr.mxu0 %v2363_v62  ;;  %v4065_v12 = vpop.f32.mrf.mxu0  ;;  %v4298_v1 = vpop.f32.mrf.mxu1  ;;  %5760 = vmatprep.subr.msk.mxu1 %vm2580_vm3, %v2495_v14  ;;  %v2356_v52 = vld [vmem:[%s11151_s2 + $0x10d0] sm:$0xff] }
 0x34d   :  { %4972 = vmatpush2.msra.mxu0 %v2362_v0  ;;  %v4297_v27 = vadd.f32 %v4296_v43, %v4064_v63  ;;  %v4066_v22 = vadd.f32 %v4065_v12, %v10345_v51  ;;  %5761 = vmatpush2.msk.msra.mxu1 %vm2580_vm3, %v2494_v23  ;;  %v6097_v0 = vld [vmem:[#allocation2 + $0x508] sm:$0xff] }
 0x34e   :  { %4642 = vmatmul.mubr.f32.gmra.mxu0 %v6095_v54  ;;  %4875 = vmatmul.mubr.f32.gmra.mxu1 %v6096_v48  ;;  %v4069_v62 = vpop.f32.mrf.mxu0  ;;  %v4302_v14 = vpop.f32.mrf.mxu1  ;;  %v2351_v12 = vld [vmem:[%s11151_s2 + $0x10a8] sm:$0xff] }
 0x34f   :  { %4647 = vmatprep.mubr.f32.mxu0 %v6097_v0  ;;  %4880 = vmatprep.mubr.f32.mxu1 %v6098_v13  ;;  %5397 = vst [vmem:[#allocation3 + $0x10] sm:$0xff] %v4297_v27  ;;  %v4299_v43 = vadd.f32 %v4298_v1, %v4066_v22  ;;  %v4070_v51 = vadd.f32 %v4069_v62, %v10356_v55  ;;  %v6100_v0 = vld [vmem:[#allocation2 + $0x510] sm:$0xff]  ;;  %v2350_v55 = vld [vmem:[%s11151_s2 + $0x10a0] sm:$0xff]  ;;  %v6101_v1 = vld [vmem:[#allocation2 + $0x548] sm:$0xff] }
 0x350   :  { %4973 = vmatprep.subr.mxu0 %v2357_v56  ;;  %v4071_v23 = vpop.f32.mrf.mxu0  ;;  %v4304_v63 = vpop.f32.mrf.mxu1  ;;  %v6102_v56 = vld [vmem:[#allocation2 + $0x558] sm:$0xff]  ;;  %v2344_v13 = vld [vmem:[%s11151_s2 + $0x1070] sm:$0xff] }
 0x351   :  { %4974 = vmatpush2.msra.mxu0 %v2356_v52  ;;  %5398 = vst [vmem:[#allocation3 + $0x18] sm:$0xff] %v4299_v43  ;;  %v4303_v54 = vadd.f32 %v4302_v14, %v4070_v51  ;;  %v4072_v48 = vadd.f32 %v4071_v23, %v10365_v49  ;;  %v2345_v49 = vld [vmem:[%s11151_s2 + $0x1078] sm:$0xff]  ;;  %v6103_v23 = vld [vmem:[#allocation2 + $0x540] sm:$0xff] }
 0x352   :  { %4648 = vmatmul.mubr.f32.gmra.mxu0 %v6099_v2  ;;  %4881 = vmatmul.mubr.f32.gmra.mxu1 %v6100_v0  ;;  %v4075_v27 = vpop.f32.mrf.mxu0  ;;  %v4308_v22 = vpop.f32.mrf.mxu1 }
 0x353   :  { %4653 = vmatprep.mubr.f32.mxu0 %v6101_v1  ;;  %4886 = vmatprep.mubr.f32.mxu1 %v6102_v56  ;;  %5404 = vst [vmem:[#allocation3 + $0x40] sm:$0xff] %v4303_v54  ;;  %v4305_v52 = vadd.f32 %v4304_v63, %v4072_v48  ;;  %v4076_v62 = vadd.f32 %v4075_v27, %v10373_v18  ;;  %v6104_v63 = vld [vmem:[#allocation2 + $0x550] sm:$0xff]  ;;  %v2339_v18 = vld [vmem:[%s11151_s2 + $0x1048] sm:$0xff]  ;;  %v6106_v27 = vld [vmem:[#allocation2 + $0x598] sm:$0xff] }
 0x354   :  { %4975 = vmatprep.subr.mxu0 %v2351_v12  ;;  %v4077_v2 = vpop.f32.mrf.mxu0  ;;  %v4310_v14 = vpop.f32.mrf.mxu1  ;;  %v6105_v48 = vld [vmem:[#allocation2 + $0x588] sm:$0xff]  ;;  %v2338_v1 = vld [vmem:[%s11151_s2 + $0x1040] sm:$0xff] }
 0x355   :  { %4976 = vmatpush2.msra.mxu0 %v2350_v55  ;;  %5405 = vst [vmem:[#allocation3 + $0x48] sm:$0xff] %v4305_v52  ;;  %v4309_v43 = vadd.f32 %v4308_v22, %v4076_v62  ;;  %v4078_v51 = vadd.f32 %v4077_v2, %v10382_v38  ;;  %v6107_v62 = vld [vmem:[#allocation2 + $0x580] sm:$0xff] }
 0x356   :  { %4654 = vmatmul.mubr.f32.gmra.mxu0 %v6103_v23  ;;  %4887 = vmatmul.mubr.f32.gmra.mxu1 %v6104_v63  ;;  %v4081_v12 = vpop.f32.mrf.mxu0  ;;  %v4314_v54 = vpop.f32.mrf.mxu1 }
 0x357   :  { %4977 = vmatprep.subr.mxu0 %v2345_v49  ;;  %4659 = vmatprep.mubr.f32.mxu0 %v6105_v48  ;;  %5410 = vst [vmem:[#allocation3 + $0x70] sm:$0xff] %v4309_v43  ;;  %v4311_v0 = vadd.f32 %v4310_v14, %v4078_v51  ;;  %v4082_v55 = vadd.f32 %v4081_v12, %v10393_v35  ;;  %v6108_v49 = vld [vmem:[#allocation2 + $0x590] sm:$0xff]  ;;  %v2333_v35 = vld [vmem:[%s11151_s2 + $0x1018] sm:$0xff]  ;;  %v2327_v12 = vld [vmem:[%s11151_s2 + $0xfe8] sm:$0xff] }
 0x358   :  { %4892 = vmatprep.mubr.f32.mxu1 %v6106_v27  ;;  %4978 = vmatpush2.msra.mxu0 %v2344_v13  ;;  %v4083_v38 = vpop.f32.mrf.mxu0  ;;  %v4316_v22 = vpop.f32.mrf.mxu1  ;;  %v6109_v13 = vld [vmem:[#allocation2 + $0x5c8] sm:$0xff]  ;;  %v6110_v43 = vld [vmem:[#allocation2 + $0x5d8] sm:$0xff] }
 0x359   :  { %4979 = vmatprep.subr.mxu0 %v2339_v18  ;;  %5411 = vst [vmem:[#allocation3 + $0x78] sm:$0xff] %v4311_v0  ;;  %v4315_v56 = vadd.f32 %v4314_v54, %v4082_v55  ;;  %v4084_v52 = vadd.f32 %v4083_v38, %v10402_v50  ;;  %v2332_v50 = vld [vmem:[%s11151_s2 + $0x1010] sm:$0xff]  ;;  %v6111_v0 = vld [vmem:[#allocation2 + $0x5c0] sm:$0xff]  ;;  %v6113_v38 = vld [vmem:[#allocation2 + $0x608] sm:$0xff] }
 0x35a   :  { %4660 = vmatmul.mubr.f32.gmra.mxu0 %v6107_v62  ;;  %4893 = vmatmul.mubr.f32.gmra.mxu1 %v6108_v49  ;;  %v4087_v2 = vpop.f32.mrf.mxu0  ;;  %v4320_v14 = vpop.f32.mrf.mxu1  ;;  %v6112_v55 = vld [vmem:[#allocation2 + $0x5d0] sm:$0xff]  ;;  %v2321_v62 = vld [vmem:[%s11151_s2 + $0xfb8] sm:$0xff] }
 0x35b   :  { %4665 = vmatprep.mubr.f32.mxu0 %v6109_v13  ;;  %4898 = vmatprep.mubr.f32.mxu1 %v6110_v43  ;;  %5416 = vst [vmem:[#allocation3 + $0xa0] sm:$0xff] %v4315_v56  ;;  %v4317_v51 = vadd.f32 %v4316_v22, %v4084_v52  ;;  %v4088_v23 = vadd.f32 %v4087_v2, %v10410_v57  ;;  %v2326_v57 = vld [vmem:[%s11151_s2 + $0xfe0] sm:$0xff]  ;;  %v6114_v56 = vld [vmem:[#allocation2 + $0x618] sm:$0xff]  ;;  %v6116_v2 = vld [vmem:[#allocation2 + $0x610] sm:$0xff] }
 0x35c   :  { %4980 = vmatpush2.msra.mxu0 %v2338_v1  ;;  %v4089_v63 = vpop.f32.mrf.mxu0  ;;  %v4322_v18 = vpop.f32.mrf.mxu1 }
 0x35d   :  { %4981 = vmatprep.subr.mxu0 %v2333_v35  ;;  %5417 = vst [vmem:[#allocation3 + $0xa8] sm:$0xff] %v4317_v51  ;;  %v4321_v54 = vadd.f32 %v4320_v14, %v4088_v23  ;;  %v4090_v48 = vadd.f32 %v4089_v63, %v10419_v53  ;;  %v6115_v35 = vld [vmem:[#allocation2 + $0x600] sm:$0xff]  ;;  %v2320_v14 = vld [vmem:[%s11151_s2 + $0xfb0] sm:$0xff]  ;;  %v6117_v51 = vld [vmem:[#allocation2 + $0x648] sm:$0xff] }
 0x35e   :  { %4666 = vmatmul.mubr.f32.gmra.mxu0 %v6111_v0  ;;  %4899 = vmatmul.mubr.f32.gmra.mxu1 %v6112_v55  ;;  %v4326_v27 = vpop.f32.mrf.mxu1  ;;  %v6118_v23 = vld [vmem:[#allocation2 + $0x658] sm:$0xff]  ;;  %v6119_v0 = vld [vmem:[#allocation2 + $0x640] sm:$0xff] }
 0x35f   :  { %4982 = vmatpush2.msra.mxu0 %v2332_v50  ;;  %4671 = vmatprep.mubr.f32.mxu0 %v6113_v38  ;;  %5422 = vst [vmem:[#allocation3 + $0xd0] sm:$0xff] %v4321_v54  ;;  %v4323_v22 = vadd.f32 %v4322_v18, %v4090_v48  ;;  %v4093_v1 = vpop.f32.mrf.mxu0  ;;  %v2315_v54 = vld [vmem:[%s11151_s2 + $0xf88] sm:$0xff]  ;;  %v2314_v55 = vld [vmem:[%s11151_s2 + $0xf80] sm:$0xff] }
 0x360   :  { %4904 = vmatprep.mubr.f32.mxu1 %v6114_v56  ;;  %4983 = vmatprep.subr.mxu0 %v2327_v12  ;;  %v4094_v53 = vadd.f32 %v4093_v1, %v10427_v39  ;;  %v4328_v52 = vpop.f32.mrf.mxu1  ;;  %v6121_v38 = vld [vmem:[#allocation2 + $0x688] sm:$0xff] }
 0x361   :  { %4984 = vmatpush2.msra.mxu0 %v2326_v57  ;;  %5423 = vst [vmem:[#allocation3 + $0xd8] sm:$0xff] %v4323_v22  ;;  %v4095_v49 = vpop.f32.mrf.mxu0  ;;  %v6122_v22 = vld [vmem:[#allocation2 + $0x698] sm:$0xff] }
 0x362   :  { %4672 = vmatmul.mubr.f32.gmra.mxu0 %v6115_v35  ;;  %4905 = vmatmul.mubr.f32.gmra.mxu1 %v6116_v2  ;;  %v4327_v13 = vadd.f32 %v4326_v27, %v4094_v53  ;;  %v4096_v43 = vadd.f32 %v4095_v49, %v10436_v34  ;;  %v4332_v39 = vpop.f32.mrf.mxu1  ;;  %v6120_v34 = vld [vmem:[#allocation2 + $0x650] sm:$0xff]  ;;  %v6123_v35 = vld [vmem:[#allocation2 + $0x680] sm:$0xff] }
 0x363   :  { %4677 = vmatprep.mubr.f32.mxu0 %v6117_v51  ;;  %4910 = vmatprep.mubr.f32.mxu1 %v6118_v23  ;;  %v4099_v50 = vpop.f32.mrf.mxu0  ;;  %v2308_v2 = vld [vmem:[%s11151_s2 + $0xf50] sm:$0xff]  ;;  %v2303_v23 = vld [vmem:[%s11151_s2 + $0xf28] sm:$0xff] }
 0x364   :  { %4985 = vmatprep.subr.mxu0 %v2321_v62  ;;  %5428 = vst [vmem:[#allocation3 + $0x100] sm:$0xff] %v4327_v13  ;;  %v4329_v63 = vadd.f32 %v4328_v52, %v4096_v43  ;;  %v4100_v18 = vadd.f32 %v4099_v50, %v10444_v26  ;;  %v4334_v12 = vpop.f32.mrf.mxu1  ;;  %v2309_v62 = vld [vmem:[%s11151_s2 + $0xf58] sm:$0xff]  ;;  %v6125_v43 = vld [vmem:[#allocation2 + $0x6c8] sm:$0xff] }
 0x365   :  { %4986 = vmatpush2.msra.mxu0 %v2320_v14  ;;  %v4101_v48 = vpop.f32.mrf.mxu0 }
 0x366   :  { %4678 = vmatmul.mubr.f32.gmra.mxu0 %v6119_v0  ;;  %4911 = vmatmul.mubr.f32.gmra.mxu1 %v6120_v34  ;;  %5429 = vst [vmem:[#allocation3 + $0x108] sm:$0xff] %v4329_v63  ;;  %v4333_v57 = vadd.f32 %v4332_v39, %v4100_v18  ;;  %v4102_v27 = vadd.f32 %v4101_v48, %v10455_v42  ;;  %v4338_v26 = vpop.f32.mrf.mxu1  ;;  %v6124_v42 = vld [vmem:[#allocation2 + $0x690] sm:$0xff]  ;;  %v6126_v39 = vld [vmem:[#allocation2 + $0x6d8] sm:$0xff] }
 0x367   :  { %4683 = vmatprep.mubr.f32.mxu0 %v6121_v38  ;;  %4916 = vmatprep.mubr.f32.mxu1 %v6122_v22  ;;  %v4105_v1 = vpop.f32.mrf.mxu0  ;;  %v6128_v48 = vld [vmem:[#allocation2 + $0x6d0] sm:$0xff] }
 0x368   :  { %4987 = vmatprep.subr.mxu0 %v2315_v54  ;;  %5434 = vst [vmem:[#allocation3 + $0x130] sm:$0xff] %v4333_v57  ;;  %v4335_v56 = vadd.f32 %v4334_v12, %v4102_v27  ;;  %v4106_v53 = vadd.f32 %v4105_v1, %v10461_v46  ;;  %v4340_v52 = vpop.f32.mrf.mxu1  ;;  %v6127_v54 = vld [vmem:[#allocation2 + $0x6c0] sm:$0xff] }
 0x369   :  { %4988 = vmatpush2.msra.mxu0 %v2314_v55  ;;  %v4107_v49 = vpop.f32.mrf.mxu0  ;;  %v6129_v55 = vld [vmem:[#allocation2 + $0x28] sm:$0xff]  ;;  %v6131_v1 = vld [vmem:[#allocation2 + $0x20] sm:$0xff] }
 0x36a   :  { %4684 = vmatmul.mubr.f32.gmra.mxu0 %v6123_v35  ;;  %4917 = vmatmul.mubr.f32.gmra.mxu1 %v6124_v42  ;;  %5435 = vst [vmem:[#allocation3 + $0x138] sm:$0xff] %v4335_v56  ;;  %v4339_v14 = vadd.f32 %v4338_v26, %v4106_v53  ;;  %v4108_v13 = vadd.f32 %v4107_v49, %v10473_v36  ;;  %v4344_v46 = vpop.f32.mrf.mxu1  ;;  %v2302_v36 = vld [vmem:[%s11151_s2 + $0xf20] sm:$0xff]  ;;  %v6132_v56 = vld [vmem:[#allocation2 + $0x30] sm:$0xff]  ;;  %v6134_v49 = vld [vmem:[#allocation2 + $0x78] sm:$0xff]  ;;  %s6263_s2 = smov [#allocation3]  }
 0x36b   :  { %4689 = vmatprep.mubr.f32.mxu0 %v6125_v43  ;;  %4922 = vmatprep.mubr.f32.mxu1 %v6126_v39  ;;  %v4111_v51 = vpop.f32.mrf.mxu0  ;;  %s5569_s8 = sshll.u32 %s6263_s2, 4  ;;  %s5570_s8 = int_to_ptr.vmem [resolvable:$true] %s5569_s8 }
 0x36c   :  { %4989 = vmatprep.subr.mxu0 %v2309_v62  ;;  %5440 = vst [vmem:[#allocation3 + $0x160] sm:$0xff] %v4339_v14  ;;  %v4341_v50 = vadd.f32 %v4340_v52, %v4108_v13  ;;  %v4112_v63 = vadd.f32 %v4111_v51, %v10481_v5  ;;  %v4346_v18 = vpop.f32.mrf.mxu1  ;;  %v6130_v5 = vld [vmem:[#allocation2 + $0x38] sm:$0xff]  ;;  %v6133_v62 = vld [vmem:[#allocation2 + $0x68] sm:$0xff]  ;;  %v6135_v13 = vld [vmem:[#allocation2 + $0x60] sm:$0xff]  ;;  %s6241_s9 = scalar_lea.vmem %s5570_s8, 21504  ;;  %p6246_p1 = scmp.lt.s32.totalorder %s5570_s8, %s5570_s8 }
 0x36d   :  { %4990 = vmatpush2.msra.mxu0 %v2308_v2  ;;  %v4113_v12 = vpop.f32.mrf.mxu0  ;;  %v6137_v51 = vld [vmem:[#allocation2 + $0xa8] sm:$0xff]  ;;  %p6242_p0 = scmp.ne.s32.totalorder %s5570_s8, %s6241_s9  ;;  %p6247_p2 = scmp.lt.s32.totalorder %s6241_s9, %s6241_s9 }
 0x36e   :  { %4690 = vmatmul.mubr.f32.gmra.mxu0 %v6127_v54  ;;  %4923 = vmatmul.mubr.f32.gmra.mxu1 %v6128_v48  ;;  %5441 = vst [vmem:[#allocation3 + $0x168] sm:$0xff] %v4341_v50  ;;  %v4345_v0 = vadd.f32 %v4344_v46, %v4112_v63  ;;  %v4114_v34 = vadd.f32 %v4113_v12, %v10492_v31  ;;  %v6136_v46 = vld [vmem:[#allocation2 + $0x70] sm:$0xff] }
 0x36f   :  { %4991 = vmatprep.subr.mxu0 %v2303_v23  ;;  %4993 = vmatprep.mubr.f32.mxu0 %v6129_v55  ;;  %v4117_v57 = vpop.f32.mrf.mxu0  ;;  %v6138_v23 = vld [vmem:[#allocation2 + $0xb8] sm:$0xff]  ;;  %v6140_v12 = vld [vmem:[#allocation2 + $0xb0] sm:$0xff]  ;;  %p6248_p3 = por %p6247_p2, %p6246_p1 }
 0x370   :  { %5762 = vmatprep.mubr.msk.f32.mxu1 %vm1376_vm2, %v6130_v5  ;;  %4992 = vmatpush2.msra.mxu0 %v2302_v36  ;;  %5446 = vst [vmem:[#allocation3 + $0x190] sm:$0xff] %v4345_v0  ;;  %v4347_v27 = vadd.f32 %v4346_v18, %v4114_v34  ;;  %v4118_v26 = vadd.f32 %v4117_v57, %v10497_v37  ;;  %v4350_v38 = vpop.f32.mrf.mxu1  ;;  %v6139_v36 = vld [vmem:[#allocation2 + $0xa0] sm:$0xff]  ;;  %v6142_v0 = vld [vmem:[#allocation2 + $0xf8] sm:$0xff] }
 0x371   :  { %v4119_v22 = vpop.f32.mrf.mxu0  ;;  %p6249_p4 = pnand %p6248_p3, %p6242_p0 }
 0x372   :  { %4994 = vmatmul.mubr.f32.vlgmr.msra.gmra.mxu0 %v6131_v1  ;;  %5227 = vmatmul.mubr.f32.vlgmr.msra.gmra.mxu1 %v6132_v56  ;;  %5447 = vst [vmem:[#allocation3 + $0x198] sm:$0xff] %v4347_v27  ;;  %v4351_v31 = vadd.f32 %v4350_v38, %v4118_v26  ;;  %v4120_v53 = vadd.f32 %v4119_v22, %v10508_v25  ;;  %v4352_v52 = vpop.f32.mrf.mxu1  ;;  %v6144_v26 = vld [vmem:[#allocation2 + $0xf0] sm:$0xff]  ;;  %v6145_v1 = vld [vmem:[#allocation2 + $0x128] sm:$0xff]  ;;  %v6146_v56 = vld [vmem:[#allocation2 + $0x138] sm:$0xff] }
 0x373   :  { %4999 = vmatprep.mubr.f32.mxu0 %v6133_v62  ;;  %5763 = vmatprep.mubr.msk.f32.mxu1 %vm1376_vm2, %v6134_v49  ;;  %v4123_v35 = vpop.f32.mrf.mxu0  ;;  %v6147_v49 = vld [vmem:[#allocation2 + $0x120] sm:$0xff] }
 0x374   :  { %5452 = vst [vmem:[#allocation3 + $0x1c0] sm:$0xff] %v4351_v31  ;;  %v4353_v42 = vadd.f32 %v4352_v52, %v4120_v53  ;;  %v4124_v37 = vadd.f32 %v4123_v35, %v10513_v7  ;;  %v4356_v2 = vpop.f32.mrf.mxu1  ;;  %v6148_v35 = vld [vmem:[#allocation2 + $0x130] sm:$0xff] }
 0x375   :  { %v4125_v14 = vpop.f32.mrf.mxu0 }
 0x376   :  { %5000 = vmatmul.mubr.f32.gmra.mxu0 %v6135_v13  ;;  %5233 = vmatmul.mubr.f32.gmra.mxu1 %v6136_v46  ;;  %5453 = vst [vmem:[#allocation3 + $0x1c8] sm:$0xff] %v4353_v42  ;;  %v4357_v43 = vadd.f32 %v4356_v2, %v4124_v37  ;;  %v4126_v25 = vadd.f32 %v4125_v14, %v10524_v19  ;;  %v4358_v39 = vpop.f32.mrf.mxu1  ;;  %v6141_v19 = vld [vmem:[#allocation2 + $0xe8] sm:$0xff]  ;;  %v6150_v14 = vld [vmem:[#allocation2 + $0x178] sm:$0xff] }
 0x377   :  { %5005 = vmatprep.mubr.f32.mxu0 %v6137_v51  ;;  %5764 = vmatprep.mubr.msk.f32.mxu1 %vm1376_vm2, %v6138_v23  ;;  %v6149_v2 = vld [vmem:[#allocation2 + $0x168] sm:$0xff]  ;;  %v6152_v51 = vld [vmem:[#allocation2 + $0x170] sm:$0xff] }
 0x378   :  { %5458 = vst [vmem:[#allocation3 + $0x1f0] sm:$0xff] %v4357_v43  ;;  %v4359_v50 = vadd.f32 %v4358_v39, %v4126_v25  ;;  %v4129_v63 = vpop.f32.mrf.mxu0  ;;  %v4362_v7 = vpop.f32.mrf.mxu1  ;;  %v6151_v39 = vld [vmem:[#allocation2 + $0x160] sm:$0xff] }
 0x379   :  { %v4130_v18 = vadd.f32 %v4129_v63, %v10532_v8  ;;  %v6143_v8 = vld [vmem:[#allocation2 + $0xe0] sm:$0xff]  ;;  %v6153_v63 = vld [vmem:[#allocation2 + $0x1a8] sm:$0xff] }
 0x37a   :  { %5006 = vmatmul.mubr.f32.gmra.mxu0 %v6139_v36  ;;  %5239 = vmatmul.mubr.f32.gmra.mxu1 %v6140_v12  ;;  %5459 = vst [vmem:[#allocation3 + $0x1f8] sm:$0xff] %v4359_v50  ;;  %v4131_v54 = vpop.f32.mrf.mxu0  ;;  %v4364_v48 = vpop.f32.mrf.mxu1 }
 0x37b   :  { %5011 = vmatprep.mubr.f32.mxu0 %v6141_v19  ;;  %5765 = vmatprep.mubr.msk.f32.mxu1 %vm1376_vm2, %v6142_v0  ;;  %v4363_v34 = vadd.f32 %v4362_v7, %v4130_v18  ;;  %v4132_v55 = vadd.f32 %v4131_v54, %v10537_v29  ;;  %v6154_v7 = vld [vmem:[#allocation2 + $0x1b8] sm:$0xff]  ;;  %v6156_v19 = vld [vmem:[#allocation2 + $0x1b0] sm:$0xff] }
 0x37c   :  { %v4368_v57 = vpop.f32.mrf.mxu1 }
 0x37d   :  { %5464 = vst [vmem:[#allocation3 + $0x220] sm:$0xff] %v4363_v34  ;;  %v4365_v5 = vadd.f32 %v4364_v48, %v4132_v55  ;;  %v4135_v27 = vpop.f32.mrf.mxu0  ;;  %v6155_v48 = vld [vmem:[#allocation2 + $0x1a0] sm:$0xff]  ;;  %v6157_v55 = vld [vmem:[#allocation2 + $0x1e8] sm:$0xff] }
 0x37e   :  { %5012 = vmatmul.mubr.f32.gmra.mxu0 %v6143_v8  ;;  %5245 = vmatmul.mubr.f32.gmra.mxu1 %v6144_v26  ;;  %v4136_v38 = vadd.f32 %v4135_v27, %v10548_v44  ;;  %v4370_v22 = vpop.f32.mrf.mxu1  ;;  %v6159_v26 = vld [vmem:[#allocation2 + $0x1e0] sm:$0xff] }
 0x37f   :  { %5017 = vmatprep.mubr.f32.mxu0 %v6145_v1  ;;  %5766 = vmatprep.mubr.msk.f32.mxu1 %vm1376_vm2, %v6146_v56  ;;  %5465 = vst [vmem:[#allocation3 + $0x228] sm:$0xff] %v4365_v5  ;;  %v4137_v31 = vpop.f32.mrf.mxu0  ;;  %v6161_v56 = vld [vmem:[#allocation2 + $0x228] sm:$0xff] }
 0x380   :  { %v4369_v53 = vadd.f32 %v4368_v57, %v4136_v38  ;;  %v4138_v29 = vadd.f32 %v4137_v31, %v10553_v32  ;;  %v4374_v52 = vpop.f32.mrf.mxu1  ;;  %v6158_v57 = vld [vmem:[#allocation2 + $0x1f8] sm:$0xff]  ;;  %v6160_v38 = vld [vmem:[#allocation2 + $0x1f0] sm:$0xff] }
 0x381   :  { %v4141_v62 = vpop.f32.mrf.mxu0  ;;  %v6162_v31 = vld [vmem:[#allocation2 + $0x238] sm:$0xff] }
 0x382   :  { %5470 = vst [vmem:[#allocation3 + $0x250] sm:$0xff] %v4369_v53  ;;  %5018 = vmatmul.mubr.f32.gmra.mxu0 %v6147_v49  ;;  %5251 = vmatmul.mubr.f32.gmra.mxu1 %v6148_v35  ;;  %v4371_v42 = vadd.f32 %v4370_v22, %v4138_v29  ;;  %v4142_v44 = vadd.f32 %v4141_v62, %v10564_v15  ;;  %v4376_v37 = vpop.f32.mrf.mxu1  ;;  %v6163_v49 = vld [vmem:[#allocation2 + $0x220] sm:$0xff]  ;;  %v6164_v35 = vld [vmem:[#allocation2 + $0x230] sm:$0xff] }
 0x383   :  { %5023 = vmatprep.mubr.f32.mxu0 %v6149_v2  ;;  %5767 = vmatprep.mubr.msk.f32.mxu1 %vm1376_vm2, %v6150_v14  ;;  %v4143_v13 = vpop.f32.mrf.mxu0  ;;  %v6166_v2 = vld [vmem:[#allocation2 + $0x278] sm:$0xff] }
 0x384   :  { %5471 = vst [vmem:[#allocation3 + $0x258] sm:$0xff] %v4371_v42  ;;  %v4375_v46 = vadd.f32 %v4374_v52, %v4142_v44  ;;  %v4144_v32 = vadd.f32 %v4143_v13, %v10569_v4  ;;  %v4380_v43 = vpop.f32.mrf.mxu1 }
 0x385   :  { %v4147_v25 = vpop.f32.mrf.mxu0 }
 0x386   :  { %5476 = vst [vmem:[#allocation3 + $0x280] sm:$0xff] %v4375_v46  ;;  %5024 = vmatmul.mubr.f32.gmra.mxu0 %v6151_v39  ;;  %5257 = vmatmul.mubr.f32.gmra.mxu1 %v6152_v51  ;;  %v4377_v23 = vadd.f32 %v4376_v37, %v4144_v32  ;;  %v4148_v15 = vadd.f32 %v4147_v25, %v10580_v59  ;;  %v4382_v50 = vpop.f32.mrf.mxu1  ;;  %v6165_v37 = vld [vmem:[#allocation2 + $0x268] sm:$0xff]  ;;  %v6167_v32 = vld [vmem:[#allocation2 + $0x260] sm:$0xff] }
 0x387   :  { %5029 = vmatprep.mubr.f32.mxu0 %v6153_v63  ;;  %5768 = vmatprep.mubr.msk.f32.mxu1 %vm1376_vm2, %v6154_v7  ;;  %v4149_v18 = vpop.f32.mrf.mxu0  ;;  %v6169_v51 = vld [vmem:[#allocation2 + $0x2a8] sm:$0xff] }
 0x388   :  { %5477 = vst [vmem:[#allocation3 + $0x288] sm:$0xff] %v4377_v23  ;;  %v4381_v36 = vadd.f32 %v4380_v43, %v4148_v15  ;;  %v4150_v4 = vadd.f32 %v4149_v18, %v10585_v28  ;;  %v4386_v12 = vpop.f32.mrf.mxu1  ;;  %v6168_v43 = vld [vmem:[#allocation2 + $0x270] sm:$0xff]  ;;  %v6170_v23 = vld [vmem:[#allocation2 + $0x2b8] sm:$0xff]  ;;  %v6171_v18 = vld [vmem:[#allocation2 + $0x2a0] sm:$0xff] }
 0x389   :  { %v4153_v54 = vpop.f32.mrf.mxu0 }
 0x38a   :  { %5482 = vst [vmem:[#allocation3 + $0x2b0] sm:$0xff] %v4381_v36  ;;  %5030 = vmatmul.mubr.f32.gmra.mxu0 %v6155_v48  ;;  %5263 = vmatmul.mubr.f32.gmra.mxu1 %v6156_v19  ;;  %v4383_v0 = vadd.f32 %v4382_v50, %v4150_v4  ;;  %v4154_v59 = vadd.f32 %v4153_v54, %v10596_v45  ;;  %v4388_v34 = vpop.f32.mrf.mxu1  ;;  %v6172_v36 = vld [vmem:[#allocation2 + $0x2b0] sm:$0xff]  ;;  %v6174_v54 = vld [vmem:[#allocation2 + $0x2f8] sm:$0xff] }
 0x38b   :  { %5035 = vmatprep.mubr.f32.mxu0 %v6157_v55  ;;  %5769 = vmatprep.mubr.msk.f32.mxu1 %vm1376_vm2, %v6158_v57  ;;  %v4155_v5 = vpop.f32.mrf.mxu0  ;;  %v6176_v55 = vld [vmem:[#allocation2 + $0x2f0] sm:$0xff] }
 0x38c   :  { %5483 = vst [vmem:[#allocation3 + $0x2b8] sm:$0xff] %v4383_v0  ;;  %v4387_v27 = vadd.f32 %v4386_v12, %v4154_v59  ;;  %v4156_v28 = vadd.f32 %v4155_v5, %v10601_v61  ;;  %v6173_v12 = vld [vmem:[#allocation2 + $0x2e8] sm:$0xff] }
 0x38d   :  { %v4159_v8 = vpop.f32.mrf.mxu0 }
 0x38e   :  { %5488 = vst [vmem:[#allocation3 + $0x2e0] sm:$0xff] %v4387_v27  ;;  %5036 = vmatmul.mubr.f32.gmra.mxu0 %v6159_v26  ;;  %5269 = vmatmul.mubr.f32.gmra.mxu1 %v6160_v38  ;;  %v4389_v22 = vadd.f32 %v4388_v34, %v4156_v28  ;;  %v4160_v45 = vadd.f32 %v4159_v8, %v10612_v47  ;;  %v4392_v1 = vpop.f32.mrf.mxu1  ;;  %v6177_v27 = vld [vmem:[#allocation2 + $0x328] sm:$0xff]  ;;  %v6178_v28 = vld [vmem:[#allocation2 + $0x338] sm:$0xff] }
 0x38f   :  { %5041 = vmatprep.mubr.f32.mxu0 %v6161_v56  ;;  %5770 = vmatprep.mubr.msk.f32.mxu1 %vm1376_vm2, %v6162_v31  ;;  %v4161_v53 = vpop.f32.mrf.mxu0  ;;  %v6180_v56 = vld [vmem:[#allocation2 + $0x330] sm:$0xff] }
 0x390   :  { %5489 = vst [vmem:[#allocation3 + $0x2e8] sm:$0xff] %v4389_v22  ;;  %v4393_v29 = vadd.f32 %v4392_v1, %v4160_v45  ;;  %v4162_v61 = vadd.f32 %v4161_v53, %v10620_v20  ;;  %v4394_v52 = vpop.f32.mrf.mxu1  ;;  %v6179_v1 = vld [vmem:[#allocation2 + $0x320] sm:$0xff]  ;;  %v6181_v53 = vld [vmem:[#allocation2 + $0x368] sm:$0xff] }
 0x391   :  { %v4165_v62 = vpop.f32.mrf.mxu0 }
 0x392   :  { %5494 = vst [vmem:[#allocation3 + $0x310] sm:$0xff] %v4393_v29  ;;  %5042 = vmatmul.mubr.f32.gmra.mxu0 %v6163_v49  ;;  %5275 = vmatmul.mubr.f32.gmra.mxu1 %v6164_v35  ;;  %v4395_v42 = vadd.f32 %v4394_v52, %v4162_v61  ;;  %v4166_v47 = vadd.f32 %v4165_v62, %v10628_v9  ;;  %v4398_v44 = vpop.f32.mrf.mxu1  ;;  %v6182_v29 = vld [vmem:[#allocation2 + $0x378] sm:$0xff] }
 0x393   :  { %5047 = vmatprep.mubr.f32.mxu0 %v6165_v37  ;;  %5771 = vmatprep.mubr.msk.f32.mxu1 %vm1376_vm2, %v6166_v2  ;;  %v4167_v14 = vpop.f32.mrf.mxu0  ;;  %v6185_v37 = vld [vmem:[#allocation2 + $0x3a8] sm:$0xff]  ;;  %v6186_v2 = vld [vmem:[#allocation2 + $0x3b8] sm:$0xff] }
 0x394   :  { %5495 = vst [vmem:[#allocation3 + $0x318] sm:$0xff] %v4395_v42  ;;  %v4399_v13 = vadd.f32 %v4398_v44, %v4166_v47  ;;  %v4168_v20 = vadd.f32 %v4167_v14, %v10633_v21  ;;  %v4400_v46 = vpop.f32.mrf.mxu1  ;;  %v6183_v42 = vld [vmem:[#allocation2 + $0x360] sm:$0xff]  ;;  %v6184_v47 = vld [vmem:[#allocation2 + $0x370] sm:$0xff] }
 0x396   :  { %5500 = vst [vmem:[#allocation3 + $0x340] sm:$0xff] %v4399_v13  ;;  %5048 = vmatmul.mubr.f32.gmra.mxu0 %v6167_v32  ;;  %5281 = vmatmul.mubr.f32.gmra.mxu1 %v6168_v43  ;;  %v4401_v25 = vadd.f32 %v4400_v46, %v4168_v20  ;;  %v4171_v39 = vpop.f32.mrf.mxu0  ;;  %v4404_v9 = vpop.f32.mrf.mxu1  ;;  %v6187_v43 = vld [vmem:[#allocation2 + $0x3a0] sm:$0xff] }
 0x397   :  { %5053 = vmatprep.mubr.f32.mxu0 %v6169_v51  ;;  %5772 = vmatprep.mubr.msk.f32.mxu1 %vm1376_vm2, %v6170_v23  ;;  %v4172_v15 = vadd.f32 %v4171_v39, %v10644_v11  ;;  %v6189_v39 = vld [vmem:[#allocation2 + $0x3e8] sm:$0xff] }
 0x398   :  { %5501 = vst [vmem:[#allocation3 + $0x348] sm:$0xff] %v4401_v25  ;;  %v4173_v50 = vpop.f32.mrf.mxu0  ;;  %v4406_v63 = vpop.f32.mrf.mxu1  ;;  %v6188_v25 = vld [vmem:[#allocation2 + $0x3b0] sm:$0xff] }
 0x399   :  { %v4405_v21 = vadd.f32 %v4404_v9, %v4172_v15  ;;  %v4174_v7 = vadd.f32 %v4173_v50, %v10652_v40  ;;  %v6175_v40 = vld [vmem:[#allocation2 + $0x2e0] sm:$0xff]  ;;  %v6190_v9 = vld [vmem:[#allocation2 + $0x3f8] sm:$0xff] }
 0x39a   :  { %5054 = vmatmul.mubr.f32.gmra.mxu0 %v6171_v18  ;;  %5287 = vmatmul.mubr.f32.gmra.mxu1 %v6172_v36  ;;  %v4410_v4 = vpop.f32.mrf.mxu1  ;;  %v6193_v36 = vld [vmem:[#allocation2 + $0x428] sm:$0xff] }
 0x39b   :  { %5506 = vst [vmem:[#allocation3 + $0x370] sm:$0xff] %v4405_v21  ;;  %5059 = vmatprep.mubr.f32.mxu0 %v6173_v12  ;;  %5773 = vmatprep.mubr.msk.f32.mxu1 %vm1376_vm2, %v6174_v54  ;;  %v4407_v48 = vadd.f32 %v4406_v63, %v4174_v7  ;;  %v4177_v19 = vpop.f32.mrf.mxu0  ;;  %v6191_v21 = vld [vmem:[#allocation2 + $0x3e0] sm:$0xff]  ;;  %v6192_v7 = vld [vmem:[#allocation2 + $0x3f0] sm:$0xff] }
 0x39c   :  { %v4178_v11 = vadd.f32 %v4177_v19, %v10660_v58  ;;  %v4412_v0 = vpop.f32.mrf.mxu1 }
 0x39d   :  { %5507 = vst [vmem:[#allocation3 + $0x378] sm:$0xff] %v4407_v48  ;;  %v4179_v59 = vpop.f32.mrf.mxu0 }
 0x39e   :  { %v4411_v34 = vadd.f32 %v4410_v4, %v4178_v11  ;;  %5060 = vmatmul.mubr.f32.gmra.mxu0 %v6175_v40  ;;  %5293 = vmatmul.mubr.f32.gmra.mxu1 %v6176_v55  ;;  %v4180_v57 = vadd.f32 %v4179_v59, %v10665_v10  ;;  %v4416_v5 = vpop.f32.mrf.mxu1  ;;  %v6194_v4 = vld [vmem:[#allocation2 + $0x438] sm:$0xff]  ;;  %v6196_v59 = vld [vmem:[#allocation2 + $0x430] sm:$0xff]  ;;  %v6197_v55 = vld [vmem:[#allocation2 + $0x468] sm:$0xff] }
 0x39f   :  { %5065 = vmatprep.mubr.f32.mxu0 %v6177_v27  ;;  %5774 = vmatprep.mubr.msk.f32.mxu1 %vm1376_vm2, %v6178_v28  ;;  %v4183_v8 = vpop.f32.mrf.mxu0  ;;  %v11175_v28 = vld [vmem:[#allocation7_spill] sm:$0xff] }
 0x3a0   :  { %5512 = vst [vmem:[#allocation3 + $0x3a0] sm:$0xff] %v4411_v34  ;;  %v4413_v26 = vadd.f32 %v4412_v0, %v4180_v57  ;;  %v4184_v58 = vadd.f32 %v4183_v8, %v10676_v30  ;;  %v4418_v38 = vpop.f32.mrf.mxu1  ;;  %v6195_v0 = vld [vmem:[#allocation2 + $0x420] sm:$0xff]  ;;  %v6198_v57 = vld [vmem:[#allocation2 + $0x478] sm:$0xff] }
 0x3a1   :  { %v4185_v22 = vpop.f32.mrf.mxu0 }
 0x3a2   :  { %5513 = vst [vmem:[#allocation3 + $0x3a8] sm:$0xff] %v4413_v26  ;;  %v4417_v45 = vadd.f32 %v4416_v5, %v4184_v58  ;;  %5066 = vmatmul.mubr.f32.gmra.mxu0 %v6179_v1  ;;  %5299 = vmatmul.mubr.f32.gmra.mxu1 %v6180_v56  ;;  %v4186_v10 = vadd.f32 %v4185_v22, %v10681_v24  ;;  %v4422_v31 = vpop.f32.mrf.mxu1  ;;  %v6199_v26 = vld [vmem:[#allocation2 + $0x460] sm:$0xff]  ;;  %v6200_v58 = vld [vmem:[#allocation2 + $0x470] sm:$0xff]  ;;  %v6201_v1 = vld [vmem:[#allocation2 + $0x4a8] sm:$0xff] }
 0x3a3   :  { %5071 = vmatprep.mubr.f32.mxu0 %v6181_v53  ;;  %5775 = vmatprep.mubr.msk.f32.mxu1 %vm1376_vm2, %v6182_v29  ;;  %v4189_v61 = vpop.f32.mrf.mxu0  ;;  %v6202_v56 = vld [vmem:[#allocation2 + $0x4b8] sm:$0xff] }
 0x3a4   :  { %5518 = vst [vmem:[#allocation3 + $0x3d0] sm:$0xff] %v4417_v45  ;;  %v4419_v52 = vadd.f32 %v4418_v38, %v4186_v10  ;;  %v4190_v30 = vadd.f32 %v4189_v61, %v10692_v33  ;;  %v4424_v62 = vpop.f32.mrf.mxu1  ;;  %v11176_v10 = vld [vmem:[#allocation8_spill] sm:$0xff] }
 0x3a5   :  { %v4191_v49 = vpop.f32.mrf.mxu0 }
 0x3a6   :  { %5519 = vst [vmem:[#allocation3 + $0x3d8] sm:$0xff] %v4419_v52  ;;  %v4423_v35 = vadd.f32 %v4422_v31, %v4190_v30  ;;  %5072 = vmatmul.mubr.f32.gmra.mxu0 %v6183_v42  ;;  %5305 = vmatmul.mubr.f32.gmra.mxu1 %v6184_v47  ;;  %v4192_v24 = vadd.f32 %v4191_v49, %v10697_v41  ;;  %v4428_v44 = vpop.f32.mrf.mxu1  ;;  %v11177_v52 = vld [vmem:[#allocation9_spill] sm:$0xff]  ;;  %v6204_v49 = vld [vmem:[#allocation2 + $0x4b0] sm:$0xff]  ;;  %v6205_v42 = vld [vmem:[#allocation2 + $0x4e8] sm:$0xff] }
 0x3a7   :  { %5077 = vmatprep.mubr.f32.mxu0 %v6185_v37  ;;  %5776 = vmatprep.mubr.msk.f32.mxu1 %vm1376_vm2, %v6186_v2  ;;  %v4195_v14 = vpop.f32.mrf.mxu0  ;;  %v6206_v47 = vld [vmem:[#allocation2 + $0x4f8] sm:$0xff]  ;;  %v11178_v37 = vld [vmem:[#allocation10_spill] sm:$0xff] }
 0x3a8   :  { %5524 = vst [vmem:[#allocation3 + $0x400] sm:$0xff] %v4423_v35  ;;  %v4425_v13 = vadd.f32 %v4424_v62, %v4192_v24  ;;  %v4196_v33 = vadd.f32 %v4195_v14, %v10708_v16  ;;  %v4430_v20 = vpop.f32.mrf.mxu1  ;;  %v6203_v62 = vld [vmem:[#allocation2 + $0x4a0] sm:$0xff] }
 0x3a9   :  { %v4197_v46 = vpop.f32.mrf.mxu0 }
 0x3aa   :  { %5525 = vst [vmem:[#allocation3 + $0x408] sm:$0xff] %v4425_v13  ;;  %v4429_v32 = vadd.f32 %v4428_v44, %v4196_v33  ;;  %5078 = vmatmul.mubr.f32.gmra.mxu0 %v6187_v43  ;;  %5311 = vmatmul.mubr.f32.gmra.mxu1 %v6188_v25  ;;  %v4198_v41 = vadd.f32 %v4197_v46, %v10713_v6  ;;  %v6208_v43 = vld [vmem:[#allocation2 + $0x4f0] sm:$0xff] }
 0x3ab   :  { %5083 = vmatprep.mubr.f32.mxu0 %v6189_v39  ;;  %5777 = vmatprep.mubr.msk.f32.mxu1 %vm1376_vm2, %v6190_v9  ;;  %v4201_v51 = vpop.f32.mrf.mxu0  ;;  %v6210_v39 = vld [vmem:[#allocation2 + $0x538] sm:$0xff] }
 0x3ac   :  { %5530 = vst [vmem:[#allocation3 + $0x430] sm:$0xff] %v4429_v32  ;;  %v4431_v23 = vadd.f32 %v4430_v20, %v4198_v41  ;;  %v4202_v16 = vadd.f32 %v4201_v51, %v10724_v3  ;;  %v4434_v15 = vpop.f32.mrf.mxu1  ;;  %v11179_v20 = vld [vmem:[#allocation11_spill] sm:$0xff]  ;;  %v6207_v32 = vld [vmem:[#allocation2 + $0x4e0] sm:$0xff] }
 0x3ad   :  { %v4203_v50 = vpop.f32.mrf.mxu0  ;;  %v6209_v41 = vld [vmem:[#allocation2 + $0x528] sm:$0xff] }
 0x3ae   :  { %5531 = vst [vmem:[#allocation3 + $0x438] sm:$0xff] %v4431_v23  ;;  %v4435_v63 = vadd.f32 %v4434_v15, %v4202_v16  ;;  %5084 = vmatmul.mubr.f32.gmra.mxu0 %v6191_v21  ;;  %5317 = vmatmul.mubr.f32.gmra.mxu1 %v6192_v7  ;;  %v4204_v6 = vadd.f32 %v4203_v50, %v10732_v17  ;;  %v4436_v18 = vpop.f32.mrf.mxu1  ;;  %v11174_v17 = vld [vmem:[#allocation6_spill] sm:$0xff]  ;;  %v11180_v23 = vld [vmem:[#allocation12_spill] sm:$0xff] }
 0x3af   :  { %5089 = vmatprep.mubr.f32.mxu0 %v6193_v36  ;;  %5778 = vmatprep.mubr.msk.f32.mxu1 %vm1376_vm2, %v6194_v4  ;;  %v4207_v12 = vpop.f32.mrf.mxu0  ;;  %v6211_v21 = vld [vmem:[#allocation2 + $0x520] sm:$0xff]  ;;  %v6212_v7 = vld [vmem:[#allocation2 + $0x530] sm:$0xff]  ;;  %v6214_v36 = vld [vmem:[#allocation2 + $0x578] sm:$0xff] }
 0x3b0   :  { %5536 = vst [vmem:[#allocation3 + $0x460] sm:$0xff] %v4435_v63  ;;  %v4437_v54 = vadd.f32 %v4436_v18, %v4204_v6  ;;  %v4208_v3 = vadd.f32 %v4207_v12, %v10740_v60  ;;  %v4440_v48 = vpop.f32.mrf.mxu1  ;;  %v6213_v18 = vld [vmem:[#allocation2 + $0x568] sm:$0xff] }
 0x3b1   :  { %v4209_v19 = vpop.f32.mrf.mxu0 }
 0x3b2   :  { %5537 = vst [vmem:[#allocation3 + $0x468] sm:$0xff] %v4437_v54  ;;  %v4441_v11 = vadd.f32 %v4440_v48, %v4208_v3  ;;  %5090 = vmatmul.mubr.f32.gmra.mxu0 %v6195_v0  ;;  %5323 = vmatmul.mubr.f32.gmra.mxu1 %v6196_v59  ;;  %v4210_v34 = vadd.f32 %v4209_v19, %v11174_v17  ;;  %v4442_v40 = vpop.f32.mrf.mxu1  ;;  %v6215_v19 = vld [vmem:[#allocation2 + $0x560] sm:$0xff]  ;;  %v6217_v59 = vld [vmem:[#allocation2 + $0x5a8] sm:$0xff]  ;;  %v6218_v17 = vld [vmem:[#allocation2 + $0x5b8] sm:$0xff] }
 0x3b3   :  { %5095 = vmatprep.mubr.f32.mxu0 %v6197_v55  ;;  %5779 = vmatprep.mubr.msk.f32.mxu1 %vm1376_vm2, %v6198_v57 }
 0x3b4   :  { %5542 = vst [vmem:[#allocation3 + $0x490] sm:$0xff] %v4441_v11  ;;  %v4443_v5 = vadd.f32 %v4442_v40, %v4210_v34  ;;  %v4213_v27 = vpop.f32.mrf.mxu0  ;;  %v4446_v60 = vpop.f32.mrf.mxu1  ;;  %v6216_v11 = vld [vmem:[#allocation2 + $0x570] sm:$0xff] }
 0x3b5   :  { %v4214_v8 = vadd.f32 %v4213_v27, %v11175_v28  ;;  %v6219_v27 = vld [vmem:[#allocation2 + $0x5a0] sm:$0xff] }
 0x3b6   :  { %5543 = vst [vmem:[#allocation3 + $0x498] sm:$0xff] %v4443_v5  ;;  %5096 = vmatmul.mubr.f32.gmra.mxu0 %v6199_v26  ;;  %5329 = vmatmul.mubr.f32.gmra.mxu1 %v6200_v58  ;;  %v4215_v38 = vpop.f32.mrf.mxu0  ;;  %v4448_v22 = vpop.f32.mrf.mxu1  ;;  %v6222_v26 = vld [vmem:[#allocation2 + $0x5f8] sm:$0xff] }
 0x3b7   :  { %v4447_v45 = vadd.f32 %v4446_v60, %v4214_v8  ;;  %5101 = vmatprep.mubr.f32.mxu0 %v6201_v1  ;;  %5780 = vmatprep.mubr.msk.f32.mxu1 %vm1376_vm2, %v6202_v56  ;;  %v4216_v31 = vadd.f32 %v4215_v38, %v11176_v10  ;;  %v6220_v60 = vld [vmem:[#allocation2 + $0x5b0] sm:$0xff]  ;;  %v6221_v8 = vld [vmem:[#allocation2 + $0x5e8] sm:$0xff]  ;;  %v6223_v56 = vld [vmem:[#allocation2 + $0x5e0] sm:$0xff] }
 0x3b8   :  { %v4452_v53 = vpop.f32.mrf.mxu1  ;;  %v6224_v10 = vld [vmem:[#allocation2 + $0x5f0] sm:$0xff] }
 0x3b9   :  { %5548 = vst [vmem:[#allocation3 + $0x4c0] sm:$0xff] %v4447_v45  ;;  %v4449_v29 = vadd.f32 %v4448_v22, %v4216_v31  ;;  %v4219_v61 = vpop.f32.mrf.mxu0 }
 0x3ba   :  { %v4220_v30 = vadd.f32 %v4219_v61, %v11177_v52  ;;  %5102 = vmatmul.mubr.f32.gmra.mxu0 %v6203_v62  ;;  %5335 = vmatmul.mubr.f32.gmra.mxu1 %v6204_v49  ;;  %v4454_v35 = vpop.f32.mrf.mxu1 }
 0x3bb   :  { %5549 = vst [vmem:[#allocation3 + $0x4c8] sm:$0xff] %v4449_v29  ;;  %5107 = vmatprep.mubr.f32.mxu0 %v6205_v42  ;;  %5781 = vmatprep.mubr.msk.f32.mxu1 %vm1376_vm2, %v6206_v47  ;;  %v4221_v24 = vpop.f32.mrf.mxu0  ;;  %v6226_v29 = vld [vmem:[#allocation2 + $0x638] sm:$0xff]  ;;  %v6228_v42 = vld [vmem:[#allocation2 + $0x630] sm:$0xff] }
 0x3bc   :  { %v4453_v44 = vadd.f32 %v4452_v53, %v4220_v30  ;;  %v4222_v2 = vadd.f32 %v4221_v24, %v11178_v37  ;;  %v4458_v14 = vpop.f32.mrf.mxu1  ;;  %v6225_v53 = vld [vmem:[#allocation2 + $0x628] sm:$0xff] }
 0x3bd   :  { %v4225_v13 = vpop.f32.mrf.mxu0  ;;  %v6229_v24 = vld [vmem:[#allocation2 + $0x668] sm:$0xff] }
 0x3be   :  { %5554 = vst [vmem:[#allocation3 + $0x4f0] sm:$0xff] %v4453_v44  ;;  %v4455_v33 = vadd.f32 %v4454_v35, %v4222_v2  ;;  %v4226_v46 = vadd.f32 %v4225_v13, %v11179_v20  ;;  %5108 = vmatmul.mubr.f32.gmra.mxu0 %v6207_v32  ;;  %5341 = vmatmul.mubr.f32.gmra.mxu1 %v6208_v43  ;;  %v4460_v25 = vpop.f32.mrf.mxu1  ;;  %v6227_v35 = vld [vmem:[#allocation2 + $0x620] sm:$0xff]  ;;  %v6230_v44 = vld [vmem:[#allocation2 + $0x678] sm:$0xff]  ;;  %v6233_v43 = vld [vmem:[#allocation2 + $0x6a8] sm:$0xff] }
 0x3bf   :  { %5113 = vmatprep.mubr.f32.mxu0 %v6209_v41  ;;  %5782 = vmatprep.mubr.msk.f32.mxu1 %vm1376_vm2, %v6210_v39  ;;  %v4227_v9 = vpop.f32.mrf.mxu0  ;;  %v6231_v20 = vld [vmem:[#allocation2 + $0x660] sm:$0xff] }
 0x3c0   :  { %5555 = vst [vmem:[#allocation3 + $0x4f8] sm:$0xff] %v4455_v33  ;;  %v4459_v51 = vadd.f32 %v4458_v14, %v4226_v46  ;;  %v4228_v16 = vadd.f32 %v4227_v9, %v11180_v23  ;;  %v6232_v46 = vld [vmem:[#allocation2 + $0x670] sm:$0xff] }
 0x3c1   :  { %v4529_v15 = vpop.f32.mrf.mxu0 }
 0x3c2   :  { %5560 = vst [vmem:[#allocation3 + $0x520] sm:$0xff] %v4459_v51  ;;  %v4461_v50 = vadd.f32 %v4460_v25, %v4228_v16  ;;  %v4762_v63 = vpop.f32.mrf.mxu1  ;;  %5114 = vmatmul.mubr.f32.gmra.mxu0 %v6211_v21  ;;  %5347 = vmatmul.mubr.f32.gmra.mxu1 %v6212_v7  ;;  %v6234_v25 = vld [vmem:[#allocation2 + $0x6b8] sm:$0xff]  ;;  %v6235_v16 = vld [vmem:[#allocation2 + $0x6a0] sm:$0xff] }
 0x3c3   :  { %v10943_v6 = vadd.f32 %v4762_v63, %v4529_v15  ;;  %5119 = vmatprep.mubr.f32.mxu0 %v6213_v18  ;;  %5783 = vmatprep.mubr.msk.f32.mxu1 %vm1376_vm2, %v6214_v36  ;;  %v4531_v4 = vpop.f32.mrf.mxu0  ;;  %v6236_v15 = vld [vmem:[#allocation2 + $0x6b0] sm:$0xff]  ;;  %v6237_v63 = vld [vmem:[#allocation2 + $0x6e8] sm:$0xff]  ;;  %v6238_v21 = vld [vmem:[#allocation2 + $0x6f8] sm:$0xff] }
 0x3c4   :  { %5561 = vst [vmem:[#allocation3 + $0x528] sm:$0xff] %v4461_v50  ;;  %v4764_v12 = vpop.f32.mrf.mxu1 }
 0x3c5   :  { %v10946_v54 = vadd.f32 %v4764_v12, %v4531_v4  ;;  %v4535_v3 = vpop.f32.mrf.mxu0 }
 0x3c6   :  { %v4768_v48 = vpop.f32.mrf.mxu1  ;;  %5120 = vmatmul.mubr.f32.gmra.mxu0 %v6215_v19  ;;  %5353 = vmatmul.mubr.f32.gmra.mxu1 %v6216_v11 }
 0x3c7   :  { %v10948_v0 = vadd.f32 %v4768_v48, %v4535_v3  ;;  %5125 = vmatprep.mubr.f32.mxu0 %v6217_v59  ;;  %5784 = vmatprep.mubr.msk.f32.mxu1 %vm1376_vm2, %v6218_v17  ;;  %v4537_v34 = vpop.f32.mrf.mxu0  ;;  %v6239_v3 = vld [vmem:[#allocation2 + $0x6e0] sm:$0xff]  ;;  %v6240_v48 = vld [vmem:[#allocation2 + $0x6f0] sm:$0xff] }
 0x3c8   :  { %v4770_v40 = vpop.f32.mrf.mxu1 }
 0x3c9   :  { %v10951_v55 = vadd.f32 %v4770_v40, %v4537_v34  ;;  %v4541_v57 = vpop.f32.mrf.mxu0 }
 0x3ca   :  { %v4774_v5 = vpop.f32.mrf.mxu1  ;;  %5126 = vmatmul.mubr.f32.gmra.mxu0 %v6219_v27  ;;  %5359 = vmatmul.mubr.f32.gmra.mxu1 %v6220_v60 }
 0x3cb   :  { %v10953_v28 = vadd.f32 %v4774_v5, %v4541_v57  ;;  %5131 = vmatprep.mubr.f32.mxu0 %v6221_v8  ;;  %5785 = vmatprep.mubr.msk.f32.mxu1 %vm1376_vm2, %v6222_v26  ;;  %v4543_v58 = vpop.f32.mrf.mxu0 }
 0x3cc   :  { %v4776_v38 = vpop.f32.mrf.mxu1 }
 0x3cd   :  { %v10956_v22 = vadd.f32 %v4776_v38, %v4543_v58  ;;  %v4547_v45 = vpop.f32.mrf.mxu0 }
 0x3ce   :  { %v4780_v1 = vpop.f32.mrf.mxu1  ;;  %5132 = vmatmul.mubr.f32.gmra.mxu0 %v6223_v56  ;;  %5365 = vmatmul.mubr.f32.gmra.mxu1 %v6224_v10 }
 0x3cf   :  { %v10958_v31 = vadd.f32 %v4780_v1, %v4547_v45  ;;  %5137 = vmatprep.mubr.f32.mxu0 %v6225_v53  ;;  %5786 = vmatprep.mubr.msk.f32.mxu1 %vm1376_vm2, %v6226_v29  ;;  %v4549_v61 = vpop.f32.mrf.mxu0 }
 0x3d0   :  { %v4782_v52 = vpop.f32.mrf.mxu1 }
 0x3d1   :  { %v10961_v30 = vadd.f32 %v4782_v52, %v4549_v61 }
 0x3d2   :  { %v4553_v62 = vpop.f32.mrf.mxu0  ;;  %v4786_v49 = vpop.f32.mrf.mxu1  ;;  %5138 = vmatmul.mubr.f32.gmra.mxu0 %v6227_v35  ;;  %5371 = vmatmul.mubr.f32.gmra.mxu1 %v6228_v42 }
 0x3d3   :  { %v10963_v47 = vadd.f32 %v4786_v49, %v4553_v62  ;;  %5143 = vmatprep.mubr.f32.mxu0 %v6229_v24  ;;  %5787 = vmatprep.mubr.msk.f32.mxu1 %vm1376_vm2, %v6230_v44 }
 0x3d4   :  { %v4555_v37 = vpop.f32.mrf.mxu0  ;;  %v4788_v2 = vpop.f32.mrf.mxu1 }
 0x3d5   :  { %v10966_v14 = vadd.f32 %v4788_v2, %v4555_v37 }
 0x3d6   :  { %v4559_v13 = vpop.f32.mrf.mxu0  ;;  %v4792_v33 = vpop.f32.mrf.mxu1  ;;  %5144 = vmatmul.mubr.f32.gmra.mxu0 %v6231_v20  ;;  %5377 = vmatmul.mubr.f32.gmra.mxu1 %v6232_v46 }
 0x3d7   :  { %v10968_v32 = vadd.f32 %v4792_v33, %v4559_v13  ;;  %5149 = vmatprep.mubr.f32.mxu0 %v6233_v43  ;;  %5788 = vmatprep.mubr.msk.f32.mxu1 %vm1376_vm2, %v6234_v25 }
 0x3d8   :  { %v4561_v41 = vpop.f32.mrf.mxu0  ;;  %v4794_v39 = vpop.f32.mrf.mxu1 }
 0x3d9   :  { %v10971_v9 = vadd.f32 %v4794_v39, %v4561_v41 }
 0x3da   :  { %v4565_v51 = vpop.f32.mrf.mxu0  ;;  %v4798_v23 = vpop.f32.mrf.mxu1  ;;  %5150 = vmatmul.mubr.f32.gmra.mxu0 %v6235_v16  ;;  %5383 = vmatmul.mubr.f32.gmra.mxu1 %v6236_v15 }
 0x3db   :  { %v10973_v50 = vadd.f32 %v4798_v23, %v4565_v51  ;;  %5155 = vmatprep.mubr.f32.mxu0 %v6237_v63  ;;  %5789 = vmatprep.mubr.msk.f32.mxu1 %vm1376_vm2, %v6238_v21 }
 0x3dc   :  { %v4567_v7 = vpop.f32.mrf.mxu0  ;;  %v4800_v18 = vpop.f32.mrf.mxu1 }
 0x3dd   :  { %v10976_v36 = vadd.f32 %v4800_v18, %v4567_v7 }
 0x3de   :  { %v4571_v4 = vpop.f32.mrf.mxu0  ;;  %v4804_v12 = vpop.f32.mrf.mxu1  ;;  %5156 = vmatmul.mubr.f32.gmra.mxu0 %v6239_v3  ;;  %5389 = vmatmul.mubr.f32.gmra.mxu1 %v6240_v48 }
 0x3df   :  { %v10978_v19 = vadd.f32 %v4804_v12, %v4571_v4 }
 0x3e0   :  { %v4573_v11 = vpop.f32.mrf.mxu0  ;;  %v4806_v59 = vpop.f32.mrf.mxu1 }
 0x3e1   :  { %v10980_v17 = vadd.f32 %v4806_v59, %v4573_v11 }
 0x3e2   :  { %v4577_v34 = vpop.f32.mrf.mxu0  ;;  %v4810_v40 = vpop.f32.mrf.mxu1 }
 0x3e3   :  { %v10982_v57 = vadd.f32 %v4810_v40, %v4577_v34 }
 0x3e4   :  { %v4579_v5 = vpop.f32.mrf.mxu0  ;;  %v4812_v27 = vpop.f32.mrf.mxu1 }
 0x3e5   :  { %v10984_v60 = vadd.f32 %v4812_v27, %v4579_v5 }
 0x3e6   :  { %v4583_v8 = vpop.f32.mrf.mxu0  ;;  %v4816_v26 = vpop.f32.mrf.mxu1 }
 0x3e7   :  { %v10986_v58 = vadd.f32 %v4816_v26, %v4583_v8 }
 0x3e8   :  { %v4585_v38 = vpop.f32.mrf.mxu0  ;;  %v4818_v45 = vpop.f32.mrf.mxu1 }
 0x3e9   :  { %v10988_v1 = vadd.f32 %v4818_v45, %v4585_v38 }
 0x3ea   :  { %v4589_v56 = vpop.f32.mrf.mxu0  ;;  %v4822_v10 = vpop.f32.mrf.mxu1 }
 0x3eb   :  { %v10990_v53 = vadd.f32 %v4822_v10, %v4589_v56 }
 0x3ec   :  { %v4591_v29 = vpop.f32.mrf.mxu0  ;;  %v4824_v61 = vpop.f32.mrf.mxu1 }
 0x3ed   :  { %v10992_v52 = vadd.f32 %v4824_v61, %v4591_v29 }
 0x3ee   :  { %v4595_v62 = vpop.f32.mrf.mxu0  ;;  %v4828_v49 = vpop.f32.mrf.mxu1 }
 0x3ef   :  { %v10994_v35 = vadd.f32 %v4828_v49, %v4595_v62 }
 0x3f0   :  { %v4597_v42 = vpop.f32.mrf.mxu0  ;;  %v4830_v24 = vpop.f32.mrf.mxu1 }
 0x3f1   :  { %v10996_v44 = vadd.f32 %v4830_v24, %v4597_v42 }
 0x3f2   :  { %v4601_v37 = vpop.f32.mrf.mxu0  ;;  %v4834_v2 = vpop.f32.mrf.mxu1 }
 0x3f3   :  { %v10998_v13 = vadd.f32 %v4834_v2, %v4601_v37 }
 0x3f4   :  { %v4603_v33 = vpop.f32.mrf.mxu0  ;;  %v4836_v20 = vpop.f32.mrf.mxu1 }
 0x3f5   :  { %v11000_v46 = vadd.f32 %v4836_v20, %v4603_v33 }
 0x3f6   :  { %v4607_v43 = vpop.f32.mrf.mxu0  ;;  %v4840_v25 = vpop.f32.mrf.mxu1 }
 0x3f7   :  { %v11002_v41 = vadd.f32 %v4840_v25, %v4607_v43 }
 0x3f8   :  { %v4609_v39 = vpop.f32.mrf.mxu0  ;;  %v4842_v51 = vpop.f32.mrf.mxu1 }
 0x3f9   :  { %v11004_v23 = vadd.f32 %v4842_v51, %v4609_v39 }
 0x3fa   :  { %v4613_v16 = vpop.f32.mrf.mxu0  ;;  %v4846_v15 = vpop.f32.mrf.mxu1 }
 0x3fb   :  { %v11006_v63 = vadd.f32 %v4846_v15, %v4613_v16 }
 0x3fc   :  { %v4615_v21 = vpop.f32.mrf.mxu0  ;;  %v4848_v7 = vpop.f32.mrf.mxu1 }
 0x3fd   :  { %v11008_v18 = vadd.f32 %v4848_v7, %v4615_v21 }
 0x3fe   :  { %v4619_v4 = vpop.f32.mrf.mxu0  ;;  %v4852_v12 = vpop.f32.mrf.mxu1 }
 0x3ff   :  { %v11010_v3 = vadd.f32 %v4852_v12, %v4619_v4 }
 0x400   :  { %v4621_v48 = vpop.f32.mrf.mxu0  ;;  %v4854_v11 = vpop.f32.mrf.mxu1 }
 0x401   :  { %v11012_v59 = vadd.f32 %v4854_v11, %v4621_v48 }
 0x402   :  { %v4625_v34 = vpop.f32.mrf.mxu0  ;;  %v4858_v40 = vpop.f32.mrf.mxu1 }
 0x403   :  { %v11014_v5 = vadd.f32 %v4858_v40, %v4625_v34 }
 0x404   :  { %v4627_v27 = vpop.f32.mrf.mxu0  ;;  %v4860_v8 = vpop.f32.mrf.mxu1 }
 0x405   :  { %v11016_v26 = vadd.f32 %v4860_v8, %v4627_v27 }
 0x406   :  { %v4631_v38 = vpop.f32.mrf.mxu0  ;;  %v4864_v45 = vpop.f32.mrf.mxu1 }
 0x407   :  { %v11018_v56 = vadd.f32 %v4864_v45, %v4631_v38 }
 0x408   :  { %v4633_v10 = vpop.f32.mrf.mxu0  ;;  %v4866_v29 = vpop.f32.mrf.mxu1 }
 0x409   :  { %v11020_v61 = vadd.f32 %v4866_v29, %v4633_v10 }
 0x40a   :  { %v4637_v62 = vpop.f32.mrf.mxu0  ;;  %v4870_v49 = vpop.f32.mrf.mxu1 }
 0x40b   :  { %v11022_v42 = vadd.f32 %v4870_v49, %v4637_v62 }
 0x40c   :  { %v4639_v24 = vpop.f32.mrf.mxu0  ;;  %v4872_v37 = vpop.f32.mrf.mxu1 }
 0x40d   :  { %v11024_v2 = vadd.f32 %v4872_v37, %v4639_v24 }
 0x40e   :  { %v4643_v33 = vpop.f32.mrf.mxu0  ;;  %v4876_v20 = vpop.f32.mrf.mxu1 }
 0x40f   :  { %v11026_v43 = vadd.f32 %v4876_v20, %v4643_v33 }
 0x410   :  { %v4645_v25 = vpop.f32.mrf.mxu0  ;;  %v4878_v39 = vpop.f32.mrf.mxu1 }
 0x411   :  { %v11028_v51 = vadd.f32 %v4878_v39, %v4645_v25 }
 0x412   :  { %v4649_v16 = vpop.f32.mrf.mxu0  ;;  %v4882_v15 = vpop.f32.mrf.mxu1 }
 0x413   :  { %v11030_v21 = vadd.f32 %v4882_v15, %v4649_v16 }
 0x414   :  { %v4651_v7 = vpop.f32.mrf.mxu0  ;;  %v4884_v4 = vpop.f32.mrf.mxu1 }
 0x415   :  { %v11032_v12 = vadd.f32 %v4884_v4, %v4651_v7 }
 0x416   :  { %v4655_v48 = vpop.f32.mrf.mxu0  ;;  %v4888_v11 = vpop.f32.mrf.mxu1 }
 0x417   :  { %v11034_v34 = vadd.f32 %v4888_v11, %v4655_v48 }
 0x418   :  { %v4657_v40 = vpop.f32.mrf.mxu0  ;;  %v4890_v27 = vpop.f32.mrf.mxu1 }
 0x419   :  { %v11036_v8 = vadd.f32 %v4890_v27, %v4657_v40 }
 0x41a   :  { %v4661_v38 = vpop.f32.mrf.mxu0  ;;  %v4894_v45 = vpop.f32.mrf.mxu1 }
 0x41b   :  { %v11038_v10 = vadd.f32 %v4894_v45, %v4661_v38 }
 0x41c   :  { %v4663_v29 = vpop.f32.mrf.mxu0  ;;  %v4896_v62 = vpop.f32.mrf.mxu1 }
 0x41d   :  { %v11040_v49 = vadd.f32 %v4896_v62, %v4663_v29 }
 0x41e   :  { %v4667_v24 = vpop.f32.mrf.mxu0  ;;  %v4900_v37 = vpop.f32.mrf.mxu1 }
 0x41f   :  { %v11042_v33 = vadd.f32 %v4900_v37, %v4667_v24 }
 0x420   :  { %v4669_v20 = vpop.f32.mrf.mxu0  ;;  %v4902_v25 = vpop.f32.mrf.mxu1 }
 0x421   :  { %v11044_v39 = vadd.f32 %v4902_v25, %v4669_v20 }
 0x422   :  { %v4673_v16 = vpop.f32.mrf.mxu0  ;;  %v4906_v15 = vpop.f32.mrf.mxu1 }
 0x423   :  { %11181 = vst [vmem:[#allocation6_spill] sm:$0xff] %v11044_v39  ;;  %v11046_v7 = vadd.f32 %v4906_v15, %v4673_v16 }
 0x424   :  { %v4675_v4 = vpop.f32.mrf.mxu0  ;;  %v4908_v48 = vpop.f32.mrf.mxu1 }
 0x425   :  { %11182 = vst [vmem:[#allocation7_spill] sm:$0xff] %v11046_v7  ;;  %v11048_v11 = vadd.f32 %v4908_v48, %v4675_v4 }
 0x426   :  { %v4679_v40 = vpop.f32.mrf.mxu0  ;;  %v4912_v27 = vpop.f32.mrf.mxu1 }
 0x427   :  { %11183 = vst [vmem:[#allocation8_spill] sm:$0xff] %v11048_v11  ;;  %v11050_v38 = vadd.f32 %v4912_v27, %v4679_v40 }
 0x428   :  { %v4681_v45 = vpop.f32.mrf.mxu0  ;;  %v4914_v29 = vpop.f32.mrf.mxu1 }
 0x429   :  { %11184 = vst [vmem:[#allocation9_spill] sm:$0xff] %v11050_v38  ;;  %v11052_v62 = vadd.f32 %v4914_v29, %v4681_v45 }
 0x42a   :  { %v4685_v24 = vpop.f32.mrf.mxu0  ;;  %v4918_v37 = vpop.f32.mrf.mxu1 }
 0x42b   :  { %11185 = vst [vmem:[#allocation10_spill] sm:$0xff] %v11052_v62  ;;  %v11054_v20 = vadd.f32 %v4918_v37, %v4685_v24 }
 0x42c   :  { %v4687_v25 = vpop.f32.mrf.mxu0  ;;  %v4920_v39 = vpop.f32.mrf.mxu1 }
 0x42d   :  { %v11056_v16 = vadd.f32 %v4920_v39, %v4687_v25 }
 0x42e   :  { %v4691_v15 = vpop.f32.mrf.mxu0  ;;  %v4924_v7 = vpop.f32.mrf.mxu1 }
 0x42f   :  { %11186 = vst [vmem:[#allocation11_spill] sm:$0xff] %v11056_v16  ;;  %v11058_v4 = vadd.f32 %v4924_v7, %v4691_v15 }
 0x430   :  { %v4693_v48 = vpop.f32.mrf.mxu0  ;;  %v4926_v11 = vpop.f32.mrf.mxu1 }
 0x431   :  { %11187 = vst [vmem:[#allocation12_spill] sm:$0xff] %v11058_v4  ;;  %v11060_v40 = vadd.f32 %v4926_v11, %v4693_v48 }
 0x432   :  { %v4995_v27 = vpop.f32.mrf.mxu0  ;;  %v5228_v38 = vpop.f32.mrf.mxu1 }
 0x433   :  { %v4996_v45 = vadd.f32 %v4995_v27, %v10943_v6 }
 0x434   :  { %v4997_v29 = vpop.f32.mrf.mxu0  ;;  %v5230_v62 = vpop.f32.mrf.mxu1 }
 0x435   :  { %v5229_v24 = vadd.f32 %v5228_v38, %v4996_v45  ;;  %v4998_v37 = vadd.f32 %v4997_v29, %v10946_v54 }
 0x436   :  { %v5001_v39 = vpop.f32.mrf.mxu0  ;;  %v5234_v25 = vpop.f32.mrf.mxu1 }
 0x437   :  { %5399 = vst [vmem:[#allocation3 + $0x20] sm:$0xff] %v5229_v24  ;;  %v5231_v16 = vadd.f32 %v5230_v62, %v4998_v37  ;;  %v5002_v7 = vadd.f32 %v5001_v39, %v10948_v0 }
 0x438   :  { %v5003_v15 = vpop.f32.mrf.mxu0  ;;  %v5236_v4 = vpop.f32.mrf.mxu1 }
 0x439   :  { %5401 = vst.msk [vmem:[#allocation3 + $0x28] sm:$0xff] %vm5400_vm4, %v5231_v16  ;;  %v5235_v11 = vadd.f32 %v5234_v25, %v5002_v7  ;;  %v5004_v48 = vadd.f32 %v5003_v15, %v10951_v55 }
 0x43a   :  { %v5007_v6 = vpop.f32.mrf.mxu0  ;;  %v5240_v27 = vpop.f32.mrf.mxu1 }
 0x43b   :  { %5406 = vst [vmem:[#allocation3 + $0x50] sm:$0xff] %v5235_v11  ;;  %v5237_v38 = vadd.f32 %v5236_v4, %v5004_v48  ;;  %v5008_v54 = vadd.f32 %v5007_v6, %v10953_v28 }
 0x43c   :  { %v5009_v45 = vpop.f32.mrf.mxu0  ;;  %v5242_v29 = vpop.f32.mrf.mxu1 }
 0x43d   :  { %5407 = vst.msk [vmem:[#allocation3 + $0x58] sm:$0xff] %vm5400_vm4, %v5237_v38  ;;  %v5241_v62 = vadd.f32 %v5240_v27, %v5008_v54  ;;  %v5010_v0 = vadd.f32 %v5009_v45, %v10956_v22 }
 0x43e   :  { %v5013_v24 = vpop.f32.mrf.mxu0  ;;  %v5246_v37 = vpop.f32.mrf.mxu1 }
 0x43f   :  { %5412 = vst [vmem:[#allocation3 + $0x80] sm:$0xff] %v5241_v62  ;;  %v5243_v16 = vadd.f32 %v5242_v29, %v5010_v0  ;;  %v5014_v39 = vadd.f32 %v5013_v24, %v10958_v31 }
 0x440   :  { %v5015_v55 = vpop.f32.mrf.mxu0  ;;  %v5248_v25 = vpop.f32.mrf.mxu1 }
 0x441   :  { %5413 = vst.msk [vmem:[#allocation3 + $0x88] sm:$0xff] %vm5400_vm4, %v5243_v16  ;;  %v5247_v4 = vadd.f32 %v5246_v37, %v5014_v39  ;;  %v5016_v28 = vadd.f32 %v5015_v55, %v10961_v30 }
 0x442   :  { %v5019_v7 = vpop.f32.mrf.mxu0  ;;  %v5252_v15 = vpop.f32.mrf.mxu1 }
 0x443   :  { %5418 = vst [vmem:[#allocation3 + $0xb0] sm:$0xff] %v5247_v4  ;;  %v5249_v11 = vadd.f32 %v5248_v25, %v5016_v28  ;;  %v5020_v48 = vadd.f32 %v5019_v7, %v10963_v47 }
 0x444   :  { %v5021_v22 = vpop.f32.mrf.mxu0  ;;  %v5254_v6 = vpop.f32.mrf.mxu1 }
 0x445   :  { %5419 = vst.msk [vmem:[#allocation3 + $0xb8] sm:$0xff] %vm5400_vm4, %v5249_v11  ;;  %v5253_v27 = vadd.f32 %v5252_v15, %v5020_v48  ;;  %v5022_v31 = vadd.f32 %v5021_v22, %v10966_v14 }
 0x446   :  { %v5025_v38 = vpop.f32.mrf.mxu0  ;;  %v5258_v54 = vpop.f32.mrf.mxu1 }
 0x447   :  { %5424 = vst [vmem:[#allocation3 + $0xe0] sm:$0xff] %v5253_v27  ;;  %v5255_v45 = vadd.f32 %v5254_v6, %v5022_v31  ;;  %v5026_v29 = vadd.f32 %v5025_v38, %v10968_v32 }
 0x448   :  { %v5027_v30 = vpop.f32.mrf.mxu0  ;;  %v5260_v62 = vpop.f32.mrf.mxu1 }
 0x449   :  { %5425 = vst.msk [vmem:[#allocation3 + $0xe8] sm:$0xff] %vm5400_vm4, %v5255_v45  ;;  %v5259_v0 = vadd.f32 %v5258_v54, %v5026_v29  ;;  %v5028_v47 = vadd.f32 %v5027_v30, %v10971_v9 }
 0x44a   :  { %v5031_v24 = vpop.f32.mrf.mxu0  ;;  %v5264_v37 = vpop.f32.mrf.mxu1 }
 0x44b   :  { %5430 = vst [vmem:[#allocation3 + $0x110] sm:$0xff] %v5259_v0  ;;  %v5261_v16 = vadd.f32 %v5260_v62, %v5028_v47  ;;  %v5032_v39 = vadd.f32 %v5031_v24, %v10973_v50 }
 0x44c   :  { %v5033_v14 = vpop.f32.mrf.mxu0  ;;  %v5266_v55 = vpop.f32.mrf.mxu1 }
 0x44d   :  { %5431 = vst.msk [vmem:[#allocation3 + $0x118] sm:$0xff] %vm5400_vm4, %v5261_v16  ;;  %v5265_v25 = vadd.f32 %v5264_v37, %v5032_v39  ;;  %v5034_v32 = vadd.f32 %v5033_v14, %v10976_v36 }
 0x44e   :  { %v5037_v4 = vpop.f32.mrf.mxu0  ;;  %v5270_v28 = vpop.f32.mrf.mxu1 }
 0x44f   :  { %5436 = vst [vmem:[#allocation3 + $0x140] sm:$0xff] %v5265_v25  ;;  %v5267_v7 = vadd.f32 %v5266_v55, %v5034_v32  ;;  %v5038_v15 = vadd.f32 %v5037_v4, %v10978_v19 }
 0x450   :  { %v5039_v9 = vpop.f32.mrf.mxu0  ;;  %v5272_v11 = vpop.f32.mrf.mxu1 }
 0x451   :  { %5437 = vst.msk [vmem:[#allocation3 + $0x148] sm:$0xff] %vm5400_vm4, %v5267_v7  ;;  %v5271_v48 = vadd.f32 %v5270_v28, %v5038_v15  ;;  %v5040_v50 = vadd.f32 %v5039_v9, %v10980_v17 }
 0x452   :  { %v5043_v22 = vpop.f32.mrf.mxu0  ;;  %v5276_v6 = vpop.f32.mrf.mxu1 }
 0x453   :  { %5442 = vst [vmem:[#allocation3 + $0x170] sm:$0xff] %v5271_v48  ;;  %v5273_v27 = vadd.f32 %v5272_v11, %v5040_v50  ;;  %v5044_v31 = vadd.f32 %v5043_v22, %v10982_v57 }
 0x454   :  { %v5045_v36 = vpop.f32.mrf.mxu0  ;;  %v5278_v38 = vpop.f32.mrf.mxu1 }
 0x455   :  { %5443 = vst.msk [vmem:[#allocation3 + $0x178] sm:$0xff] %vm5400_vm4, %v5273_v27  ;;  %v5277_v54 = vadd.f32 %v5276_v6, %v5044_v31  ;;  %v5046_v19 = vadd.f32 %v5045_v36, %v10984_v60 }
 0x456   :  { %v5049_v45 = vpop.f32.mrf.mxu0  ;;  %v5282_v29 = vpop.f32.mrf.mxu1 }
 0x457   :  { %5448 = vst [vmem:[#allocation3 + $0x1a0] sm:$0xff] %v5277_v54  ;;  %v5279_v30 = vadd.f32 %v5278_v38, %v5046_v19  ;;  %v5050_v62 = vadd.f32 %v5049_v45, %v10986_v58 }
 0x458   :  { %v5051_v17 = vpop.f32.mrf.mxu0  ;;  %v5284_v0 = vpop.f32.mrf.mxu1 }
 0x459   :  { %5449 = vst.msk [vmem:[#allocation3 + $0x1a8] sm:$0xff] %vm5400_vm4, %v5279_v30  ;;  %v5283_v47 = vadd.f32 %v5282_v29, %v5050_v62  ;;  %v5052_v57 = vadd.f32 %v5051_v17, %v10988_v1 }
 0x45a   :  { %v5055_v24 = vpop.f32.mrf.mxu0  ;;  %v5288_v37 = vpop.f32.mrf.mxu1 }
 0x45b   :  { %5454 = vst [vmem:[#allocation3 + $0x1d0] sm:$0xff] %v5283_v47  ;;  %v5285_v16 = vadd.f32 %v5284_v0, %v5052_v57  ;;  %v5056_v39 = vadd.f32 %v5055_v24, %v10990_v53 }
 0x45c   :  { %v5057_v60 = vpop.f32.mrf.mxu0  ;;  %v5290_v14 = vpop.f32.mrf.mxu1 }
 0x45d   :  { %5455 = vst.msk [vmem:[#allocation3 + $0x1d8] sm:$0xff] %vm5400_vm4, %v5285_v16  ;;  %v5289_v55 = vadd.f32 %v5288_v37, %v5056_v39  ;;  %v5058_v58 = vadd.f32 %v5057_v60, %v10992_v52 }
 0x45e   :  { %v5061_v25 = vpop.f32.mrf.mxu0  ;;  %v5294_v32 = vpop.f32.mrf.mxu1 }
 0x45f   :  { %5460 = vst [vmem:[#allocation3 + $0x200] sm:$0xff] %v5289_v55  ;;  %v5291_v4 = vadd.f32 %v5290_v14, %v5058_v58  ;;  %v5062_v28 = vadd.f32 %v5061_v25, %v10994_v35 }
 0x460   :  { %v5063_v1 = vpop.f32.mrf.mxu0  ;;  %v5296_v7 = vpop.f32.mrf.mxu1 }
 0x461   :  { %5461 = vst.msk [vmem:[#allocation3 + $0x208] sm:$0xff] %vm5400_vm4, %v5291_v4  ;;  %v5295_v15 = vadd.f32 %v5294_v32, %v5062_v28  ;;  %v5064_v53 = vadd.f32 %v5063_v1, %v10996_v44 }
 0x462   :  { %v5067_v9 = vpop.f32.mrf.mxu0  ;;  %v5300_v11 = vpop.f32.mrf.mxu1 }
 0x463   :  { %5466 = vst [vmem:[#allocation3 + $0x230] sm:$0xff] %v5295_v15  ;;  %v5297_v48 = vadd.f32 %v5296_v7, %v5064_v53  ;;  %v5068_v50 = vadd.f32 %v5067_v9, %v10998_v13 }
 0x464   :  { %v5069_v52 = vpop.f32.mrf.mxu0  ;;  %v5302_v22 = vpop.f32.mrf.mxu1 }
 0x465   :  { %5467 = vst.msk [vmem:[#allocation3 + $0x238] sm:$0xff] %vm5400_vm4, %v5297_v48  ;;  %v5301_v6 = vadd.f32 %v5300_v11, %v5068_v50  ;;  %v5070_v35 = vadd.f32 %v5069_v52, %v11000_v46 }
 0x466   :  { %v5073_v27 = vpop.f32.mrf.mxu0  ;;  %v5306_v31 = vpop.f32.mrf.mxu1 }
 0x467   :  { %5472 = vst [vmem:[#allocation3 + $0x260] sm:$0xff] %v5301_v6  ;;  %v5303_v36 = vadd.f32 %v5302_v22, %v5070_v35  ;;  %v5074_v38 = vadd.f32 %v5073_v27, %v11002_v41 }
 0x468   :  { %v5075_v44 = vpop.f32.mrf.mxu0  ;;  %v5308_v54 = vpop.f32.mrf.mxu1 }
 0x469   :  { %5473 = vst.msk [vmem:[#allocation3 + $0x268] sm:$0xff] %vm5400_vm4, %v5303_v36  ;;  %v5307_v19 = vadd.f32 %v5306_v31, %v5074_v38  ;;  %v5076_v13 = vadd.f32 %v5075_v44, %v11004_v23 }
 0x46a   :  { %v5079_v45 = vpop.f32.mrf.mxu0  ;;  %v5312_v29 = vpop.f32.mrf.mxu1 }
 0x46b   :  { %5478 = vst [vmem:[#allocation3 + $0x290] sm:$0xff] %v5307_v19  ;;  %v5309_v30 = vadd.f32 %v5308_v54, %v5076_v13  ;;  %v5080_v62 = vadd.f32 %v5079_v45, %v11006_v63 }
 0x46c   :  { %v5081_v46 = vpop.f32.mrf.mxu0  ;;  %v5314_v17 = vpop.f32.mrf.mxu1 }
 0x46d   :  { %5479 = vst.msk [vmem:[#allocation3 + $0x298] sm:$0xff] %vm5400_vm4, %v5309_v30  ;;  %v5313_v0 = vadd.f32 %v5312_v29, %v5080_v62  ;;  %v5082_v41 = vadd.f32 %v5081_v46, %v11008_v18 }
 0x46e   :  { %v5085_v47 = vpop.f32.mrf.mxu0  ;;  %v5318_v57 = vpop.f32.mrf.mxu1 }
 0x46f   :  { %5484 = vst [vmem:[#allocation3 + $0x2c0] sm:$0xff] %v5313_v0  ;;  %v5315_v24 = vadd.f32 %v5314_v17, %v5082_v41  ;;  %v5086_v37 = vadd.f32 %v5085_v47, %v11010_v3 }
 0x470   :  { %v5087_v23 = vpop.f32.mrf.mxu0  ;;  %v5320_v16 = vpop.f32.mrf.mxu1 }
 0x471   :  { %5485 = vst.msk [vmem:[#allocation3 + $0x2c8] sm:$0xff] %vm5400_vm4, %v5315_v24  ;;  %v5319_v39 = vadd.f32 %v5318_v57, %v5086_v37  ;;  %v5088_v63 = vadd.f32 %v5087_v23, %v11012_v59 }
 0x472   :  { %v5091_v60 = vpop.f32.mrf.mxu0  ;;  %v5324_v14 = vpop.f32.mrf.mxu1 }
 0x473   :  { %5490 = vst [vmem:[#allocation3 + $0x2f0] sm:$0xff] %v5319_v39  ;;  %v5321_v55 = vadd.f32 %v5320_v16, %v5088_v63  ;;  %v5092_v58 = vadd.f32 %v5091_v60, %v11014_v5 }
 0x474   :  { %v5093_v18 = vpop.f32.mrf.mxu0  ;;  %v5326_v25 = vpop.f32.mrf.mxu1 }
 0x475   :  { %5491 = vst.msk [vmem:[#allocation3 + $0x2f8] sm:$0xff] %vm5400_vm4, %v5321_v55  ;;  %v5325_v32 = vadd.f32 %v5324_v14, %v5092_v58  ;;  %v5094_v3 = vadd.f32 %v5093_v18, %v11016_v26  ;;  %v11188_v18 = vld [vmem:[#allocation6_spill] sm:$0xff] }
 0x476   :  { %v5097_v4 = vpop.f32.mrf.mxu0  ;;  %v5330_v28 = vpop.f32.mrf.mxu1 }
 0x477   :  { %5496 = vst [vmem:[#allocation3 + $0x320] sm:$0xff] %v5325_v32  ;;  %v5327_v1 = vadd.f32 %v5326_v25, %v5094_v3  ;;  %v5098_v7 = vadd.f32 %v5097_v4, %v11018_v56  ;;  %v11189_v4 = vld [vmem:[#allocation7_spill] sm:$0xff] }
 0x478   :  { %v5099_v59 = vpop.f32.mrf.mxu0  ;;  %v5332_v15 = vpop.f32.mrf.mxu1 }
 0x479   :  { %5497 = vst.msk [vmem:[#allocation3 + $0x328] sm:$0xff] %vm5400_vm4, %v5327_v1  ;;  %v5331_v53 = vadd.f32 %v5330_v28, %v5098_v7  ;;  %v5100_v5 = vadd.f32 %v5099_v59, %v11020_v61  ;;  %v11190_v59 = vld [vmem:[#allocation8_spill] sm:$0xff] }
 0x47a   :  { %v5103_v9 = vpop.f32.mrf.mxu0  ;;  %v5336_v11 = vpop.f32.mrf.mxu1 }
 0x47b   :  { %5502 = vst [vmem:[#allocation3 + $0x350] sm:$0xff] %v5331_v53  ;;  %v5333_v48 = vadd.f32 %v5332_v15, %v5100_v5  ;;  %v5104_v50 = vadd.f32 %v5103_v9, %v11022_v42  ;;  %v11191_v9 = vld [vmem:[#allocation9_spill] sm:$0xff] }
 0x47c   :  { %v5105_v26 = vpop.f32.mrf.mxu0  ;;  %v5338_v52 = vpop.f32.mrf.mxu1 }
 0x47d   :  { %5503 = vst.msk [vmem:[#allocation3 + $0x358] sm:$0xff] %vm5400_vm4, %v5333_v48  ;;  %v5337_v22 = vadd.f32 %v5336_v11, %v5104_v50  ;;  %v5106_v56 = vadd.f32 %v5105_v26, %v11024_v2 }
 0x47e   :  { %v5109_v6 = vpop.f32.mrf.mxu0  ;;  %v5342_v35 = vpop.f32.mrf.mxu1 }
 0x47f   :  { %5508 = vst [vmem:[#allocation3 + $0x380] sm:$0xff] %v5337_v22  ;;  %v5339_v27 = vadd.f32 %v5338_v52, %v5106_v56  ;;  %v5110_v31 = vadd.f32 %v5109_v6, %v11026_v43  ;;  %v11192_v52 = vld [vmem:[#allocation10_spill] sm:$0xff] }
 0x480   :  { %v5111_v61 = vpop.f32.mrf.mxu0  ;;  %v5344_v36 = vpop.f32.mrf.mxu1 }
 0x481   :  { %5509 = vst.msk [vmem:[#allocation3 + $0x388] sm:$0xff] %vm5400_vm4, %v5339_v27  ;;  %v5343_v38 = vadd.f32 %v5342_v35, %v5110_v31  ;;  %v5112_v42 = vadd.f32 %v5111_v61, %v11028_v51 }
 0x482   :  { %v5115_v44 = vpop.f32.mrf.mxu0  ;;  %v5348_v54 = vpop.f32.mrf.mxu1 }
 0x483   :  { %5514 = vst [vmem:[#allocation3 + $0x3b0] sm:$0xff] %v5343_v38  ;;  %v5345_v19 = vadd.f32 %v5344_v36, %v5112_v42  ;;  %v5116_v13 = vadd.f32 %v5115_v44, %v11030_v21  ;;  %v11193_v38 = vld [vmem:[#allocation11_spill] sm:$0xff] }
 0x484   :  { %v5117_v2 = vpop.f32.mrf.mxu0  ;;  %v5350_v45 = vpop.f32.mrf.mxu1 }
 0x485   :  { %5515 = vst.msk [vmem:[#allocation3 + $0x3b8] sm:$0xff] %vm5400_vm4, %v5345_v19  ;;  %v5349_v29 = vadd.f32 %v5348_v54, %v5116_v13  ;;  %v5118_v43 = vadd.f32 %v5117_v2, %v11032_v12  ;;  %v11194_v13 = vld [vmem:[#allocation12_spill] sm:$0xff] }
 0x486   :  { %v5121_v30 = vpop.f32.mrf.mxu0  ;;  %v5354_v62 = vpop.f32.mrf.mxu1 }
 0x487   :  { %5520 = vst [vmem:[#allocation3 + $0x3e0] sm:$0xff] %v5349_v29  ;;  %v5351_v46 = vadd.f32 %v5350_v45, %v5118_v43  ;;  %v5122_v17 = vadd.f32 %v5121_v30, %v11034_v34 }
 0x488   :  { %v5123_v51 = vpop.f32.mrf.mxu0  ;;  %v5356_v0 = vpop.f32.mrf.mxu1 }
 0x489   :  { %5521 = vst.msk [vmem:[#allocation3 + $0x3e8] sm:$0xff] %vm5400_vm4, %v5351_v46  ;;  %v5355_v41 = vadd.f32 %v5354_v62, %v5122_v17  ;;  %v5124_v21 = vadd.f32 %v5123_v51, %v11036_v8 }
 0x48a   :  { %v5127_v47 = vpop.f32.mrf.mxu0  ;;  %v5360_v57 = vpop.f32.mrf.mxu1 }
 0x48b   :  { %5526 = vst [vmem:[#allocation3 + $0x410] sm:$0xff] %v5355_v41  ;;  %v5357_v24 = vadd.f32 %v5356_v0, %v5124_v21  ;;  %v5128_v37 = vadd.f32 %v5127_v47, %v11038_v10 }
 0x48c   :  { %v5129_v12 = vpop.f32.mrf.mxu0  ;;  %v5362_v23 = vpop.f32.mrf.mxu1 }
 0x48d   :  { %5527 = vst.msk [vmem:[#allocation3 + $0x418] sm:$0xff] %vm5400_vm4, %v5357_v24  ;;  %v5361_v16 = vadd.f32 %v5360_v57, %v5128_v37  ;;  %v5130_v34 = vadd.f32 %v5129_v12, %v11040_v49 }
 0x48e   :  { %v5133_v39 = vpop.f32.mrf.mxu0  ;;  %v5366_v63 = vpop.f32.mrf.mxu1 }
 0x48f   :  { %5532 = vst [vmem:[#allocation3 + $0x440] sm:$0xff] %v5361_v16  ;;  %v5363_v60 = vadd.f32 %v5362_v23, %v5130_v34  ;;  %v5134_v14 = vadd.f32 %v5133_v39, %v11042_v33 }
 0x490   :  { %v5135_v8 = vpop.f32.mrf.mxu0  ;;  %v5368_v55 = vpop.f32.mrf.mxu1 }
 0x491   :  { %5533 = vst.msk [vmem:[#allocation3 + $0x448] sm:$0xff] %vm5400_vm4, %v5363_v60  ;;  %v5367_v58 = vadd.f32 %v5366_v63, %v5134_v14  ;;  %v5136_v10 = vadd.f32 %v5135_v8, %v11188_v18 }
 0x492   :  { %v5139_v25 = vpop.f32.mrf.mxu0  ;;  %v5372_v32 = vpop.f32.mrf.mxu1 }
 0x493   :  { %5538 = vst [vmem:[#allocation3 + $0x470] sm:$0xff] %v5367_v58  ;;  %v5369_v3 = vadd.f32 %v5368_v55, %v5136_v10  ;;  %v5140_v28 = vadd.f32 %v5139_v25, %v11189_v4 }
 0x494   :  { %v5141_v49 = vpop.f32.mrf.mxu0  ;;  %v5374_v1 = vpop.f32.mrf.mxu1 }
 0x495   :  { %5539 = vst.msk [vmem:[#allocation3 + $0x478] sm:$0xff] %vm5400_vm4, %v5369_v3  ;;  %v5373_v7 = vadd.f32 %v5372_v32, %v5140_v28  ;;  %v5142_v33 = vadd.f32 %v5141_v49, %v11190_v59 }
 0x496   :  { %v5145_v15 = vpop.f32.mrf.mxu0  ;;  %v5378_v53 = vpop.f32.mrf.mxu1 }
 0x497   :  { %5544 = vst [vmem:[#allocation3 + $0x4a0] sm:$0xff] %v5373_v7  ;;  %v5375_v5 = vadd.f32 %v5374_v1, %v5142_v33  ;;  %v5146_v11 = vadd.f32 %v5145_v15, %v11191_v9 }
 0x498   :  { %v5147_v48 = vpop.f32.mrf.mxu0  ;;  %v5380_v50 = vpop.f32.mrf.mxu1 }
 0x499   :  { %5545 = vst.msk [vmem:[#allocation3 + $0x4a8] sm:$0xff] %vm5400_vm4, %v5375_v5  ;;  %v5379_v26 = vadd.f32 %v5378_v53, %v5146_v11  ;;  %v5148_v22 = vadd.f32 %v5147_v48, %v11192_v52 }
 0x49a   :  { %v5151_v56 = vpop.f32.mrf.mxu0  ;;  %v5384_v6 = vpop.f32.mrf.mxu1 }
 0x49b   :  { %5550 = vst [vmem:[#allocation3 + $0x4d0] sm:$0xff] %v5379_v26  ;;  %v5381_v35 = vadd.f32 %v5380_v50, %v5148_v22  ;;  %v5152_v27 = vadd.f32 %v5151_v56, %v11054_v20 }
 0x49c   :  { %v5153_v31 = vpop.f32.mrf.mxu0  ;;  %v5386_v61 = vpop.f32.mrf.mxu1 }
 0x49d   :  { %5551 = vst.msk [vmem:[#allocation3 + $0x4d8] sm:$0xff] %vm5400_vm4, %v5381_v35  ;;  %v5385_v36 = vadd.f32 %v5384_v6, %v5152_v27  ;;  %v5154_v42 = vadd.f32 %v5153_v31, %v11193_v38 }
 0x49e   :  { %v5157_v44 = vpop.f32.mrf.mxu0  ;;  %v5390_v54 = vpop.f32.mrf.mxu1 }
 0x49f   :  { %5556 = vst [vmem:[#allocation3 + $0x500] sm:$0xff] %v5385_v36  ;;  %v5387_v19 = vadd.f32 %v5386_v61, %v5154_v42  ;;  %v5158_v2 = vadd.f32 %v5157_v44, %v11194_v13 }
 0x4a0   :  { %v5159_v45 = vpop.f32.mrf.mxu0  ;;  %v5392_v43 = vpop.f32.mrf.mxu1 }
 0x4a1   :  { %5557 = vst.msk [vmem:[#allocation3 + $0x508] sm:$0xff] %vm5400_vm4, %v5387_v19  ;;  %v5391_v29 = vadd.f32 %v5390_v54, %v5158_v2  ;;  %v5160_v20 = vadd.f32 %v5159_v45, %v11060_v40 }
 0x4a3   :  { %5562 = vst [vmem:[#allocation3 + $0x530] sm:$0xff] %v5391_v29  ;;  %v5393_v30 = vadd.f32 %v5392_v43, %v5160_v20 }
 0x4a5   :  { %5563 = vst.msk [vmem:[#allocation3 + $0x538] sm:$0xff] %vm5400_vm4, %v5393_v30 }
 0x4a6   :  { %6252 = shalt.err (!%p6249_p4)
}
 0x4a7   :  { %s6264_s10 = smov 768   ;;  %s6265_s0 = smov 48  }
 0x4a8   :  { %5575 = dma.vmem_to_hbm [thread:$0]  %s5570_s8, 21504, %s11152_s3, [#allocation4], %s6264_s10, %s6264_s10, %s6265_s0  }
 0x4a9   :  { %6261 = dma.done.wait [#allocation4], 21504  }
 0x4aa   :  { %6262 = vsyncadd [#allocation4], 4294945792 }
 0x4ab   :  { %5579 = vsyncpa [#allocation4], 1 }

</bundles_post_ra>
